<compile_context>
chip_gen: v7x
topology: tpu7x:2x2x1
jax: 0.10.0
libtpu: 0.0.40
codegen_flags: <defaults>
</compile_context>

<pallas_src>
import functools

import jax
import jax.numpy as jnp
from jax.experimental import pallas as pl
from jax.experimental.pallas import tpu as pltpu


# ----------------------------------------------------------------------------
# Model configuration (mini SDXL-style UNet)
# ----------------------------------------------------------------------------

C_IN = 4          # latent channels
C_PAD = 8         # latent channels padded to a sublane multiple for the conv slab
CH = 32           # block channels
T_DIM = 64        # time embedding dim
CTX = 32          # encoder_hidden_states hidden size
ADD_T = 8         # addition_time_embed_dim
POOLED = 32       # pooled text_embeds dim
ADD_IN = POOLED + 6 * ADD_T
GROUPS = 4
FF = 4 * CH
EPS = 1e-5

# Indices into the packed (N_AFF, CH, 1) affine/bias parameter array.
_AFF = dict(
    cin_b=0, gn1_g=1, gn1_b=2, rc1_b=3, gn2_g=4, gn2_b=5, rc2_b=6,
    tn_g=7, tn_b=8, pin_b=9, ln1_g=10, ln1_b=11, bo=12,
    ln2_g=13, ln2_b=14, ff2_b=15, pout_b=16, gno_g=17, gno_b=18, tproj_b=19,
)
N_AFF = len(_AFF)


# ----------------------------------------------------------------------------
# In-kernel helpers (traced inside the Pallas kernel; channel-major layout)
# ----------------------------------------------------------------------------

def _silu(x):
    return x * jax.nn.sigmoid(x)


def _conv3x3_cm(x, w, b, masks_ref, W, HW):
    """3x3 'same' conv, channel-major, single stacked-tap GEMM.

    x: (Cin, HW) f32 for one batch element; w: (Cout, 9*Cin) bf16 with column
    index = tap*Cin + cin (tap-major, cross-correlation ordering == PyTorch
    Conv2d, no kernel flip); b: (Cout, 1) f32; masks_ref: (9, 1, HW) edge masks.
    Tap shifts are XLU lane rotations of the flattened token axis + masking, so
    the input is read once and contracted in ONE K=9*Cin MXU GEMM (no im2col).
    """
    taps = []
    for i in range(9):
        dy, dx = i // 3 - 1, i % 3 - 1
        off = dy * W + dx
        if off == 0:
            xs = x
        else:
            xs = pltpu.roll(x, shift=(-off) % HW, axis=1) * masks_ref[i]
        taps.append(xs)
    slab = jnp.concatenate(taps, axis=0).astype(jnp.bfloat16)       # (9*Cin, HW)
    return jnp.dot(w, slab, preferred_element_type=jnp.float32) + b


def _group_norm_cm(x, gmat, g, b, eps, silu):
    """GroupNorm over (channels-in-group x tokens), channel-major, f32 stats.

    x: (C, HW).  gmat: (C, C) group-averaging matrix (1/n on same-group
    entries) -> per-group statistics are one tiny MXU dot, no transposes.
    Two-pass mean/variance for numerical safety.
    """
    s1 = jnp.sum(x, axis=1, keepdims=True)                              # (C, 1)
    mean_c = jnp.dot(gmat, s1, preferred_element_type=jnp.float32)
    d = x - mean_c
    s2 = jnp.sum(d * d, axis=1, keepdims=True)                          # (C, 1)
    var_c = jnp.dot(gmat, s2, preferred_element_type=jnp.float32)
    y = d * jax.lax.rsqrt(var_c + eps) * g + b
    if silu:
        y = _silu(y)
    return y


def _layer_norm_cm(x, g, b, eps):
    """LayerNorm over channels (sublane axis), f32.  x: (C, HW)."""
    mu = jnp.mean(x, axis=0, keepdims=True)
    d = x - mu
    var = jnp.mean(d * d, axis=0, keepdims=True)
    return d * jax.lax.rsqrt(var + eps) * g + b


# ----------------------------------------------------------------------------
# The single fused kernel: embeddings + conv_in + ResNet + transformer + head
# ----------------------------------------------------------------------------

def _unet_fused_kernel(x_ref, tsin_ref, addcat_ref, ehs_tok_ref, ehs_cm_ref,
                       masks_ref, gmat_ref,
                       cin_w_ref, rc_w_ref, cout_w_ref,
                       sq_w_ref, ff1_w_ref, ff2_w_ref,
                       aff_ref, ff1_b_ref, cout_b_ref,
                       tw1_ref, aw1_ref, w64_ref, tproj_w_ref, tb_ref,
                       o_ref, *, W, HW, eps):
    f32 = jnp.float32
    bf16 = jnp.bfloat16
    gmat = gmat_ref[...]

    def A(name):  # packed (CH, 1) affine/bias params, static slice
        return aff_ref[_AFF[name]]

    # ---- time / added-cond embedding MLPs (fused; were separate XLA dots) ----
    temb = jnp.dot(tw1_ref[...], tsin_ref[0], preferred_element_type=f32) + tb_ref[0]
    temb = _silu(temb)
    temb = jnp.dot(w64_ref[0], temb, preferred_element_type=f32) + tb_ref[1]
    aug = jnp.dot(aw1_ref[...], addcat_ref[0], preferred_element_type=f32) + tb_ref[2]
    aug = _silu(aug)
    aug = jnp.dot(w64_ref[1], aug, preferred_element_type=f32) + tb_ref[3]
    emb = _silu(temb + aug)
    temb_proj = (jnp.dot(tproj_w_ref[...], emb, preferred_element_type=f32)
                 + A("tproj_b"))                                          # (CH, 1)

    # ---- conv_in + ResNet block (GN+SiLU fused, stacked-tap convs) ----
    x = x_ref[0]                                                          # (C_PAD, HW)
    h = _conv3x3_cm(x, cin_w_ref[...], A("cin_b"), masks_ref, W, HW)      # (CH, HW)
    hn = _group_norm_cm(h, gmat, A("gn1_g"), A("gn1_b"), eps, True)
    hh = _conv3x3_cm(hn, rc_w_ref[0], A("rc1_b"), masks_ref, W, HW) + temb_proj
    hn2 = _group_norm_cm(hh, gmat, A("gn2_g"), A("gn2_b"), eps, True)
    h = h + _conv3x3_cm(hn2, rc_w_ref[1], A("rc2_b"), masks_ref, W, HW)

    # ---- transformer block (single-head cross-attention + FF), all NN GEMMs ----
    hn = _group_norm_cm(h, gmat, A("tn_g"), A("tn_b"), eps, False)
    tok = (jnp.dot(sq_w_ref[0], hn.astype(bf16), preferred_element_type=f32)
           + A("pin_b"))                                                  # (CH, HW)

    qn = _layer_norm_cm(tok, A("ln1_g"), A("ln1_b"), eps)
    # Attention scale is pre-folded into the Q projection weights (sq_w[1]).
    q = jnp.dot(sq_w_ref[1], qn.astype(bf16), preferred_element_type=f32)         # (CH, HW)
    ehs_tok = ehs_tok_ref[0].astype(bf16)                                          # (S, CTX)
    ehs_cm = ehs_cm_ref[0].astype(bf16)                                            # (CTX, S)
    k_tok = jnp.dot(ehs_tok, sq_w_ref[2], preferred_element_type=f32)              # (S, CH)
    v_cm = jnp.dot(sq_w_ref[3], ehs_cm, preferred_element_type=f32)                # (CH, S)

    s = jnp.dot(k_tok.astype(bf16), q.astype(bf16), preferred_element_type=f32)    # (S, HW)
    s = s - jnp.max(s, axis=0, keepdims=True)
    p = jnp.exp(s)                                                                  # f32 EUP
    p = p * pl.reciprocal(jnp.sum(p, axis=0, keepdims=True), approx=True)
    attn = jnp.dot(v_cm.astype(bf16), p.astype(bf16), preferred_element_type=f32)  # (CH, HW)
    tok = tok + (jnp.dot(sq_w_ref[4], attn.astype(bf16), preferred_element_type=f32)
                 + A("bo"))

    y = _layer_norm_cm(tok, A("ln2_g"), A("ln2_b"), eps)
    f = (jnp.dot(ff1_w_ref[...], y.astype(bf16), preferred_element_type=f32)
         + ff1_b_ref[...])                                                # (FF, HW)
    # TODO(synk): diffusers' default GELU is the exact erf form; tanh approx used here.
    f = jax.nn.gelu(f, approximate=True)
    tok = tok + (jnp.dot(ff2_w_ref[...], f.astype(bf16), preferred_element_type=f32)
                 + A("ff2_b"))
    tok = (jnp.dot(sq_w_ref[5], tok.astype(bf16), preferred_element_type=f32)
           + A("pout_b"))
    h = h + tok

    # ---- output head: GN + SiLU + conv_out ----
    hn = _group_norm_cm(h, gmat, A("gno_g"), A("gno_b"), eps, True)
    out = _conv3x3_cm(hn, cout_w_ref[...], cout_b_ref[...], masks_ref, W, HW)  # (C_IN, HW)
    o_ref[0] = out.astype(o_ref.dtype)


# ----------------------------------------------------------------------------
# pallas_call wrapper
# ----------------------------------------------------------------------------

def _const_spec(arr):
    nd = arr.ndim
    return pl.BlockSpec(arr.shape, lambda b, _nd=nd: (0,) * _nd)


def _batch_spec(arr):
    shp = tuple(arr.shape)
    nrest = len(shp) - 1
    return pl.BlockSpec((1,) + shp[1:], lambda b, _n=nrest: (b,) + (0,) * _n)


def unet_fused(x_cm, t_sin, add_cat, ehs_tok, ehs_cm, masks, gmat, p, H, W):
    B = x_cm.shape[0]
    HW = H * W
    args = (x_cm, t_sin, add_cat, ehs_tok, ehs_cm,
            masks, gmat,
            p["cin_w"], p["rc_w"], p["cout_w"],
            p["sq_w"], p["ff1_w"], p["ff2_w"],
            p["aff"], p["ff1_b"], p["cout_b"],
            p["tw1"], p["aw1"], p["w64"], p["tproj_w"], p["tb"])
    in_specs = ([_batch_spec(a) for a in args[:5]]
                + [_const_spec(a) for a in args[5:]])
    return pl.pallas_call(
        functools.partial(_unet_fused_kernel, W=W, HW=HW, eps=EPS),
        out_shape=jax.ShapeDtypeStruct((B, C_IN, HW), jnp.float32),
        grid=(B,),
        in_specs=in_specs,
        out_specs=pl.BlockSpec((1, C_IN, HW), lambda b: (b, 0, 0)),
        compiler_params=pltpu.CompilerParams(dimension_semantics=("parallel",)),
    )(*args)


# ----------------------------------------------------------------------------
# Glue (plain JAX): sinusoidal embeddings, conv edge masks, group-avg matrix
# ----------------------------------------------------------------------------

def timestep_embedding(t, dim, max_period=10000.0):
    half = dim // 2
    freqs = jnp.exp(-jnp.log(max_period) * jnp.arange(half, dtype=jnp.float32) / half)
    args = t.astype(jnp.float32)[:, None] * freqs[None, :]
    return jnp.concatenate([jnp.cos(args), jnp.sin(args)], axis=-1)


def _conv_edge_masks(H, W):
    """(9, 1, HW) validity masks for the 9 conv taps over the flattened tokens."""
    t = jnp.arange(H * W)
    hh = t // W
    ww = t % W
    rows = []
    for dy in (-1, 0, 1):
        for dx in (-1, 0, 1):
            m = (hh + dy >= 0) & (hh + dy < H) & (ww + dx >= 0) & (ww + dx < W)
            rows.append(m.astype(jnp.float32))
    return jnp.stack(rows).reshape(9, 1, H * W)


def _group_avg_matrix(HW):
    """(C, C) matrix averaging over each channel's group x tokens (1/n entries)."""
    cg = CH // GROUPS
    same = (jnp.arange(CH)[:, None] // cg) == (jnp.arange(CH)[None, :] // cg)
    return same.astype(jnp.float32) / float(HW * cg)


# ----------------------------------------------------------------------------
# Deterministic parameter init (weights stored in kernel-ready, packed form)
# ----------------------------------------------------------------------------

def init_params(key):
    keys = iter(jax.random.split(key, 64))

    def w(*shape, scale=0.05):
        return jax.random.normal(next(keys), shape, jnp.float32) * scale

    def b(*shape, scale=0.01):
        return jax.random.normal(next(keys), shape, jnp.float32) * scale

    p = {}
    # Time / added-cond MLPs, channel-major (out, in) orientation; biases packed.
    p["tw1"] = w(T_DIM, CH)
    time_w2 = w(T_DIM, T_DIM)
    p["aw1"] = w(T_DIM, ADD_IN)
    add_w2 = w(T_DIM, T_DIM)
    p["w64"] = jnp.stack([time_w2, add_w2])                       # (2, 64, 64)
    p["tproj_w"] = w(CH, T_DIM)
    p["tb"] = jnp.stack([b(T_DIM, 1), b(T_DIM, 1),
                         b(T_DIM, 1), b(T_DIM, 1)])               # (4, 64, 1)

    # Stacked-tap conv weights (Cout, 9*Cin), column = tap*Cin + cin
    # (cross-correlation ordering == PyTorch Conv2d; no kernel flip). bf16 for MXU.
    cin_w = w(CH, 9, C_PAD)
    cin_w = cin_w.at[:, :, C_IN:].set(0.0)                        # padded channels are zero
    p["cin_w"] = cin_w.reshape(CH, 9 * C_PAD).astype(jnp.bfloat16)
    p["rc_w"] = jnp.stack([w(CH, 9 * CH), w(CH, 9 * CH)]).astype(jnp.bfloat16)
    p["cout_w"] = w(C_IN, 9 * CH).astype(jnp.bfloat16)
    p["cout_b"] = b(C_IN, 1)

    # Transformer weights, channel-major (out, in); attention scale folded into wq.
    scale = 1.0 / float(CH) ** 0.5
    pin_wT = w(CH, CH)
    wqT = w(CH, CH) * scale
    wk = w(CTX, CH)          # token-major K projection: ehs_tok @ wk
    wvT = w(CH, CTX)         # channel-major V projection: wvT @ ehs_cm
    woT = w(CH, CH)
    pout_wT = w(CH, CH)
    p["sq_w"] = jnp.stack([pin_wT, wqT, wk, wvT, woT, pout_wT]).astype(jnp.bfloat16)
    p["ff1_w"] = w(FF, CH).astype(jnp.bfloat16)
    p["ff2_w"] = w(CH, FF).astype(jnp.bfloat16)
    p["ff1_b"] = b(FF, 1)

    # Packed (CH, 1) affine / bias parameters (f32; VPU math stays f32).
    ones = jnp.ones((CH, 1), jnp.float32)
    aff = [None] * N_AFF
    for name in ("gn1_g", "gn2_g", "tn_g", "ln1_g", "ln2_g", "gno_g"):
        aff[_AFF[name]] = ones
    for name in ("cin_b", "gn1_b", "rc1_b", "gn2_b", "rc2_b", "tn_b", "pin_b",
                 "ln1_b", "bo", "ln2_b", "ff2_b", "pout_b", "gno_b", "tproj_b"):
        aff[_AFF[name]] = b(CH, 1)
    p["aff"] = jnp.stack(aff)                                     # (N_AFF, CH, 1)
    return p


# ----------------------------------------------------------------------------
# Forward pass (== UNetXLWrapper.forward on the mini SDXL UNet)
# ----------------------------------------------------------------------------

def unet_xl_forward(p, sample, timestep, encoder_hidden_states, text_embeds, time_ids):
    # sample: (B, C_IN, H, W) NCHW.  Channel-major token layout == NCHW reshaped;
    # latent channels padded 4 -> 8 (zeros) so conv tap chunks stay sublane-aligned.
    B, _, H, W = sample.shape
    HW = H * W
    x_cm = jnp.zeros((B, C_PAD, HW), jnp.float32)
    x_cm = x_cm.at[:, :C_IN, :].set(sample.astype(jnp.float32).reshape(B, C_IN, HW))

    # Sinusoidal embeddings (tiny trig glue); the MLPs themselves run in-kernel.
    t_sin = timestep_embedding(timestep.reshape(B), CH).reshape(B, CH, 1)
    tid_sin = timestep_embedding(time_ids.reshape(-1), ADD_T).reshape(B, 6 * ADD_T)
    add_cat = jnp.concatenate([text_embeds.astype(jnp.float32), tid_sin],
                              axis=-1).reshape(B, ADD_IN, 1)

    # encoder_hidden_states in both layouts so every attention GEMM is a plain
    # NN dot in-kernel (no in-kernel transpose); the extra input is ~1 KB.
    ehs_tok = encoder_hidden_states.astype(jnp.float32)           # (B, S, CTX)
    ehs_cm = jnp.transpose(ehs_tok, (0, 2, 1))                    # (B, CTX, S)

    masks = _conv_edge_masks(H, W)
    gmat = _group_avg_matrix(HW)

    out = unet_fused(x_cm, t_sin, add_cat, ehs_tok, ehs_cm, masks, gmat, p, H, W)
    return out.reshape(B, C_IN, H, W)                             # NCHW


# ----------------------------------------------------------------------------
# Driver
# ----------------------------------------------------------------------------

if __name__ == "__main__":
    root = jax.random.PRNGKey(0)
    k_params, k_s, k_e, k_t, k_i = jax.random.split(root, 5)

    params = init_params(k_params)

    B, H, W, S = 2, 16, 16, 8
    sample = jax.random.normal(k_s, (B, C_IN, H, W), jnp.float32)          # NCHW
    timestep = jnp.array([999.0, 500.0], jnp.float32)                      # (B,)
    encoder_hidden_states = jax.random.normal(k_e, (B, S, CTX), jnp.float32)
    text_embeds = jax.random.normal(k_t, (B, POOLED), jnp.float32)
    time_ids = jax.random.uniform(k_i, (B, 6), jnp.float32, 0.0, 1024.0)

    fwd = jax.jit(unet_xl_forward)
    out = fwd(params, sample, timestep, encoder_hidden_states, text_embeds, time_ids)
    out = jax.block_until_ready(out)

    assert out.shape == (B, C_IN, H, W), out.shape
    assert out.dtype == jnp.float32
    assert bool(jnp.all(jnp.isfinite(out)))
    print("KERNEL_OK")
</pallas_src>

<mosaic_0001>
module attributes {stable_mosaic.version = 11 : i64} {
  func.func @_unet_fused_kernel(%arg0: i32, %arg1: memref<1x8x256xf32, #tpu.memory_space<vmem>>, %arg2: memref<1x32x1xf32, #tpu.memory_space<vmem>>, %arg3: memref<1x80x1xf32, #tpu.memory_space<vmem>>, %arg4: memref<1x8x32xf32, #tpu.memory_space<vmem>>, %arg5: memref<1x32x8xf32, #tpu.memory_space<vmem>>, %arg6: memref<9x1x256xf32, #tpu.memory_space<vmem>>, %arg7: memref<32x32xf32, #tpu.memory_space<vmem>>, %arg8: memref<32x72xbf16, #tpu.memory_space<vmem>>, %arg9: memref<2x32x288xbf16, #tpu.memory_space<vmem>>, %arg10: memref<4x288xbf16, #tpu.memory_space<vmem>>, %arg11: memref<6x32x32xbf16, #tpu.memory_space<vmem>>, %arg12: memref<128x32xbf16, #tpu.memory_space<vmem>>, %arg13: memref<32x128xbf16, #tpu.memory_space<vmem>>, %arg14: memref<20x32x1xf32, #tpu.memory_space<vmem>>, %arg15: memref<128x1xf32, #tpu.memory_space<vmem>>, %arg16: memref<4x1xf32, #tpu.memory_space<vmem>>, %arg17: memref<64x32xf32, #tpu.memory_space<vmem>>, %arg18: memref<64x80xf32, #tpu.memory_space<vmem>>, %arg19: memref<2x64x64xf32, #tpu.memory_space<vmem>>, %arg20: memref<32x64xf32, #tpu.memory_space<vmem>>, %arg21: memref<4x64x1xf32, #tpu.memory_space<vmem>>, %arg22: memref<1x4x256xf32, #tpu.memory_space<vmem>>) attributes {dimension_semantics = [#tpu.dimension_semantics<parallel>], iteration_bounds = array<i64: 2>, scalar_prefetch = 0 : i64, scratch_operands = 0 : i64, tpu.core_type = #tpu.core_type<tc>, window_params = [{transform_indices = @transform_0, window_bounds = array<i64: 1, 8, 256>}, {transform_indices = @transform_1, window_bounds = array<i64: 1, 32, 1>}, {transform_indices = @transform_2, window_bounds = array<i64: 1, 80, 1>}, {transform_indices = @transform_3, window_bounds = array<i64: 1, 8, 32>}, {transform_indices = @transform_4, window_bounds = array<i64: 1, 32, 8>}, {pipeline_mode = #tpu.pipeline_mode<synchronous>, transform_indices = @transform_5, window_bounds = array<i64: 9, 1, 256>}, {pipeline_mode = #tpu.pipeline_mode<synchronous>, transform_indices = @transform_6, window_bounds = array<i64: 32, 32>}, {pipeline_mode = #tpu.pipeline_mode<synchronous>, transform_indices = @transform_7, window_bounds = array<i64: 32, 72>}, {pipeline_mode = #tpu.pipeline_mode<synchronous>, transform_indices = @transform_8, window_bounds = array<i64: 2, 32, 288>}, {pipeline_mode = #tpu.pipeline_mode<synchronous>, transform_indices = @transform_9, window_bounds = array<i64: 4, 288>}, {pipeline_mode = #tpu.pipeline_mode<synchronous>, transform_indices = @transform_10, window_bounds = array<i64: 6, 32, 32>}, {pipeline_mode = #tpu.pipeline_mode<synchronous>, transform_indices = @transform_11, window_bounds = array<i64: 128, 32>}, {pipeline_mode = #tpu.pipeline_mode<synchronous>, transform_indices = @transform_12, window_bounds = array<i64: 32, 128>}, {pipeline_mode = #tpu.pipeline_mode<synchronous>, transform_indices = @transform_13, window_bounds = array<i64: 20, 32, 1>}, {pipeline_mode = #tpu.pipeline_mode<synchronous>, transform_indices = @transform_14, window_bounds = array<i64: 128, 1>}, {pipeline_mode = #tpu.pipeline_mode<synchronous>, transform_indices = @transform_15, window_bounds = array<i64: 4, 1>}, {pipeline_mode = #tpu.pipeline_mode<synchronous>, transform_indices = @transform_16, window_bounds = array<i64: 64, 32>}, {pipeline_mode = #tpu.pipeline_mode<synchronous>, transform_indices = @transform_17, window_bounds = array<i64: 64, 80>}, {pipeline_mode = #tpu.pipeline_mode<synchronous>, transform_indices = @transform_18, window_bounds = array<i64: 2, 64, 64>}, {pipeline_mode = #tpu.pipeline_mode<synchronous>, transform_indices = @transform_19, window_bounds = array<i64: 32, 64>}, {pipeline_mode = #tpu.pipeline_mode<synchronous>, transform_indices = @transform_20, window_bounds = array<i64: 4, 64, 1>}, {transform_indices = @transform_21, window_bounds = array<i64: 1, 4, 256>}]} {
    %c0 = arith.constant 0 : index
    %c0_0 = arith.constant 0 : index
    %0 = vector.load %arg7[%c0, %c0_0] : memref<32x32xf32, #tpu.memory_space<vmem>>, vector<32x32xf32>
    %c0_1 = arith.constant 0 : index
    %c0_2 = arith.constant 0 : index
    %1 = vector.load %arg17[%c0_1, %c0_2] : memref<64x32xf32, #tpu.memory_space<vmem>>, vector<64x32xf32>
    %c0_3 = arith.constant 0 : index
    %c0_4 = arith.constant 0 : index
    %c0_5 = arith.constant 0 : index
    %2 = vector.load %arg2[%c0_3, %c0_4, %c0_5] : memref<1x32x1xf32, #tpu.memory_space<vmem>>, vector<1x32x1xf32>
    %3 = vector.shape_cast %2 : vector<1x32x1xf32> to vector<32x1xf32>
    %cst = arith.constant dense<0.000000e+00> : vector<64x1xf32>
    %4 = tpu.matmul %1, %3, %cst {dimension_numbers = #tpu.dot_dimension_numbers<[1], [0], [0], [1], [0, 0, 1, 1], [], []>} : vector<64x32xf32>, vector<32x1xf32>, vector<64x1xf32> -> vector<64x1xf32>
    %c0_6 = arith.constant 0 : index
    %c0_7 = arith.constant 0 : index
    %c0_8 = arith.constant 0 : index
    %5 = vector.load %arg21[%c0_6, %c0_7, %c0_8] : memref<4x64x1xf32, #tpu.memory_space<vmem>>, vector<1x64x1xf32>
    %6 = vector.shape_cast %5 : vector<1x64x1xf32> to vector<64x1xf32>
    %7 = arith.addf %4, %6 : vector<64x1xf32>
    %8 = arith.negf %7 : vector<64x1xf32>
    %9 = math.exp %8 : vector<64x1xf32>
    %cst_9 = arith.constant 1.000000e+00 : f32
    %10 = vector.broadcast %cst_9 : f32 to vector<64x1xf32>
    %11 = arith.addf %10, %9 : vector<64x1xf32>
    %12 = arith.divf %10, %11 : vector<64x1xf32>
    %13 = arith.mulf %7, %12 : vector<64x1xf32>
    %c0_10 = arith.constant 0 : index
    %c0_11 = arith.constant 0 : index
    %c0_12 = arith.constant 0 : index
    %14 = vector.load %arg19[%c0_10, %c0_11, %c0_12] : memref<2x64x64xf32, #tpu.memory_space<vmem>>, vector<1x64x64xf32>
    %15 = vector.shape_cast %14 : vector<1x64x64xf32> to vector<64x64xf32>
    %cst_13 = arith.constant dense<0.000000e+00> : vector<64x1xf32>
    %16 = tpu.matmul %15, %13, %cst_13 {dimension_numbers = #tpu.dot_dimension_numbers<[1], [0], [0], [1], [0, 0, 1, 1], [], []>} : vector<64x64xf32>, vector<64x1xf32>, vector<64x1xf32> -> vector<64x1xf32>
    %c1 = arith.constant 1 : index
    %c0_14 = arith.constant 0 : index
    %c0_15 = arith.constant 0 : index
    %17 = vector.load %arg21[%c1, %c0_14, %c0_15] : memref<4x64x1xf32, #tpu.memory_space<vmem>>, vector<1x64x1xf32>
    %18 = vector.shape_cast %17 : vector<1x64x1xf32> to vector<64x1xf32>
    %19 = arith.addf %16, %18 : vector<64x1xf32>
    %c0_16 = arith.constant 0 : index
    %c0_17 = arith.constant 0 : index
    %20 = vector.load %arg18[%c0_16, %c0_17] : memref<64x80xf32, #tpu.memory_space<vmem>>, vector<64x80xf32>
    %c0_18 = arith.constant 0 : index
    %c0_19 = arith.constant 0 : index
    %c0_20 = arith.constant 0 : index
    %21 = vector.load %arg3[%c0_18, %c0_19, %c0_20] : memref<1x80x1xf32, #tpu.memory_space<vmem>>, vector<1x80x1xf32>
    %22 = vector.shape_cast %21 : vector<1x80x1xf32> to vector<80x1xf32>
    %cst_21 = arith.constant dense<0.000000e+00> : vector<64x1xf32>
    %23 = tpu.matmul %20, %22, %cst_21 {dimension_numbers = #tpu.dot_dimension_numbers<[1], [0], [0], [1], [0, 0, 1, 1], [], []>} : vector<64x80xf32>, vector<80x1xf32>, vector<64x1xf32> -> vector<64x1xf32>
    %c2 = arith.constant 2 : index
    %c0_22 = arith.constant 0 : index
    %c0_23 = arith.constant 0 : index
    %24 = vector.load %arg21[%c2, %c0_22, %c0_23] : memref<4x64x1xf32, #tpu.memory_space<vmem>>, vector<1x64x1xf32>
    %25 = vector.shape_cast %24 : vector<1x64x1xf32> to vector<64x1xf32>
    %26 = arith.addf %23, %25 : vector<64x1xf32>
    %27 = arith.negf %26 : vector<64x1xf32>
    %28 = math.exp %27 : vector<64x1xf32>
    %cst_24 = arith.constant 1.000000e+00 : f32
    %29 = vector.broadcast %cst_24 : f32 to vector<64x1xf32>
    %30 = arith.addf %29, %28 : vector<64x1xf32>
    %31 = arith.divf %29, %30 : vector<64x1xf32>
    %32 = arith.mulf %26, %31 : vector<64x1xf32>
    %c1_25 = arith.constant 1 : index
    %c0_26 = arith.constant 0 : index
    %c0_27 = arith.constant 0 : index
    %33 = vector.load %arg19[%c1_25, %c0_26, %c0_27] : memref<2x64x64xf32, #tpu.memory_space<vmem>>, vector<1x64x64xf32>
    %34 = vector.shape_cast %33 : vector<1x64x64xf32> to vector<64x64xf32>
    %cst_28 = arith.constant dense<0.000000e+00> : vector<64x1xf32>
    %35 = tpu.matmul %34, %32, %cst_28 {dimension_numbers = #tpu.dot_dimension_numbers<[1], [0], [0], [1], [0, 0, 1, 1], [], []>} : vector<64x64xf32>, vector<64x1xf32>, vector<64x1xf32> -> vector<64x1xf32>
    %c3 = arith.constant 3 : index
    %c0_29 = arith.constant 0 : index
    %c0_30 = arith.constant 0 : index
    %36 = vector.load %arg21[%c3, %c0_29, %c0_30] : memref<4x64x1xf32, #tpu.memory_space<vmem>>, vector<1x64x1xf32>
    %37 = vector.shape_cast %36 : vector<1x64x1xf32> to vector<64x1xf32>
    %38 = arith.addf %35, %37 : vector<64x1xf32>
    %39 = arith.addf %19, %38 : vector<64x1xf32>
    %40 = arith.negf %39 : vector<64x1xf32>
    %41 = math.exp %40 : vector<64x1xf32>
    %cst_31 = arith.constant 1.000000e+00 : f32
    %42 = vector.broadcast %cst_31 : f32 to vector<64x1xf32>
    %43 = arith.addf %42, %41 : vector<64x1xf32>
    %44 = arith.divf %42, %43 : vector<64x1xf32>
    %45 = arith.mulf %39, %44 : vector<64x1xf32>
    %c0_32 = arith.constant 0 : index
    %c0_33 = arith.constant 0 : index
    %46 = vector.load %arg20[%c0_32, %c0_33] : memref<32x64xf32, #tpu.memory_space<vmem>>, vector<32x64xf32>
    %cst_34 = arith.constant dense<0.000000e+00> : vector<32x1xf32>
    %47 = tpu.matmul %46, %45, %cst_34 {dimension_numbers = #tpu.dot_dimension_numbers<[1], [0], [0], [1], [0, 0, 1, 1], [], []>} : vector<32x64xf32>, vector<64x1xf32>, vector<32x1xf32> -> vector<32x1xf32>
    %c19 = arith.constant 19 : index
    %c0_35 = arith.constant 0 : index
    %c0_36 = arith.constant 0 : index
    %48 = vector.load %arg14[%c19, %c0_35, %c0_36] : memref<20x32x1xf32, #tpu.memory_space<vmem>>, vector<1x32x1xf32>
    %49 = vector.shape_cast %48 : vector<1x32x1xf32> to vector<32x1xf32>
    %50 = arith.addf %47, %49 : vector<32x1xf32>
    %c0_37 = arith.constant 0 : index
    %c0_38 = arith.constant 0 : index
    %c0_39 = arith.constant 0 : index
    %51 = vector.load %arg1[%c0_37, %c0_38, %c0_39] : memref<1x8x256xf32, #tpu.memory_space<vmem>>, vector<1x8x256xf32>
    %52 = vector.shape_cast %51 : vector<1x8x256xf32> to vector<8x256xf32>
    %c0_40 = arith.constant 0 : index
    %c0_41 = arith.constant 0 : index
    %53 = vector.load %arg8[%c0_40, %c0_41] : memref<32x72xbf16, #tpu.memory_space<vmem>>, vector<32x72xbf16>
    %c0_42 = arith.constant 0 : index
    %c0_43 = arith.constant 0 : index
    %c0_44 = arith.constant 0 : index
    %54 = vector.load %arg14[%c0_42, %c0_43, %c0_44] : memref<20x32x1xf32, #tpu.memory_space<vmem>>, vector<1x32x1xf32>
    %55 = vector.shape_cast %54 : vector<1x32x1xf32> to vector<32x1xf32>
    %c17_i32 = arith.constant 17 : i32
    %56 = tpu.dynamic_rotate %52 by %c17_i32 dim 1 : vector<8x256xf32>, i32 -> vector<8x256xf32>
    %c0_45 = arith.constant 0 : index
    %c0_46 = arith.constant 0 : index
    %c0_47 = arith.constant 0 : index
    %57 = vector.load %arg6[%c0_45, %c0_46, %c0_47] : memref<9x1x256xf32, #tpu.memory_space<vmem>>, vector<1x1x256xf32>
    %58 = vector.shape_cast %57 : vector<1x1x256xf32> to vector<1x256xf32>
    %59 = vector.broadcast %58 : vector<1x256xf32> to vector<8x256xf32>
    %60 = arith.mulf %56, %59 : vector<8x256xf32>
    %c16_i32 = arith.constant 16 : i32
    %61 = tpu.dynamic_rotate %52 by %c16_i32 dim 1 : vector<8x256xf32>, i32 -> vector<8x256xf32>
    %c1_48 = arith.constant 1 : index
    %c0_49 = arith.constant 0 : index
    %c0_50 = arith.constant 0 : index
    %62 = vector.load %arg6[%c1_48, %c0_49, %c0_50] : memref<9x1x256xf32, #tpu.memory_space<vmem>>, vector<1x1x256xf32>
    %63 = vector.shape_cast %62 : vector<1x1x256xf32> to vector<1x256xf32>
    %64 = vector.broadcast %63 : vector<1x256xf32> to vector<8x256xf32>
    %65 = arith.mulf %61, %64 : vector<8x256xf32>
    %c15_i32 = arith.constant 15 : i32
    %66 = tpu.dynamic_rotate %52 by %c15_i32 dim 1 : vector<8x256xf32>, i32 -> vector<8x256xf32>
    %c2_51 = arith.constant 2 : index
    %c0_52 = arith.constant 0 : index
    %c0_53 = arith.constant 0 : index
    %67 = vector.load %arg6[%c2_51, %c0_52, %c0_53] : memref<9x1x256xf32, #tpu.memory_space<vmem>>, vector<1x1x256xf32>
    %68 = vector.shape_cast %67 : vector<1x1x256xf32> to vector<1x256xf32>
    %69 = vector.broadcast %68 : vector<1x256xf32> to vector<8x256xf32>
    %70 = arith.mulf %66, %69 : vector<8x256xf32>
    %c1_i32 = arith.constant 1 : i32
    %71 = tpu.dynamic_rotate %52 by %c1_i32 dim 1 : vector<8x256xf32>, i32 -> vector<8x256xf32>
    %c3_54 = arith.constant 3 : index
    %c0_55 = arith.constant 0 : index
    %c0_56 = arith.constant 0 : index
    %72 = vector.load %arg6[%c3_54, %c0_55, %c0_56] : memref<9x1x256xf32, #tpu.memory_space<vmem>>, vector<1x1x256xf32>
    %73 = vector.shape_cast %72 : vector<1x1x256xf32> to vector<1x256xf32>
    %74 = vector.broadcast %73 : vector<1x256xf32> to vector<8x256xf32>
    %75 = arith.mulf %71, %74 : vector<8x256xf32>
    %c255_i32 = arith.constant 255 : i32
    %76 = tpu.dynamic_rotate %52 by %c255_i32 dim 1 : vector<8x256xf32>, i32 -> vector<8x256xf32>
    %c5 = arith.constant 5 : index
    %c0_57 = arith.constant 0 : index
    %c0_58 = arith.constant 0 : index
    %77 = vector.load %arg6[%c5, %c0_57, %c0_58] : memref<9x1x256xf32, #tpu.memory_space<vmem>>, vector<1x1x256xf32>
    %78 = vector.shape_cast %77 : vector<1x1x256xf32> to vector<1x256xf32>
    %79 = vector.broadcast %78 : vector<1x256xf32> to vector<8x256xf32>
    %80 = arith.mulf %76, %79 : vector<8x256xf32>
    %c241_i32 = arith.constant 241 : i32
    %81 = tpu.dynamic_rotate %52 by %c241_i32 dim 1 : vector<8x256xf32>, i32 -> vector<8x256xf32>
    %c6 = arith.constant 6 : index
    %c0_59 = arith.constant 0 : index
    %c0_60 = arith.constant 0 : index
    %82 = vector.load %arg6[%c6, %c0_59, %c0_60] : memref<9x1x256xf32, #tpu.memory_space<vmem>>, vector<1x1x256xf32>
    %83 = vector.shape_cast %82 : vector<1x1x256xf32> to vector<1x256xf32>
    %84 = vector.broadcast %83 : vector<1x256xf32> to vector<8x256xf32>
    %85 = arith.mulf %81, %84 : vector<8x256xf32>
    %c240_i32 = arith.constant 240 : i32
    %86 = tpu.dynamic_rotate %52 by %c240_i32 dim 1 : vector<8x256xf32>, i32 -> vector<8x256xf32>
    %c7 = arith.constant 7 : index
    %c0_61 = arith.constant 0 : index
    %c0_62 = arith.constant 0 : index
    %87 = vector.load %arg6[%c7, %c0_61, %c0_62] : memref<9x1x256xf32, #tpu.memory_space<vmem>>, vector<1x1x256xf32>
    %88 = vector.shape_cast %87 : vector<1x1x256xf32> to vector<1x256xf32>
    %89 = vector.broadcast %88 : vector<1x256xf32> to vector<8x256xf32>
    %90 = arith.mulf %86, %89 : vector<8x256xf32>
    %c239_i32 = arith.constant 239 : i32
    %91 = tpu.dynamic_rotate %52 by %c239_i32 dim 1 : vector<8x256xf32>, i32 -> vector<8x256xf32>
    %c8 = arith.constant 8 : index
    %c0_63 = arith.constant 0 : index
    %c0_64 = arith.constant 0 : index
    %92 = vector.load %arg6[%c8, %c0_63, %c0_64] : memref<9x1x256xf32, #tpu.memory_space<vmem>>, vector<1x1x256xf32>
    %93 = vector.shape_cast %92 : vector<1x1x256xf32> to vector<1x256xf32>
    %94 = vector.broadcast %93 : vector<1x256xf32> to vector<8x256xf32>
    %95 = arith.mulf %91, %94 : vector<8x256xf32>
    %96 = tpu.concatenate %60, %65, %70, %75, %52, %80, %85, %90, %95 in 0 : vector<8x256xf32>, vector<8x256xf32>, vector<8x256xf32>, vector<8x256xf32>, vector<8x256xf32>, vector<8x256xf32>, vector<8x256xf32>, vector<8x256xf32>, vector<8x256xf32> -> vector<72x256xf32>
    %97 = arith.truncf %96 : vector<72x256xf32> to vector<72x256xbf16>
    %cst_65 = arith.constant dense<0.000000e+00> : vector<32x256xf32>
    %98 = tpu.matmul %53, %97, %cst_65 {dimension_numbers = #tpu.dot_dimension_numbers<[1], [0], [0], [1], [0, 0, 1, 1], [], []>} : vector<32x72xbf16>, vector<72x256xbf16>, vector<32x256xf32> -> vector<32x256xf32>
    %99 = vector.broadcast %55 : vector<32x1xf32> to vector<32x256xf32>
    %100 = arith.addf %98, %99 : vector<32x256xf32>
    %c1_66 = arith.constant 1 : index
    %c0_67 = arith.constant 0 : index
    %c0_68 = arith.constant 0 : index
    %101 = vector.load %arg14[%c1_66, %c0_67, %c0_68] : memref<20x32x1xf32, #tpu.memory_space<vmem>>, vector<1x32x1xf32>
    %102 = vector.shape_cast %101 : vector<1x32x1xf32> to vector<32x1xf32>
    %c2_69 = arith.constant 2 : index
    %c0_70 = arith.constant 0 : index
    %c0_71 = arith.constant 0 : index
    %103 = vector.load %arg14[%c2_69, %c0_70, %c0_71] : memref<20x32x1xf32, #tpu.memory_space<vmem>>, vector<1x32x1xf32>
    %104 = vector.shape_cast %103 : vector<1x32x1xf32> to vector<32x1xf32>
    %cst_72 = arith.constant dense<0.000000e+00> : vector<32xf32>
    %105 = vector.multi_reduction <add>, %100, %cst_72 [1] : vector<32x256xf32> to vector<32xf32>
    %106 = vector.shape_cast %105 : vector<32xf32> to vector<32x1xf32>
    %cst_73 = arith.constant dense<0.000000e+00> : vector<32x1xf32>
    %107 = tpu.matmul %0, %106, %cst_73 {dimension_numbers = #tpu.dot_dimension_numbers<[1], [0], [0], [1], [0, 0, 1, 1], [], []>} : vector<32x32xf32>, vector<32x1xf32>, vector<32x1xf32> -> vector<32x1xf32>
    %108 = vector.broadcast %107 : vector<32x1xf32> to vector<32x256xf32>
    %109 = arith.subf %100, %108 : vector<32x256xf32>
    %110 = arith.mulf %109, %109 : vector<32x256xf32>
    %cst_74 = arith.constant dense<0.000000e+00> : vector<32xf32>
    %111 = vector.multi_reduction <add>, %110, %cst_74 [1] : vector<32x256xf32> to vector<32xf32>
    %112 = vector.shape_cast %111 : vector<32xf32> to vector<32x1xf32>
    %cst_75 = arith.constant dense<0.000000e+00> : vector<32x1xf32>
    %113 = tpu.matmul %0, %112, %cst_75 {dimension_numbers = #tpu.dot_dimension_numbers<[1], [0], [0], [1], [0, 0, 1, 1], [], []>} : vector<32x32xf32>, vector<32x1xf32>, vector<32x1xf32> -> vector<32x1xf32>
    %cst_76 = arith.constant 9.99999974E-6 : f32
    %114 = vector.broadcast %cst_76 : f32 to vector<32x1xf32>
    %115 = arith.addf %113, %114 : vector<32x1xf32>
    %116 = math.rsqrt %115 : vector<32x1xf32>
    %117 = vector.broadcast %116 : vector<32x1xf32> to vector<32x256xf32>
    %118 = arith.mulf %109, %117 : vector<32x256xf32>
    %119 = vector.broadcast %102 : vector<32x1xf32> to vector<32x256xf32>
    %120 = arith.mulf %118, %119 : vector<32x256xf32>
    %121 = vector.broadcast %104 : vector<32x1xf32> to vector<32x256xf32>
    %122 = arith.addf %120, %121 : vector<32x256xf32>
    %123 = arith.negf %122 : vector<32x256xf32>
    %124 = math.exp %123 : vector<32x256xf32>
    %cst_77 = arith.constant 1.000000e+00 : f32
    %125 = vector.broadcast %cst_77 : f32 to vector<32x256xf32>
    %126 = arith.addf %125, %124 : vector<32x256xf32>
    %127 = arith.divf %125, %126 : vector<32x256xf32>
    %128 = arith.mulf %122, %127 : vector<32x256xf32>
    %c0_78 = arith.constant 0 : index
    %c0_79 = arith.constant 0 : index
    %c0_80 = arith.constant 0 : index
    %129 = vector.load %arg9[%c0_78, %c0_79, %c0_80] : memref<2x32x288xbf16, #tpu.memory_space<vmem>>, vector<1x32x288xbf16>
    %130 = vector.shape_cast %129 : vector<1x32x288xbf16> to vector<32x288xbf16>
    %c3_81 = arith.constant 3 : index
    %c0_82 = arith.constant 0 : index
    %c0_83 = arith.constant 0 : index
    %131 = vector.load %arg14[%c3_81, %c0_82, %c0_83] : memref<20x32x1xf32, #tpu.memory_space<vmem>>, vector<1x32x1xf32>
    %132 = vector.shape_cast %131 : vector<1x32x1xf32> to vector<32x1xf32>
    %c17_i32_84 = arith.constant 17 : i32
    %133 = tpu.dynamic_rotate %128 by %c17_i32_84 dim 1 : vector<32x256xf32>, i32 -> vector<32x256xf32>
    %c0_85 = arith.constant 0 : index
    %c0_86 = arith.constant 0 : index
    %c0_87 = arith.constant 0 : index
    %134 = vector.load %arg6[%c0_85, %c0_86, %c0_87] : memref<9x1x256xf32, #tpu.memory_space<vmem>>, vector<1x1x256xf32>
    %135 = vector.shape_cast %134 : vector<1x1x256xf32> to vector<1x256xf32>
    %136 = vector.broadcast %135 : vector<1x256xf32> to vector<32x256xf32>
    %137 = arith.mulf %133, %136 : vector<32x256xf32>
    %c16_i32_88 = arith.constant 16 : i32
    %138 = tpu.dynamic_rotate %128 by %c16_i32_88 dim 1 : vector<32x256xf32>, i32 -> vector<32x256xf32>
    %c1_89 = arith.constant 1 : index
    %c0_90 = arith.constant 0 : index
    %c0_91 = arith.constant 0 : index
    %139 = vector.load %arg6[%c1_89, %c0_90, %c0_91] : memref<9x1x256xf32, #tpu.memory_space<vmem>>, vector<1x1x256xf32>
    %140 = vector.shape_cast %139 : vector<1x1x256xf32> to vector<1x256xf32>
    %141 = vector.broadcast %140 : vector<1x256xf32> to vector<32x256xf32>
    %142 = arith.mulf %138, %141 : vector<32x256xf32>
    %c15_i32_92 = arith.constant 15 : i32
    %143 = tpu.dynamic_rotate %128 by %c15_i32_92 dim 1 : vector<32x256xf32>, i32 -> vector<32x256xf32>
    %c2_93 = arith.constant 2 : index
    %c0_94 = arith.constant 0 : index
    %c0_95 = arith.constant 0 : index
    %144 = vector.load %arg6[%c2_93, %c0_94, %c0_95] : memref<9x1x256xf32, #tpu.memory_space<vmem>>, vector<1x1x256xf32>
    %145 = vector.shape_cast %144 : vector<1x1x256xf32> to vector<1x256xf32>
    %146 = vector.broadcast %145 : vector<1x256xf32> to vector<32x256xf32>
    %147 = arith.mulf %143, %146 : vector<32x256xf32>
    %c1_i32_96 = arith.constant 1 : i32
    %148 = tpu.dynamic_rotate %128 by %c1_i32_96 dim 1 : vector<32x256xf32>, i32 -> vector<32x256xf32>
    %c3_97 = arith.constant 3 : index
    %c0_98 = arith.constant 0 : index
    %c0_99 = arith.constant 0 : index
    %149 = vector.load %arg6[%c3_97, %c0_98, %c0_99] : memref<9x1x256xf32, #tpu.memory_space<vmem>>, vector<1x1x256xf32>
    %150 = vector.shape_cast %149 : vector<1x1x256xf32> to vector<1x256xf32>
    %151 = vector.broadcast %150 : vector<1x256xf32> to vector<32x256xf32>
    %152 = arith.mulf %148, %151 : vector<32x256xf32>
    %c255_i32_100 = arith.constant 255 : i32
    %153 = tpu.dynamic_rotate %128 by %c255_i32_100 dim 1 : vector<32x256xf32>, i32 -> vector<32x256xf32>
    %c5_101 = arith.constant 5 : index
    %c0_102 = arith.constant 0 : index
    %c0_103 = arith.constant 0 : index
    %154 = vector.load %arg6[%c5_101, %c0_102, %c0_103] : memref<9x1x256xf32, #tpu.memory_space<vmem>>, vector<1x1x256xf32>
    %155 = vector.shape_cast %154 : vector<1x1x256xf32> to vector<1x256xf32>
    %156 = vector.broadcast %155 : vector<1x256xf32> to vector<32x256xf32>
    %157 = arith.mulf %153, %156 : vector<32x256xf32>
    %c241_i32_104 = arith.constant 241 : i32
    %158 = tpu.dynamic_rotate %128 by %c241_i32_104 dim 1 : vector<32x256xf32>, i32 -> vector<32x256xf32>
    %c6_105 = arith.constant 6 : index
    %c0_106 = arith.constant 0 : index
    %c0_107 = arith.constant 0 : index
    %159 = vector.load %arg6[%c6_105, %c0_106, %c0_107] : memref<9x1x256xf32, #tpu.memory_space<vmem>>, vector<1x1x256xf32>
    %160 = vector.shape_cast %159 : vector<1x1x256xf32> to vector<1x256xf32>
    %161 = vector.broadcast %160 : vector<1x256xf32> to vector<32x256xf32>
    %162 = arith.mulf %158, %161 : vector<32x256xf32>
    %c240_i32_108 = arith.constant 240 : i32
    %163 = tpu.dynamic_rotate %128 by %c240_i32_108 dim 1 : vector<32x256xf32>, i32 -> vector<32x256xf32>
    %c7_109 = arith.constant 7 : index
    %c0_110 = arith.constant 0 : index
    %c0_111 = arith.constant 0 : index
    %164 = vector.load %arg6[%c7_109, %c0_110, %c0_111] : memref<9x1x256xf32, #tpu.memory_space<vmem>>, vector<1x1x256xf32>
    %165 = vector.shape_cast %164 : vector<1x1x256xf32> to vector<1x256xf32>
    %166 = vector.broadcast %165 : vector<1x256xf32> to vector<32x256xf32>
    %167 = arith.mulf %163, %166 : vector<32x256xf32>
    %c239_i32_112 = arith.constant 239 : i32
    %168 = tpu.dynamic_rotate %128 by %c239_i32_112 dim 1 : vector<32x256xf32>, i32 -> vector<32x256xf32>
    %c8_113 = arith.constant 8 : index
    %c0_114 = arith.constant 0 : index
    %c0_115 = arith.constant 0 : index
    %169 = vector.load %arg6[%c8_113, %c0_114, %c0_115] : memref<9x1x256xf32, #tpu.memory_space<vmem>>, vector<1x1x256xf32>
    %170 = vector.shape_cast %169 : vector<1x1x256xf32> to vector<1x256xf32>
    %171 = vector.broadcast %170 : vector<1x256xf32> to vector<32x256xf32>
    %172 = arith.mulf %168, %171 : vector<32x256xf32>
    %173 = tpu.concatenate %137, %142, %147, %152, %128, %157, %162, %167, %172 in 0 : vector<32x256xf32>, vector<32x256xf32>, vector<32x256xf32>, vector<32x256xf32>, vector<32x256xf32>, vector<32x256xf32>, vector<32x256xf32>, vector<32x256xf32>, vector<32x256xf32> -> vector<288x256xf32>
    %174 = arith.truncf %173 : vector<288x256xf32> to vector<288x256xbf16>
    %cst_116 = arith.constant dense<0.000000e+00> : vector<32x256xf32>
    %175 = tpu.matmul %130, %174, %cst_116 {dimension_numbers = #tpu.dot_dimension_numbers<[1], [0], [0], [1], [0, 0, 1, 1], [], []>} : vector<32x288xbf16>, vector<288x256xbf16>, vector<32x256xf32> -> vector<32x256xf32>
    %176 = vector.broadcast %132 : vector<32x1xf32> to vector<32x256xf32>
    %177 = arith.addf %175, %176 : vector<32x256xf32>
    %178 = vector.broadcast %50 : vector<32x1xf32> to vector<32x256xf32>
    %179 = arith.addf %177, %178 : vector<32x256xf32>
    %c4 = arith.constant 4 : index
    %c0_117 = arith.constant 0 : index
    %c0_118 = arith.constant 0 : index
    %180 = vector.load %arg14[%c4, %c0_117, %c0_118] : memref<20x32x1xf32, #tpu.memory_space<vmem>>, vector<1x32x1xf32>
    %181 = vector.shape_cast %180 : vector<1x32x1xf32> to vector<32x1xf32>
    %c5_119 = arith.constant 5 : index
    %c0_120 = arith.constant 0 : index
    %c0_121 = arith.constant 0 : index
    %182 = vector.load %arg14[%c5_119, %c0_120, %c0_121] : memref<20x32x1xf32, #tpu.memory_space<vmem>>, vector<1x32x1xf32>
    %183 = vector.shape_cast %182 : vector<1x32x1xf32> to vector<32x1xf32>
    %cst_122 = arith.constant dense<0.000000e+00> : vector<32xf32>
    %184 = vector.multi_reduction <add>, %179, %cst_122 [1] : vector<32x256xf32> to vector<32xf32>
    %185 = vector.shape_cast %184 : vector<32xf32> to vector<32x1xf32>
    %cst_123 = arith.constant dense<0.000000e+00> : vector<32x1xf32>
    %186 = tpu.matmul %0, %185, %cst_123 {dimension_numbers = #tpu.dot_dimension_numbers<[1], [0], [0], [1], [0, 0, 1, 1], [], []>} : vector<32x32xf32>, vector<32x1xf32>, vector<32x1xf32> -> vector<32x1xf32>
    %187 = vector.broadcast %186 : vector<32x1xf32> to vector<32x256xf32>
    %188 = arith.subf %179, %187 : vector<32x256xf32>
    %189 = arith.mulf %188, %188 : vector<32x256xf32>
    %cst_124 = arith.constant dense<0.000000e+00> : vector<32xf32>
    %190 = vector.multi_reduction <add>, %189, %cst_124 [1] : vector<32x256xf32> to vector<32xf32>
    %191 = vector.shape_cast %190 : vector<32xf32> to vector<32x1xf32>
    %cst_125 = arith.constant dense<0.000000e+00> : vector<32x1xf32>
    %192 = tpu.matmul %0, %191, %cst_125 {dimension_numbers = #tpu.dot_dimension_numbers<[1], [0], [0], [1], [0, 0, 1, 1], [], []>} : vector<32x32xf32>, vector<32x1xf32>, vector<32x1xf32> -> vector<32x1xf32>
    %cst_126 = arith.constant 9.99999974E-6 : f32
    %193 = vector.broadcast %cst_126 : f32 to vector<32x1xf32>
    %194 = arith.addf %192, %193 : vector<32x1xf32>
    %195 = math.rsqrt %194 : vector<32x1xf32>
    %196 = vector.broadcast %195 : vector<32x1xf32> to vector<32x256xf32>
    %197 = arith.mulf %188, %196 : vector<32x256xf32>
    %198 = vector.broadcast %181 : vector<32x1xf32> to vector<32x256xf32>
    %199 = arith.mulf %197, %198 : vector<32x256xf32>
    %200 = vector.broadcast %183 : vector<32x1xf32> to vector<32x256xf32>
    %201 = arith.addf %199, %200 : vector<32x256xf32>
    %202 = arith.negf %201 : vector<32x256xf32>
    %203 = math.exp %202 : vector<32x256xf32>
    %cst_127 = arith.constant 1.000000e+00 : f32
    %204 = vector.broadcast %cst_127 : f32 to vector<32x256xf32>
    %205 = arith.addf %204, %203 : vector<32x256xf32>
    %206 = arith.divf %204, %205 : vector<32x256xf32>
    %207 = arith.mulf %201, %206 : vector<32x256xf32>
    %c1_128 = arith.constant 1 : index
    %c0_129 = arith.constant 0 : index
    %c0_130 = arith.constant 0 : index
    %208 = vector.load %arg9[%c1_128, %c0_129, %c0_130] : memref<2x32x288xbf16, #tpu.memory_space<vmem>>, vector<1x32x288xbf16>
    %209 = vector.shape_cast %208 : vector<1x32x288xbf16> to vector<32x288xbf16>
    %c6_131 = arith.constant 6 : index
    %c0_132 = arith.constant 0 : index
    %c0_133 = arith.constant 0 : index
    %210 = vector.load %arg14[%c6_131, %c0_132, %c0_133] : memref<20x32x1xf32, #tpu.memory_space<vmem>>, vector<1x32x1xf32>
    %211 = vector.shape_cast %210 : vector<1x32x1xf32> to vector<32x1xf32>
    %c17_i32_134 = arith.constant 17 : i32
    %212 = tpu.dynamic_rotate %207 by %c17_i32_134 dim 1 : vector<32x256xf32>, i32 -> vector<32x256xf32>
    %c0_135 = arith.constant 0 : index
    %c0_136 = arith.constant 0 : index
    %c0_137 = arith.constant 0 : index
    %213 = vector.load %arg6[%c0_135, %c0_136, %c0_137] : memref<9x1x256xf32, #tpu.memory_space<vmem>>, vector<1x1x256xf32>
    %214 = vector.shape_cast %213 : vector<1x1x256xf32> to vector<1x256xf32>
    %215 = vector.broadcast %214 : vector<1x256xf32> to vector<32x256xf32>
    %216 = arith.mulf %212, %215 : vector<32x256xf32>
    %c16_i32_138 = arith.constant 16 : i32
    %217 = tpu.dynamic_rotate %207 by %c16_i32_138 dim 1 : vector<32x256xf32>, i32 -> vector<32x256xf32>
    %c1_139 = arith.constant 1 : index
    %c0_140 = arith.constant 0 : index
    %c0_141 = arith.constant 0 : index
    %218 = vector.load %arg6[%c1_139, %c0_140, %c0_141] : memref<9x1x256xf32, #tpu.memory_space<vmem>>, vector<1x1x256xf32>
    %219 = vector.shape_cast %218 : vector<1x1x256xf32> to vector<1x256xf32>
    %220 = vector.broadcast %219 : vector<1x256xf32> to vector<32x256xf32>
    %221 = arith.mulf %217, %220 : vector<32x256xf32>
    %c15_i32_142 = arith.constant 15 : i32
    %222 = tpu.dynamic_rotate %207 by %c15_i32_142 dim 1 : vector<32x256xf32>, i32 -> vector<32x256xf32>
    %c2_143 = arith.constant 2 : index
    %c0_144 = arith.constant 0 : index
    %c0_145 = arith.constant 0 : index
    %223 = vector.load %arg6[%c2_143, %c0_144, %c0_145] : memref<9x1x256xf32, #tpu.memory_space<vmem>>, vector<1x1x256xf32>
    %224 = vector.shape_cast %223 : vector<1x1x256xf32> to vector<1x256xf32>
    %225 = vector.broadcast %224 : vector<1x256xf32> to vector<32x256xf32>
    %226 = arith.mulf %222, %225 : vector<32x256xf32>
    %c1_i32_146 = arith.constant 1 : i32
    %227 = tpu.dynamic_rotate %207 by %c1_i32_146 dim 1 : vector<32x256xf32>, i32 -> vector<32x256xf32>
    %c3_147 = arith.constant 3 : index
    %c0_148 = arith.constant 0 : index
    %c0_149 = arith.constant 0 : index
    %228 = vector.load %arg6[%c3_147, %c0_148, %c0_149] : memref<9x1x256xf32, #tpu.memory_space<vmem>>, vector<1x1x256xf32>
    %229 = vector.shape_cast %228 : vector<1x1x256xf32> to vector<1x256xf32>
    %230 = vector.broadcast %229 : vector<1x256xf32> to vector<32x256xf32>
    %231 = arith.mulf %227, %230 : vector<32x256xf32>
    %c255_i32_150 = arith.constant 255 : i32
    %232 = tpu.dynamic_rotate %207 by %c255_i32_150 dim 1 : vector<32x256xf32>, i32 -> vector<32x256xf32>
    %c5_151 = arith.constant 5 : index
    %c0_152 = arith.constant 0 : index
    %c0_153 = arith.constant 0 : index
    %233 = vector.load %arg6[%c5_151, %c0_152, %c0_153] : memref<9x1x256xf32, #tpu.memory_space<vmem>>, vector<1x1x256xf32>
    %234 = vector.shape_cast %233 : vector<1x1x256xf32> to vector<1x256xf32>
    %235 = vector.broadcast %234 : vector<1x256xf32> to vector<32x256xf32>
    %236 = arith.mulf %232, %235 : vector<32x256xf32>
    %c241_i32_154 = arith.constant 241 : i32
    %237 = tpu.dynamic_rotate %207 by %c241_i32_154 dim 1 : vector<32x256xf32>, i32 -> vector<32x256xf32>
    %c6_155 = arith.constant 6 : index
    %c0_156 = arith.constant 0 : index
    %c0_157 = arith.constant 0 : index
    %238 = vector.load %arg6[%c6_155, %c0_156, %c0_157] : memref<9x1x256xf32, #tpu.memory_space<vmem>>, vector<1x1x256xf32>
    %239 = vector.shape_cast %238 : vector<1x1x256xf32> to vector<1x256xf32>
    %240 = vector.broadcast %239 : vector<1x256xf32> to vector<32x256xf32>
    %241 = arith.mulf %237, %240 : vector<32x256xf32>
    %c240_i32_158 = arith.constant 240 : i32
    %242 = tpu.dynamic_rotate %207 by %c240_i32_158 dim 1 : vector<32x256xf32>, i32 -> vector<32x256xf32>
    %c7_159 = arith.constant 7 : index
    %c0_160 = arith.constant 0 : index
    %c0_161 = arith.constant 0 : index
    %243 = vector.load %arg6[%c7_159, %c0_160, %c0_161] : memref<9x1x256xf32, #tpu.memory_space<vmem>>, vector<1x1x256xf32>
    %244 = vector.shape_cast %243 : vector<1x1x256xf32> to vector<1x256xf32>
    %245 = vector.broadcast %244 : vector<1x256xf32> to vector<32x256xf32>
    %246 = arith.mulf %242, %245 : vector<32x256xf32>
    %c239_i32_162 = arith.constant 239 : i32
    %247 = tpu.dynamic_rotate %207 by %c239_i32_162 dim 1 : vector<32x256xf32>, i32 -> vector<32x256xf32>
    %c8_163 = arith.constant 8 : index
    %c0_164 = arith.constant 0 : index
    %c0_165 = arith.constant 0 : index
    %248 = vector.load %arg6[%c8_163, %c0_164, %c0_165] : memref<9x1x256xf32, #tpu.memory_space<vmem>>, vector<1x1x256xf32>
    %249 = vector.shape_cast %248 : vector<1x1x256xf32> to vector<1x256xf32>
    %250 = vector.broadcast %249 : vector<1x256xf32> to vector<32x256xf32>
    %251 = arith.mulf %247, %250 : vector<32x256xf32>
    %252 = tpu.concatenate %216, %221, %226, %231, %207, %236, %241, %246, %251 in 0 : vector<32x256xf32>, vector<32x256xf32>, vector<32x256xf32>, vector<32x256xf32>, vector<32x256xf32>, vector<32x256xf32>, vector<32x256xf32>, vector<32x256xf32>, vector<32x256xf32> -> vector<288x256xf32>
    %253 = arith.truncf %252 : vector<288x256xf32> to vector<288x256xbf16>
    %cst_166 = arith.constant dense<0.000000e+00> : vector<32x256xf32>
    %254 = tpu.matmul %209, %253, %cst_166 {dimension_numbers = #tpu.dot_dimension_numbers<[1], [0], [0], [1], [0, 0, 1, 1], [], []>} : vector<32x288xbf16>, vector<288x256xbf16>, vector<32x256xf32> -> vector<32x256xf32>
    %255 = vector.broadcast %211 : vector<32x1xf32> to vector<32x256xf32>
    %256 = arith.addf %254, %255 : vector<32x256xf32>
    %257 = arith.addf %100, %256 : vector<32x256xf32>
    %c7_167 = arith.constant 7 : index
    %c0_168 = arith.constant 0 : index
    %c0_169 = arith.constant 0 : index
    %258 = vector.load %arg14[%c7_167, %c0_168, %c0_169] : memref<20x32x1xf32, #tpu.memory_space<vmem>>, vector<1x32x1xf32>
    %259 = vector.shape_cast %258 : vector<1x32x1xf32> to vector<32x1xf32>
    %c8_170 = arith.constant 8 : index
    %c0_171 = arith.constant 0 : index
    %c0_172 = arith.constant 0 : index
    %260 = vector.load %arg14[%c8_170, %c0_171, %c0_172] : memref<20x32x1xf32, #tpu.memory_space<vmem>>, vector<1x32x1xf32>
    %261 = vector.shape_cast %260 : vector<1x32x1xf32> to vector<32x1xf32>
    %cst_173 = arith.constant dense<0.000000e+00> : vector<32xf32>
    %262 = vector.multi_reduction <add>, %257, %cst_173 [1] : vector<32x256xf32> to vector<32xf32>
    %263 = vector.shape_cast %262 : vector<32xf32> to vector<32x1xf32>
    %cst_174 = arith.constant dense<0.000000e+00> : vector<32x1xf32>
    %264 = tpu.matmul %0, %263, %cst_174 {dimension_numbers = #tpu.dot_dimension_numbers<[1], [0], [0], [1], [0, 0, 1, 1], [], []>} : vector<32x32xf32>, vector<32x1xf32>, vector<32x1xf32> -> vector<32x1xf32>
    %265 = vector.broadcast %264 : vector<32x1xf32> to vector<32x256xf32>
    %266 = arith.subf %257, %265 : vector<32x256xf32>
    %267 = arith.mulf %266, %266 : vector<32x256xf32>
    %cst_175 = arith.constant dense<0.000000e+00> : vector<32xf32>
    %268 = vector.multi_reduction <add>, %267, %cst_175 [1] : vector<32x256xf32> to vector<32xf32>
    %269 = vector.shape_cast %268 : vector<32xf32> to vector<32x1xf32>
    %cst_176 = arith.constant dense<0.000000e+00> : vector<32x1xf32>
    %270 = tpu.matmul %0, %269, %cst_176 {dimension_numbers = #tpu.dot_dimension_numbers<[1], [0], [0], [1], [0, 0, 1, 1], [], []>} : vector<32x32xf32>, vector<32x1xf32>, vector<32x1xf32> -> vector<32x1xf32>
    %cst_177 = arith.constant 9.99999974E-6 : f32
    %271 = vector.broadcast %cst_177 : f32 to vector<32x1xf32>
    %272 = arith.addf %270, %271 : vector<32x1xf32>
    %273 = math.rsqrt %272 : vector<32x1xf32>
    %274 = vector.broadcast %273 : vector<32x1xf32> to vector<32x256xf32>
    %275 = arith.mulf %266, %274 : vector<32x256xf32>
    %276 = vector.broadcast %259 : vector<32x1xf32> to vector<32x256xf32>
    %277 = arith.mulf %275, %276 : vector<32x256xf32>
    %278 = vector.broadcast %261 : vector<32x1xf32> to vector<32x256xf32>
    %279 = arith.addf %277, %278 : vector<32x256xf32>
    %c0_178 = arith.constant 0 : index
    %c0_179 = arith.constant 0 : index
    %c0_180 = arith.constant 0 : index
    %280 = vector.load %arg11[%c0_178, %c0_179, %c0_180] : memref<6x32x32xbf16, #tpu.memory_space<vmem>>, vector<1x32x32xbf16>
    %281 = vector.shape_cast %280 : vector<1x32x32xbf16> to vector<32x32xbf16>
    %282 = arith.truncf %279 : vector<32x256xf32> to vector<32x256xbf16>
    %cst_181 = arith.constant dense<0.000000e+00> : vector<32x256xf32>
    %283 = tpu.matmul %281, %282, %cst_181 {dimension_numbers = #tpu.dot_dimension_numbers<[1], [0], [0], [1], [0, 0, 1, 1], [], []>} : vector<32x32xbf16>, vector<32x256xbf16>, vector<32x256xf32> -> vector<32x256xf32>
    %c9 = arith.constant 9 : index
    %c0_182 = arith.constant 0 : index
    %c0_183 = arith.constant 0 : index
    %284 = vector.load %arg14[%c9, %c0_182, %c0_183] : memref<20x32x1xf32, #tpu.memory_space<vmem>>, vector<1x32x1xf32>
    %285 = vector.shape_cast %284 : vector<1x32x1xf32> to vector<32x1xf32>
    %286 = vector.broadcast %285 : vector<32x1xf32> to vector<32x256xf32>
    %287 = arith.addf %283, %286 : vector<32x256xf32>
    %c10 = arith.constant 10 : index
    %c0_184 = arith.constant 0 : index
    %c0_185 = arith.constant 0 : index
    %288 = vector.load %arg14[%c10, %c0_184, %c0_185] : memref<20x32x1xf32, #tpu.memory_space<vmem>>, vector<1x32x1xf32>
    %289 = vector.shape_cast %288 : vector<1x32x1xf32> to vector<32x1xf32>
    %c11 = arith.constant 11 : index
    %c0_186 = arith.constant 0 : index
    %c0_187 = arith.constant 0 : index
    %290 = vector.load %arg14[%c11, %c0_186, %c0_187] : memref<20x32x1xf32, #tpu.memory_space<vmem>>, vector<1x32x1xf32>
    %291 = vector.shape_cast %290 : vector<1x32x1xf32> to vector<32x1xf32>
    %cst_188 = arith.constant dense<0.000000e+00> : vector<256xf32>
    %292 = vector.multi_reduction <add>, %287, %cst_188 [0] : vector<32x256xf32> to vector<256xf32>
    %293 = vector.shape_cast %292 : vector<256xf32> to vector<1x256xf32>
    %cst_189 = arith.constant 3.200000e+01 : f32
    %294 = vector.broadcast %cst_189 : f32 to vector<1x256xf32>
    %295 = arith.divf %293, %294 : vector<1x256xf32>
    %296 = vector.broadcast %295 : vector<1x256xf32> to vector<32x256xf32>
    %297 = arith.subf %287, %296 : vector<32x256xf32>
    %298 = arith.mulf %297, %297 : vector<32x256xf32>
    %cst_190 = arith.constant dense<0.000000e+00> : vector<256xf32>
    %299 = vector.multi_reduction <add>, %298, %cst_190 [0] : vector<32x256xf32> to vector<256xf32>
    %300 = vector.shape_cast %299 : vector<256xf32> to vector<1x256xf32>
    %cst_191 = arith.constant 3.200000e+01 : f32
    %301 = vector.broadcast %cst_191 : f32 to vector<1x256xf32>
    %302 = arith.divf %300, %301 : vector<1x256xf32>
    %cst_192 = arith.constant 9.99999974E-6 : f32
    %303 = vector.broadcast %cst_192 : f32 to vector<1x256xf32>
    %304 = arith.addf %302, %303 : vector<1x256xf32>
    %305 = math.rsqrt %304 : vector<1x256xf32>
    %306 = vector.broadcast %305 : vector<1x256xf32> to vector<32x256xf32>
    %307 = arith.mulf %297, %306 : vector<32x256xf32>
    %308 = vector.broadcast %289 : vector<32x1xf32> to vector<32x256xf32>
    %309 = arith.mulf %307, %308 : vector<32x256xf32>
    %310 = vector.broadcast %291 : vector<32x1xf32> to vector<32x256xf32>
    %311 = arith.addf %309, %310 : vector<32x256xf32>
    %c1_193 = arith.constant 1 : index
    %c0_194 = arith.constant 0 : index
    %c0_195 = arith.constant 0 : index
    %312 = vector.load %arg11[%c1_193, %c0_194, %c0_195] : memref<6x32x32xbf16, #tpu.memory_space<vmem>>, vector<1x32x32xbf16>
    %313 = vector.shape_cast %312 : vector<1x32x32xbf16> to vector<32x32xbf16>
    %314 = arith.truncf %311 : vector<32x256xf32> to vector<32x256xbf16>
    %cst_196 = arith.constant dense<0.000000e+00> : vector<32x256xf32>
    %315 = tpu.matmul %313, %314, %cst_196 {dimension_numbers = #tpu.dot_dimension_numbers<[1], [0], [0], [1], [0, 0, 1, 1], [], []>} : vector<32x32xbf16>, vector<32x256xbf16>, vector<32x256xf32> -> vector<32x256xf32>
    %c0_197 = arith.constant 0 : index
    %c0_198 = arith.constant 0 : index
    %c0_199 = arith.constant 0 : index
    %316 = vector.load %arg4[%c0_197, %c0_198, %c0_199] : memref<1x8x32xf32, #tpu.memory_space<vmem>>, vector<1x8x32xf32>
    %317 = vector.shape_cast %316 : vector<1x8x32xf32> to vector<8x32xf32>
    %318 = arith.truncf %317 : vector<8x32xf32> to vector<8x32xbf16>
    %c0_200 = arith.constant 0 : index
    %c0_201 = arith.constant 0 : index
    %c0_202 = arith.constant 0 : index
    %319 = vector.load %arg5[%c0_200, %c0_201, %c0_202] : memref<1x32x8xf32, #tpu.memory_space<vmem>>, vector<1x32x8xf32>
    %320 = vector.shape_cast %319 : vector<1x32x8xf32> to vector<32x8xf32>
    %321 = arith.truncf %320 : vector<32x8xf32> to vector<32x8xbf16>
    %c2_203 = arith.constant 2 : index
    %c0_204 = arith.constant 0 : index
    %c0_205 = arith.constant 0 : index
    %322 = vector.load %arg11[%c2_203, %c0_204, %c0_205] : memref<6x32x32xbf16, #tpu.memory_space<vmem>>, vector<1x32x32xbf16>
    %323 = vector.shape_cast %322 : vector<1x32x32xbf16> to vector<32x32xbf16>
    %cst_206 = arith.constant dense<0.000000e+00> : vector<8x32xf32>
    %324 = tpu.matmul %318, %323, %cst_206 {dimension_numbers = #tpu.dot_dimension_numbers<[1], [0], [0], [1], [0, 0, 1, 1], [], []>} : vector<8x32xbf16>, vector<32x32xbf16>, vector<8x32xf32> -> vector<8x32xf32>
    %c3_207 = arith.constant 3 : index
    %c0_208 = arith.constant 0 : index
    %c0_209 = arith.constant 0 : index
    %325 = vector.load %arg11[%c3_207, %c0_208, %c0_209] : memref<6x32x32xbf16, #tpu.memory_space<vmem>>, vector<1x32x32xbf16>
    %326 = vector.shape_cast %325 : vector<1x32x32xbf16> to vector<32x32xbf16>
    %cst_210 = arith.constant dense<0.000000e+00> : vector<32x8xf32>
    %327 = tpu.matmul %326, %321, %cst_210 {dimension_numbers = #tpu.dot_dimension_numbers<[1], [0], [0], [1], [0, 0, 1, 1], [], []>} : vector<32x32xbf16>, vector<32x8xbf16>, vector<32x8xf32> -> vector<32x8xf32>
    %328 = arith.truncf %324 : vector<8x32xf32> to vector<8x32xbf16>
    %329 = arith.truncf %315 : vector<32x256xf32> to vector<32x256xbf16>
    %cst_211 = arith.constant dense<0.000000e+00> : vector<8x256xf32>
    %330 = tpu.matmul %328, %329, %cst_211 {dimension_numbers = #tpu.dot_dimension_numbers<[1], [0], [0], [1], [0, 0, 1, 1], [], []>} : vector<8x32xbf16>, vector<32x256xbf16>, vector<8x256xf32> -> vector<8x256xf32>
    %cst_212 = arith.constant dense<0xFF800000> : vector<256xf32>
    %331 = vector.multi_reduction <maximumf>, %330, %cst_212 [0] : vector<8x256xf32> to vector<256xf32>
    %332 = vector.shape_cast %331 : vector<256xf32> to vector<1x256xf32>
    %333 = vector.broadcast %332 : vector<1x256xf32> to vector<8x256xf32>
    %334 = arith.subf %330, %333 : vector<8x256xf32>
    %335 = math.exp %334 : vector<8x256xf32>
    %cst_213 = arith.constant dense<0.000000e+00> : vector<256xf32>
    %336 = vector.multi_reduction <add>, %335, %cst_213 [0] : vector<8x256xf32> to vector<256xf32>
    %337 = vector.shape_cast %336 : vector<256xf32> to vector<1x256xf32>
    %338 = tpu.reciprocal %337 {approx = true} : vector<1x256xf32> -> vector<1x256xf32>
    %339 = vector.broadcast %338 : vector<1x256xf32> to vector<8x256xf32>
    %340 = arith.mulf %335, %339 : vector<8x256xf32>
    %341 = arith.truncf %327 : vector<32x8xf32> to vector<32x8xbf16>
    %342 = arith.truncf %340 : vector<8x256xf32> to vector<8x256xbf16>
    %cst_214 = arith.constant dense<0.000000e+00> : vector<32x256xf32>
    %343 = tpu.matmul %341, %342, %cst_214 {dimension_numbers = #tpu.dot_dimension_numbers<[1], [0], [0], [1], [0, 0, 1, 1], [], []>} : vector<32x8xbf16>, vector<8x256xbf16>, vector<32x256xf32> -> vector<32x256xf32>
    %c4_215 = arith.constant 4 : index
    %c0_216 = arith.constant 0 : index
    %c0_217 = arith.constant 0 : index
    %344 = vector.load %arg11[%c4_215, %c0_216, %c0_217] : memref<6x32x32xbf16, #tpu.memory_space<vmem>>, vector<1x32x32xbf16>
    %345 = vector.shape_cast %344 : vector<1x32x32xbf16> to vector<32x32xbf16>
    %346 = arith.truncf %343 : vector<32x256xf32> to vector<32x256xbf16>
    %cst_218 = arith.constant dense<0.000000e+00> : vector<32x256xf32>
    %347 = tpu.matmul %345, %346, %cst_218 {dimension_numbers = #tpu.dot_dimension_numbers<[1], [0], [0], [1], [0, 0, 1, 1], [], []>} : vector<32x32xbf16>, vector<32x256xbf16>, vector<32x256xf32> -> vector<32x256xf32>
    %c12 = arith.constant 12 : index
    %c0_219 = arith.constant 0 : index
    %c0_220 = arith.constant 0 : index
    %348 = vector.load %arg14[%c12, %c0_219, %c0_220] : memref<20x32x1xf32, #tpu.memory_space<vmem>>, vector<1x32x1xf32>
    %349 = vector.shape_cast %348 : vector<1x32x1xf32> to vector<32x1xf32>
    %350 = vector.broadcast %349 : vector<32x1xf32> to vector<32x256xf32>
    %351 = arith.addf %347, %350 : vector<32x256xf32>
    %352 = arith.addf %287, %351 : vector<32x256xf32>
    %c13 = arith.constant 13 : index
    %c0_221 = arith.constant 0 : index
    %c0_222 = arith.constant 0 : index
    %353 = vector.load %arg14[%c13, %c0_221, %c0_222] : memref<20x32x1xf32, #tpu.memory_space<vmem>>, vector<1x32x1xf32>
    %354 = vector.shape_cast %353 : vector<1x32x1xf32> to vector<32x1xf32>
    %c14 = arith.constant 14 : index
    %c0_223 = arith.constant 0 : index
    %c0_224 = arith.constant 0 : index
    %355 = vector.load %arg14[%c14, %c0_223, %c0_224] : memref<20x32x1xf32, #tpu.memory_space<vmem>>, vector<1x32x1xf32>
    %356 = vector.shape_cast %355 : vector<1x32x1xf32> to vector<32x1xf32>
    %cst_225 = arith.constant dense<0.000000e+00> : vector<256xf32>
    %357 = vector.multi_reduction <add>, %352, %cst_225 [0] : vector<32x256xf32> to vector<256xf32>
    %358 = vector.shape_cast %357 : vector<256xf32> to vector<1x256xf32>
    %cst_226 = arith.constant 3.200000e+01 : f32
    %359 = vector.broadcast %cst_226 : f32 to vector<1x256xf32>
    %360 = arith.divf %358, %359 : vector<1x256xf32>
    %361 = vector.broadcast %360 : vector<1x256xf32> to vector<32x256xf32>
    %362 = arith.subf %352, %361 : vector<32x256xf32>
    %363 = arith.mulf %362, %362 : vector<32x256xf32>
    %cst_227 = arith.constant dense<0.000000e+00> : vector<256xf32>
    %364 = vector.multi_reduction <add>, %363, %cst_227 [0] : vector<32x256xf32> to vector<256xf32>
    %365 = vector.shape_cast %364 : vector<256xf32> to vector<1x256xf32>
    %cst_228 = arith.constant 3.200000e+01 : f32
    %366 = vector.broadcast %cst_228 : f32 to vector<1x256xf32>
    %367 = arith.divf %365, %366 : vector<1x256xf32>
    %cst_229 = arith.constant 9.99999974E-6 : f32
    %368 = vector.broadcast %cst_229 : f32 to vector<1x256xf32>
    %369 = arith.addf %367, %368 : vector<1x256xf32>
    %370 = math.rsqrt %369 : vector<1x256xf32>
    %371 = vector.broadcast %370 : vector<1x256xf32> to vector<32x256xf32>
    %372 = arith.mulf %362, %371 : vector<32x256xf32>
    %373 = vector.broadcast %354 : vector<32x1xf32> to vector<32x256xf32>
    %374 = arith.mulf %372, %373 : vector<32x256xf32>
    %375 = vector.broadcast %356 : vector<32x1xf32> to vector<32x256xf32>
    %376 = arith.addf %374, %375 : vector<32x256xf32>
    %c0_230 = arith.constant 0 : index
    %c0_231 = arith.constant 0 : index
    %377 = vector.load %arg12[%c0_230, %c0_231] : memref<128x32xbf16, #tpu.memory_space<vmem>>, vector<128x32xbf16>
    %378 = arith.truncf %376 : vector<32x256xf32> to vector<32x256xbf16>
    %cst_232 = arith.constant dense<0.000000e+00> : vector<128x256xf32>
    %379 = tpu.matmul %377, %378, %cst_232 {dimension_numbers = #tpu.dot_dimension_numbers<[1], [0], [0], [1], [0, 0, 1, 1], [], []>} : vector<128x32xbf16>, vector<32x256xbf16>, vector<128x256xf32> -> vector<128x256xf32>
    %c0_233 = arith.constant 0 : index
    %c0_234 = arith.constant 0 : index
    %380 = vector.load %arg15[%c0_233, %c0_234] : memref<128x1xf32, #tpu.memory_space<vmem>>, vector<128x1xf32>
    %381 = vector.broadcast %380 : vector<128x1xf32> to vector<128x256xf32>
    %382 = arith.addf %379, %381 : vector<128x256xf32>
    %383 = arith.mulf %382, %382 : vector<128x256xf32>
    %384 = arith.mulf %382, %383 : vector<128x256xf32>
    %cst_235 = arith.constant 4.471500e-02 : f32
    %385 = vector.broadcast %cst_235 : f32 to vector<128x256xf32>
    %386 = arith.mulf %385, %384 : vector<128x256xf32>
    %387 = arith.addf %382, %386 : vector<128x256xf32>
    %cst_236 = arith.constant 0.797884583 : f32
    %388 = vector.broadcast %cst_236 : f32 to vector<128x256xf32>
    %389 = arith.mulf %388, %387 : vector<128x256xf32>
    %390 = math.tanh %389 : vector<128x256xf32>
    %cst_237 = arith.constant 1.000000e+00 : f32
    %391 = vector.broadcast %cst_237 : f32 to vector<128x256xf32>
    %392 = arith.addf %391, %390 : vector<128x256xf32>
    %cst_238 = arith.constant 5.000000e-01 : f32
    %393 = vector.broadcast %cst_238 : f32 to vector<128x256xf32>
    %394 = arith.mulf %393, %392 : vector<128x256xf32>
    %395 = arith.mulf %382, %394 : vector<128x256xf32>
    %c0_239 = arith.constant 0 : index
    %c0_240 = arith.constant 0 : index
    %396 = vector.load %arg13[%c0_239, %c0_240] : memref<32x128xbf16, #tpu.memory_space<vmem>>, vector<32x128xbf16>
    %397 = arith.truncf %395 : vector<128x256xf32> to vector<128x256xbf16>
    %cst_241 = arith.constant dense<0.000000e+00> : vector<32x256xf32>
    %398 = tpu.matmul %396, %397, %cst_241 {dimension_numbers = #tpu.dot_dimension_numbers<[1], [0], [0], [1], [0, 0, 1, 1], [], []>} : vector<32x128xbf16>, vector<128x256xbf16>, vector<32x256xf32> -> vector<32x256xf32>
    %c15 = arith.constant 15 : index
    %c0_242 = arith.constant 0 : index
    %c0_243 = arith.constant 0 : index
    %399 = vector.load %arg14[%c15, %c0_242, %c0_243] : memref<20x32x1xf32, #tpu.memory_space<vmem>>, vector<1x32x1xf32>
    %400 = vector.shape_cast %399 : vector<1x32x1xf32> to vector<32x1xf32>
    %401 = vector.broadcast %400 : vector<32x1xf32> to vector<32x256xf32>
    %402 = arith.addf %398, %401 : vector<32x256xf32>
    %403 = arith.addf %352, %402 : vector<32x256xf32>
    %c5_244 = arith.constant 5 : index
    %c0_245 = arith.constant 0 : index
    %c0_246 = arith.constant 0 : index
    %404 = vector.load %arg11[%c5_244, %c0_245, %c0_246] : memref<6x32x32xbf16, #tpu.memory_space<vmem>>, vector<1x32x32xbf16>
    %405 = vector.shape_cast %404 : vector<1x32x32xbf16> to vector<32x32xbf16>
    %406 = arith.truncf %403 : vector<32x256xf32> to vector<32x256xbf16>
    %cst_247 = arith.constant dense<0.000000e+00> : vector<32x256xf32>
    %407 = tpu.matmul %405, %406, %cst_247 {dimension_numbers = #tpu.dot_dimension_numbers<[1], [0], [0], [1], [0, 0, 1, 1], [], []>} : vector<32x32xbf16>, vector<32x256xbf16>, vector<32x256xf32> -> vector<32x256xf32>
    %c16 = arith.constant 16 : index
    %c0_248 = arith.constant 0 : index
    %c0_249 = arith.constant 0 : index
    %408 = vector.load %arg14[%c16, %c0_248, %c0_249] : memref<20x32x1xf32, #tpu.memory_space<vmem>>, vector<1x32x1xf32>
    %409 = vector.shape_cast %408 : vector<1x32x1xf32> to vector<32x1xf32>
    %410 = vector.broadcast %409 : vector<32x1xf32> to vector<32x256xf32>
    %411 = arith.addf %407, %410 : vector<32x256xf32>
    %412 = arith.addf %257, %411 : vector<32x256xf32>
    %c17 = arith.constant 17 : index
    %c0_250 = arith.constant 0 : index
    %c0_251 = arith.constant 0 : index
    %413 = vector.load %arg14[%c17, %c0_250, %c0_251] : memref<20x32x1xf32, #tpu.memory_space<vmem>>, vector<1x32x1xf32>
    %414 = vector.shape_cast %413 : vector<1x32x1xf32> to vector<32x1xf32>
    %c18 = arith.constant 18 : index
    %c0_252 = arith.constant 0 : index
    %c0_253 = arith.constant 0 : index
    %415 = vector.load %arg14[%c18, %c0_252, %c0_253] : memref<20x32x1xf32, #tpu.memory_space<vmem>>, vector<1x32x1xf32>
    %416 = vector.shape_cast %415 : vector<1x32x1xf32> to vector<32x1xf32>
    %cst_254 = arith.constant dense<0.000000e+00> : vector<32xf32>
    %417 = vector.multi_reduction <add>, %412, %cst_254 [1] : vector<32x256xf32> to vector<32xf32>
    %418 = vector.shape_cast %417 : vector<32xf32> to vector<32x1xf32>
    %cst_255 = arith.constant dense<0.000000e+00> : vector<32x1xf32>
    %419 = tpu.matmul %0, %418, %cst_255 {dimension_numbers = #tpu.dot_dimension_numbers<[1], [0], [0], [1], [0, 0, 1, 1], [], []>} : vector<32x32xf32>, vector<32x1xf32>, vector<32x1xf32> -> vector<32x1xf32>
    %420 = vector.broadcast %419 : vector<32x1xf32> to vector<32x256xf32>
    %421 = arith.subf %412, %420 : vector<32x256xf32>
    %422 = arith.mulf %421, %421 : vector<32x256xf32>
    %cst_256 = arith.constant dense<0.000000e+00> : vector<32xf32>
    %423 = vector.multi_reduction <add>, %422, %cst_256 [1] : vector<32x256xf32> to vector<32xf32>
    %424 = vector.shape_cast %423 : vector<32xf32> to vector<32x1xf32>
    %cst_257 = arith.constant dense<0.000000e+00> : vector<32x1xf32>
    %425 = tpu.matmul %0, %424, %cst_257 {dimension_numbers = #tpu.dot_dimension_numbers<[1], [0], [0], [1], [0, 0, 1, 1], [], []>} : vector<32x32xf32>, vector<32x1xf32>, vector<32x1xf32> -> vector<32x1xf32>
    %cst_258 = arith.constant 9.99999974E-6 : f32
    %426 = vector.broadcast %cst_258 : f32 to vector<32x1xf32>
    %427 = arith.addf %425, %426 : vector<32x1xf32>
    %428 = math.rsqrt %427 : vector<32x1xf32>
    %429 = vector.broadcast %428 : vector<32x1xf32> to vector<32x256xf32>
    %430 = arith.mulf %421, %429 : vector<32x256xf32>
    %431 = vector.broadcast %414 : vector<32x1xf32> to vector<32x256xf32>
    %432 = arith.mulf %430, %431 : vector<32x256xf32>
    %433 = vector.broadcast %416 : vector<32x1xf32> to vector<32x256xf32>
    %434 = arith.addf %432, %433 : vector<32x256xf32>
    %435 = arith.negf %434 : vector<32x256xf32>
    %436 = math.exp %435 : vector<32x256xf32>
    %cst_259 = arith.constant 1.000000e+00 : f32
    %437 = vector.broadcast %cst_259 : f32 to vector<32x256xf32>
    %438 = arith.addf %437, %436 : vector<32x256xf32>
    %439 = arith.divf %437, %438 : vector<32x256xf32>
    %440 = arith.mulf %434, %439 : vector<32x256xf32>
    %c0_260 = arith.constant 0 : index
    %c0_261 = arith.constant 0 : index
    %441 = vector.load %arg10[%c0_260, %c0_261] : memref<4x288xbf16, #tpu.memory_space<vmem>>, vector<4x288xbf16>
    %c0_262 = arith.constant 0 : index
    %c0_263 = arith.constant 0 : index
    %442 = vector.load %arg16[%c0_262, %c0_263] : memref<4x1xf32, #tpu.memory_space<vmem>>, vector<4x1xf32>
    %c17_i32_264 = arith.constant 17 : i32
    %443 = tpu.dynamic_rotate %440 by %c17_i32_264 dim 1 : vector<32x256xf32>, i32 -> vector<32x256xf32>
    %c0_265 = arith.constant 0 : index
    %c0_266 = arith.constant 0 : index
    %c0_267 = arith.constant 0 : index
    %444 = vector.load %arg6[%c0_265, %c0_266, %c0_267] : memref<9x1x256xf32, #tpu.memory_space<vmem>>, vector<1x1x256xf32>
    %445 = vector.shape_cast %444 : vector<1x1x256xf32> to vector<1x256xf32>
    %446 = vector.broadcast %445 : vector<1x256xf32> to vector<32x256xf32>
    %447 = arith.mulf %443, %446 : vector<32x256xf32>
    %c16_i32_268 = arith.constant 16 : i32
    %448 = tpu.dynamic_rotate %440 by %c16_i32_268 dim 1 : vector<32x256xf32>, i32 -> vector<32x256xf32>
    %c1_269 = arith.constant 1 : index
    %c0_270 = arith.constant 0 : index
    %c0_271 = arith.constant 0 : index
    %449 = vector.load %arg6[%c1_269, %c0_270, %c0_271] : memref<9x1x256xf32, #tpu.memory_space<vmem>>, vector<1x1x256xf32>
    %450 = vector.shape_cast %449 : vector<1x1x256xf32> to vector<1x256xf32>
    %451 = vector.broadcast %450 : vector<1x256xf32> to vector<32x256xf32>
    %452 = arith.mulf %448, %451 : vector<32x256xf32>
    %c15_i32_272 = arith.constant 15 : i32
    %453 = tpu.dynamic_rotate %440 by %c15_i32_272 dim 1 : vector<32x256xf32>, i32 -> vector<32x256xf32>
    %c2_273 = arith.constant 2 : index
    %c0_274 = arith.constant 0 : index
    %c0_275 = arith.constant 0 : index
    %454 = vector.load %arg6[%c2_273, %c0_274, %c0_275] : memref<9x1x256xf32, #tpu.memory_space<vmem>>, vector<1x1x256xf32>
    %455 = vector.shape_cast %454 : vector<1x1x256xf32> to vector<1x256xf32>
    %456 = vector.broadcast %455 : vector<1x256xf32> to vector<32x256xf32>
    %457 = arith.mulf %453, %456 : vector<32x256xf32>
    %c1_i32_276 = arith.constant 1 : i32
    %458 = tpu.dynamic_rotate %440 by %c1_i32_276 dim 1 : vector<32x256xf32>, i32 -> vector<32x256xf32>
    %c3_277 = arith.constant 3 : index
    %c0_278 = arith.constant 0 : index
    %c0_279 = arith.constant 0 : index
    %459 = vector.load %arg6[%c3_277, %c0_278, %c0_279] : memref<9x1x256xf32, #tpu.memory_space<vmem>>, vector<1x1x256xf32>
    %460 = vector.shape_cast %459 : vector<1x1x256xf32> to vector<1x256xf32>
    %461 = vector.broadcast %460 : vector<1x256xf32> to vector<32x256xf32>
    %462 = arith.mulf %458, %461 : vector<32x256xf32>
    %c255_i32_280 = arith.constant 255 : i32
    %463 = tpu.dynamic_rotate %440 by %c255_i32_280 dim 1 : vector<32x256xf32>, i32 -> vector<32x256xf32>
    %c5_281 = arith.constant 5 : index
    %c0_282 = arith.constant 0 : index
    %c0_283 = arith.constant 0 : index
    %464 = vector.load %arg6[%c5_281, %c0_282, %c0_283] : memref<9x1x256xf32, #tpu.memory_space<vmem>>, vector<1x1x256xf32>
    %465 = vector.shape_cast %464 : vector<1x1x256xf32> to vector<1x256xf32>
    %466 = vector.broadcast %465 : vector<1x256xf32> to vector<32x256xf32>
    %467 = arith.mulf %463, %466 : vector<32x256xf32>
    %c241_i32_284 = arith.constant 241 : i32
    %468 = tpu.dynamic_rotate %440 by %c241_i32_284 dim 1 : vector<32x256xf32>, i32 -> vector<32x256xf32>
    %c6_285 = arith.constant 6 : index
    %c0_286 = arith.constant 0 : index
    %c0_287 = arith.constant 0 : index
    %469 = vector.load %arg6[%c6_285, %c0_286, %c0_287] : memref<9x1x256xf32, #tpu.memory_space<vmem>>, vector<1x1x256xf32>
    %470 = vector.shape_cast %469 : vector<1x1x256xf32> to vector<1x256xf32>
    %471 = vector.broadcast %470 : vector<1x256xf32> to vector<32x256xf32>
    %472 = arith.mulf %468, %471 : vector<32x256xf32>
    %c240_i32_288 = arith.constant 240 : i32
    %473 = tpu.dynamic_rotate %440 by %c240_i32_288 dim 1 : vector<32x256xf32>, i32 -> vector<32x256xf32>
    %c7_289 = arith.constant 7 : index
    %c0_290 = arith.constant 0 : index
    %c0_291 = arith.constant 0 : index
    %474 = vector.load %arg6[%c7_289, %c0_290, %c0_291] : memref<9x1x256xf32, #tpu.memory_space<vmem>>, vector<1x1x256xf32>
    %475 = vector.shape_cast %474 : vector<1x1x256xf32> to vector<1x256xf32>
    %476 = vector.broadcast %475 : vector<1x256xf32> to vector<32x256xf32>
    %477 = arith.mulf %473, %476 : vector<32x256xf32>
    %c239_i32_292 = arith.constant 239 : i32
    %478 = tpu.dynamic_rotate %440 by %c239_i32_292 dim 1 : vector<32x256xf32>, i32 -> vector<32x256xf32>
    %c8_293 = arith.constant 8 : index
    %c0_294 = arith.constant 0 : index
    %c0_295 = arith.constant 0 : index
    %479 = vector.load %arg6[%c8_293, %c0_294, %c0_295] : memref<9x1x256xf32, #tpu.memory_space<vmem>>, vector<1x1x256xf32>
    %480 = vector.shape_cast %479 : vector<1x1x256xf32> to vector<1x256xf32>
    %481 = vector.broadcast %480 : vector<1x256xf32> to vector<32x256xf32>
    %482 = arith.mulf %478, %481 : vector<32x256xf32>
    %483 = tpu.concatenate %447, %452, %457, %462, %440, %467, %472, %477, %482 in 0 : vector<32x256xf32>, vector<32x256xf32>, vector<32x256xf32>, vector<32x256xf32>, vector<32x256xf32>, vector<32x256xf32>, vector<32x256xf32>, vector<32x256xf32>, vector<32x256xf32> -> vector<288x256xf32>
    %484 = arith.truncf %483 : vector<288x256xf32> to vector<288x256xbf16>
    %cst_296 = arith.constant dense<0.000000e+00> : vector<4x256xf32>
    %485 = tpu.matmul %441, %484, %cst_296 {dimension_numbers = #tpu.dot_dimension_numbers<[1], [0], [0], [1], [0, 0, 1, 1], [], []>} : vector<4x288xbf16>, vector<288x256xbf16>, vector<4x256xf32> -> vector<4x256xf32>
    %486 = vector.broadcast %442 : vector<4x1xf32> to vector<4x256xf32>
    %487 = arith.addf %485, %486 : vector<4x256xf32>
    %c0_297 = arith.constant 0 : index
    %c0_298 = arith.constant 0 : index
    %c0_299 = arith.constant 0 : index
    %488 = vector.load %arg22[%c0_297, %c0_298, %c0_299] : memref<1x4x256xf32, #tpu.memory_space<vmem>>, vector<1x4x256xf32>
    %489 = vector.shape_cast %488 : vector<1x4x256xf32> to vector<4x256xf32>
    %490 = vector.shape_cast %487 : vector<4x256xf32> to vector<1x4x256xf32>
    tpu.vector_store %arg22[%c0_297, %c0_298, %c0_299], %490 {strides = array<i32>} : memref<1x4x256xf32, #tpu.memory_space<vmem>>, vector<1x4x256xf32>,
    return
  }
  func.func @transform_0(%arg0: i32) -> (i32, i32, i32) {
    %c0_i32 = arith.constant 0 : i32
    %c0_i32_0 = arith.constant 0 : i32
    %c0_i32_1 = arith.constant 0 : i32
    return %arg0, %c0_i32, %c0_i32_0 : i32, i32, i32
  }
  func.func @transform_1(%arg0: i32) -> (i32, i32, i32) {
    %c0_i32 = arith.constant 0 : i32
    %c0_i32_0 = arith.constant 0 : i32
    %c0_i32_1 = arith.constant 0 : i32
    return %arg0, %c0_i32, %c0_i32_0 : i32, i32, i32
  }
  func.func @transform_2(%arg0: i32) -> (i32, i32, i32) {
    %c0_i32 = arith.constant 0 : i32
    %c0_i32_0 = arith.constant 0 : i32
    %c0_i32_1 = arith.constant 0 : i32
    return %arg0, %c0_i32, %c0_i32_0 : i32, i32, i32
  }
  func.func @transform_3(%arg0: i32) -> (i32, i32, i32) {
    %c0_i32 = arith.constant 0 : i32
    %c0_i32_0 = arith.constant 0 : i32
    %c0_i32_1 = arith.constant 0 : i32
    return %arg0, %c0_i32, %c0_i32_0 : i32, i32, i32
  }
  func.func @transform_4(%arg0: i32) -> (i32, i32, i32) {
    %c0_i32 = arith.constant 0 : i32
    %c0_i32_0 = arith.constant 0 : i32
    %c0_i32_1 = arith.constant 0 : i32
    return %arg0, %c0_i32, %c0_i32_0 : i32, i32, i32
  }
  func.func @transform_5(%arg0: i32) -> (i32, i32, i32) {
    %c0_i32 = arith.constant 0 : i32
    %c0_i32_0 = arith.constant 0 : i32
    %c0_i32_1 = arith.constant 0 : i32
    %c0_i32_2 = arith.constant 0 : i32
    return %c0_i32, %c0_i32_0, %c0_i32_1 : i32, i32, i32
  }
  func.func @transform_6(%arg0: i32) -> (i32, i32) {
    %c0_i32 = arith.constant 0 : i32
    %c0_i32_0 = arith.constant 0 : i32
    %c0_i32_1 = arith.constant 0 : i32
    return %c0_i32, %c0_i32_0 : i32, i32
  }
  func.func @transform_7(%arg0: i32) -> (i32, i32) {
    %c0_i32 = arith.constant 0 : i32
    %c0_i32_0 = arith.constant 0 : i32
    %c0_i32_1 = arith.constant 0 : i32
    return %c0_i32, %c0_i32_0 : i32, i32
  }
  func.func @transform_8(%arg0: i32) -> (i32, i32, i32) {
    %c0_i32 = arith.constant 0 : i32
    %c0_i32_0 = arith.constant 0 : i32
    %c0_i32_1 = arith.constant 0 : i32
    %c0_i32_2 = arith.constant 0 : i32
    return %c0_i32, %c0_i32_0, %c0_i32_1 : i32, i32, i32
  }
  func.func @transform_9(%arg0: i32) -> (i32, i32) {
    %c0_i32 = arith.constant 0 : i32
    %c0_i32_0 = arith.constant 0 : i32
    %c0_i32_1 = arith.constant 0 : i32
    return %c0_i32, %c0_i32_0 : i32, i32
  }
  func.func @transform_10(%arg0: i32) -> (i32, i32, i32) {
    %c0_i32 = arith.constant 0 : i32
    %c0_i32_0 = arith.constant 0 : i32
    %c0_i32_1 = arith.constant 0 : i32
    %c0_i32_2 = arith.constant 0 : i32
    return %c0_i32, %c0_i32_0, %c0_i32_1 : i32, i32, i32
  }
  func.func @transform_11(%arg0: i32) -> (i32, i32) {
    %c0_i32 = arith.constant 0 : i32
    %c0_i32_0 = arith.constant 0 : i32
    %c0_i32_1 = arith.constant 0 : i32
    return %c0_i32, %c0_i32_0 : i32, i32
  }
  func.func @transform_12(%arg0: i32) -> (i32, i32) {
    %c0_i32 = arith.constant 0 : i32
    %c0_i32_0 = arith.constant 0 : i32
    %c0_i32_1 = arith.constant 0 : i32
    return %c0_i32, %c0_i32_0 : i32, i32
  }
  func.func @transform_13(%arg0: i32) -> (i32, i32, i32) {
    %c0_i32 = arith.constant 0 : i32
    %c0_i32_0 = arith.constant 0 : i32
    %c0_i32_1 = arith.constant 0 : i32
    %c0_i32_2 = arith.constant 0 : i32
    return %c0_i32, %c0_i32_0, %c0_i32_1 : i32, i32, i32
  }
  func.func @transform_14(%arg0: i32) -> (i32, i32) {
    %c0_i32 = arith.constant 0 : i32
    %c0_i32_0 = arith.constant 0 : i32
    %c0_i32_1 = arith.constant 0 : i32
    return %c0_i32, %c0_i32_0 : i32, i32
  }
  func.func @transform_15(%arg0: i32) -> (i32, i32) {
    %c0_i32 = arith.constant 0 : i32
    %c0_i32_0 = arith.constant 0 : i32
    %c0_i32_1 = arith.constant 0 : i32
    return %c0_i32, %c0_i32_0 : i32, i32
  }
  func.func @transform_16(%arg0: i32) -> (i32, i32) {
    %c0_i32 = arith.constant 0 : i32
    %c0_i32_0 = arith.constant 0 : i32
    %c0_i32_1 = arith.constant 0 : i32
    return %c0_i32, %c0_i32_0 : i32, i32
  }
  func.func @transform_17(%arg0: i32) -> (i32, i32) {
    %c0_i32 = arith.constant 0 : i32
    %c0_i32_0 = arith.constant 0 : i32
    %c0_i32_1 = arith.constant 0 : i32
    return %c0_i32, %c0_i32_0 : i32, i32
  }
  func.func @transform_18(%arg0: i32) -> (i32, i32, i32) {
    %c0_i32 = arith.constant 0 : i32
    %c0_i32_0 = arith.constant 0 : i32
    %c0_i32_1 = arith.constant 0 : i32
    %c0_i32_2 = arith.constant 0 : i32
    return %c0_i32, %c0_i32_0, %c0_i32_1 : i32, i32, i32
  }
  func.func @transform_19(%arg0: i32) -> (i32, i32) {
    %c0_i32 = arith.constant 0 : i32
    %c0_i32_0 = arith.constant 0 : i32
    %c0_i32_1 = arith.constant 0 : i32
    return %c0_i32, %c0_i32_0 : i32, i32
  }
  func.func @transform_20(%arg0: i32) -> (i32, i32, i32) {
    %c0_i32 = arith.constant 0 : i32
    %c0_i32_0 = arith.constant 0 : i32
    %c0_i32_1 = arith.constant 0 : i32
    %c0_i32_2 = arith.constant 0 : i32
    return %c0_i32, %c0_i32_0, %c0_i32_1 : i32, i32, i32
  }
  func.func @transform_21(%arg0: i32) -> (i32, i32, i32) {
    %c0_i32 = arith.constant 0 : i32
    %c0_i32_0 = arith.constant 0 : i32
    %c0_i32_1 = arith.constant 0 : i32
    return %arg0, %c0_i32, %c0_i32_0 : i32, i32, i32
  }
}

</mosaic_0001>

<bundles_post_ra>
// kernel: mul.26
= control target key start
LH: loop header
LB: loop body
LE: loop exit
PB: predicated region body
PF: predicated region fallthrough
CT: control target
= control target key end

     0   :  { %vm7_vm0 = vcmask 48128   ;;  %vm13_vm1 = vcmask 97328   ;;  %s39_s0 = inlined_call_operand.vmem [shape: f32[2,6], index: 0, kind: input, shape index: {}]   ;;  %s40_s1 = inlined_call_operand.vmem [shape: f32[12], index: 1, kind: output, shape index: {}]  }
   0x1   :  { %v4_v0 = vld [vmem:[%s39_s0] sm:$0x3]  ;;  %s22_s0 = smov 6  }
   0x2   :  { %5 = vst [vmem:[#allocation1] sm:$0x3] %v4_v0 }
   0x9   :  { %v10_v1 = vld [vmem:[#allocation1 + $0x1] sm:$0x1]   ;;  %v6_v2 = vld [vmem:[#allocation1] sm:$0x1]  }
   0xa   :  { %11 = vrot.lane.b32.xlu0 %v10_v1, %s22_s0  ;;  %8 = vst.msk [vmem:[#allocation0] sm:$0x1] %vm7_vm0, %v6_v2  }
  0x7c   :  { %v12_v3 = vpop.permute.xlu0 %11  }
  0x7d   :  { %14 = vst.msk [vmem:[#allocation0] sm:$0x1] %vm13_vm1, %v12_v3  }
  0x84   :  { %v18_v4 = vld [vmem:[#allocation0] sm:$0x1] }
  0x85   :  { %20 = vst [vmem:[%s40_s1] sm:$0x1] %v18_v4 }

// kernel: unet_xl_forward.1
= control target key start
LH: loop header
LB: loop body
LE: loop exit
PB: predicated region body
PF: predicated region fallthrough
CT: control target
= control target key end

     0   :  { %s11067_s0 = inlined_call_operand.vmem [shape: f32[2,8,256], index: 0, kind: input, shape index: {}]   ;;  %s11068_s1 = inlined_call_operand.vmem [shape: f32[2,32,1], index: 1, kind: input, shape index: {}]   ;;  %s11069_s2 = inlined_call_operand.vmem [shape: f32[2,80,1], index: 2, kind: input, shape index: {}]   ;;  %s11070_s3 = inlined_call_operand.vmem [shape: f32[2,8,32], index: 3, kind: input, shape index: {}]   ;;  %s11071_s4 = inlined_call_operand.vmem [shape: f32[2,32,8], index: 4, kind: input, shape index: {}]   ;;  %s11072_s5 = inlined_call_operand.vmem [shape: f32[9,1,256], index: 5, kind: input, shape index: {}]   ;;  %s11073_s6 = inlined_call_operand.vmem [shape: f32[32,32], index: 6, kind: input, shape index: {}]   ;;  %s11074_s7 = inlined_call_operand.vmem [shape: bf16[32,72], index: 7, kind: input, shape index: {}]   ;;  %s11075_s8 = inlined_call_operand.vmem [shape: bf16[2,32,288], index: 8, kind: input, shape index: {}]   ;;  %s11076_s9 = inlined_call_operand.vmem [shape: bf16[4,288], index: 9, kind: input, shape index: {}]   ;;  %s11077_s10 = inlined_call_operand.vmem [shape: bf16[6,32,32], index: 10, kind: input, shape index: {}]   ;;  %s11078_s11 = inlined_call_operand.vmem [shape: bf16[128,32], index: 11, kind: input, shape index: {}]   ;;  %s11079_s12 = inlined_call_operand.vmem [shape: bf16[32,128], index: 12, kind: input, shape index: {}]   ;;  %s11080_s13 = inlined_call_operand.vmem [shape: f32[20,32,1], index: 13, kind: input, shape index: {}]   ;;  %s11081_s14 = inlined_call_operand.vmem [shape: f32[128,1], index: 14, kind: input, shape index: {}]   ;;  %s11082_s15 = inlined_call_operand.vmem [shape: f32[4,1], index: 15, kind: input, shape index: {}]   ;;  %s11083_s16 = inlined_call_operand.vmem [shape: f32[64,32], index: 16, kind: input, shape index: {}]   ;;  %s11084_s17 = inlined_call_operand.vmem [shape: f32[64,80], index: 17, kind: input, shape index: {}]   ;;  %s11085_s18 = inlined_call_operand.vmem [shape: f32[2,64,64], index: 18, kind: input, shape index: {}]   ;;  %s11086_s19 = inlined_call_operand.vmem [shape: f32[32,64], index: 19, kind: input, shape index: {}]   ;;  %s11087_s20 = inlined_call_operand.vmem [shape: f32[4,64,1], index: 20, kind: input, shape index: {}]   ;;  %s11088_s21 = inlined_call_operand.vmem [shape: f32[2,4,256], index: 21, kind: output, shape index: {}]  }
   0x1   :  { %11158 = sst [smem:[#allocation28_spill]] %s11067_s0 }
   0x2   :  { %11159 = sst [smem:[#allocation29_spill]] %s11068_s1 }
   0x3   :  { %11160 = sst [smem:[#allocation30_spill]] %s11069_s2  ;;  %s8013_s2 = smov 0  }
   0x4   :  { %11161 = sst [smem:[#allocation31_spill]] %s11070_s3 }
   0x5   :  { %11162 = sst [smem:[#allocation32_spill]] %s11071_s4 }
   0x6   :  { %11163 = sst [smem:[#allocation33_spill]] %s11072_s5 }
   0x7   :  { %11164 = sst [smem:[#allocation34_spill]] %s11074_s7 }
   0x8   :  { %11165 = sst [smem:[#allocation35_spill]] %s11075_s8 }
   0x9   :  { %11166 = sst [smem:[#allocation36_spill]] %s11083_s16 }
   0xa   :  { %11167 = sst [smem:[#allocation37_spill]] %s11084_s17 }
   0xb   :  { %11168 = sst [smem:[#allocation38_spill]] %s11085_s18 }
   0xc LB: > { %s6551_s25 = sadd.s32 4294967295, %s7889_s2   ;;  %p6555_p0 = scmp.ge.s32.totalorder %s7889_s2, 1  ;;  %s7889_s2 = sphi %s8013_s2, %s31_s2  }
   0xd   : > { %p626_p1 = scmp.lt.s32.totalorder %s7889_s2, 3 }
   0xf   : > { %p627_p2 = pnand %p6555_p0, %p626_p1 }
  0x11   : > { %630 = sbr.rel (%p627_p2) target bundleno = 8218 (0x201a), region = 104 }
  0x18   : > { %p705_p3 = scmp.lt.s32.totalorder %s6551_s25, 1  ;;  %s11169_s16 = sld [smem:[#allocation36_spill]]  ;;  %vm759_vm0 = vcmask 261120   ;;  %vm1119_vm1 = vcmask 654336   ;;  %vm962_vm2 = vcmask 523264   ;;  %v11108_v40 = vmov 0  }
  0x19   : > { %s11170_s17 = sld [smem:[#allocation37_spill]]  ;;  %s11172_s24 = sld [smem:[#allocation30_spill]]  ;;  %7524 = vset.pattern.permute.xlu0 %v11108_v40  ;;  %7525 = vset.pattern.permute.xlu1 %v11108_v40  ;;  %v1628_v41 = vld [vmem:[%s11080_s13] sm:$0xff]  ;;  %v1629_v42 = vld [vmem:[%s11080_s13 + $0x8] sm:$0xff]  ;;  %v1630_v43 = vld [vmem:[%s11080_s13 + $0x10] sm:$0xff]  ;;  %vm1856_vm11 = vcmask 1043456  }
  0x1a   : > { %s11252_s25 = smov (!%p705_p3, %s6551_s25), 1  ;;  %s11171_s5 = sld [smem:[#allocation29_spill]]  ;;  %v1631_v44 = vld [vmem:[%s11080_s13 + $0x18] sm:$0xff]  ;;  %v752_v45 = vld [vmem:[%s11087_s20 + $0x8] sm:$0xff]  ;;  %v751_v46 = vld [vmem:[%s11087_s20] sm:$0xff]  ;;  %vm1849_vm12 = vcmask 588800  }
  0x1b   : > { %s11090_s29 = sshll.u32 %s11252_s25, 5  ;;  %s7503_s0 = smul.u32 80, %s11252_s25  ;;  %v754_v51 = vld [vmem:[%s11087_s20 + $0x18] sm:$0xff]  ;;  %v753_v53 = vld [vmem:[%s11087_s20 + $0x10] sm:$0xff]  ;;  %v756_v59 = vld [vmem:[%s11087_s20 + $0x28] sm:$0xff]  ;;  %vm7901_vm13 = vmmov 0  }
  0x1c   : > { %s6894_s27 = sshll.u32 %s11252_s25, 4  ;;  %s11173_s4 = sld [smem:[#allocation28_spill]]  ;;  %v755_v61 = vld [vmem:[%s11087_s20 + $0x20] sm:$0xff]  ;;  %vm4535_vm14 = vcmask 64512  }
  0x1d   : > { %s11101_s30 = smov 15   ;;  %s11099_s3 = smov 1  }
  0x1e   : > { %v739_v0 = vld [vmem:[%s11169_s16] sm:$0xff]  ;;  %v740_v20 = vld [vmem:[%s11169_s16 + $0x8] sm:$0xff]  ;;  %v741_v22 = vld [vmem:[%s11169_s16 + $0x10] sm:$0xff]  ;;  %s11174_s18 = sld [smem:[#allocation38_spill]]  ;;  %s11194_s7 = sld [smem:[#allocation34_spill]] }
  0x1f   : > { %7051 = vmatprep.mubr.msk.f32.mxu1 %vm759_vm0, %v739_v0  ;;  %v1092_v1 = vld [vmem:[%s11170_s17] sm:$0xff]  ;;  %s8041_s26 = scalar_lea.vmem %s11172_s24, %s7503_s0  ;;  %s11105_s24 = smov 17   ;;  %v742_v25 = vld [vmem:[%s11169_s16 + $0x18] sm:$0xff]  ;;  %v744_v28 = vld [vmem:[%s11169_s16 + $0x28] sm:$0xff] }
  0x20   : > { %7111 = vmatprep.mubr.msk.f32.mxu0 %vm1119_vm1, %v1092_v1  ;;  %s714_s22 = scalar_lea.vmem %s11171_s5, %s11090_s29  ;;  %v1100_v6 = vld [vmem:[%s8041_s26] sm:$0xff]  ;;  %v1101_v7 = vld [vmem:[%s8041_s26 + $0x8] sm:$0xff]  ;;  %v1102_v11 = vld [vmem:[%s8041_s26 + $0x10] sm:$0xff]  ;;  %s11097_s5 = smov 127  }
  0x21   : > { %v747_v2 = vld [vmem:[%s714_s22] sm:$0xff]  ;;  %v748_v3 = vld [vmem:[%s714_s22 + $0x8] sm:$0xff]  ;;  %v749_v4 = vld [vmem:[%s714_s22 + $0x10] sm:$0xff]  ;;  %v7325_v9 = vpack.c.bf16 %v1101_v7, %v1100_v6  ;;  %s11204_s29 = smov 1   ;;  %s11205_s1 = smov 127  }
  0x22   : > { %v7301_v5 = vpack.c.bf16 %v748_v3, %v747_v2  ;;  %v750_v8 = vld [vmem:[%s714_s22 + $0x18] sm:$0xff]  ;;  %s709_s0 = scalar_lea.vmem %s11173_s4, %s6894_s27  ;;  %v1104_v14 = vld [vmem:[%s8041_s26 + $0x20] sm:$0xff]  ;;  %v1105_v15 = vld [vmem:[%s8041_s26 + $0x28] sm:$0xff]  ;;  %s11103_s22 = smov 16  }
  0x23   : > { %v7305_v10 = vpack.c.bf16 %v750_v8, %v749_v4  ;;  %v1103_v12 = vld [vmem:[%s8041_s26 + $0x18] sm:$0xff]  ;;  %7326 = vmatprep.subr.bf16.mxu0 %v7325_v9  ;;  %v8053_v16 = vld [vmem:[%s709_s0] sm:$0xff]  ;;  %v1106_v17 = vld [vmem:[%s8041_s26 + $0x30] sm:$0xff]  ;;  %v7333_v21 = vpack.c.bf16 %v1105_v15, %v1104_v14  ;;  %s11095_s4 = smov 113   ;;  %s11093_s27 = smov 112  }
  0x24   : > { %7302 = vmatprep.subr.bf16.mxu1 %v7301_v5  ;;  %v7329_v13 = vpack.c.bf16 %v1103_v12, %v1102_v11  ;;  %7328 = vmatpush3.bf16.msra.mxu0 %v7325_v9  ;;  %v1107_v18 = vld [vmem:[%s8041_s26 + $0x38] sm:$0xff]  ;;  %v8057_v19 = vld [vmem:[%s709_s0 + $0x8] sm:$0xff]  ;;  %v1108_v23 = vld [vmem:[%s8041_s26 + $0x40] sm:$0xff]  ;;  %s11207_s28 = smov 112   ;;  %s11208_s8 = sld [smem:[#allocation35_spill]] }
  0x25   : > { %7304 = vmatpush3.bf16.msra.mxu1 %v7301_v5  ;;  %1655 = vrot.lane.b32.xlu1 %v8053_v16, %s11103_s22  ;;  %v1109_v24 = vld [vmem:[%s8041_s26 + $0x48] sm:$0xff]  ;;  %v7337_v26 = vpack.c.bf16 %v1107_v18, %v1106_v17  ;;  %v743_v27 = vld [vmem:[%s11169_s16 + $0x20] sm:$0xff]  ;;  %v745_v30 = vld [vmem:[%s11169_s16 + $0x30] sm:$0xff]  ;;  %s11091_s26 = smov 111  }
  0x26   : > { %7306 = vmatprep.subr.bf16.mxu1 %v7305_v10  ;;  %7330 = vmatprep.subr.bf16.mxu0 %v7329_v13  ;;  %v7341_v29 = vpack.c.bf16 %v1109_v24, %v1108_v23  ;;  %v746_v31 = vld [vmem:[%s11169_s16 + $0x38] sm:$0xff]  ;;  %v1093_v32 = vld [vmem:[%s11170_s17 + $0x8] sm:$0xff]  ;;  %v1094_v33 = vld [vmem:[%s11170_s17 + $0x10] sm:$0xff]  ;;  %s11157_s16 = sshll.u32 %s11252_s25, 3 }
  0x27   : > { %1632 = vrot.lane.b32.xlu0 %v8053_v16, %s11105_s24  ;;  %v1095_v34 = vld [vmem:[%s11170_s17 + $0x18] sm:$0xff]  ;;  %v1096_v35 = vld [vmem:[%s11170_s17 + $0x20] sm:$0xff]  ;;  %v1097_v36 = vld [vmem:[%s11170_s17 + $0x28] sm:$0xff] }
  0x28   : > { %7332 = vmatpush3.bf16.msra.mxu0 %v7329_v13  ;;  %v1098_v37 = vld [vmem:[%s11170_s17 + $0x30] sm:$0xff]  ;;  %v1099_v38 = vld [vmem:[%s11170_s17 + $0x38] sm:$0xff]  ;;  %v945_v39 = vld [vmem:[%s11174_s18] sm:$0xff] }
  0x29   : > { %7308 = vmatpush3.bf16.msra.mxu1 %v7305_v10  ;;  %7334 = vmatprep.subr.bf16.mxu0 %v7333_v21  ;;  %v758_v3 = vld [vmem:[%s11087_s20 + $0x38] sm:$0xff]  ;;  %v757_v5 = vld [vmem:[%s11087_s20 + $0x30] sm:$0xff]  ;;  %v6599_v6 = vld [vmem:[%s11087_s20 + $0x88] sm:$0xff] }
  0x2a   : > { %1657 = vrot.lane.b32.xlu1 %v8057_v19, %s11103_s22  ;;  %v6598_v12 = vld [vmem:[%s11087_s20 + $0x80] sm:$0xff] }
  0x2b   : > { %1634 = vrot.lane.b32.xlu0 %v8057_v19, %s11105_s24 }
  0x2c   : > { %7052 = vmatmul.mubr.msk.f32.vlgmr.msra.gmra.mrb[0].mxu1 %vm759_vm0, %v740_v20  ;;  %7336 = vmatpush3.bf16.msra.mxu0 %v7333_v21  ;;  %v6601_v20 = vld [vmem:[%s11087_s20 + $0x98] sm:$0xff] }
  0x2d   : > { %7054 = vmatprep.mubr.msk.f32.mxu1 %vm759_vm0, %v741_v22  ;;  %7338 = vmatprep.subr.bf16.mxu0 %v7337_v26 }
  0x2e   : > { %1679 = vrot.lane.b32.xlu1 %v8057_v19, %s11101_s30 }
  0x2f   : > { %1677 = vrot.lane.b32.xlu0 %v8053_v16, %s11101_s30  ;;  %s11203_s30 = smov 15  }
  0x30   : > { %7055 = vmatmul.mubr.msk.f32.gmra.mrb[2].mxu1 %vm759_vm0, %v742_v25  ;;  %7340 = vmatpush3.bf16.msra.mxu0 %v7337_v26 }
  0x31   : > { %7057 = vmatprep.mubr.msk.f32.mxu1 %vm759_vm0, %v743_v27  ;;  %7342 = vmatprep.subr.bf16.mxu0 %v7341_v29 }
  0x32   : > { %1701 = vrot.lane.b32.xlu1 %v8057_v19, %s11099_s3 }
  0x33   : > { %1699 = vrot.lane.b32.xlu0 %v8053_v16, %s11099_s3  ;;  %s11177_s3 = sld [smem:[#allocation33_spill]] }
  0x34   : > { %7058 = vmatmul.mubr.msk.f32.gmra.mrb[4].mxu1 %vm759_vm0, %v744_v28  ;;  %7344 = vmatpush3.bf16.msra.mxu0 %v7341_v29  ;;  %v6600_v28 = vld [vmem:[%s11087_s20 + $0x90] sm:$0xff] }
  0x35   : > { %7060 = vmatprep.mubr.msk.f32.mxu1 %vm759_vm0, %v745_v30 }
  0x36   : > { %1723 = vrot.lane.b32.xlu1 %v8057_v19, %s11097_s5 }
  0x37   : > { %1721 = vrot.lane.b32.xlu0 %v8053_v16, %s11097_s5  ;;  %7112 = vmatmul.mubr.msk.f32.vlgmr.msra.gmra.mrb[0].mxu0 %vm1119_vm1, %v1093_v32  ;;  %v6603_v32 = vld [vmem:[%s11087_s20 + $0xa8] sm:$0xff]  ;;  %s11209_s5 = smov 111  }
  0x38   : > { %7061 = vmatmul.mubr.msk.f32.gmra.mrb[6].mxu1 %vm759_vm0, %v746_v31  ;;  %7114 = vmatprep.mubr.msk.f32.mxu0 %vm1119_vm1, %v1094_v33 }
  0x39   : > { %7079 = vmatprep.mubr.msk.f32.mxu1 %vm962_vm2, %v945_v39 }
  0x3a   : > { %1745 = vrot.lane.b32.xlu1 %v8057_v19, %s11095_s4 }
  0x3b   : > { %1743 = vrot.lane.b32.xlu0 %v8053_v16, %s11095_s4  ;;  %7115 = vmatmul.mubr.msk.f32.gmra.mrb[2].mxu0 %vm1119_vm1, %v1095_v34  ;;  %s11211_s4 = smov 17  }
  0x3c   : > { %7117 = vmatprep.mubr.msk.f32.mxu0 %vm1119_vm1, %v1096_v35 }
  0x3e   : > { %1767 = vrot.lane.b32.xlu1 %v8057_v19, %s11093_s27 }
  0x3f   : > { %1765 = vrot.lane.b32.xlu0 %v8053_v16, %s11093_s27  ;;  %7118 = vmatmul.mubr.msk.f32.gmra.mrb[4].mxu0 %vm1119_vm1, %v1097_v36  ;;  %s11212_s27 = smov 16  }
  0x40   : > { %7120 = vmatprep.mubr.msk.f32.mxu0 %vm1119_vm1, %v1098_v37  ;;  %v6602_v37 = vld [vmem:[%s11087_s20 + $0xa0] sm:$0xff] }
  0x42   : > { %1789 = vrot.lane.b32.xlu1 %v8057_v19, %s11091_s26 }
  0x43   : > { %1787 = vrot.lane.b32.xlu0 %v8053_v16, %s11091_s26  ;;  %7121 = vmatmul.mubr.msk.f32.gmra.mrb[6].mxu0 %vm1119_vm1, %v1099_v38  ;;  %s11206_s26 = smov 113  }
  0x46   : > { %1826 = vperm.xlu1 %7525, %v1629_v42  }
  0x47   : > { %1821 = vperm.xlu0 %7524, %v1628_v41  }
  0x4a   : > { %1831 = vperm.xlu1 %7525, %v1630_v43  }
  0x4b   : > { %1836 = vperm.xlu0 %7524, %v1631_v44  }
  0xff   : > { %v7053_v47 = vpop.f32.mrb[0].mxu1 }
 0x100   : > { %v8173_v48 = vadd.f32 %v7053_v47, %v752_v45  ;;  %v850_v49 = vpop.f32.mrb[1].mxu1 }
 0x101   : > { %v8175_v50 = vadd.f32 %v850_v49, %v751_v46  ;;  %v6605_v46 = vld [vmem:[%s11087_s20 + $0xb8] sm:$0xff] }
 0x102   : > { %v6575_v52 = vmul.f32 -1.442695, %v8173_v48 }
 0x103   : > { %v6574_v54 = vmul.f32 -1.442695, %v8175_v50  ;;  %v7056_v55 = vpop.f32.mrb[2].mxu1 }
 0x104   : > { %7567 = vpow2.f32 %v6575_v52  ;;  %v8185_v56 = vadd.f32 %v7056_v55, %v754_v51  ;;  %v860_v57 = vpop.f32.mrb[3].mxu1  ;;  %v6604_v52 = vld [vmem:[%s11087_s20 + $0xb0] sm:$0xff] }
 0x105   : > { %7569 = vpow2.f32 %v6574_v54  ;;  %v8187_v58 = vadd.f32 %v860_v57, %v753_v53 }
 0x106   : > { %v6577_v60 = vmul.f32 -1.442695, %v8185_v56 }
 0x107   : > { %v6576_v62 = vmul.f32 -1.442695, %v8187_v58  ;;  %v7059_v63 = vpop.f32.mrb[4].mxu1 }
 0x108   : > { %7571 = vpow2.f32 %v6577_v60  ;;  %v8197_v0 = vadd.f32 %v7059_v63, %v756_v59  ;;  %v870_v1 = vpop.f32.mrb[5].mxu1 }
 0x109   : > { %7573 = vpow2.f32 %v6576_v62  ;;  %v8199_v2 = vadd.f32 %v870_v1, %v755_v61 }
 0x10a   : > { %v6579_v4 = vmul.f32 -1.442695, %v8197_v0  ;;  %v7113_v11 = vpop.f32.mrb[0].mxu0 }
 0x10b   : > { %v6578_v7 = vmul.f32 -1.442695, %v8199_v2  ;;  %v7062_v8 = vpop.f32.mrb[6].mxu1  ;;  %v8219_v14 = vadd.f32 %v7113_v11, %v6599_v6  ;;  %v1210_v15 = vpop.f32.mrb[1].mxu0 }
 0x10c   : > { %7575 = vpow2.f32 %v6579_v4  ;;  %v8212_v9 = vadd.f32 %v7062_v8, %v758_v3  ;;  %v880_v10 = vpop.f32.mrb[7].mxu1  ;;  %v8226_v24 = vadd.f32 %v6598_v12, %v1210_v15  ;;  %v8262_v4 = vpop.permute.xlu1 %1655 }
 0x10d   : > { %7577 = vpow2.f32 %v6578_v7  ;;  %v8217_v13 = vadd.f32 %v880_v10, %v757_v5  ;;  %v6615_v26 = vmul.f32 -1.442695, %v8219_v14  ;;  %v8264_v5 = vpop.permute.xlu0 %1632 }
 0x10e   : > { %v7568_v17 = vpop.eup %7567  ;;  %v6581_v18 = vmul.f32 -1.442695, %v8212_v9  ;;  %v7116_v27 = vpop.f32.mrb[2].mxu0  ;;  %v6614_v35 = vmul.f32 -1.442695, %v8226_v24 }
 0x10f   : > { %v7570_v21 = vpop.eup %7569  ;;  %v914_v22 = vadd.f32 1.0, %v7568_v17  ;;  %v6580_v23 = vmul.f32 -1.442695, %v8217_v13  ;;  %v8232_v29 = vadd.f32 %v7116_v27, %v6601_v20  ;;  %v1220_v30 = vpop.f32.mrb[3].mxu0 }
 0x110   : > { %v913_v25 = vadd.f32 1.0, %v7570_v21  ;;  %7579 = vpow2.f32 %v6581_v18  ;;  %v8238_v36 = vadd.f32 %v6600_v28, %v1220_v30 }
 0x111   : > { %7581 = vrcp.f32 %v914_v22  ;;  %v6617_v39 = vmul.f32 -1.442695, %v8232_v29 }
 0x112   : > { %v7572_v31 = vpop.eup %7571  ;;  %7583 = vrcp.f32 %v913_v25  ;;  %v7119_v41 = vpop.f32.mrb[4].mxu0  ;;  %v6616_v51 = vmul.f32 -1.442695, %v8238_v36 }
 0x113   : > { %v7574_v33 = vpop.eup %7573  ;;  %v916_v34 = vadd.f32 1.0, %v7572_v31  ;;  %7585 = vpow2.f32 %v6580_v23  ;;  %v8244_v42 = vadd.f32 %v7119_v41, %v6603_v32  ;;  %v1230_v43 = vpop.f32.mrb[5].mxu0 }
 0x114   : > { %v915_v38 = vadd.f32 1.0, %v7574_v33  ;;  %7587 = vpow2.f32 %v6615_v26  ;;  %v8246_v45 = vadd.f32 %v6602_v37, %v1230_v43  ;;  %v8273_v25 = vpop.permute.xlu0 %1634 }
 0x115   : > { %7589 = vrcp.f32 %v916_v34  ;;  %v6619_v54 = vmul.f32 -1.442695, %v8244_v42 }
 0x116   : > { %v7576_v44 = vpop.eup %7575  ;;  %7591 = vrcp.f32 %v915_v38  ;;  %v7122_v55 = vpop.f32.mrb[6].mxu0  ;;  %v6618_v61 = vmul.f32 -1.442695, %v8246_v45 }
 0x117   : > { %v7578_v47 = vpop.eup %7577  ;;  %v918_v49 = vadd.f32 1.0, %v7576_v44  ;;  %7593 = vpow2.f32 %v6614_v35  ;;  %v8256_v57 = vadd.f32 %v7122_v55, %v6605_v46  ;;  %v1240_v59 = vpop.f32.mrb[7].mxu0 }
 0x118   : > { %v917_v53 = vadd.f32 1.0, %v7578_v47  ;;  %7595 = vpow2.f32 %v6617_v39  ;;  %v8259_v62 = vadd.f32 %v6604_v52, %v1240_v59  ;;  %v8279_v43 = vpop.permute.xlu0 %1677 }
 0x119   : > { %7597 = vrcp.f32 %v918_v49  ;;  %v6621_v3 = vmul.f32 -1.442695, %v8256_v57 }
 0x11a   : > { %v7580_v60 = vpop.eup %7579  ;;  %7599 = vrcp.f32 %v917_v53  ;;  %v6620_v15 = vmul.f32 -1.442695, %v8259_v62 }
 0x11b   : > { %v7582_v63 = vpop.eup %7581  ;;  %v920_v1 = vadd.f32 1.0, %v7580_v60  ;;  %7601 = vpow2.f32 %v6616_v51  ;;  %v1636_v51 = vlaneseq }
 0x11c   : > { %v7584_v6 = vpop.eup %7583  ;;  %v938_v7 = vmul.f32 %v7582_v63, %v8173_v48  ;;  %7603 = vpow2.f32 %v6619_v54 }
 0x11d   : > { %v7586_v8 = vpop.eup %7585  ;;  %v937_v10 = vmul.f32 %v7584_v6, %v8175_v50  ;;  %7605 = vrcp.f32 %v920_v1  ;;  %v8271_v50 = vpop.permute.xlu1 %1657  ;;  %v8288_v1 = vshrl.u32 %v1636_v51, 7 }
 0x11e   : > { %v7588_v11 = vpop.eup %7587  ;;  %v919_v12 = vadd.f32 1.0, %v7586_v8  ;;  %7607 = vpow2.f32 %v6618_v61 }
 0x11f   : > { %v7590_v17 = vpop.eup %7589  ;;  %v1274_v18 = vadd.f32 1.0, %v7588_v11  ;;  %7609 = vpow2.f32 %v6621_v3  ;;  %v7309_v20 = vpack.c.bf16 %v938_v7, %v937_v10  ;;  %11175 = vst [vmem:[#allocation2_spill] sm:$0xff] %v8288_v1  ;;  %v947_v10 = vld [vmem:[%s11174_s18 + $0x10] sm:$0xff] }
 0x120   : > { %v7592_v21 = vpop.eup %7591  ;;  %v940_v22 = vmul.f32 %v7590_v17, %v8185_v56  ;;  %7611 = vrcp.f32 %v919_v12  ;;  %v8301_v12 = vsub.s32 1, %v8288_v1  ;;  %v6662_v17 = vld [vmem:[%s11177_s3 + $0x2] sm:$0x3] }
 0x121   : > { %v7594_v23 = vpop.eup %7593  ;;  %v939_v48 = vmul.f32 %v7592_v21, %v8187_v58  ;;  %7613 = vrcp.f32 %v1274_v18  ;;  %7310 = vmatprep.subr.bf16.mxu1 %v7309_v20  ;;  %v8277_v41 = vpop.permute.xlu1 %1679 }
 0x122   : > { %v7596_v26 = vpop.eup %7595  ;;  %v1273_v27 = vadd.f32 1.0, %v7594_v23  ;;  %7615 = vpow2.f32 %v6620_v15  ;;  %7312 = vmatpush3.bf16.msra.mxu1 %v7309_v20  ;;  %v8323_v23 = vsub.s32 0, %v8288_v1 }
 0x123   : > { %v7598_v28 = vpop.eup %7597  ;;  %v1276_v30 = vadd.f32 1.0, %v7596_v26  ;;  %v7313_v31 = vpack.c.bf16 %v940_v22, %v939_v48 }
 0x124   : > { %v7600_v32 = vpop.eup %7599  ;;  %v942_v56 = vmul.f32 %v7598_v28, %v8197_v0  ;;  %7617 = vrcp.f32 %v1273_v27  ;;  %v8330_v28 = vrot.slane %v6662_v17, %v8301_v12 }
 0x125   : > { %v7602_v33 = vpop.eup %7601  ;;  %v941_v58 = vmul.f32 %v7600_v32, %v8199_v2  ;;  %7619 = vrcp.f32 %v1276_v30  ;;  %7314 = vmatprep.subr.bf16.mxu1 %v7313_v31  ;;  %v8284_v61 = vpop.permute.xlu1 %1701 }
 0x126   : > { %v7604_v34 = vpop.eup %7603  ;;  %v1275_v35 = vadd.f32 1.0, %v7602_v33  ;;  %7316 = vmatpush3.bf16.msra.mxu1 %v7313_v31  ;;  %11178 = vst [vmem:[#allocation4_spill] sm:$0xff] %v8330_v28 }
 0x127   : > { %v7606_v37 = vpop.eup %7605  ;;  %v1278_v38 = vadd.f32 1.0, %v7604_v34  ;;  %v7317_v39 = vpack.c.bf16 %v942_v56, %v941_v58  ;;  %v6663_v56 = vld [vmem:[%s11177_s3 + $0x4] sm:$0x3]  ;;  %v6664_v58 = vld [vmem:[%s11177_s3 + $0x6] sm:$0x3]  ;;  %v950_v34 = vld [vmem:[%s11174_s18 + $0x28] sm:$0xff] }
 0x128   : > { %v7608_v44 = vpop.eup %7607  ;;  %7621 = vrcp.f32 %v1275_v35  ;;  %v944_v0 = vmul.f32 %v7606_v37, %v8212_v9  ;;  %v8286_v9 = vpop.permute.xlu0 %1699 }
 0x129   : > { %v7610_v46 = vpop.eup %7609  ;;  %7623 = vrcp.f32 %v1278_v38  ;;  %v1277_v47 = vadd.f32 1.0, %v7608_v44  ;;  %7318 = vmatprep.subr.bf16.mxu1 %v7317_v39  ;;  %v8311_v18 = vpop.permute.xlu1 %1723 }
 0x12a   : > { %v7612_v2 = vpop.eup %7611  ;;  %v1280_v49 = vadd.f32 1.0, %v7610_v46  ;;  %7320 = vmatpush3.bf16.msra.mxu1 %v7317_v39  ;;  %v951_v39 = vld [vmem:[%s11174_s18 + $0x30] sm:$0xff] }
 0x12b   : > { %v7614_v52 = vpop.eup %7613  ;;  %v943_v53 = vmul.f32 %v7612_v2, %v8217_v13  ;;  %7625 = vrcp.f32 %v1277_v47  ;;  %v8291_v13 = vand.u32 127, %v1636_v51  ;;  %v8382_v2 = vrot.slane %v6663_v56, %v8323_v23 }
 0x12c   : > { %v7616_v54 = vpop.eup %7615  ;;  %7627 = vrcp.f32 %v1280_v49  ;;  %v1298_v55 = vmul.f32 %v7614_v52, %v8219_v14  ;;  %v946_v14 = vld [vmem:[%s11174_s18 + $0x8] sm:$0xff]  ;;  %v8313_v20 = vpop.permute.xlu0 %1721  ;;  %v8385_v49 = vrot.slane %v6663_v56, %v8301_v12  ;;  %v8392_v51 = vrot.slane %v6664_v58, %v8301_v12  ;;  %v6625_v56 = vld [vmem:[%s11174_s18 + $0x58] sm:$0xff] }
 0x12d   : > { %v1279_v59 = vadd.f32 1.0, %v7616_v54  ;;  %v7321_v60 = vpack.c.bf16 %v944_v0, %v943_v53  ;;  %11176 = vst [vmem:[#allocation3_spill] sm:$0xff] %v8291_v13  ;;  %vm1638_vm3 = vcmp.lt.s32.totalorder %v8291_v13, 17  ;;  %vm1659_vm4 = vcmp.lt.s32.totalorder %v8291_v13, 16  ;;  %v8370_v44 = vpop.permute.xlu1 %1745  ;;  %11182 = vst [vmem:[#allocation8_spill] sm:$0xff] %v8382_v2  ;;  %v952_v54 = vld [vmem:[%s11174_s18 + $0x38] sm:$0xff] }
 0x12e   : > { %v7618_v63 = vpop.eup %7617  ;;  %v1660_v31 = vsel %vm1659_vm4, %v8262_v4, %v8271_v50  ;;  %v1639_v32 = vsel %vm1638_vm3, %v8264_v5, %v8273_v25  ;;  %vm1681_vm5 = vcmp.lt.s32.totalorder %v8291_v13, 15  ;;  %vm1703_vm6 = vcmp.lt.s32.totalorder %v8291_v13, 1  ;;  %11183 = vst [vmem:[#allocation9_spill] sm:$0xff] %v8385_v49  ;;  %11184 = vst [vmem:[#allocation10_spill] sm:$0xff] %v8392_v51  ;;  %v6665_v53 = vld [vmem:[%s11177_s3 + $0xa] sm:$0x3] }
 0x12f   : > { %v7620_v3 = vpop.eup %7619  ;;  %v1297_v6 = vmul.f32 %v7618_v63, %v8226_v24  ;;  %7629 = vrcp.f32 %v1279_v59  ;;  %7322 = vmatprep.subr.bf16.mxu1 %v7321_v60  ;;  %v1661_v37 = vsel %vm1659_vm4, %v8271_v50, %v8262_v4  ;;  %v1676_v47 = vmul.f32 %v8330_v28, %v1660_v31 }
 0x130   : > { %7324 = vmatpush3.bf16.msra.mxu1 %v7321_v60  ;;  %v1300_v7 = vmul.f32 %v7620_v3, %v8232_v29  ;;  %v1641_v29 = vld [vmem:[%s11177_s3] sm:$0x3]  ;;  %v8372_v46 = vpop.permute.xlu0 %1743  ;;  %v1640_v4 = vsel %vm1638_vm3, %v8273_v25, %v8264_v5  ;;  %v8396_v5 = vrot.slane %v6664_v58, %v8323_v23  ;;  %v1704_v25 = vsel %vm1703_vm6, %v8286_v9, %v8284_v61 }
 0x131   : > { %v7345_v8 = vpack.c.bf16 %v1298_v55, %v1297_v6  ;;  %v8333_v30 = vrot.slane %v1641_v29, %v8301_v12  ;;  %v8365_v38 = vrot.slane %v1641_v29, %v8323_v23  ;;  %vm1725_vm7 = vcmp.lt.s32.totalorder %v8291_v13, 127  ;;  %v6622_v60 = vld [vmem:[%s11174_s18 + $0x40] sm:$0xff]  ;;  %v6624_v29 = vld [vmem:[%s11174_s18 + $0x50] sm:$0xff] }
 0x132   : > { %v7622_v11 = vpop.eup %7621  ;;  %11185 = vst [vmem:[#allocation11_spill] sm:$0xff] %v8396_v5  ;;  %v1683_v55 = vsel %vm1681_vm5, %v8277_v41, %v8279_v43  ;;  %v1705_v59 = vsel %vm1703_vm6, %v8284_v61, %v8286_v9  ;;  %v1768_v61 = vpop.permute.xlu1 %1767  ;;  %vm1747_vm8 = vcmp.lt.s32.totalorder %v8291_v13, 113  ;;  %vm1769_vm9 = vcmp.lt.s32.totalorder %v8291_v13, 112 }
 0x133   : > { %v7624_v24 = vpop.eup %7623  ;;  %v1299_v15 = vmul.f32 %v7622_v11, %v8238_v36  ;;  %7346 = vmatprep.subr.bf16.mxu1 %v7345_v8  ;;  %7080 = vmatmul.mubr.msk.f32.vlgmr.msra.gmra.mrb[8].mxu1 %vm962_vm2, %v946_v14  ;;  %v948_v36 = vld [vmem:[%s11174_s18 + $0x18] sm:$0xff]  ;;  %11179 = vst [vmem:[#allocation5_spill] sm:$0xff] %v8333_v30  ;;  %11181 = vst [vmem:[#allocation7_spill] sm:$0xff] %v8365_v38  ;;  %v1654_v50 = vmul.f32 %v8333_v30, %v1639_v32  ;;  %v6666_v11 = vld [vmem:[%s11177_s3 + $0xc] sm:$0x3]  ;;  %vm1791_vm10 = vcmp.lt.s32.totalorder %v8291_v13, 111 }
 0x134   : > { %v1302_v21 = vmul.f32 %v7624_v24, %v8244_v42  ;;  %7348 = vmatpush3.bf16.msra.mxu1 %v7345_v8  ;;  %7082 = vmatprep.mubr.msk.f32.mxu1 %vm962_vm2, %v947_v10  ;;  %v949_v42 = vld [vmem:[%s11174_s18 + $0x20] sm:$0xff]  ;;  %v1653_v3 = vmul.f32 %v8365_v38, %v1640_v4  ;;  %v1720_v14 = vmul.f32 %v8392_v51, %v1704_v25  ;;  %v1766_v9 = vpop.permute.xlu0 %1765  ;;  %v6623_v24 = vld [vmem:[%s11174_s18 + $0x48] sm:$0xff] }
 0x135   : > { %v7626_v22 = vpop.eup %7625  ;;  %v7349_v48 = vpack.c.bf16 %v1300_v7, %v1299_v15  ;;  %v1697_v7 = vmul.f32 %v8382_v2, %v1683_v55  ;;  %v1719_v8 = vmul.f32 %v8396_v5, %v1705_v59  ;;  %v1727_v10 = vsel %vm1725_vm7, %v8311_v18, %v8313_v20  ;;  %v6667_v15 = vld [vmem:[%s11177_s3 + $0xe] sm:$0x3]  ;;  %v6629_v59 = vld [vmem:[%s11174_s18 + $0x78] sm:$0xff] }
 0x136   : > { %v7628_v26 = vpop.eup %7627  ;;  %v1301_v27 = vmul.f32 %v7626_v22, %v8246_v45  ;;  %v6668_v22 = vld [vmem:[%s11177_s3 + $0x10] sm:$0x3]  ;;  %v1790_v31 = vpop.permute.xlu1 %1789  ;;  %v8481_v58 = vrot.slane %v6666_v11, %v8323_v23 }
 0x137   : > { %7350 = vmatprep.subr.bf16.mxu1 %v7349_v48  ;;  %7083 = vmatmul.mubr.msk.f32.gmra.mrb[10].mxu1 %vm962_vm2, %v948_v36  ;;  %v1304_v45 = vmul.f32 %v7628_v26, %v8256_v57  ;;  %v8357_v57 = vrot.slane %v6662_v17, %v8323_v23  ;;  %v8448_v17 = vrot.slane %v6665_v53, %v8323_v23 }
 0x138   : > { %7352 = vmatpush3.bf16.msra.mxu1 %v7349_v48  ;;  %v7353_v33 = vpack.c.bf16 %v1302_v21, %v1301_v27  ;;  %7085 = vmatprep.mubr.msk.f32.mxu1 %vm962_vm2, %v949_v42  ;;  %v1726_v36 = vsel %vm1725_vm7, %v8313_v20, %v8311_v18  ;;  %v8463_v42 = vrot.slane %v6666_v11, %v8301_v12  ;;  %v1788_v32 = vpop.permute.xlu0 %1787 }
 0x139   : > { %v7630_v35 = vpop.eup %7629  ;;  %11180 = vst [vmem:[#allocation6_spill] sm:$0xff] %v8357_v57  ;;  %v1675_v63 = vmul.f32 %v8357_v57, %v1661_v37  ;;  %11187 = vst [vmem:[#allocation13_spill] sm:$0xff] %v8448_v17  ;;  %v8467_v27 = vrot.slane %v6667_v15, %v8301_v12  ;;  %v1749_v18 = vsel %vm1747_vm8, %v8370_v44, %v8372_v46 }
 0x13a   : > { %v1303_v0 = vmul.f32 %v7630_v35, %v8259_v62  ;;  %7354 = vmatprep.subr.bf16.mxu1 %v7353_v33  ;;  %v1682_v62 = vsel %vm1681_vm5, %v8279_v43, %v8277_v41  ;;  %v8426_v41 = vrot.slane %v6665_v53, %v8301_v12  ;;  %v1810_v43 = vpack.c.bf16 %v1676_v47, %v1654_v50 }
 0x13b   : > { %7086 = vmatmul.mubr.msk.f32.gmra.mrb[12].mxu1 %vm962_vm2, %v950_v34  ;;  %v1698_v6 = vmul.f32 %v8385_v49, %v1682_v62  ;;  %v1809_v21 = vpack.c.bf16 %v1675_v63, %v1653_v3  ;;  %11188 = vst [vmem:[#allocation14_spill] sm:$0xff] %v8463_v42  ;;  %11189 = vst [vmem:[#allocation15_spill] sm:$0xff] %v8467_v27  ;;  %v1771_v20 = vsel %vm1769_vm9, %v1768_v61, %v1766_v9  ;;  %v6626_v34 = vld [vmem:[%s11174_s18 + $0x60] sm:$0xff] }
 0x13c   : > { %7356 = vmatpush3.bf16.msra.mxu1 %v7353_v33  ;;  %v7357_v52 = vpack.c.bf16 %v1304_v45, %v1303_v0  ;;  %7088 = vmatprep.mubr.msk.f32.mxu1 %vm962_vm2, %v951_v39  ;;  %11186 = vst [vmem:[#allocation12_spill] sm:$0xff] %v8426_v41  ;;  %v1742_v48 = vmul.f32 %v8426_v41, %v1727_v10  ;;  %11190 = vst [vmem:[#allocation16_spill] sm:$0xff] %v8481_v58  ;;  %v6582_v10 = vld [vmem:[%s11087_s20 + $0x40] sm:$0xff] }
 0x13d   : > { %v1812_v26 = vpack.c.bf16 %v1720_v14, %v1698_v6  ;;  %v1811_v45 = vpack.c.bf16 %v1719_v8, %v1697_v7  ;;  %v1741_v33 = vmul.f32 %v8448_v17, %v1726_v36  ;;  %v8487_v35 = vrot.slane %v6668_v22, %v8323_v23  ;;  %v7526_v6 = vld [vmem:[%s11194_s7] sm:$0xff]   ;;  %v7527_v14 = vld [vmem:[%s11194_s7 + $0x8] sm:$0xff]   ;;  %v6585_v7 = vld [vmem:[%s11087_s20 + $0x58] sm:$0xff] }
 0x13e   : > { %7358 = vmatprep.subr.bf16.mxu1 %v7357_v52  ;;  %v8490_v37 = vrot.slane %v6668_v22, %v8301_v12  ;;  %v1748_v39 = vsel %vm1747_vm8, %v8372_v46, %v8370_v44  ;;  %v8497_v0 = vrot.slane %v6667_v15, %v8323_v23  ;;  %v1792_v47 = vsel %vm1791_vm10, %v1788_v32, %v1790_v31  ;;  %v6627_v23 = vld [vmem:[%s11174_s18 + $0x68] sm:$0xff]  ;;  %v6633_v8 = vld [vmem:[%s11087_s20 + $0xd8] sm:$0xff] }
 0x13f   : > { %7089 = vmatmul.mubr.msk.f32.gmra.mrb[14].mxu1 %vm962_vm2, %v952_v54  ;;  %11191 = vst [vmem:[#allocation17_spill] sm:$0xff] %v8487_v35  ;;  %v1793_v4 = vsel %vm1791_vm10, %v1790_v31, %v1788_v32  ;;  %v1764_v50 = vmul.f32 %v8463_v42, %v1749_v18  ;;  %v1770_v12 = vsel %vm1769_vm9, %v1766_v9, %v1768_v61  ;;  %v6631_v61 = vld [vmem:[%s11087_s20 + $0xc8] sm:$0xff]  ;;  %v6584_v31 = vld [vmem:[%s11087_s20 + $0x50] sm:$0xff] }
 0x140   : > { %7360 = vmatpush3.bf16.msra.mxu1 %v7357_v52  ;;  %7139 = vmatprep.mubr.msk.f32.mxu1 %vm962_vm2, %v6622_v60  ;;  %11192 = vst [vmem:[#allocation18_spill] sm:$0xff] %v8490_v37  ;;  %11193 = vst [vmem:[#allocation19_spill] sm:$0xff] %v8497_v0  ;;  %v1786_v62 = vmul.f32 %v8467_v27, %v1771_v20  ;;  %v1814_v44 = vpack.c.bf16 %v1742_v48, %v8057_v19  ;;  %v6628_v52 = vld [vmem:[%s11174_s18 + $0x70] sm:$0xff]  ;;  %v6587_v22 = vld [vmem:[%s11087_s20 + $0x68] sm:$0xff]  ;;  %s11225_s18 = sld [smem:[#allocation31_spill]] }
 0x141   : > { %1863 = vmatprep.subr.bf16.mxu1 %v1810_v43  ;;  %v1807_v46 = vmul.f32 %v8487_v35, %v1792_v47  ;;  %v1808_v25 = vmul.f32 %v8490_v37, %v1793_v4  ;;  %v1813_v53 = vpack.c.bf16 %v1741_v33, %v8053_v16  ;;  %v1763_v19 = vmul.f32 %v8481_v58, %v1748_v39  ;;  %v6583_v43 = vld [vmem:[%s11087_s20 + $0x48] sm:$0xff]  ;;  %v6589_v47 = vld [vmem:[%s11087_s20 + $0x78] sm:$0xff] }
 0x142   : > { %v1785_v54 = vmul.f32 %v8497_v0, %v1770_v12  ;;  %v1816_v55 = vpack.c.bf16 %v1786_v62, %v1764_v50  ;;  %v7441_v9 = vadd.f32 %v6631_v61, %v6583_v43  ;;  %v6635_v48 = vld [vmem:[%s11087_s20 + $0xe8] sm:$0xff]  ;;  %v6637_v4 = vld [vmem:[%s11087_s20 + $0xf8] sm:$0xff]  ;;  %v6586_v12 = vld [vmem:[%s11087_s20 + $0x60] sm:$0xff] }
 0x143   : > { %7140 = vmatmul.mubr.msk.f32.vlgmr.msra.gmra.mrb[8].mxu1 %vm962_vm2, %v6623_v24  ;;  %v1817_v60 = vpack.c.bf16 %v1807_v46, %v1807_v46  ;;  %v1818_v63 = vpack.c.bf16 %v1808_v25, %v1808_v25  ;;  %v7449_v33 = vadd.f32 %v6635_v48, %v6587_v22  ;;  %v6634_v25 = vld [vmem:[%s11087_s20 + $0xe0] sm:$0xff]  ;;  %v1827_v22 = vpop.permute.xlu1 %1826 }
 0x144   : > { %1864 = vmatpush1.bf16.msra.mxu1 %v1809_v21  ;;  %7142 = vmatprep.mubr.msk.f32.mxu1 %vm962_vm2, %v6624_v29  ;;  %v1815_v3 = vpack.c.bf16 %v1785_v54, %v1763_v19  ;;  %v6630_v29 = vld [vmem:[%s11087_s20 + $0xc0] sm:$0xff]  ;;  %v7445_v21 = vadd.f32 %v6633_v8, %v6585_v7 }
 0x145   : > { %1865 = vmatprep.subr.bf16.mxu1 %v1812_v26  ;;  %v1858_v16 = vsel %vm1856_vm11, %v1817_v60, 0 }
 0x146   : > { %s723_s7 = scalar_lea.vmem %s11225_s18, %s11157_s16  ;;  %s11227_s18 = sld [smem:[#allocation32_spill]] }
 0x147   : > { %7143 = vmatmul.mubr.msk.f32.gmra.mrb[10].mxu1 %vm962_vm2, %v6625_v56  ;;  %v6632_v56 = vld [vmem:[%s11087_s20 + $0xd0] sm:$0xff] }
 0x148   : > { %1866 = vmatpush1.bf16.msra.mxu1 %v1811_v45  ;;  %7145 = vmatprep.mubr.msk.f32.mxu1 %vm962_vm2, %v6626_v34 }
 0x149   : > { %1867 = vmatprep.subr.bf16.mxu1 %v1814_v44 }
 0x14b   : > { %7146 = vmatmul.mubr.msk.f32.gmra.mrb[12].mxu1 %vm962_vm2, %v6627_v23 }
 0x14c   : > { %1868 = vmatpush1.bf16.msra.mxu1 %v1813_v53  ;;  %7148 = vmatprep.mubr.msk.f32.mxu1 %vm962_vm2, %v6628_v52  ;;  %v7453_v52 = vadd.f32 %v6637_v4, %v6589_v47 }
 0x14d   : > { %1869 = vmatprep.subr.bf16.mxu1 %v1816_v55  ;;  %v6588_v55 = vld [vmem:[%s11087_s20 + $0x70] sm:$0xff] }
 0x14f   : > { %7149 = vmatmul.mubr.msk.f32.gmra.mrb[14].mxu1 %vm962_vm2, %v6629_v59 }
 0x150   : > { %1870 = vmatpush1.bf16.msra.mxu1 %v1815_v3  ;;  %1895 = vmatprep.mubr.bf16.mxu1 %v11108_v40 }
 0x151   : > { %6671 = vmatprep.subr.msk.bf16.mxu1 %vm1856_vm11, %v1818_v63 }
 0x154   : > { %1872 = vmatpush1.bf16.msra.mxu1 %v1858_v16  ;;  %v6636_v16 = vld [vmem:[%s11087_s20 + $0xf0] sm:$0xff] }
 0x157   : > { %6672 = vmatmul.mubr.msk.bf16.vlgmr.msra.gmra.mrb[16].mxu1 %vm1849_vm12, %v7526_v6 }
 0x158   : > { %1905 = vmatprep.mubr.bf16.mxu1 %v11108_v40 }
 0x15f   : > { %6673 = vmatmul.mubr.msk.bf16.gmra.mrb[20].mxu1 %vm1849_vm12, %v7527_v14 }
 0x216   : > { %v7141_v11 = vpop.f32.mrb[8].mxu1 }
 0x217   : > { %v8552_v24 = vadd.f32 %v7441_v9, %v7141_v11  ;;  %v1413_v15 = vpop.f32.mrb[9].mxu1  ;;  %v1822_v11 = vpop.permute.xlu0 %1821 }
 0x218   : > { %v7443_v36 = vadd.f32 %v6582_v10, %v1413_v15 }
 0x219   : > { %v6647_v26 = vmul.f32 -1.442695, %v8552_v24 }
 0x21a   : > { %v8567_v32 = vadd.f32 %v7443_v36, %v6630_v29  ;;  %v7144_v45 = vpop.f32.mrb[10].mxu1 }
 0x21b   : > { %7631 = vpow2.f32 %v6647_v26  ;;  %v8569_v18 = vadd.f32 %v7445_v21, %v7144_v45  ;;  %v1423_v20 = vpop.f32.mrb[11].mxu1 }
 0x21c   : > { %v6646_v34 = vmul.f32 -1.442695, %v8567_v32  ;;  %v7447_v39 = vadd.f32 %v6584_v31, %v1423_v20 }
 0x21d   : > { %v6649_v50 = vmul.f32 -1.442695, %v8569_v18 }
 0x21e   : > { %7633 = vpow2.f32 %v6646_v34  ;;  %v8585_v62 = vadd.f32 %v7447_v39, %v6632_v56  ;;  %v7147_v44 = vpop.f32.mrb[12].mxu1 }
 0x21f   : > { %7635 = vpow2.f32 %v6649_v50  ;;  %v8587_v23 = vadd.f32 %v7449_v33, %v7147_v44  ;;  %v1433_v46 = vpop.f32.mrb[13].mxu1  ;;  %v1832_v44 = vpop.permute.xlu1 %1831 }
 0x220   : > { %v6648_v53 = vmul.f32 -1.442695, %v8585_v62  ;;  %v7451_v19 = vadd.f32 %v6586_v12, %v1433_v46 }
 0x221   : > { %v6651_v54 = vmul.f32 -1.442695, %v8587_v23 }
 0x222   : > { %7637 = vpow2.f32 %v6648_v53  ;;  %v8597_v59 = vadd.f32 %v7451_v19, %v6634_v25  ;;  %v7150_v60 = vpop.f32.mrb[14].mxu1 }
 0x223   : > { %7639 = vpow2.f32 %v6651_v54  ;;  %v8599_v63 = vadd.f32 %v7453_v52, %v7150_v60  ;;  %v1443_v3 = vpop.f32.mrb[15].mxu1 }
 0x224   : > { %v6650_v6 = vmul.f32 -1.442695, %v8597_v59  ;;  %v7455_v14 = vadd.f32 %v6588_v55, %v1443_v3 }
 0x225   : > { %v7632_v43 = vpop.eup %7631  ;;  %v6653_v61 = vmul.f32 -1.442695, %v8599_v63 }
 0x226   : > { %v1485_v9 = vadd.f32 1.0, %v7632_v43  ;;  %7641 = vpow2.f32 %v6650_v6  ;;  %v8606_v7 = vadd.f32 %v7455_v14, %v6636_v16  ;;  %v1837_v16 = vpop.permute.xlu0 %1836 }
 0x227   : > { %7643 = vpow2.f32 %v6653_v61 }
 0x228   : > { %v7634_v8 = vpop.eup %7633  ;;  %v6652_v10 = vmul.f32 -1.442695, %v8606_v7  ;;  %7645 = vrcp.f32 %v1485_v9 }
 0x229   : > { %v7636_v15 = vpop.eup %7635  ;;  %v1484_v29 = vadd.f32 1.0, %v7634_v8 }
 0x22a   : > { %v1487_v21 = vadd.f32 1.0, %v7636_v15  ;;  %7647 = vpow2.f32 %v6652_v10  ;;  %v1897_v36 = vpop.f32.mrb[16].mxu1 }
 0x22b   : > { %7649 = vrcp.f32 %v1484_v29  ;;  %v8609_v48 = vadd.f32 %v1897_v36, %v1822_v11  ;;  %v1899_v26 = vpop.f32.mrb[17].mxu1 }
 0x22c   : > { %v7638_v31 = vpop.eup %7637  ;;  %v8611_v45 = vadd.f32 %v1899_v26, %v1822_v11  ;;  %v1901_v20 = vpop.f32.mrb[18].mxu1  ;;  %7651 = vrcp.f32 %v1487_v21 }
 0x22d   : > { %11195 = vst [vmem:[#allocation20_spill] sm:$0xff] %v8609_v48  ;;  %v7640_v56 = vpop.eup %7639  ;;  %v1486_v33 = vadd.f32 1.0, %v7638_v31  ;;  %v8613_v34 = vadd.f32 %v1901_v20, %v1827_v22  ;;  %v1903_v39 = vpop.f32.mrb[19].mxu1 }
 0x22e   : > { %11196 = vst [vmem:[#allocation21_spill] sm:$0xff] %v8611_v45  ;;  %v1489_v47 = vadd.f32 1.0, %v7640_v56  ;;  %v8615_v4 = vadd.f32 %v1903_v39, %v1827_v22  ;;  %v1926_v50 = vadd.f32 %v8611_v45, %v8609_v48 }
 0x22f   : > { %11197 = vst [vmem:[#allocation22_spill] sm:$0xff] %v8613_v34  ;;  %7653 = vrcp.f32 %v1486_v33 }
 0x230   : > { %11198 = vst [vmem:[#allocation23_spill] sm:$0xff] %v8615_v4  ;;  %v7642_v12 = vpop.eup %7641  ;;  %1927 = vadd.xlane.f32.xlu1 %v1926_v50  ;;  %v1929_v46 = vadd.f32 %v8615_v4, %v8613_v34  ;;  %7655 = vrcp.f32 %v1489_v47 }
 0x231   : > { %v7644_v25 = vpop.eup %7643  ;;  %v1488_v52 = vadd.f32 1.0, %v7642_v12 }
 0x232   : > { %v1491_v53 = vadd.f32 1.0, %v7644_v25  ;;  %v1907_v19 = vpop.f32.mrb[20].mxu1  ;;  %1930 = vadd.xlane.f32.xlu0 %v1929_v46  ;;  %v7646_v54 = vpop.eup %7645  ;;  %v1518_v46 = vld [vmem:[%s11086_s19 + $0x10] sm:$0xff] }
 0x233   : > { %7657 = vrcp.f32 %v1488_v52  ;;  %v8621_v55 = vadd.f32 %v1907_v19, %v1832_v44  ;;  %v1909_v60 = vpop.f32.mrb[21].mxu1  ;;  %v1509_v10 = vmul.f32 %v7646_v54, %v8552_v24 }
 0x234   : > { %v7648_v3 = vpop.eup %7647  ;;  %v8623_v6 = vadd.f32 %v1909_v60, %v1832_v44  ;;  %v1911_v14 = vpop.f32.mrb[22].mxu1  ;;  %7659 = vrcp.f32 %v1491_v53 }
 0x235   : > { %11199 = vst [vmem:[#allocation24_spill] sm:$0xff] %v8621_v55  ;;  %v7650_v43 = vpop.eup %7649  ;;  %v1490_v61 = vadd.f32 1.0, %v7648_v3  ;;  %v8625_v9 = vadd.f32 %v1911_v14, %v1837_v16  ;;  %v1913_v8 = vpop.f32.mrb[23].mxu1  ;;  %v8667_v3 = vld [vmem:[%s11073_s6 + $0x8] sm:$0xff]  ;;  %v8681_v14 = vld [vmem:[%s11073_s6 + $0x18] sm:$0xff] }
 0x236   : > { %11200 = vst [vmem:[#allocation25_spill] sm:$0xff] %v8623_v6  ;;  %v1508_v11 = vmul.f32 %v7650_v43, %v8567_v32  ;;  %v8629_v15 = vadd.f32 %v1913_v8, %v1837_v16  ;;  %v1932_v29 = vadd.f32 %v8623_v6, %v8621_v55  ;;  %v7652_v21 = vpop.eup %7651  ;;  %v8672_v16 = vld [vmem:[%s11073_s6 + $0x10] sm:$0xff] }
 0x237   : > { %11201 = vst [vmem:[#allocation26_spill] sm:$0xff] %v8625_v9  ;;  %7661 = vrcp.f32 %v1490_v61  ;;  %v1511_v31 = vmul.f32 %v7652_v21, %v8569_v18  ;;  %v1516_v18 = vld [vmem:[%s11086_s19] sm:$0xff] }
 0x238   : > { %11202 = vst [vmem:[#allocation27_spill] sm:$0xff] %v8629_v15  ;;  %1933 = vadd.xlane.f32.xlu0 %v1932_v29  ;;  %v7361_v36 = vpack.c.bf16 %v1509_v10, %v1508_v11  ;;  %v1935_v22 = vadd.f32 %v8629_v15, %v8625_v9  ;;  %7167 = vmatprep.mubr.msk.f32.mxu0 %vm962_vm2, %v1516_v18 }
 0x239   : > { %v7654_v26 = vpop.eup %7653 }
 0x23a   : > { %v1510_v20 = vmul.f32 %v7654_v26, %v8585_v62  ;;  %7362 = vmatprep.subr.bf16.mxu0 %v7361_v36  ;;  %1936 = vadd.xlane.f32.xlu1 %v1935_v22  ;;  %v7656_v24 = vpop.eup %7655 }
 0x23b   : > { %7364 = vmatpush3.bf16.msra.mxu0 %v7361_v36  ;;  %v1513_v33 = vmul.f32 %v7656_v24, %v8587_v23 }
 0x23c   : > { %v7365_v32 = vpack.c.bf16 %v1511_v31, %v1510_v20 }
 0x23d   : > { %v7658_v56 = vpop.eup %7657 }
 0x23e   : > { %v1512_v39 = vmul.f32 %v7658_v56, %v8597_v59  ;;  %7366 = vmatprep.subr.bf16.mxu0 %v7365_v32  ;;  %v7660_v47 = vpop.eup %7659  ;;  %v1517_v59 = vld [vmem:[%s11086_s19 + $0x8] sm:$0xff] }
 0x23f   : > { %7368 = vmatpush3.bf16.msra.mxu0 %v7365_v32  ;;  %v1515_v62 = vmul.f32 %v7660_v47, %v8599_v63  ;;  %v1519_v63 = vld [vmem:[%s11086_s19 + $0x18] sm:$0xff] }
 0x240   : > { %v7369_v50 = vpack.c.bf16 %v1513_v33, %v1512_v39 }
 0x241   : > { %v7662_v12 = vpop.eup %7661 }
 0x242   : > { %v1514_v44 = vmul.f32 %v7662_v12, %v8606_v7  ;;  %7370 = vmatprep.subr.bf16.mxu0 %v7369_v50  ;;  %v8659_v7 = vld [vmem:[%s11073_s6] sm:$0xff] }
 0x243   : > { %7372 = vmatpush3.bf16.msra.mxu0 %v7369_v50 }
 0x244   : > { %v7373_v23 = vpack.c.bf16 %v1515_v62, %v1514_v44 }
 0x246   : > { %7374 = vmatprep.subr.bf16.mxu0 %v7373_v23 }
 0x247   : > { %7376 = vmatpush3.bf16.msra.mxu0 %v7373_v23 }
 0x24a   : > { %7168 = vmatmul.mubr.msk.f32.vlgmr.msra.gmra.mrb[8].mxu0 %vm962_vm2, %v1517_v59 }
 0x24b   : > { %7170 = vmatprep.mubr.msk.f32.mxu0 %vm962_vm2, %v1518_v46 }
 0x24e   : > { %7171 = vmatmul.mubr.msk.f32.gmra.mrb[10].mxu0 %vm962_vm2, %v1519_v63 }
 0x24f   : > { %7181 = vmatprep.mubr.msk.f32.mxu0 %vm759_vm0, %v8659_v7 }
 0x2bd   : > { %v1928_v25 = vpop.xlane.xlu1 %1927 }
 0x2bf   : > { %v1931_v52 = vpop.xlane.xlu0 %1930 }
 0x2c0   : > { %v7377_v53 = vpack.c.bf16 %v1931_v52, %v1928_v25 }
 0x2c2   : > { %7378 = vmatprep.subr.bf16.mxu0 %v7377_v53 }
 0x2c3   : > { %7380 = vmatpush3.bf16.msra.mxu0 %v7377_v53 }
 0x2c5   : > { %v1934_v19 = vpop.xlane.xlu0 %1933 }
 0x2c7   : > { %v1937_v54 = vpop.xlane.xlu1 %1936 }
 0x2c8   : > { %v7381_v60 = vpack.c.bf16 %v1937_v54, %v1934_v19 }
 0x2ca   : > { %7382 = vmatprep.subr.bf16.mxu0 %v7381_v60 }
 0x2cb   : > { %7384 = vmatpush3.bf16.msra.mxu0 %v7381_v60  ;;  %v6674_v60 = vld [vmem:[%s11080_s13 + $0x20] sm:$0xff] }
 0x2ce   : > { %7182 = vmatmul.mubr.msk.f32.vlgmr.msra.gmra.mrb[12].mxu0 %vm759_vm0, %v8667_v3 }
 0x2cf   : > { %7184 = vmatprep.mubr.msk.f32.mxu0 %vm759_vm0, %v8672_v16 }
 0x2d2   : > { %7185 = vmatmul.mubr.msk.f32.gmra.mrb[14].mxu0 %vm759_vm0, %v8681_v14 }
 0x2d3   : > { %7195 = vmatprep.mubr.msk.f32.mxu0 %vm759_vm0, %v8659_v7 }
 0x31d   : > { %v8687_v43 = vpop.f32.mrb[8].mxu0 }
 0x31e   : > { %v8689_v61 = vpop.f32.mrb[9].mxu0 }
 0x321   : > { %v8691_v8 = vpop.f32.mrb[10].mxu0 }
 0x322   : > { %v8693_v10 = vpop.f32.mrb[11].mxu0 }
 0x3a1   : > { %v7183_v11 = vpop.f32.mrb[12].mxu0 }
 0x3a2   : > { %2042 = vperm.xlu1 %7525, %v7183_v11   ;;  %v2016_v29 = vpop.f32.mrb[13].mxu0  ;;  %v6678_v11 = vld [vmem:[%s11080_s13 + $0x40] sm:$0xff] }
 0x3a3   : > { %2037 = vperm.xlu0 %7524, %v2016_v29   ;;  %v6675_v29 = vld [vmem:[%s11080_s13 + $0x28] sm:$0xff] }
 0x3a5   : > { %v7186_v21 = vpop.f32.mrb[14].mxu0 }
 0x3a6   : > { %v2026_v36 = vpop.f32.mrb[15].mxu0 }
 0x3a7   : > { %2052 = vperm.xlu0 %7524, %v7186_v21   ;;  %2047 = vperm.xlu1 %7525, %v2026_v36   ;;  %v6676_v21 = vld [vmem:[%s11080_s13 + $0x30] sm:$0xff]  ;;  %v6679_v36 = vld [vmem:[%s11080_s13 + $0x48] sm:$0xff] }
 0x421   : > { %v2043_v22 = vpop.permute.xlu1 %2042 }
 0x422   : > { %v8696_v26 = vsub.f32 %v8613_v34, %v2043_v22  ;;  %v8699_v31 = vsub.f32 %v8615_v4, %v2043_v22  ;;  %v2038_v20 = vpop.permute.xlu0 %2037  ;;  %v6677_v22 = vld [vmem:[%s11080_s13 + $0x38] sm:$0xff] }
 0x423   : > { %v8702_v24 = vsub.f32 %v8609_v48, %v2038_v20  ;;  %v8705_v32 = vsub.f32 %v8611_v45, %v2038_v20 }
 0x424   : > { %v2065_v56 = vmul.f32 %v8696_v26, %v8696_v26  ;;  %v2066_v33 = vmul.f32 %v8699_v31, %v8699_v31 }
 0x425   : > { %v2063_v39 = vmul.f32 %v8702_v24, %v8702_v24  ;;  %v2064_v47 = vmul.f32 %v8705_v32, %v8705_v32 }
 0x426   : > { %v2053_v50 = vpop.permute.xlu0 %2052  ;;  %v2048_v18 = vpop.permute.xlu1 %2047  ;;  %v2074_v12 = vadd.f32 %v2066_v33, %v2065_v56 }
 0x427   : > { %v8716_v62 = vsub.f32 %v8625_v9, %v2053_v50  ;;  %v8719_v44 = vsub.f32 %v8629_v15, %v2053_v50  ;;  %v8722_v23 = vsub.f32 %v8621_v55, %v2048_v18  ;;  %v8725_v59 = vsub.f32 %v8623_v6, %v2048_v18 }
 0x428   : > { %2075 = vadd.xlane.f32.xlu0 %v2074_v12  ;;  %v2071_v46 = vadd.f32 %v2064_v47, %v2063_v39 }
 0x429   : > { %v2069_v63 = vmul.f32 %v8716_v62, %v8716_v62  ;;  %v2070_v25 = vmul.f32 %v8719_v44, %v8719_v44  ;;  %v2067_v52 = vmul.f32 %v8722_v23, %v8722_v23  ;;  %v2068_v53 = vmul.f32 %v8725_v59, %v8725_v59 }
 0x42a   : > { %2072 = vadd.xlane.f32.xlu1 %v2071_v46 }
 0x42b   : > { %v2080_v19 = vadd.f32 %v2070_v25, %v2069_v63  ;;  %v2077_v54 = vadd.f32 %v2068_v53, %v2067_v52 }
 0x42d   : > { %2078 = vadd.xlane.f32.xlu0 %v2077_v54 }
 0x42e   : > { %2081 = vadd.xlane.f32.xlu1 %v2080_v19 }
 0x43f   : > { %2202 = vperm.xlu1 %7525, %v6674_v60   ;;  %v6681_v60 = vld [vmem:[%s11080_s13 + $0x58] sm:$0xff] }
 0x443   : > { %2230 = vperm.xlu1 %7525, %v6678_v11   ;;  %2207 = vperm.xlu0 %7524, %v6675_v29  }
 0x447   : > { %2212 = vperm.xlu1 %7525, %v6676_v21   ;;  %2235 = vperm.xlu0 %7524, %v6679_v36  }
 0x44b   : > { %2217 = vperm.xlu0 %7524, %v6677_v22  }
 0x4b5   : > { %v2076_v20 = vpop.xlane.xlu0 %2075 }
 0x4b7   : > { %v2073_v56 = vpop.xlane.xlu1 %2072 }
 0x4b8   : > { %v7385_v33 = vpack.c.bf16 %v2076_v20, %v2073_v56 }
 0x4ba   : > { %7386 = vmatprep.subr.bf16.mxu0 %v7385_v33  ;;  %v2079_v39 = vpop.xlane.xlu0 %2078 }
 0x4bb   : > { %7388 = vmatpush3.bf16.msra.mxu0 %v7385_v33  ;;  %v2082_v47 = vpop.xlane.xlu1 %2081 }
 0x4bc   : > { %v7389_v50 = vpack.c.bf16 %v2082_v47, %v2079_v39 }
 0x4be   : > { %7390 = vmatprep.subr.bf16.mxu0 %v7389_v50 }
 0x4bf   : > { %7392 = vmatpush3.bf16.msra.mxu0 %v7389_v50  ;;  %v2203_v11 = vpop.permute.xlu1 %2202 }
 0x4c2   : > { %7196 = vmatmul.mubr.msk.f32.vlgmr.msra.gmra.mrb[16].mxu0 %vm759_vm0, %v8667_v3  ;;  %v2208_v29 = vpop.permute.xlu0 %2207 }
 0x4c3   : > { %7198 = vmatprep.mubr.msk.f32.mxu0 %vm759_vm0, %v8672_v16  ;;  %v2231_v21 = vpop.permute.xlu1 %2230 }
 0x4c6   : > { %7199 = vmatmul.mubr.msk.f32.gmra.mrb[18].mxu0 %vm759_vm0, %v8681_v14  ;;  %v2236_v36 = vpop.permute.xlu0 %2235 }
 0x4c7   : > { %7209 = vmatprep.mubr.msk.f32.mxu0 %vm759_vm0, %v8659_v7  ;;  %v6680_v7 = vld [vmem:[%s11080_s13 + $0x50] sm:$0xff]  ;;  %v2213_v22 = vpop.permute.xlu1 %2212 }
 0x4ca   : > { %v2218_v20 = vpop.permute.xlu0 %2217 }
 0x595   : > { %v7197_v18 = vpop.f32.mrb[16].mxu0 }
 0x596   : > { %v2155_v12 = vadd.f32 1e-05, %v7197_v18  ;;  %v2149_v46 = vpop.f32.mrb[17].mxu0 }
 0x597   : > { %v2150_v63 = vadd.f32 1e-05, %v2149_v46 }
 0x598   : > { %7663 = vrsqrt.f32 %v2155_v12 }
 0x599   : > { %7665 = vrsqrt.f32 %v2150_v63  ;;  %v7200_v25 = vpop.f32.mrb[18].mxu0 }
 0x59a   : > { %v2165_v52 = vadd.f32 1e-05, %v7200_v25  ;;  %v2159_v53 = vpop.f32.mrb[19].mxu0 }
 0x59b   : > { %v2160_v19 = vadd.f32 1e-05, %v2159_v53 }
 0x59c   : > { %7667 = vrsqrt.f32 %v2165_v52 }
 0x59d   : > { %7669 = vrsqrt.f32 %v2160_v19 }
 0x5a2   : > { %v7664_v3 = vpop.eup %7663 }
 0x5a3   : > { %v7666_v16 = vpop.eup %7665  ;;  %2179 = vperm.xlu1 %7525, %v7664_v3  }
 0x5a4   : > { %2174 = vperm.xlu0 %7524, %v7666_v16  }
 0x5a6   : > { %v7668_v14 = vpop.eup %7667 }
 0x5a7   : > { %v7670_v54 = vpop.eup %7669 }
 0x5a8   : > { %2184 = vperm.xlu1 %7525, %v7670_v54   ;;  %2189 = vperm.xlu0 %7524, %v7668_v14  }
 0x5ac   : > { %2240 = vperm.xlu1 %7525, %v6680_v7   ;;  %2245 = vperm.xlu0 %7524, %v6681_v60  }
 0x622   : > { %v2180_v56 = vpop.permute.xlu1 %2179 }
 0x623   : > { %v2194_v33 = vmul.f32 %v2180_v56, %v8696_v26  ;;  %v2195_v39 = vmul.f32 %v2180_v56, %v8699_v31  ;;  %v2175_v47 = vpop.permute.xlu0 %2174 }
 0x624   : > { %v2192_v50 = vmul.f32 %v2175_v47, %v8702_v24  ;;  %v2193_v18 = vmul.f32 %v2175_v47, %v8705_v32 }
 0x625   : > { %v2222_v12 = vmul.f32 %v2208_v29, %v2194_v33  ;;  %v2223_v46 = vmul.f32 %v2208_v29, %v2195_v39 }
 0x626   : > { %v2220_v63 = vmul.f32 %v2203_v11, %v2192_v50  ;;  %v2221_v25 = vmul.f32 %v2203_v11, %v2193_v18 }
 0x627   : > { %v2250_v52 = vadd.f32 %v2236_v36, %v2222_v12  ;;  %v2251_v53 = vadd.f32 %v2236_v36, %v2223_v46  ;;  %v2190_v56 = vpop.permute.xlu0 %2189  ;;  %v2185_v50 = vpop.permute.xlu1 %2184 }
 0x628   : > { %v2248_v19 = vadd.f32 %v2231_v21, %v2220_v63  ;;  %v2249_v3 = vadd.f32 %v2231_v21, %v2221_v25  ;;  %v2198_v12 = vmul.f32 %v2190_v56, %v8716_v62  ;;  %v2196_v25 = vmul.f32 %v2185_v50, %v8722_v23 }
 0x629   : > { %v6692_v16 = vmul.f32 -1.442695, %v2250_v52  ;;  %v6693_v14 = vmul.f32 -1.442695, %v2251_v53 }
 0x62a   : > { %v6690_v54 = vmul.f32 -1.442695, %v2248_v19  ;;  %v6691_v7 = vmul.f32 -1.442695, %v2249_v3 }
 0x62b   : > { %7671 = vpow2.f32 %v6692_v16  ;;  %v2246_v62 = vpop.permute.xlu0 %2245 }
 0x62c   : > { %7673 = vpow2.f32 %v6693_v14  ;;  %v2226_v14 = vmul.f32 %v2218_v20, %v2198_v12 }
 0x62d   : > { %7675 = vpow2.f32 %v6690_v54  ;;  %v2224_v54 = vmul.f32 %v2213_v22, %v2196_v25 }
 0x62e   : > { %7677 = vpow2.f32 %v6691_v7  ;;  %v2254_v7 = vadd.f32 %v2246_v62, %v2226_v14 }
 0x635   : > { %v7672_v26 = vpop.eup %7671 }
 0x636   : > { %v7674_v31 = vpop.eup %7673  ;;  %v2282_v24 = vadd.f32 1.0, %v7672_v26 }
 0x637   : > { %v7676_v32 = vpop.eup %7675  ;;  %v2283_v60 = vadd.f32 1.0, %v7674_v31  ;;  %v6696_v31 = vmul.f32 -1.442695, %v2254_v7 }
 0x638   : > { %v7678_v29 = vpop.eup %7677  ;;  %7679 = vrcp.f32 %v2282_v24  ;;  %v2280_v11 = vadd.f32 1.0, %v7676_v32 }
 0x639   : > { %7681 = vrcp.f32 %v2283_v60  ;;  %v2281_v36 = vadd.f32 1.0, %v7678_v29 }
 0x63a   : > { %7683 = vrcp.f32 %v2280_v11 }
 0x63b   : > { %7685 = vrcp.f32 %v2281_v36 }
 0x63c   : > { %7687 = vpow2.f32 %v6696_v31 }
 0x642   : > { %v7680_v21 = vpop.eup %7679 }
 0x643   : > { %v7682_v33 = vpop.eup %7681  ;;  %v8771_v39 = vmul.f32 %v7680_v21, %v2250_v52  ;;  %v2199_v52 = vmul.f32 %v2190_v56, %v8719_v44 }
 0x644   : > { %v7684_v47 = vpop.eup %7683  ;;  %v8778_v63 = vmul.f32 %v7682_v33, %v2251_v53  ;;  %v2241_v53 = vpop.permute.xlu1 %2240 }
 0x645   : > { %v8773_v18 = vmul.f32 %v7684_v47, %v2248_v19  ;;  %2327 = vrot.lane.b32.xlu0 %v8771_v39, %s11105_s24  ;;  %v7686_v46 = vpop.eup %7685  ;;  %v2197_v19 = vmul.f32 %v2185_v50, %v8725_v59  ;;  %v2227_v23 = vmul.f32 %v2218_v20, %v2199_v52  ;;  %v2252_v26 = vadd.f32 %v2241_v53, %v2224_v54 }
 0x646   : > { %v8783_v16 = vmul.f32 %v7686_v46, %v2249_v3  ;;  %v7688_v32 = vpop.eup %7687 }
 0x647   : > { %2325 = vrot.lane.b32.xlu1 %v8773_v18, %s11105_s24  ;;  %v2225_v3 = vmul.f32 %v2213_v22, %v2197_v19  ;;  %v2255_v44 = vadd.f32 %v2246_v62, %v2227_v23  ;;  %v6694_v24 = vmul.f32 -1.442695, %v2252_v26  ;;  %v2286_v29 = vadd.f32 1.0, %v7688_v32  ;;  %v7530_v19 = vld [vmem:[%s11208_s8 + $0x4] ss:$12 sps:$4 sm:$0xff]  }
 0x648   : > { %2705 = vmatprep.mubr.bf16.mxu1 %v7530_v19 }
 0x649   : > { %2335 = vrot.lane.b32.xlu0 %v8778_v63, %s11105_s24  ;;  %v2253_v59 = vadd.f32 %v2241_v53, %v2225_v3  ;;  %v6697_v20 = vmul.f32 -1.442695, %v2255_v44  ;;  %7689 = vpow2.f32 %v6694_v24 }
 0x64b   : > { %2333 = vrot.lane.b32.xlu1 %v8783_v16, %s11105_s24  ;;  %v6695_v22 = vmul.f32 -1.442695, %v2253_v59  ;;  %7691 = vpow2.f32 %v6697_v20 }
 0x64d   : > { %2359 = vrot.lane.b32.xlu0 %v8771_v39, %s11103_s22  ;;  %7693 = vpow2.f32 %v6695_v22 }
 0x64e   : > { %7695 = vrcp.f32 %v2286_v29 }
 0x64f   : > { %2357 = vrot.lane.b32.xlu1 %v8773_v18, %s11103_s22 }
 0x651   : > { %2367 = vrot.lane.b32.xlu0 %v8778_v63, %s11103_s22 }
 0x653   : > { %2365 = vrot.lane.b32.xlu1 %v8783_v16, %s11103_s22  ;;  %v7690_v60 = vpop.eup %7689 }
 0x654   : > { %v2284_v36 = vadd.f32 1.0, %v7690_v60 }
 0x655   : > { %2391 = vrot.lane.b32.xlu0 %v8771_v39, %s11203_s30  ;;  %v7692_v11 = vpop.eup %7691 }
 0x656   : > { %v2287_v56 = vadd.f32 1.0, %v7692_v11  ;;  %7697 = vrcp.f32 %v2284_v36  ;;  %v6699_v36 = vld [vmem:[%s11080_s13 + $0x68] sm:$0xff] }
 0x657   : > { %2389 = vrot.lane.b32.xlu1 %v8773_v18, %s11203_s30  ;;  %v7694_v21 = vpop.eup %7693 }
 0x658   : > { %v2285_v33 = vadd.f32 1.0, %v7694_v21  ;;  %7699 = vrcp.f32 %v2287_v56  ;;  %v7696_v47 = vpop.eup %7695  ;;  %v6655_v56 = vld [vmem:[%s11080_s13 + $0x268] sm:$0xff] }
 0x659   : > { %2399 = vrot.lane.b32.xlu0 %v8778_v63, %s11203_s30  ;;  %v8829_v12 = vmul.f32 %v7696_v47, %v2254_v7 }
 0x65a   : > { %7701 = vrcp.f32 %v2285_v33  ;;  %v6698_v33 = vld [vmem:[%s11080_s13 + $0x60] sm:$0xff] }
 0x65b   : > { %2397 = vrot.lane.b32.xlu1 %v8783_v16, %s11203_s30 }
 0x65d   : > { %2423 = vrot.lane.b32.xlu0 %v8771_v39, %s11204_s29 }
 0x65f   : > { %2421 = vrot.lane.b32.xlu1 %v8773_v18, %s11204_s29 }
 0x660   : > { %v7698_v50 = vpop.eup %7697 }
 0x661   : > { %2431 = vrot.lane.b32.xlu0 %v8778_v63, %s11204_s29  ;;  %v8833_v25 = vmul.f32 %v7698_v50, %v2252_v26  ;;  %v6654_v50 = vld [vmem:[%s11080_s13 + $0x260] sm:$0xff] }
 0x662   : > { %v7700_v46 = vpop.eup %7699  ;;  %v1604_v19 = vadd.f32 %v6654_v50, %v8689_v61  ;;  %v6656_v61 = vld [vmem:[%s11080_s13 + $0x270] sm:$0xff] }
 0x663   : > { %2429 = vrot.lane.b32.xlu1 %v8783_v16, %s11204_s29  ;;  %v8837_v14 = vmul.f32 %v7700_v46, %v2255_v44  ;;  %v1609_v46 = vadd.f32 %v8687_v43, %v6655_v56  ;;  %v6700_v43 = vld [vmem:[%s11080_s13 + $0x70] sm:$0xff] }
 0x664   : > { %v7702_v52 = vpop.eup %7701 }
 0x665   : > { %2455 = vrot.lane.b32.xlu0 %v8771_v39, %s11205_s1  ;;  %v8841_v62 = vmul.f32 %v7702_v52, %v2253_v59 }
 0x667   : > { %2453 = vrot.lane.b32.xlu1 %v8773_v18, %s11205_s1 }
 0x669   : > { %2463 = vrot.lane.b32.xlu0 %v8778_v63, %s11205_s1 }
 0x66b   : > { %2461 = vrot.lane.b32.xlu1 %v8783_v16, %s11205_s1 }
 0x66d   : > { %2487 = vrot.lane.b32.xlu0 %v8771_v39, %s11206_s26 }
 0x66f   : > { %2485 = vrot.lane.b32.xlu1 %v8773_v18, %s11206_s26 }
 0x671   : > { %2495 = vrot.lane.b32.xlu0 %v8778_v63, %s11206_s26 }
 0x673   : > { %2493 = vrot.lane.b32.xlu1 %v8783_v16, %s11206_s26 }
 0x675   : > { %2331 = vrot.lane.b32.xlu0 %v8829_v12, %s11105_s24 }
 0x677   : > { %2329 = vrot.lane.b32.xlu1 %v8833_v25, %s11105_s24 }
 0x679   : > { %2339 = vrot.lane.b32.xlu0 %v8837_v14, %s11105_s24 }
 0x67b   : > { %2337 = vrot.lane.b32.xlu1 %v8841_v62, %s11105_s24  ;;  %s11226_s24 = sshll.u32 %s11252_s25, 5 }
 0x67d   : > { %2363 = vrot.lane.b32.xlu0 %v8829_v12, %s11103_s22 }
 0x67f   : > { %2361 = vrot.lane.b32.xlu1 %v8833_v25, %s11103_s22 }
 0x681   : > { %2371 = vrot.lane.b32.xlu0 %v8837_v14, %s11103_s22 }
 0x683   : > { %2369 = vrot.lane.b32.xlu1 %v8841_v62, %s11103_s22 }
 0x685   : > { %2395 = vrot.lane.b32.xlu0 %v8829_v12, %s11203_s30 }
 0x687   : > { %2393 = vrot.lane.b32.xlu1 %v8833_v25, %s11203_s30 }
 0x689   : > { %2403 = vrot.lane.b32.xlu0 %v8837_v14, %s11203_s30 }
 0x68b   : > { %2401 = vrot.lane.b32.xlu1 %v8841_v62, %s11203_s30 }
 0x68d   : > { %2427 = vrot.lane.b32.xlu0 %v8829_v12, %s11204_s29 }
 0x68f   : > { %2425 = vrot.lane.b32.xlu1 %v8833_v25, %s11204_s29 }
 0x691   : > { %2435 = vrot.lane.b32.xlu0 %v8837_v14, %s11204_s29 }
 0x693   : > { %2433 = vrot.lane.b32.xlu1 %v8841_v62, %s11204_s29 }
 0x695   : > { %2459 = vrot.lane.b32.xlu0 %v8829_v12, %s11205_s1 }
 0x697   : > { %2517 = vrot.lane.b32.xlu1 %v8773_v18, %s11207_s28 }
 0x699   : > { %2467 = vrot.lane.b32.xlu0 %v8837_v14, %s11205_s1 }
 0x69b   : > { %2525 = vrot.lane.b32.xlu1 %v8783_v16, %s11207_s28 }
 0x69d   : > { %2491 = vrot.lane.b32.xlu0 %v8829_v12, %s11206_s26 }
 0x69f   : > { %2457 = vrot.lane.b32.xlu1 %v8833_v25, %s11205_s1 }
 0x6a1   : > { %2499 = vrot.lane.b32.xlu0 %v8837_v14, %s11206_s26 }
 0x6a3   : > { %2465 = vrot.lane.b32.xlu1 %v8841_v62, %s11205_s1 }
 0x6a5   : > { %2519 = vrot.lane.b32.xlu0 %v8771_v39, %s11207_s28 }
 0x6a7   : > { %2489 = vrot.lane.b32.xlu1 %v8833_v25, %s11206_s26 }
 0x6a9   : > { %2527 = vrot.lane.b32.xlu0 %v8778_v63, %s11207_s28 }
 0x6ab   : > { %2497 = vrot.lane.b32.xlu1 %v8841_v62, %s11206_s26 }
 0x6ad   : > { %2523 = vrot.lane.b32.xlu0 %v8829_v12, %s11207_s28 }
 0x6af   : > { %2521 = vrot.lane.b32.xlu1 %v8833_v25, %s11207_s28 }
 0x6b1   : > { %2531 = vrot.lane.b32.xlu0 %v8837_v14, %s11207_s28 }
 0x6b3   : > { %2529 = vrot.lane.b32.xlu1 %v8841_v62, %s11207_s28 }
 0x6b5   : > { %2551 = vrot.lane.b32.xlu0 %v8771_v39, %s11209_s5 }
 0x6b7   : > { %2549 = vrot.lane.b32.xlu1 %v8773_v18, %s11209_s5  ;;  %v2328_v54 = vpop.permute.xlu0 %2327 }
 0x6b9   : > { %v2326_v53 = vpop.permute.xlu1 %2325  ;;  %2559 = vrot.lane.b32.xlu0 %v8778_v63, %s11209_s5 }
 0x6bb   : > { %2557 = vrot.lane.b32.xlu1 %v8783_v16, %s11209_s5  ;;  %v2336_v23 = vpop.permute.xlu0 %2335 }
 0x6bc   : > { %v2342_v7 = vsel %vm1638_vm3, %v2328_v54, %v2336_v23  ;;  %v2346_v3 = vsel %vm1638_vm3, %v2336_v23, %v2328_v54 }
 0x6bd   : > { %v2351_v26 = vmul.f32 %v2346_v3, %v8365_v38  ;;  %v2352_v44 = vmul.f32 %v2342_v7, %v8333_v30  ;;  %v2334_v31 = vpop.permute.xlu1 %2333  ;;  %2555 = vrot.lane.b32.xlu0 %v8829_v12, %s11209_s5  ;;  %v6657_v7 = vld [vmem:[%s11080_s13 + $0x278] sm:$0xff] }
 0x6be   : > { %v2341_v59 = vsel %vm1638_vm3, %v2326_v53, %v2334_v31  ;;  %v2345_v24 = vsel %vm1638_vm3, %v2334_v31, %v2326_v53  ;;  %v6701_v53 = vld [vmem:[%s11080_s13 + $0x78] sm:$0xff]  ;;  %v1614_v31 = vadd.f32 %v6656_v61, %v8693_v10 }
 0x6bf   : > { %v2349_v20 = vmul.f32 %v2345_v24, %v8365_v38  ;;  %v2350_v22 = vmul.f32 %v2341_v59, %v8333_v30  ;;  %2553 = vrot.lane.b32.xlu1 %v8833_v25, %s11209_s5  ;;  %v2360_v32 = vpop.permute.xlu0 %2359 }
 0x6c1   : > { %v2581_v60 = vpack.c.bf16 %v2351_v26, %v2349_v20  ;;  %v2358_v29 = vpop.permute.xlu1 %2357  ;;  %2563 = vrot.lane.b32.xlu0 %v8837_v14, %s11209_s5  ;;  %v2582_v11 = vpack.c.bf16 %v2352_v44, %v2350_v22  ;;  %v1619_v26 = vadd.f32 %v8691_v8, %v6657_v7 }
 0x6c3   : > { %2561 = vrot.lane.b32.xlu1 %v8841_v62, %s11209_s5  ;;  %2673 = vmatprep.subr.bf16.mxu1 %v2582_v11  ;;  %v2368_v21 = vpop.permute.xlu0 %2367 }
 0x6c4   : > { %2674 = vmatpush1.bf16.msra.mxu1 %v2581_v60  ;;  %v2378_v1 = vsel %vm1659_vm4, %v2368_v21, %v2360_v32 }
 0x6c5   : > { %v2366_v47 = vpop.permute.xlu1 %2365  ;;  %2624 = vperm.xlu0 %7524, %v6699_v36  }
 0x6c6   : > { %v2373_v7 = vsel %vm1659_vm4, %v2358_v29, %v2366_v47  ;;  %v2377_v15 = vsel %vm1659_vm4, %v2366_v47, %v2358_v29 }
 0x6c7   : > { %2619 = vperm.xlu1 %7525, %v6698_v33   ;;  %v8947_v52 = vpop.permute.xlu0 %2391 }
 0x6c9   : > { %v8950_v54 = vpop.permute.xlu1 %2389  ;;  %2786 = vperm.xlu0 %7524, %v1609_v46  }
 0x6cb   : > { %2781 = vperm.xlu1 %7525, %v1604_v19   ;;  %v2400_v23 = vpop.permute.xlu0 %2399 }
 0x6cd   : > { %v2398_v3 = vpop.permute.xlu1 %2397  ;;  %2634 = vperm.xlu0 %7524, %v6701_v53   ;;  %v2374_v53 = vsel %vm1659_vm4, %v2360_v32, %v2368_v21  ;;  %v2383_v32 = vmul.f32 %v2378_v1, %v8357_v57  ;;  %v2381_v21 = vmul.f32 %v2377_v15, %v8357_v57 }
 0x6ce   : > { %v2384_v55 = vmul.f32 %v2374_v53, %v8330_v28  ;;  %v2410_v53 = vsel %vm1681_vm5, %v2400_v23, %v8947_v52 }
 0x6cf   : > { %2629 = vperm.xlu1 %7525, %v6700_v43   ;;  %v8965_v44 = vpop.permute.xlu0 %2423  ;;  %v2585_v15 = vpack.c.bf16 %v2383_v32, %v2381_v21 }
 0x6d1   : > { %v8968_v59 = vpop.permute.xlu1 %2421  ;;  %2796 = vperm.xlu0 %7524, %v1619_v26  }
 0x6d3   : > { %2791 = vperm.xlu1 %7525, %v1614_v31   ;;  %v8970_v24 = vpop.permute.xlu0 %2431 }
 0x6d4   : > { %v2438_v32 = vsel %vm1703_vm6, %v8965_v44, %v8970_v24 }
 0x6d5   : > { %v8972_v20 = vpop.permute.xlu1 %2429 }
 0x6d7   : > { %v8974_v22 = vpop.permute.xlu0 %2455 }
 0x6d9   : > { %v8976_v60 = vpop.permute.xlu1 %2453 }
 0x6db   : > { %v8978_v11 = vpop.permute.xlu0 %2463 }
 0x6dd   : > { %v8980_v8 = vpop.permute.xlu1 %2461 }
 0x6df   : > { %v8982_v36 = vpop.permute.xlu0 %2487 }
 0x6e1   : > { %v8984_v56 = vpop.permute.xlu1 %2485 }
 0x6e3   : > { %v8986_v10 = vpop.permute.xlu0 %2495 }
 0x6e5   : > { %v8988_v33 = vpop.permute.xlu1 %2493 }
 0x6e7   : > { %v2332_v50 = vpop.permute.xlu0 %2331 }
 0x6e9   : > { %v2330_v46 = vpop.permute.xlu1 %2329 }
 0x6eb   : > { %v2340_v19 = vpop.permute.xlu0 %2339 }
 0x6ec   : > { %v2344_v43 = vsel %vm1638_vm3, %v2332_v50, %v2340_v19  ;;  %v2348_v61 = vsel %vm1638_vm3, %v2340_v19, %v2332_v50  ;;  %v2382_v50 = vmul.f32 %v2373_v7, %v8330_v28  ;;  %v2409_v7 = vsel %vm1681_vm5, %v2398_v3, %v8950_v54 }
 0x6ed   : > { %v2355_v26 = vmul.f32 %v2348_v61, %v8365_v38  ;;  %v2356_v31 = vmul.f32 %v2344_v43, %v8333_v30  ;;  %v2338_v40 = vpop.permute.xlu1 %2337 }
 0x6ee   : > { %v2343_v9 = vsel %vm1638_vm3, %v2330_v46, %v2338_v40  ;;  %v2347_v6 = vsel %vm1638_vm3, %v2338_v40, %v2330_v46  ;;  %v2586_v45 = vpack.c.bf16 %v2384_v55, %v2382_v50  ;;  %v2406_v40 = vsel %vm1681_vm5, %v8947_v52, %v2400_v23 }
 0x6ef   : > { %v2353_v19 = vmul.f32 %v2347_v6, %v8365_v38  ;;  %v2354_v43 = vmul.f32 %v2343_v9, %v8333_v30  ;;  %v2364_v61 = vpop.permute.xlu0 %2363  ;;  %v2405_v6 = vsel %vm1681_vm5, %v8950_v54, %v2398_v3  ;;  %v2415_v52 = vmul.f32 %v2410_v53, %v8382_v2 }
 0x6f0   : > { %v2414_v50 = vmul.f32 %v2405_v6, %v8385_v49  ;;  %v2413_v54 = vmul.f32 %v2409_v7, %v8382_v2 }
 0x6f1   : > { %v2583_v29 = vpack.c.bf16 %v2355_v26, %v2353_v19  ;;  %v2362_v47 = vpop.permute.xlu1 %2361  ;;  %v2584_v4 = vpack.c.bf16 %v2356_v31, %v2354_v43  ;;  %v2416_v31 = vmul.f32 %v2406_v40, %v8385_v49 }
 0x6f3   : > { %2675 = vmatprep.subr.bf16.mxu1 %v2584_v4  ;;  %v2372_v34 = vpop.permute.xlu0 %2371 }
 0x6f4   : > { %v2376_v9 = vsel %vm1659_vm4, %v2364_v61, %v2372_v34  ;;  %v2380_v1 = vsel %vm1659_vm4, %v2372_v34, %v2364_v61  ;;  %2676 = vmatpush1.bf16.msra.mxu1 %v2583_v29  ;;  %v2590_v29 = vpack.c.bf16 %v2416_v31, %v2414_v50 }
 0x6f5   : > { %v2387_v4 = vmul.f32 %v2380_v1, %v8357_v57  ;;  %v2388_v55 = vmul.f32 %v2376_v9, %v8330_v28  ;;  %2677 = vmatprep.subr.bf16.mxu1 %v2586_v45  ;;  %v2370_v46 = vpop.permute.xlu1 %2369  ;;  %v2589_v9 = vpack.c.bf16 %v2415_v52, %v2413_v54 }
 0x6f6   : > { %v2375_v26 = vsel %vm1659_vm4, %v2362_v47, %v2370_v46  ;;  %v2379_v34 = vsel %vm1659_vm4, %v2370_v46, %v2362_v47  ;;  %v2437_v47 = vsel %vm1703_vm6, %v8968_v59, %v8972_v20  ;;  %v2448_v46 = vmul.f32 %v2438_v32, %v8392_v51 }
 0x6f7   : > { %v2385_v45 = vmul.f32 %v2379_v34, %v8357_v57  ;;  %v2386_v19 = vmul.f32 %v2375_v26, %v8330_v28  ;;  %v2396_v43 = vpop.permute.xlu0 %2395  ;;  %v2441_v26 = vsel %vm1703_vm6, %v8972_v20, %v8968_v59  ;;  %v2446_v34 = vmul.f32 %v2437_v47, %v8392_v51 }
 0x6f8   : > { %2678 = vmatpush1.bf16.msra.mxu1 %v2585_v15  ;;  %v2445_v52 = vmul.f32 %v2441_v26, %v8396_v5 }
 0x6f9   : > { %v2587_v23 = vpack.c.bf16 %v2387_v4, %v2385_v45  ;;  %v2394_v3 = vpop.permute.xlu1 %2393  ;;  %v2588_v61 = vpack.c.bf16 %v2388_v55, %v2386_v19  ;;  %v2442_v55 = vsel %vm1703_vm6, %v8970_v24, %v8965_v44 }
 0x6fb   : > { %2679 = vmatprep.subr.bf16.mxu1 %v2588_v61  ;;  %v2404_v21 = vpop.permute.xlu0 %2403 }
 0x6fc   : > { %v2408_v40 = vsel %vm1681_vm5, %v2396_v43, %v2404_v21  ;;  %v2412_v6 = vsel %vm1681_vm5, %v2404_v21, %v2396_v43  ;;  %2680 = vmatpush1.bf16.msra.mxu1 %v2587_v23  ;;  %v2447_v43 = vmul.f32 %v2442_v55, %v8396_v5  ;;  %v2594_v23 = vpack.c.bf16 %v2448_v46, %v2446_v34 }
 0x6fd   : > { %v2419_v1 = vmul.f32 %v2412_v6, %v8382_v2  ;;  %v2420_v15 = vmul.f32 %v2408_v40, %v8385_v49  ;;  %2681 = vmatprep.subr.bf16.mxu1 %v2590_v29  ;;  %v2402_v4 = vpop.permute.xlu1 %2401  ;;  %v2598_v46 = vpack.c.bf16 %v8778_v63, %v8783_v16  ;;  %v2470_v34 = vsel %vm1725_vm7, %v8974_v22, %v8978_v11 }
 0x6fe   : > { %v2407_v53 = vsel %vm1681_vm5, %v2394_v3, %v2402_v4  ;;  %v2411_v7 = vsel %vm1681_vm5, %v2402_v4, %v2394_v3  ;;  %v2593_v21 = vpack.c.bf16 %v2447_v43, %v2445_v52  ;;  %v2469_v63 = vsel %vm1725_vm7, %v8976_v60, %v8980_v8 }
 0x6ff   : > { %v2417_v31 = vmul.f32 %v2411_v7, %v8382_v2  ;;  %v2418_v50 = vmul.f32 %v2407_v53, %v8385_v49  ;;  %v2428_v44 = vpop.permute.xlu0 %2427  ;;  %v2474_v53 = vsel %vm1725_vm7, %v8978_v11, %v8974_v22  ;;  %v2473_v7 = vsel %vm1725_vm7, %v8980_v8, %v8976_v60 }
 0x700   : > { %2682 = vmatpush1.bf16.msra.mxu1 %v2589_v9  ;;  %v2597_v16 = vpack.c.bf16 %v8771_v39, %v8773_v18  ;;  %v2477_v22 = vmul.f32 %v2469_v63, %v8448_v17  ;;  %v2506_v39 = vsel %vm1747_vm8, %v8986_v10, %v8982_v36  ;;  %v2599_v18 = vpack.c.bf16 %v8829_v12, %v8833_v25 }
 0x701   : > { %v2591_v24 = vpack.c.bf16 %v2419_v1, %v2417_v31  ;;  %v2426_v45 = vpop.permute.xlu1 %2425  ;;  %v2592_v19 = vpack.c.bf16 %v2420_v15, %v2418_v50  ;;  %v2480_v31 = vmul.f32 %v2474_v53, %v8426_v41  ;;  %v2478_v50 = vmul.f32 %v2473_v7, %v8426_v41 }
 0x702   : > { %v2502_v12 = vsel %vm1747_vm8, %v8982_v36, %v8986_v10  ;;  %v2512_v25 = vmul.f32 %v2506_v39, %v8463_v42 }
 0x703   : > { %2683 = vmatprep.subr.bf16.mxu1 %v2592_v19  ;;  %v2436_v54 = vpop.permute.xlu0 %2435  ;;  %v2602_v60 = vpack.c.bf16 %v2480_v31, %v2478_v50 }
 0x704   : > { %v2440_v59 = vsel %vm1703_vm6, %v2428_v44, %v2436_v54  ;;  %v2444_v20 = vsel %vm1703_vm6, %v2436_v54, %v2428_v44  ;;  %2684 = vmatpush1.bf16.msra.mxu1 %v2591_v24  ;;  %v2600_v24 = vpack.c.bf16 %v8837_v14, %v8841_v62  ;;  %v2505_v14 = vsel %vm1747_vm8, %v8988_v33, %v8984_v56 }
 0x705   : > { %v2451_v3 = vmul.f32 %v2444_v20, %v8396_v5  ;;  %v2452_v61 = vmul.f32 %v2440_v59, %v8392_v51  ;;  %2685 = vmatprep.subr.bf16.mxu1 %v2594_v23  ;;  %v2434_v32 = vpop.permute.xlu1 %2433  ;;  %v2501_v54 = vsel %vm1747_vm8, %v8984_v56, %v8988_v33  ;;  %v2510_v23 = vmul.f32 %v2505_v14, %v8463_v42 }
 0x706   : > { %v2439_v29 = vsel %vm1703_vm6, %v2426_v45, %v2434_v32  ;;  %v2443_v47 = vsel %vm1703_vm6, %v2434_v32, %v2426_v45  ;;  %v2479_v45 = vmul.f32 %v2470_v34, %v8448_v17  ;;  %v2511_v56 = vmul.f32 %v2502_v12, %v8481_v58 }
 0x707   : > { %v2449_v40 = vmul.f32 %v2443_v47, %v8396_v5  ;;  %v2450_v6 = vmul.f32 %v2439_v29, %v8392_v51  ;;  %v2460_v9 = vpop.permute.xlu0 %2459  ;;  %v2509_v33 = vmul.f32 %v2501_v54, %v8481_v58 }
 0x708   : > { %2686 = vmatpush1.bf16.msra.mxu1 %v2593_v21  ;;  %v2601_v43 = vpack.c.bf16 %v2479_v45, %v2477_v22 }
 0x709   : > { %v2595_v1 = vpack.c.bf16 %v2451_v3, %v2449_v40  ;;  %v9086_v15 = vpop.permute.xlu1 %2517  ;;  %v2596_v4 = vpack.c.bf16 %v2452_v61, %v2450_v6 }
 0x70b   : > { %2687 = vmatprep.subr.bf16.mxu1 %v2596_v4  ;;  %v2468_v55 = vpop.permute.xlu0 %2467 }
 0x70c   : > { %2688 = vmatpush1.bf16.msra.mxu1 %v2595_v1  ;;  %v2472_v8 = vsel %vm1725_vm7, %v2460_v9, %v2468_v55  ;;  %v2476_v19 = vsel %vm1725_vm7, %v2468_v55, %v2460_v9  ;;  %v2606_v1 = vpack.c.bf16 %v2512_v25, %v2510_v23  ;;  %v2605_v55 = vpack.c.bf16 %v2511_v56, %v2509_v33  ;;  %v7528_v56 = vld [vmem:[%s11208_s8] ss:$12 sps:$4 sm:$0xff]  }
 0x70d   : > { %2689 = vmatprep.subr.bf16.mxu1 %v2598_v46  ;;  %v9098_v26 = vpop.permute.xlu1 %2525  ;;  %v2483_v3 = vmul.f32 %v2472_v8, %v8448_v17  ;;  %v2484_v36 = vmul.f32 %v2476_v19, %v8426_v41 }
 0x70e   : > { %v2537_v46 = vsel %vm1769_vm9, %v9098_v26, %v9086_v15  ;;  %v2533_v22 = vsel %vm1769_vm9, %v9086_v15, %v9098_v26 }
 0x70f   : > { %v2492_v44 = vpop.permute.xlu0 %2491  ;;  %v2541_v19 = vmul.f32 %v2533_v22, %v8497_v0 }
 0x710   : > { %2690 = vmatpush1.bf16.msra.mxu1 %v2597_v16 }
 0x711   : > { %2691 = vmatprep.subr.bf16.mxu1 %v2600_v24  ;;  %v2458_v11 = vpop.permute.xlu1 %2457 }
 0x713   : > { %v2500_v62 = vpop.permute.xlu0 %2499 }
 0x714   : > { %2692 = vmatpush1.bf16.msra.mxu1 %v2599_v18  ;;  %v2504_v40 = vsel %vm1747_vm8, %v2492_v44, %v2500_v62  ;;  %v2508_v6 = vsel %vm1747_vm8, %v2500_v62, %v2492_v44 }
 0x715   : > { %2693 = vmatprep.subr.bf16.mxu1 %v2602_v60  ;;  %v2466_v52 = vpop.permute.xlu1 %2465  ;;  %v2515_v7 = vmul.f32 %v2504_v40, %v8481_v58  ;;  %v2516_v34 = vmul.f32 %v2508_v6, %v8463_v42 }
 0x716   : > { %v2471_v59 = vsel %vm1725_vm7, %v2458_v11, %v2466_v52  ;;  %v2475_v20 = vsel %vm1725_vm7, %v2466_v52, %v2458_v11  ;;  %v2542_v11 = vmul.f32 %v2537_v46, %v8467_v27 }
 0x717   : > { %v2481_v10 = vmul.f32 %v2471_v59, %v8448_v17  ;;  %v2482_v61 = vmul.f32 %v2475_v20, %v8426_v41  ;;  %v2520_v32 = vpop.permute.xlu0 %2519 }
 0x718   : > { %2694 = vmatpush1.bf16.msra.mxu1 %v2601_v43 }
 0x719   : > { %v2603_v21 = vpack.c.bf16 %v2483_v3, %v2481_v10  ;;  %v2490_v29 = vpop.permute.xlu1 %2489  ;;  %v2604_v47 = vpack.c.bf16 %v2484_v36, %v2482_v61 }
 0x71b   : > { %2695 = vmatprep.subr.bf16.mxu1 %v2604_v47  ;;  %v2528_v9 = vpop.permute.xlu0 %2527 }
 0x71c   : > { %v2538_v4 = vsel %vm1769_vm9, %v2528_v9, %v2520_v32  ;;  %2696 = vmatpush1.bf16.msra.mxu1 %v2603_v21  ;;  %v2534_v31 = vsel %vm1769_vm9, %v2520_v32, %v2528_v9 }
 0x71d   : > { %2697 = vmatprep.subr.bf16.mxu1 %v2606_v1  ;;  %v2498_v53 = vpop.permute.xlu1 %2497  ;;  %v2544_v50 = vmul.f32 %v2538_v4, %v8467_v27  ;;  %v2543_v62 = vmul.f32 %v2534_v31, %v8497_v0 }
 0x71e   : > { %v2503_v63 = vsel %vm1747_vm8, %v2490_v29, %v2498_v53  ;;  %v2507_v16 = vsel %vm1747_vm8, %v2498_v53, %v2490_v29  ;;  %v7531_v29 = vld [vmem:[%s11208_s8 + $0x1c] ss:$12 sps:$4 sm:$0xff]  }
 0x71f   : > { %v2513_v44 = vmul.f32 %v2503_v63, %v8481_v58  ;;  %v2514_v24 = vmul.f32 %v2507_v16, %v8463_v42  ;;  %v2524_v45 = vpop.permute.xlu0 %2523  ;;  %v2610_v8 = vpack.c.bf16 %v2544_v50, %v2542_v11  ;;  %v2609_v52 = vpack.c.bf16 %v2543_v62, %v2541_v19  ;;  %v7533_v16 = vld [vmem:[%s11208_s8 + $0x18] ss:$12 sps:$4 sm:$0xff]   ;;  %v7535_v19 = vld [vmem:[%s11208_s8 + $0x20] ss:$12 sps:$4 sm:$0xff]  }
 0x720   : > { %2698 = vmatpush1.bf16.msra.mxu1 %v2605_v55 }
 0x721   : > { %v2607_v39 = vpack.c.bf16 %v2515_v7, %v2513_v44  ;;  %v2522_v18 = vpop.permute.xlu1 %2521  ;;  %v2608_v14 = vpack.c.bf16 %v2516_v34, %v2514_v24 }
 0x723   : > { %2699 = vmatprep.subr.bf16.mxu1 %v2608_v14  ;;  %v2532_v60 = vpop.permute.xlu0 %2531  ;;  %v11210_v14 = vmov 0  }
 0x724   : > { %v2536_v43 = vsel %vm1769_vm9, %v2524_v45, %v2532_v60  ;;  %v2540_v12 = vsel %vm1769_vm9, %v2532_v60, %v2524_v45  ;;  %2700 = vmatpush1.bf16.msra.mxu1 %v2607_v39 }
 0x725   : > { %v2547_v15 = vmul.f32 %v2536_v43, %v8497_v0  ;;  %v2548_v26 = vmul.f32 %v2540_v12, %v8467_v27  ;;  %2701 = vmatprep.subr.bf16.mxu1 %v2610_v8  ;;  %v2530_v25 = vpop.permute.xlu1 %2529  ;;  %v7534_v8 = vld [vmem:[%s11208_s8 + $0x8] ss:$12 sps:$4 sm:$0xff]   ;;  %v7871_v43 = vld [vmem:[%s11073_s6] sm:$0xff] }
 0x726   : > { %v2535_v54 = vsel %vm1769_vm9, %v2522_v18, %v2530_v25  ;;  %v2539_v23 = vsel %vm1769_vm9, %v2530_v25, %v2522_v18 }
 0x727   : > { %v2545_v59 = vmul.f32 %v2535_v54, %v8497_v0  ;;  %v2546_v20 = vmul.f32 %v2539_v23, %v8467_v27  ;;  %v2552_v3 = vpop.permute.xlu0 %2551 }
 0x728   : > { %2702 = vmatpush1.bf16.msra.mxu1 %v2609_v52 }
 0x729   : > { %v2611_v36 = vpack.c.bf16 %v2547_v15, %v2545_v59  ;;  %v2550_v10 = vpop.permute.xlu1 %2549  ;;  %v2612_v61 = vpack.c.bf16 %v2548_v26, %v2546_v20 }
 0x72b   : > { %2703 = vmatprep.subr.bf16.mxu1 %v2612_v61  ;;  %v2560_v32 = vpop.permute.xlu0 %2559 }
 0x72c   : > { %v2566_v33 = vsel %vm1791_vm10, %v2552_v3, %v2560_v32  ;;  %v2570_v21 = vsel %vm1791_vm10, %v2560_v32, %v2552_v3  ;;  %2704 = vmatpush1.bf16.msra.mxu1 %v2611_v36 }
 0x72d   : > { %v2575_v47 = vmul.f32 %v2566_v33, %v8487_v35  ;;  %v2576_v40 = vmul.f32 %v2570_v21, %v8490_v37  ;;  %v2558_v6 = vpop.permute.xlu1 %2557 }
 0x72e   : > { %v2565_v9 = vsel %vm1791_vm10, %v2550_v10, %v2558_v6  ;;  %v2569_v1 = vsel %vm1791_vm10, %v2558_v6, %v2550_v10 }
 0x72f   : > { %v2573_v4 = vmul.f32 %v2565_v9, %v8487_v35  ;;  %v2574_v55 = vmul.f32 %v2569_v1, %v8490_v37  ;;  %2706 = vmatmul.mubr.bf16.vlgmr.msra.gmra.mrb[24].mxu1 %v7528_v56  ;;  %v2556_v46 = vpop.permute.xlu0 %2555 }
 0x730   : > { %2715 = vmatprep.mubr.bf16.mxu1 %v7531_v29 }
 0x731   : > { %v2613_v53 = vpack.c.bf16 %v2575_v47, %v2573_v4  ;;  %v2554_v7 = vpop.permute.xlu1 %2553  ;;  %v2614_v34 = vpack.c.bf16 %v2576_v40, %v2574_v55 }
 0x733   : > { %2726 = vmatprep.subr.bf16.mxu1 %v2614_v34  ;;  %v2564_v63 = vpop.permute.xlu0 %2563 }
 0x734   : > { %v2568_v31 = vsel %vm1791_vm10, %v2556_v46, %v2564_v63  ;;  %v2572_v50 = vsel %vm1791_vm10, %v2564_v63, %v2556_v46  ;;  %2727 = vmatpush1.bf16.msra.mxu1 %v2613_v53 }
 0x735   : > { %v2579_v44 = vmul.f32 %v2568_v31, %v8487_v35  ;;  %v2580_v24 = vmul.f32 %v2572_v50, %v8490_v37  ;;  %v2562_v45 = vpop.permute.xlu1 %2561 }
 0x736   : > { %v2567_v22 = vsel %vm1791_vm10, %v2554_v7, %v2562_v45  ;;  %v2571_v11 = vsel %vm1791_vm10, %v2562_v45, %v2554_v7 }
 0x737   : > { %v2577_v39 = vmul.f32 %v2567_v22, %v8487_v35  ;;  %v2578_v18 = vmul.f32 %v2571_v11, %v8490_v37  ;;  %2716 = vmatmul.mubr.bf16.gmra.mrb[28].mxu1 %v7533_v16 }
 0x738   : > { %2758 = vmatprep.mubr.bf16.mxu1 %v11210_v14 }
 0x739   : > { %v2615_v62 = vpack.c.bf16 %v2579_v44, %v2577_v39  ;;  %v2616_v60 = vpack.c.bf16 %v2580_v24, %v2578_v18 }
 0x73b   : > { %2728 = vmatprep.subr.bf16.mxu1 %v2616_v60 }
 0x73c   : > { %2729 = vmatpush1.bf16.msra.mxu1 %v2615_v62 }
 0x73f   : > { %6708 = vmatmul.mubr.msk.bf16.vlgmr.msra.gmra.mrb[24].mxu1 %vm759_vm0, %v7534_v8  ;;  %v9240_v8 = vld [vmem:[%s11073_s6 + $0x8] sm:$0xff] }
 0x740   : > { %2768 = vmatprep.mubr.bf16.mxu1 %v11210_v14 }
 0x744   : > { %v2625_v15 = vpop.permute.xlu0 %2624 }
 0x746   : > { %v2620_v12 = vpop.permute.xlu1 %2619 }
 0x747   : > { %6709 = vmatmul.mubr.msk.bf16.gmra.mrb[28].mxu1 %vm759_vm0, %v7535_v19  ;;  %v9247_v19 = vld [vmem:[%s11073_s6 + $0x10] sm:$0xff] }
 0x748   : > { %7237 = vmatprep.mubr.msk.f32.mxu1 %vm759_vm0, %v7871_v43  ;;  %v2787_v25 = vpop.permute.xlu0 %2786 }
 0x74a   : > { %v2782_v26 = vpop.permute.xlu1 %2781 }
 0x74c   : > { %v2635_v21 = vpop.permute.xlu0 %2634 }
 0x74e   : > { %v2630_v61 = vpop.permute.xlu1 %2629 }
 0x750   : > { %v2797_v63 = vpop.permute.xlu0 %2796 }
 0x752   : > { %v2792_v4 = vpop.permute.xlu1 %2791 }
 0x812   : > { %v2760_v52 = vpop.f32.mrb[24].mxu1 }
 0x813   : > { %v7457_v54 = vadd.f32 %v2760_v52, %v2620_v12  ;;  %v2762_v23 = vpop.f32.mrb[25].mxu1 }
 0x814   : > { %v7458_v59 = vadd.f32 %v2762_v23, %v2620_v12  ;;  %v2764_v20 = vpop.f32.mrb[26].mxu1  ;;  %v9254_v12 = vld [vmem:[%s11073_s6 + $0x18] sm:$0xff] }
 0x815   : > { %v2799_v3 = vadd.f32 %v7457_v54, %v2782_v26  ;;  %v7459_v36 = vadd.f32 %v2764_v20, %v2625_v15  ;;  %v2766_v10 = vpop.f32.mrb[27].mxu1 }
 0x816   : > { %v2800_v32 = vadd.f32 %v7458_v59, %v2782_v26  ;;  %v7460_v56 = vadd.f32 %v2766_v10, %v2625_v15 }
 0x817   : > { %v2801_v33 = vadd.f32 %v7459_v36, %v2787_v25 }
 0x818   : > { %v2802_v29 = vadd.f32 %v7460_v56, %v2787_v25  ;;  %v2817_v47 = vadd.f32 %v2800_v32, %v2799_v3 }
 0x81a   : > { %v2770_v40 = vpop.f32.mrb[28].mxu1  ;;  %2818 = vadd.xlane.f32.xlu1 %v2817_v47  ;;  %v2820_v6 = vadd.f32 %v2802_v29, %v2801_v33 }
 0x81b   : > { %v7461_v9 = vadd.f32 %v2770_v40, %v2630_v61  ;;  %v2772_v1 = vpop.f32.mrb[29].mxu1 }
 0x81c   : > { %v7462_v55 = vadd.f32 %v2772_v1, %v2630_v61  ;;  %v2774_v46 = vpop.f32.mrb[30].mxu1  ;;  %2821 = vadd.xlane.f32.xlu0 %v2820_v6 }
 0x81d   : > { %v2803_v53 = vadd.f32 %v7461_v9, %v2792_v4  ;;  %v7463_v7 = vadd.f32 %v2774_v46, %v2635_v21  ;;  %v2776_v34 = vpop.f32.mrb[31].mxu1 }
 0x81e   : > { %v2804_v16 = vadd.f32 %v7462_v55, %v2792_v4  ;;  %v7464_v31 = vadd.f32 %v2776_v34, %v2635_v21  ;;  %v6710_v34 = vld [vmem:[%s11080_s13 + $0x80] sm:$0xff] }
 0x81f   : > { %v2805_v50 = vadd.f32 %v7463_v7, %v2797_v63 }
 0x820   : > { %v2806_v44 = vadd.f32 %v7464_v31, %v2797_v63  ;;  %v2823_v24 = vadd.f32 %v2804_v16, %v2803_v53  ;;  %v6714_v63 = vld [vmem:[%s11080_s13 + $0xa0] sm:$0xff]  ;;  %v6712_v31 = vld [vmem:[%s11080_s13 + $0x90] sm:$0xff] }
 0x822   : > { %2824 = vadd.xlane.f32.xlu0 %v2823_v24  ;;  %v2826_v45 = vadd.f32 %v2806_v44, %v2805_v50 }
 0x824   : > { %2827 = vadd.xlane.f32.xlu1 %v2826_v45 }
 0x8a7   : > { %v2819_v22 = vpop.xlane.xlu1 %2818 }
 0x8a9   : > { %v2822_v11 = vpop.xlane.xlu0 %2821 }
 0x8aa   : > { %v7393_v39 = vpack.c.bf16 %v2822_v11, %v2819_v22 }
 0x8ac   : > { %7394 = vmatprep.subr.bf16.mxu0 %v7393_v39 }
 0x8ad   : > { %7396 = vmatpush3.bf16.msra.mxu0 %v7393_v39 }
 0x8af   : > { %v2825_v18 = vpop.xlane.xlu0 %2824 }
 0x8b1   : > { %v2828_v62 = vpop.xlane.xlu1 %2827 }
 0x8b2   : > { %v7397_v60 = vpack.c.bf16 %v2828_v62, %v2825_v18 }
 0x8b4   : > { %7398 = vmatprep.subr.bf16.mxu0 %v7397_v60 }
 0x8b5   : > { %7400 = vmatpush3.bf16.msra.mxu0 %v7397_v60 }
 0x8b8   : > { %7210 = vmatmul.mubr.msk.f32.vlgmr.msra.gmra.mrb[20].mxu0 %vm759_vm0, %v9240_v8 }
 0x8b9   : > { %7212 = vmatprep.mubr.msk.f32.mxu0 %vm759_vm0, %v9247_v19 }
 0x8bc   : > { %7213 = vmatmul.mubr.msk.f32.gmra.mrb[22].mxu0 %vm759_vm0, %v9254_v12 }
 0x8bd   : > { %7223 = vmatprep.mubr.msk.f32.mxu0 %vm759_vm0, %v7871_v43 }
 0x98b   : > { %v7211_v15 = vpop.f32.mrb[20].mxu0 }
 0x98c   : > { %2921 = vperm.xlu1 %7525, %v7211_v15   ;;  %v2895_v26 = vpop.f32.mrb[21].mxu0 }
 0x98d   : > { %2916 = vperm.xlu0 %7524, %v2895_v26  }
 0x98f   : > { %v7214_v25 = vpop.f32.mrb[22].mxu0 }
 0x990   : > { %v2905_v52 = vpop.f32.mrb[23].mxu0 }
 0x991   : > { %2931 = vperm.xlu0 %7524, %v7214_v25   ;;  %2926 = vperm.xlu1 %7525, %v2905_v52  }
 0xa0b   : > { %v2922_v54 = vpop.permute.xlu1 %2921 }
 0xa0c   : > { %v9259_v23 = vsub.f32 %v2801_v33, %v2922_v54  ;;  %v9261_v59 = vsub.f32 %v2802_v29, %v2922_v54  ;;  %v2917_v20 = vpop.permute.xlu0 %2916 }
 0xa0d   : > { %v9263_v36 = vsub.f32 %v2799_v3, %v2917_v20  ;;  %v9265_v10 = vsub.f32 %v2800_v32, %v2917_v20 }
 0xa0e   : > { %v2944_v43 = vmul.f32 %v9259_v23, %v9259_v23  ;;  %v2945_v61 = vmul.f32 %v9261_v59, %v9261_v59 }
 0xa0f   : > { %v2942_v56 = vmul.f32 %v9263_v36, %v9263_v36  ;;  %v2943_v33 = vmul.f32 %v9265_v10, %v9265_v10 }
 0xa10   : > { %v2932_v21 = vpop.permute.xlu0 %2931  ;;  %v2927_v29 = vpop.permute.xlu1 %2926  ;;  %v2953_v47 = vadd.f32 %v2945_v61, %v2944_v43 }
 0xa11   : > { %v9275_v40 = vsub.f32 %v2805_v50, %v2932_v21  ;;  %v9277_v3 = vsub.f32 %v2806_v44, %v2932_v21  ;;  %v9279_v32 = vsub.f32 %v2803_v53, %v2927_v29  ;;  %v9281_v6 = vsub.f32 %v2804_v16, %v2927_v29  ;;  %v6711_v16 = vld [vmem:[%s11080_s13 + $0x88] sm:$0xff]  ;;  %v6713_v44 = vld [vmem:[%s11080_s13 + $0x98] sm:$0xff] }
 0xa12   : > { %2954 = vadd.xlane.f32.xlu0 %v2953_v47  ;;  %v2950_v9 = vadd.f32 %v2943_v33, %v2942_v56  ;;  %v6715_v50 = vld [vmem:[%s11080_s13 + $0xa8] sm:$0xff]  ;;  %v6717_v56 = vld [vmem:[%s11080_s13 + $0xb8] sm:$0xff] }
 0xa13   : > { %v2948_v1 = vmul.f32 %v9275_v40, %v9275_v40  ;;  %v2949_v4 = vmul.f32 %v9277_v3, %v9277_v3  ;;  %v2946_v55 = vmul.f32 %v9279_v32, %v9279_v32  ;;  %v2947_v46 = vmul.f32 %v9281_v6, %v9281_v6 }
 0xa14   : > { %2951 = vadd.xlane.f32.xlu1 %v2950_v9 }
 0xa15   : > { %v2959_v7 = vadd.f32 %v2949_v4, %v2948_v1  ;;  %v2956_v53 = vadd.f32 %v2947_v46, %v2946_v55 }
 0xa17   : > { %2957 = vadd.xlane.f32.xlu0 %v2956_v53 }
 0xa18   : > { %2960 = vadd.xlane.f32.xlu1 %v2959_v7 }
 0xa29   : > { %3081 = vperm.xlu1 %7525, %v6710_v34  }
 0xa2d   : > { %3109 = vperm.xlu1 %7525, %v6714_v63   ;;  %3086 = vperm.xlu0 %7524, %v6711_v16  }
 0xa31   : > { %3091 = vperm.xlu1 %7525, %v6712_v31   ;;  %3114 = vperm.xlu0 %7524, %v6715_v50  }
 0xa35   : > { %3096 = vperm.xlu0 %7524, %v6713_v44  }
 0xa9f   : > { %v2955_v24 = vpop.xlane.xlu0 %2954 }
 0xaa1   : > { %v2952_v45 = vpop.xlane.xlu1 %2951 }
 0xaa2   : > { %v7401_v22 = vpack.c.bf16 %v2955_v24, %v2952_v45 }
 0xaa4   : > { %7402 = vmatprep.subr.bf16.mxu0 %v7401_v22  ;;  %v2958_v11 = vpop.xlane.xlu0 %2957 }
 0xaa5   : > { %7404 = vmatpush3.bf16.msra.mxu0 %v7401_v22  ;;  %v2961_v39 = vpop.xlane.xlu1 %2960 }
 0xaa6   : > { %v7405_v18 = vpack.c.bf16 %v2961_v39, %v2958_v11 }
 0xaa8   : > { %7406 = vmatprep.subr.bf16.mxu0 %v7405_v18 }
 0xaa9   : > { %7408 = vmatpush3.bf16.msra.mxu0 %v7405_v18  ;;  %v3082_v33 = vpop.permute.xlu1 %3081 }
 0xaac   : > { %7224 = vmatmul.mubr.msk.f32.vlgmr.msra.gmra.mrb[24].mxu0 %vm759_vm0, %v9240_v8  ;;  %v3087_v21 = vpop.permute.xlu0 %3086 }
 0xaad   : > { %7226 = vmatprep.mubr.msk.f32.mxu0 %vm759_vm0, %v9247_v19  ;;  %v3110_v29 = vpop.permute.xlu1 %3109 }
 0xab0   : > { %7227 = vmatmul.mubr.msk.f32.gmra.mrb[26].mxu0 %vm759_vm0, %v9254_v12  ;;  %v6716_v12 = vld [vmem:[%s11080_s13 + $0xb0] sm:$0xff]  ;;  %v3115_v47 = vpop.permute.xlu0 %3114 }
 0xab1   : > { %v3092_v9 = vpop.permute.xlu1 %3091 }
 0xab4   : > { %v3097_v1 = vpop.permute.xlu0 %3096 }
 0xb7f   : > { %v7225_v62 = vpop.f32.mrb[24].mxu0 }
 0xb80   : > { %v3034_v60 = vadd.f32 1e-05, %v7225_v62  ;;  %v3028_v15 = vpop.f32.mrb[25].mxu0 }
 0xb81   : > { %v3029_v26 = vadd.f32 1e-05, %v3028_v15 }
 0xb82   : > { %7703 = vrsqrt.f32 %v3034_v60 }
 0xb83   : > { %7705 = vrsqrt.f32 %v3029_v26  ;;  %v7228_v25 = vpop.f32.mrb[26].mxu0 }
 0xb84   : > { %v3044_v52 = vadd.f32 1e-05, %v7228_v25  ;;  %v3038_v54 = vpop.f32.mrb[27].mxu0 }
 0xb85   : > { %v3039_v20 = vadd.f32 1e-05, %v3038_v54 }
 0xb86   : > { %7707 = vrsqrt.f32 %v3044_v52 }
 0xb87   : > { %7709 = vrsqrt.f32 %v3039_v20 }
 0xb8c   : > { %v7704_v43 = vpop.eup %7703 }
 0xb8d   : > { %v7706_v8 = vpop.eup %7705  ;;  %3058 = vperm.xlu1 %7525, %v7704_v43  }
 0xb8e   : > { %3053 = vperm.xlu0 %7524, %v7706_v8  }
 0xb90   : > { %v7708_v19 = vpop.eup %7707 }
 0xb91   : > { %v7710_v61 = vpop.eup %7709 }
 0xb92   : > { %3063 = vperm.xlu1 %7525, %v7710_v61   ;;  %3068 = vperm.xlu0 %7524, %v7708_v19  }
 0xb96   : > { %3119 = vperm.xlu1 %7525, %v6716_v12   ;;  %3124 = vperm.xlu0 %7524, %v6717_v56  }
 0xc0c   : > { %v3059_v4 = vpop.permute.xlu1 %3058 }
 0xc0d   : > { %v3073_v55 = vmul.f32 %v3059_v4, %v9259_v23  ;;  %v3074_v46 = vmul.f32 %v3059_v4, %v9261_v59  ;;  %v3054_v7 = vpop.permute.xlu0 %3053 }
 0xc0e   : > { %v3071_v53 = vmul.f32 %v3054_v7, %v9263_v36  ;;  %v3072_v34 = vmul.f32 %v3054_v7, %v9265_v10 }
 0xc0f   : > { %v3101_v63 = vmul.f32 %v3087_v21, %v3073_v55  ;;  %v3102_v16 = vmul.f32 %v3087_v21, %v3074_v46 }
 0xc10   : > { %v3099_v31 = vmul.f32 %v3082_v33, %v3071_v53  ;;  %v3100_v50 = vmul.f32 %v3082_v33, %v3072_v34 }
 0xc11   : > { %v3129_v44 = vadd.f32 %v3115_v47, %v3101_v63  ;;  %v3130_v24 = vadd.f32 %v3115_v47, %v3102_v16  ;;  %v3069_v54 = vpop.permute.xlu0 %3068  ;;  %v3064_v19 = vpop.permute.xlu1 %3063 }
 0xc12   : > { %v3127_v45 = vadd.f32 %v3110_v29, %v3099_v31  ;;  %v3128_v22 = vadd.f32 %v3110_v29, %v3100_v50  ;;  %v3077_v12 = vmul.f32 %v3069_v54, %v9275_v40  ;;  %v3075_v21 = vmul.f32 %v3064_v19, %v9279_v32 }
 0xc13   : > { %v6728_v11 = vmul.f32 -1.442695, %v3129_v44  ;;  %v6729_v39 = vmul.f32 -1.442695, %v3130_v24  ;;  %v3078_v47 = vmul.f32 %v3069_v54, %v9277_v3  ;;  %v3076_v55 = vmul.f32 %v3064_v19, %v9281_v6 }
 0xc14   : > { %v6726_v18 = vmul.f32 -1.442695, %v3127_v45  ;;  %v6727_v62 = vmul.f32 -1.442695, %v3128_v22  ;;  %v3105_v4 = vmul.f32 %v3097_v1, %v3077_v12  ;;  %v3103_v46 = vmul.f32 %v3092_v9, %v3075_v21 }
 0xc15   : > { %7711 = vpow2.f32 %v6728_v11  ;;  %v3125_v40 = vpop.permute.xlu0 %3124  ;;  %v3120_v7 = vpop.permute.xlu1 %3119  ;;  %v3106_v32 = vmul.f32 %v3097_v1, %v3078_v47  ;;  %v3104_v34 = vmul.f32 %v3092_v9, %v3076_v55 }
 0xc16   : > { %7713 = vpow2.f32 %v6729_v39  ;;  %v3133_v53 = vadd.f32 %v3125_v40, %v3105_v4  ;;  %v3131_v63 = vadd.f32 %v3120_v7, %v3103_v46 }
 0xc17   : > { %7715 = vpow2.f32 %v6726_v18  ;;  %v3134_v3 = vadd.f32 %v3125_v40, %v3106_v32  ;;  %v3132_v6 = vadd.f32 %v3120_v7, %v3104_v34  ;;  %v6743_v34 = vld [vmem:[%s11080_s13 + $0xc8] sm:$0xff] }
 0xc18   : > { %7717 = vpow2.f32 %v6727_v62  ;;  %v6732_v16 = vmul.f32 -1.442695, %v3133_v53  ;;  %v6730_v31 = vmul.f32 -1.442695, %v3131_v63 }
 0xc19   : > { %v6733_v1 = vmul.f32 -1.442695, %v3134_v3  ;;  %v6731_v9 = vmul.f32 -1.442695, %v3132_v6 }
 0xc1f   : > { %v7712_v23 = vpop.eup %7711 }
 0xc20   : > { %v7714_v59 = vpop.eup %7713  ;;  %v3161_v36 = vadd.f32 1.0, %v7712_v23 }
 0xc21   : > { %v7716_v10 = vpop.eup %7715  ;;  %v3162_v60 = vadd.f32 1.0, %v7714_v59 }
 0xc22   : > { %v7718_v15 = vpop.eup %7717  ;;  %7719 = vrcp.f32 %v3161_v36  ;;  %v3159_v26 = vadd.f32 1.0, %v7716_v10 }
 0xc23   : > { %7721 = vrcp.f32 %v3162_v60  ;;  %v3160_v25 = vadd.f32 1.0, %v7718_v15 }
 0xc24   : > { %7723 = vrcp.f32 %v3159_v26 }
 0xc25   : > { %7725 = vrcp.f32 %v3160_v25  ;;  %v7538_v25 = vld [vmem:[%s11208_s8 + $0x34] ss:$12 sps:$4 sm:$0xff]  }
 0xc26   : > { %7727 = vpow2.f32 %v6732_v16  ;;  %3585 = vmatprep.mubr.bf16.mxu0 %v7538_v25 }
 0xc27   : > { %7729 = vpow2.f32 %v6730_v31 }
 0xc28   : > { %7731 = vpow2.f32 %v6733_v1  ;;  %v6744_v1 = vld [vmem:[%s11080_s13 + $0xd0] sm:$0xff] }
 0xc29   : > { %7733 = vpow2.f32 %v6731_v9 }
 0xc2c   : > { %v7720_v52 = vpop.eup %7719 }
 0xc2d   : > { %v7722_v20 = vpop.eup %7721  ;;  %v9325_v43 = vmul.f32 %v7720_v52, %v3129_v44 }
 0xc2e   : > { %v7724_v8 = vpop.eup %7723  ;;  %v9332_v33 = vmul.f32 %v7722_v20, %v3130_v24 }
 0xc2f   : > { %v9327_v61 = vmul.f32 %v7724_v8, %v3127_v45  ;;  %3207 = vrot.lane.b32.xlu0 %v9325_v43, %s11211_s4  ;;  %v7726_v56 = vpop.eup %7725 }
 0xc30   : > { %v9337_v29 = vmul.f32 %v7726_v56, %v3128_v22  ;;  %v7728_v50 = vpop.eup %7727 }
 0xc31   : > { %3205 = vrot.lane.b32.xlu1 %v9327_v61, %s11211_s4  ;;  %v7730_v44 = vpop.eup %7729  ;;  %v3165_v24 = vadd.f32 1.0, %v7728_v50 }
 0xc32   : > { %v7732_v45 = vpop.eup %7731  ;;  %v3163_v22 = vadd.f32 1.0, %v7730_v44 }
 0xc33   : > { %3215 = vrot.lane.b32.xlu0 %v9332_v33, %s11211_s4  ;;  %v7734_v11 = vpop.eup %7733  ;;  %v3166_v39 = vadd.f32 1.0, %v7732_v45  ;;  %7735 = vrcp.f32 %v3165_v24 }
 0xc34   : > { %v3164_v18 = vadd.f32 1.0, %v7734_v11  ;;  %7737 = vrcp.f32 %v3163_v22 }
 0xc35   : > { %3213 = vrot.lane.b32.xlu1 %v9337_v29, %s11211_s4  ;;  %7739 = vrcp.f32 %v3166_v39 }
 0xc36   : > { %7741 = vrcp.f32 %v3164_v18 }
 0xc37   : > { %3239 = vrot.lane.b32.xlu0 %v9325_v43, %s11212_s27 }
 0xc39   : > { %3237 = vrot.lane.b32.xlu1 %v9327_v61, %s11212_s27 }
 0xc3b   : > { %3247 = vrot.lane.b32.xlu0 %v9332_v33, %s11212_s27 }
 0xc3d   : > { %3245 = vrot.lane.b32.xlu1 %v9337_v29, %s11212_s27  ;;  %v7736_v62 = vpop.eup %7735 }
 0xc3e   : > { %v7738_v23 = vpop.eup %7737  ;;  %v9383_v59 = vmul.f32 %v7736_v62, %v3133_v53 }
 0xc3f   : > { %3271 = vrot.lane.b32.xlu0 %v9325_v43, %s11203_s30  ;;  %v7740_v36 = vpop.eup %7739  ;;  %v9387_v10 = vmul.f32 %v7738_v23, %v3131_v63 }
 0xc40   : > { %v7742_v60 = vpop.eup %7741  ;;  %v9391_v15 = vmul.f32 %v7740_v36, %v3134_v3  ;;  %v6742_v3 = vld [vmem:[%s11080_s13 + $0xc0] sm:$0xff] }
 0xc41   : > { %3269 = vrot.lane.b32.xlu1 %v9327_v61, %s11203_s30  ;;  %v9395_v26 = vmul.f32 %v7742_v60, %v3132_v6  ;;  %v6745_v6 = vld [vmem:[%s11080_s13 + $0xd8] sm:$0xff] }
 0xc43   : > { %3279 = vrot.lane.b32.xlu0 %v9332_v33, %s11203_s30 }
 0xc45   : > { %3277 = vrot.lane.b32.xlu1 %v9337_v29, %s11203_s30 }
 0xc47   : > { %3303 = vrot.lane.b32.xlu0 %v9325_v43, %s11204_s29 }
 0xc49   : > { %3301 = vrot.lane.b32.xlu1 %v9327_v61, %s11204_s29 }
 0xc4b   : > { %3311 = vrot.lane.b32.xlu0 %v9332_v33, %s11204_s29 }
 0xc4d   : > { %3309 = vrot.lane.b32.xlu1 %v9337_v29, %s11204_s29 }
 0xc4f   : > { %3335 = vrot.lane.b32.xlu0 %v9325_v43, %s11205_s1 }
 0xc51   : > { %3333 = vrot.lane.b32.xlu1 %v9327_v61, %s11205_s1 }
 0xc53   : > { %3343 = vrot.lane.b32.xlu0 %v9332_v33, %s11205_s1 }
 0xc55   : > { %3341 = vrot.lane.b32.xlu1 %v9337_v29, %s11205_s1 }
 0xc57   : > { %3367 = vrot.lane.b32.xlu0 %v9325_v43, %s11206_s26 }
 0xc59   : > { %3365 = vrot.lane.b32.xlu1 %v9327_v61, %s11206_s26 }
 0xc5b   : > { %3375 = vrot.lane.b32.xlu0 %v9332_v33, %s11206_s26 }
 0xc5d   : > { %3373 = vrot.lane.b32.xlu1 %v9337_v29, %s11206_s26 }
 0xc5f   : > { %3211 = vrot.lane.b32.xlu0 %v9383_v59, %s11211_s4 }
 0xc61   : > { %3209 = vrot.lane.b32.xlu1 %v9387_v10, %s11211_s4 }
 0xc63   : > { %3219 = vrot.lane.b32.xlu0 %v9391_v15, %s11211_s4 }
 0xc65   : > { %3217 = vrot.lane.b32.xlu1 %v9395_v26, %s11211_s4 }
 0xc67   : > { %3243 = vrot.lane.b32.xlu0 %v9383_v59, %s11212_s27 }
 0xc69   : > { %3241 = vrot.lane.b32.xlu1 %v9387_v10, %s11212_s27 }
 0xc6b   : > { %3251 = vrot.lane.b32.xlu0 %v9391_v15, %s11212_s27 }
 0xc6d   : > { %3249 = vrot.lane.b32.xlu1 %v9395_v26, %s11212_s27 }
 0xc6f   : > { %3275 = vrot.lane.b32.xlu0 %v9383_v59, %s11203_s30 }
 0xc71   : > { %3273 = vrot.lane.b32.xlu1 %v9387_v10, %s11203_s30 }
 0xc73   : > { %3283 = vrot.lane.b32.xlu0 %v9391_v15, %s11203_s30 }
 0xc75   : > { %3281 = vrot.lane.b32.xlu1 %v9395_v26, %s11203_s30 }
 0xc77   : > { %3307 = vrot.lane.b32.xlu0 %v9383_v59, %s11204_s29 }
 0xc79   : > { %3305 = vrot.lane.b32.xlu1 %v9387_v10, %s11204_s29 }
 0xc7b   : > { %3315 = vrot.lane.b32.xlu0 %v9391_v15, %s11204_s29 }
 0xc7d   : > { %3313 = vrot.lane.b32.xlu1 %v9395_v26, %s11204_s29 }
 0xc7f   : > { %3339 = vrot.lane.b32.xlu0 %v9383_v59, %s11205_s1 }
 0xc81   : > { %3397 = vrot.lane.b32.xlu1 %v9327_v61, %s11207_s28 }
 0xc83   : > { %3347 = vrot.lane.b32.xlu0 %v9391_v15, %s11205_s1 }
 0xc85   : > { %3405 = vrot.lane.b32.xlu1 %v9337_v29, %s11207_s28 }
 0xc87   : > { %3371 = vrot.lane.b32.xlu0 %v9383_v59, %s11206_s26 }
 0xc89   : > { %3337 = vrot.lane.b32.xlu1 %v9387_v10, %s11205_s1 }
 0xc8b   : > { %3379 = vrot.lane.b32.xlu0 %v9391_v15, %s11206_s26 }
 0xc8d   : > { %3345 = vrot.lane.b32.xlu1 %v9395_v26, %s11205_s1 }
 0xc8f   : > { %3399 = vrot.lane.b32.xlu0 %v9325_v43, %s11207_s28 }
 0xc91   : > { %3369 = vrot.lane.b32.xlu1 %v9387_v10, %s11206_s26 }
 0xc93   : > { %3407 = vrot.lane.b32.xlu0 %v9332_v33, %s11207_s28 }
 0xc95   : > { %3377 = vrot.lane.b32.xlu1 %v9395_v26, %s11206_s26 }
 0xc97   : > { %3403 = vrot.lane.b32.xlu0 %v9383_v59, %s11207_s28 }
 0xc99   : > { %3401 = vrot.lane.b32.xlu1 %v9387_v10, %s11207_s28 }
 0xc9b   : > { %3411 = vrot.lane.b32.xlu0 %v9391_v15, %s11207_s28 }
 0xc9d   : > { %3409 = vrot.lane.b32.xlu1 %v9395_v26, %s11207_s28 }
 0xc9f   : > { %3431 = vrot.lane.b32.xlu0 %v9325_v43, %s11209_s5 }
 0xca1   : > { %3429 = vrot.lane.b32.xlu1 %v9327_v61, %s11209_s5  ;;  %v3208_v52 = vpop.permute.xlu0 %3207 }
 0xca3   : > { %v3206_v54 = vpop.permute.xlu1 %3205  ;;  %3439 = vrot.lane.b32.xlu0 %v9332_v33, %s11209_s5 }
 0xca5   : > { %3437 = vrot.lane.b32.xlu1 %v9337_v29, %s11209_s5  ;;  %v3216_v20 = vpop.permute.xlu0 %3215 }
 0xca6   : > { %v3222_v8 = vsel %vm1638_vm3, %v3208_v52, %v3216_v20  ;;  %v3226_v19 = vsel %vm1638_vm3, %v3216_v20, %v3208_v52 }
 0xca7   : > { %v3231_v12 = vmul.f32 %v3226_v19, %v8365_v38  ;;  %v3232_v56 = vmul.f32 %v3222_v8, %v8333_v30  ;;  %v3214_v21 = vpop.permute.xlu1 %3213  ;;  %3435 = vrot.lane.b32.xlu0 %v9383_v59, %s11209_s5 }
 0xca8   : > { %v3221_v47 = vsel %vm1638_vm3, %v3206_v54, %v3214_v21  ;;  %v3225_v4 = vsel %vm1638_vm3, %v3214_v21, %v3206_v54 }
 0xca9   : > { %v3229_v40 = vmul.f32 %v3225_v4, %v8365_v38  ;;  %v3230_v55 = vmul.f32 %v3221_v47, %v8333_v30  ;;  %3433 = vrot.lane.b32.xlu1 %v9387_v10, %s11209_s5  ;;  %v3240_v46 = vpop.permute.xlu0 %3239 }
 0xcab   : > { %v3461_v7 = vpack.c.bf16 %v3231_v12, %v3229_v40  ;;  %v3238_v32 = vpop.permute.xlu1 %3237  ;;  %3443 = vrot.lane.b32.xlu0 %v9391_v15, %s11209_s5  ;;  %v3462_v53 = vpack.c.bf16 %v3232_v56, %v3230_v55 }
 0xcad   : > { %3441 = vrot.lane.b32.xlu1 %v9395_v26, %s11209_s5  ;;  %3553 = vmatprep.subr.bf16.mxu0 %v3462_v53  ;;  %v3248_v63 = vpop.permute.xlu0 %3247 }
 0xcae   : > { %3554 = vmatpush1.bf16.msra.mxu0 %v3461_v7  ;;  %v3254_v19 = vsel %vm1659_vm4, %v3240_v46, %v3248_v63  ;;  %v3258_v55 = vsel %vm1659_vm4, %v3248_v63, %v3240_v46 }
 0xcaf   : > { %v3246_v16 = vpop.permute.xlu1 %3245  ;;  %3504 = vperm.xlu0 %7524, %v6743_v34   ;;  %v3263_v46 = vmul.f32 %v3258_v55, %v8357_v57 }
 0xcb0   : > { %v3253_v12 = vsel %vm1659_vm4, %v3238_v32, %v3246_v16  ;;  %v3257_v7 = vsel %vm1659_vm4, %v3246_v16, %v3238_v32 }
 0xcb1   : > { %3499 = vperm.xlu1 %7525, %v6742_v3   ;;  %v3272_v31 = vpop.permute.xlu0 %3271  ;;  %v3264_v3 = vmul.f32 %v3254_v19, %v8330_v28  ;;  %v3261_v63 = vmul.f32 %v3257_v7, %v8357_v57 }
 0xcb3   : > { %v3270_v9 = vpop.permute.xlu1 %3269  ;;  %3514 = vperm.xlu0 %7524, %v6745_v6   ;;  %v3262_v6 = vmul.f32 %v3253_v12, %v8330_v28  ;;  %v3465_v55 = vpack.c.bf16 %v3263_v46, %v3261_v63 }
 0xcb5   : > { %3509 = vperm.xlu1 %7525, %v6744_v1   ;;  %v3280_v50 = vpop.permute.xlu0 %3279  ;;  %v3466_v48 = vpack.c.bf16 %v3264_v3, %v3262_v6 }
 0xcb7   : > { %v3278_v44 = vpop.permute.xlu1 %3277 }
 0xcb8   : > { %v3285_v19 = vsel %vm1681_vm5, %v3270_v9, %v3278_v44 }
 0xcb9   : > { %v9500_v24 = vpop.permute.xlu0 %3303 }
 0xcbb   : > { %v9502_v45 = vpop.permute.xlu1 %3301 }
 0xcbd   : > { %v9504_v22 = vpop.permute.xlu0 %3311 }
 0xcbf   : > { %v9506_v11 = vpop.permute.xlu1 %3309 }
 0xcc1   : > { %v9508_v39 = vpop.permute.xlu0 %3335 }
 0xcc3   : > { %v9510_v18 = vpop.permute.xlu1 %3333 }
 0xcc5   : > { %v9512_v62 = vpop.permute.xlu0 %3343 }
 0xcc7   : > { %v9514_v23 = vpop.permute.xlu1 %3341 }
 0xcc9   : > { %v9516_v36 = vpop.permute.xlu0 %3367 }
 0xccb   : > { %v9518_v60 = vpop.permute.xlu1 %3365 }
 0xccd   : > { %v9520_v25 = vpop.permute.xlu0 %3375 }
 0xccf   : > { %v9522_v52 = vpop.permute.xlu1 %3373 }
 0xcd1   : > { %v3212_v54 = vpop.permute.xlu0 %3211 }
 0xcd3   : > { %v3210_v20 = vpop.permute.xlu1 %3209 }
 0xcd5   : > { %v3220_v8 = vpop.permute.xlu0 %3219 }
 0xcd6   : > { %v3224_v56 = vsel %vm1638_vm3, %v3212_v54, %v3220_v8  ;;  %v3228_v21 = vsel %vm1638_vm3, %v3220_v8, %v3212_v54 }
 0xcd7   : > { %v3235_v47 = vmul.f32 %v3228_v21, %v8365_v38  ;;  %v3236_v4 = vmul.f32 %v3224_v56, %v8333_v30  ;;  %v3218_v40 = vpop.permute.xlu1 %3217 }
 0xcd8   : > { %v3223_v53 = vsel %vm1638_vm3, %v3210_v20, %v3218_v40  ;;  %v3227_v34 = vsel %vm1638_vm3, %v3218_v40, %v3210_v20  ;;  %v3286_v20 = vsel %vm1681_vm5, %v3272_v31, %v3280_v50 }
 0xcd9   : > { %v3233_v1 = vmul.f32 %v3227_v34, %v8365_v38  ;;  %v3234_v54 = vmul.f32 %v3223_v53, %v8333_v30  ;;  %v3244_v8 = vpop.permute.xlu0 %3243  ;;  %v3290_v53 = vsel %vm1681_vm5, %v3280_v50, %v3272_v31  ;;  %v3289_v34 = vsel %vm1681_vm5, %v3278_v44, %v3270_v9 }
 0xcda   : > { %v3295_v31 = vmul.f32 %v3290_v53, %v8382_v2  ;;  %v3293_v9 = vmul.f32 %v3289_v34, %v8382_v2 }
 0xcdb   : > { %v3463_v32 = vpack.c.bf16 %v3235_v47, %v3233_v1  ;;  %v3242_v16 = vpop.permute.xlu1 %3241  ;;  %v3464_v56 = vpack.c.bf16 %v3236_v4, %v3234_v54  ;;  %v3296_v1 = vmul.f32 %v3286_v20, %v8385_v49  ;;  %v3294_v54 = vmul.f32 %v3285_v19, %v8385_v49 }
 0xcdd   : > { %3555 = vmatprep.subr.bf16.mxu0 %v3464_v56  ;;  %v3252_v21 = vpop.permute.xlu0 %3251  ;;  %v3470_v56 = vpack.c.bf16 %v3296_v1, %v3294_v54 }
 0xcde   : > { %v3256_v12 = vsel %vm1659_vm4, %v3244_v8, %v3252_v21  ;;  %v3260_v40 = vsel %vm1659_vm4, %v3252_v21, %v3244_v8  ;;  %3556 = vmatpush1.bf16.msra.mxu0 %v3463_v32  ;;  %v3318_v32 = vsel %vm1703_vm6, %v9500_v24, %v9504_v22  ;;  %v3317_v21 = vsel %vm1703_vm6, %v9502_v45, %v9506_v11 }
 0xcdf   : > { %v3267_v47 = vmul.f32 %v3260_v40, %v8357_v57  ;;  %v3268_v4 = vmul.f32 %v3256_v12, %v8330_v28  ;;  %3557 = vmatprep.subr.bf16.mxu0 %v3466_v48  ;;  %v3250_v7 = vpop.permute.xlu1 %3249  ;;  %v3469_v12 = vpack.c.bf16 %v3295_v31, %v3293_v9 }
 0xce0   : > { %v3255_v3 = vsel %vm1659_vm4, %v3242_v16, %v3250_v7  ;;  %v3259_v6 = vsel %vm1659_vm4, %v3250_v7, %v3242_v16  ;;  %v3328_v7 = vmul.f32 %v3318_v32, %v8392_v51 }
 0xce1   : > { %v3265_v8 = vmul.f32 %v3259_v6, %v8357_v57  ;;  %v3266_v48 = vmul.f32 %v3255_v3, %v8330_v28  ;;  %v3276_v46 = vpop.permute.xlu0 %3275  ;;  %v3321_v3 = vsel %vm1703_vm6, %v9506_v11, %v9502_v45  ;;  %v3326_v6 = vmul.f32 %v3317_v21, %v8392_v51 }
 0xce2   : > { %3558 = vmatpush1.bf16.msra.mxu0 %v3465_v55  ;;  %v3325_v31 = vmul.f32 %v3321_v3, %v8396_v5 }
 0xce3   : > { %v3467_v50 = vpack.c.bf16 %v3267_v47, %v3265_v8  ;;  %v3274_v44 = vpop.permute.xlu1 %3273  ;;  %v3468_v63 = vpack.c.bf16 %v3268_v4, %v3266_v48  ;;  %v3322_v4 = vsel %vm1703_vm6, %v9504_v22, %v9500_v24 }
 0xce5   : > { %3559 = vmatprep.subr.bf16.mxu0 %v3468_v63  ;;  %v3284_v16 = vpop.permute.xlu0 %3283 }
 0xce6   : > { %v3288_v20 = vsel %vm1681_vm5, %v3276_v46, %v3284_v16  ;;  %v3292_v19 = vsel %vm1681_vm5, %v3284_v16, %v3276_v46  ;;  %3560 = vmatpush1.bf16.msra.mxu0 %v3467_v50  ;;  %v3327_v46 = vmul.f32 %v3322_v4, %v8396_v5  ;;  %v3474_v50 = vpack.c.bf16 %v3328_v7, %v3326_v6 }
 0xce7   : > { %v3299_v40 = vmul.f32 %v3292_v19, %v8382_v2  ;;  %v3300_v55 = vmul.f32 %v3288_v20, %v8385_v49  ;;  %3561 = vmatprep.subr.bf16.mxu0 %v3470_v56  ;;  %v3282_v47 = vpop.permute.xlu1 %3281  ;;  %v3478_v7 = vpack.c.bf16 %v9332_v33, %v9337_v29  ;;  %v3350_v6 = vsel %vm1725_vm7, %v9508_v39, %v9512_v62 }
 0xce8   : > { %v3287_v53 = vsel %vm1681_vm5, %v3274_v44, %v3282_v47  ;;  %v3291_v34 = vsel %vm1681_vm5, %v3282_v47, %v3274_v44  ;;  %v3473_v16 = vpack.c.bf16 %v3327_v46, %v3325_v31  ;;  %v3349_v33 = vsel %vm1725_vm7, %v9510_v18, %v9514_v23 }
 0xce9   : > { %v3297_v1 = vmul.f32 %v3291_v34, %v8382_v2  ;;  %v3298_v54 = vmul.f32 %v3287_v53, %v8385_v49  ;;  %v3308_v24 = vpop.permute.xlu0 %3307  ;;  %v3354_v53 = vsel %vm1725_vm7, %v9512_v62, %v9508_v39  ;;  %v3353_v34 = vsel %vm1725_vm7, %v9514_v23, %v9510_v18 }
 0xcea   : > { %3562 = vmatpush1.bf16.msra.mxu0 %v3469_v12  ;;  %v3477_v29 = vpack.c.bf16 %v9325_v43, %v9327_v61  ;;  %v3357_v39 = vmul.f32 %v3349_v33, %v8448_v17  ;;  %v3386_v43 = vsel %vm1747_vm8, %v9520_v25, %v9516_v36  ;;  %v3479_v61 = vpack.c.bf16 %v9383_v59, %v9387_v10 }
 0xceb   : > { %v3471_v22 = vpack.c.bf16 %v3299_v40, %v3297_v1  ;;  %v3306_v8 = vpop.permute.xlu1 %3305  ;;  %v3472_v48 = vpack.c.bf16 %v3300_v55, %v3298_v54  ;;  %v3360_v1 = vmul.f32 %v3354_v53, %v8426_v41  ;;  %v3358_v54 = vmul.f32 %v3353_v34, %v8426_v41 }
 0xcec   : > { %v3382_v59 = vsel %vm1747_vm8, %v9516_v36, %v9520_v25  ;;  %v3392_v10 = vmul.f32 %v3386_v43, %v8463_v42 }
 0xced   : > { %3563 = vmatprep.subr.bf16.mxu0 %v3472_v48  ;;  %v3316_v9 = vpop.permute.xlu0 %3315  ;;  %v3482_v18 = vpack.c.bf16 %v3360_v1, %v3358_v54 }
 0xcee   : > { %v3320_v45 = vsel %vm1703_vm6, %v3308_v24, %v3316_v9  ;;  %v3324_v11 = vsel %vm1703_vm6, %v3316_v9, %v3308_v24  ;;  %3564 = vmatpush1.bf16.msra.mxu0 %v3471_v22  ;;  %v3480_v22 = vpack.c.bf16 %v9391_v15, %v9395_v26  ;;  %v3385_v15 = vsel %vm1747_vm8, %v9522_v52, %v9518_v60 }
 0xcef   : > { %v3331_v44 = vmul.f32 %v3324_v11, %v8396_v5  ;;  %v3332_v63 = vmul.f32 %v3320_v45, %v8392_v51  ;;  %3565 = vmatprep.subr.bf16.mxu0 %v3474_v50  ;;  %v3314_v32 = vpop.permute.xlu1 %3313  ;;  %v3381_v9 = vsel %vm1747_vm8, %v9518_v60, %v9522_v52  ;;  %v3390_v50 = vmul.f32 %v3385_v15, %v8463_v42 }
 0xcf0   : > { %v3319_v56 = vsel %vm1703_vm6, %v3306_v8, %v3314_v32  ;;  %v3323_v21 = vsel %vm1703_vm6, %v3314_v32, %v3306_v8  ;;  %v3359_v8 = vmul.f32 %v3350_v6, %v8448_v17  ;;  %v3391_v60 = vmul.f32 %v3382_v59, %v8481_v58 }
 0xcf1   : > { %v3329_v20 = vmul.f32 %v3323_v21, %v8396_v5  ;;  %v3330_v19 = vmul.f32 %v3319_v56, %v8392_v51  ;;  %v3340_v12 = vpop.permute.xlu0 %3339  ;;  %v3389_v52 = vmul.f32 %v3381_v9, %v8481_v58 }
 0xcf2   : > { %3566 = vmatpush1.bf16.msra.mxu0 %v3473_v16  ;;  %v3481_v46 = vpack.c.bf16 %v3359_v8, %v3357_v39 }
 0xcf3   : > { %v3475_v40 = vpack.c.bf16 %v3331_v44, %v3329_v20  ;;  %v9616_v55 = vpop.permute.xlu1 %3397  ;;  %v3476_v47 = vpack.c.bf16 %v3332_v63, %v3330_v19 }
 0xcf5   : > { %3567 = vmatprep.subr.bf16.mxu0 %v3476_v47  ;;  %v3348_v4 = vpop.permute.xlu0 %3347 }
 0xcf6   : > { %3568 = vmatpush1.bf16.msra.mxu0 %v3475_v40  ;;  %v3352_v23 = vsel %vm1725_vm7, %v3340_v12, %v3348_v4  ;;  %v3356_v48 = vsel %vm1725_vm7, %v3348_v4, %v3340_v12  ;;  %v3486_v40 = vpack.c.bf16 %v3392_v10, %v3390_v50  ;;  %v3485_v4 = vpack.c.bf16 %v3391_v60, %v3389_v52  ;;  %v7536_v60 = vld [vmem:[%s11208_s8 + $0x30] ss:$12 sps:$4 sm:$0xff]  }
 0xcf7   : > { %3569 = vmatprep.subr.bf16.mxu0 %v3478_v7  ;;  %v9628_v3 = vpop.permute.xlu1 %3405  ;;  %v3363_v44 = vmul.f32 %v3352_v23, %v8448_v17  ;;  %v3364_v36 = vmul.f32 %v3356_v48, %v8426_v41 }
 0xcf8   : > { %v3417_v7 = vsel %vm1769_vm9, %v9628_v3, %v9616_v55  ;;  %v3413_v39 = vsel %vm1769_vm9, %v9616_v55, %v9628_v3 }
 0xcf9   : > { %v3372_v24 = vpop.permute.xlu0 %3371  ;;  %v3421_v48 = vmul.f32 %v3413_v39, %v8497_v0 }
 0xcfa   : > { %3570 = vmatpush1.bf16.msra.mxu0 %v3477_v29 }
 0xcfb   : > { %3571 = vmatprep.subr.bf16.mxu0 %v3480_v22  ;;  %v3338_v62 = vpop.permute.xlu1 %3337 }
 0xcfd   : > { %v3380_v26 = vpop.permute.xlu0 %3379 }
 0xcfe   : > { %3572 = vmatpush1.bf16.msra.mxu0 %v3479_v61  ;;  %v3384_v20 = vsel %vm1747_vm8, %v3372_v24, %v3380_v26  ;;  %v3388_v19 = vsel %vm1747_vm8, %v3380_v26, %v3372_v24 }
 0xcff   : > { %3573 = vmatprep.subr.bf16.mxu0 %v3482_v18  ;;  %v3346_v31 = vpop.permute.xlu1 %3345  ;;  %v3395_v34 = vmul.f32 %v3384_v20, %v8481_v58  ;;  %v3396_v6 = vmul.f32 %v3388_v19, %v8463_v42 }
 0xd00   : > { %v3351_v45 = vsel %vm1725_vm7, %v3338_v62, %v3346_v31  ;;  %v3355_v11 = vsel %vm1725_vm7, %v3346_v31, %v3338_v62  ;;  %v3422_v62 = vmul.f32 %v3417_v7, %v8467_v27 }
 0xd01   : > { %v3361_v25 = vmul.f32 %v3351_v45, %v8448_v17  ;;  %v3362_v63 = vmul.f32 %v3355_v11, %v8426_v41  ;;  %v3400_v32 = vpop.permute.xlu0 %3399 }
 0xd02   : > { %3574 = vmatpush1.bf16.msra.mxu0 %v3481_v46 }
 0xd03   : > { %v3483_v16 = vpack.c.bf16 %v3363_v44, %v3361_v25  ;;  %v3370_v56 = vpop.permute.xlu1 %3369  ;;  %v3484_v21 = vpack.c.bf16 %v3364_v36, %v3362_v63 }
 0xd05   : > { %3575 = vmatprep.subr.bf16.mxu0 %v3484_v21  ;;  %v3408_v12 = vpop.permute.xlu0 %3407 }
 0xd06   : > { %v3418_v47 = vsel %vm1769_vm9, %v3408_v12, %v3400_v32  ;;  %3576 = vmatpush1.bf16.msra.mxu0 %v3483_v16  ;;  %v3414_v1 = vsel %vm1769_vm9, %v3400_v32, %v3408_v12 }
 0xd07   : > { %3577 = vmatprep.subr.bf16.mxu0 %v3486_v40  ;;  %v3378_v53 = vpop.permute.xlu1 %3377  ;;  %v3424_v54 = vmul.f32 %v3418_v47, %v8467_v27  ;;  %v3423_v26 = vmul.f32 %v3414_v1, %v8497_v0 }
 0xd08   : > { %v3383_v33 = vsel %vm1747_vm8, %v3370_v56, %v3378_v53  ;;  %v3387_v29 = vsel %vm1747_vm8, %v3378_v53, %v3370_v56  ;;  %v7539_v56 = vld [vmem:[%s11208_s8 + $0x4c] ss:$12 sps:$4 sm:$0xff]  }
 0xd09   : > { %v3393_v24 = vmul.f32 %v3383_v33, %v8481_v58  ;;  %v3394_v22 = vmul.f32 %v3387_v29, %v8463_v42  ;;  %v3404_v8 = vpop.permute.xlu0 %3403  ;;  %v3490_v23 = vpack.c.bf16 %v3424_v54, %v3422_v62  ;;  %v3489_v31 = vpack.c.bf16 %v3423_v26, %v3421_v48  ;;  %v7541_v29 = vld [vmem:[%s11208_s8 + $0x48] ss:$12 sps:$4 sm:$0xff]  }
 0xd0a   : > { %3578 = vmatpush1.bf16.msra.mxu0 %v3485_v4 }
 0xd0b   : > { %v3487_v43 = vpack.c.bf16 %v3395_v34, %v3393_v24  ;;  %v3402_v61 = vpop.permute.xlu1 %3401  ;;  %v3488_v15 = vpack.c.bf16 %v3396_v6, %v3394_v22 }
 0xd0d   : > { %3579 = vmatprep.subr.bf16.mxu0 %v3488_v15  ;;  %v3412_v18 = vpop.permute.xlu0 %3411 }
 0xd0e   : > { %v3416_v46 = vsel %vm1769_vm9, %v3404_v8, %v3412_v18  ;;  %v3420_v59 = vsel %vm1769_vm9, %v3412_v18, %v3404_v8  ;;  %3580 = vmatpush1.bf16.msra.mxu0 %v3487_v43  ;;  %v7542_v18 = vld [vmem:[%s11208_s8 + $0x38] ss:$12 sps:$4 sm:$0xff]  }
 0xd0f   : > { %v3427_v55 = vmul.f32 %v3416_v46, %v8497_v0  ;;  %v3428_v3 = vmul.f32 %v3420_v59, %v8467_v27  ;;  %3581 = vmatprep.subr.bf16.mxu0 %v3490_v23  ;;  %v3410_v10 = vpop.permute.xlu1 %3409  ;;  %v7543_v23 = vld [vmem:[%s11208_s8 + $0x50] ss:$12 sps:$4 sm:$0xff]  }
 0xd10   : > { %v3415_v9 = vsel %vm1769_vm9, %v3402_v61, %v3410_v10  ;;  %v3419_v50 = vsel %vm1769_vm9, %v3410_v10, %v3402_v61 }
 0xd11   : > { %v3425_v45 = vmul.f32 %v3415_v9, %v8497_v0  ;;  %v3426_v11 = vmul.f32 %v3419_v50, %v8467_v27  ;;  %v3432_v44 = vpop.permute.xlu0 %3431  ;;  %v11213_v9 = vld [vmem:[#allocation20_spill] sm:$0xff] }
 0xd12   : > { %3582 = vmatpush1.bf16.msra.mxu0 %v3489_v31 }
 0xd13   : > { %v3491_v36 = vpack.c.bf16 %v3427_v55, %v3425_v45  ;;  %v3430_v25 = vpop.permute.xlu1 %3429  ;;  %v3492_v63 = vpack.c.bf16 %v3428_v3, %v3426_v11 }
 0xd15   : > { %3583 = vmatprep.subr.bf16.mxu0 %v3492_v63  ;;  %v3440_v32 = vpop.permute.xlu0 %3439  ;;  %v11215_v63 = vld [vmem:[#allocation22_spill] sm:$0xff] }
 0xd16   : > { %v3446_v52 = vsel %vm1791_vm10, %v3432_v44, %v3440_v32  ;;  %v3450_v16 = vsel %vm1791_vm10, %v3440_v32, %v3432_v44  ;;  %3584 = vmatpush1.bf16.msra.mxu0 %v3491_v36  ;;  %v11214_v44 = vld [vmem:[#allocation21_spill] sm:$0xff] }
 0xd17   : > { %v3455_v21 = vmul.f32 %v3446_v52, %v8487_v35  ;;  %v3456_v20 = vmul.f32 %v3450_v16, %v8490_v37  ;;  %v3438_v19 = vpop.permute.xlu1 %3437 }
 0xd18   : > { %v3445_v12 = vsel %vm1791_vm10, %v3430_v25, %v3438_v19  ;;  %v3449_v40 = vsel %vm1791_vm10, %v3438_v19, %v3430_v25 }
 0xd19   : > { %v3453_v47 = vmul.f32 %v3445_v12, %v8487_v35  ;;  %v3454_v4 = vmul.f32 %v3449_v40, %v8490_v37  ;;  %3586 = vmatmul.mubr.bf16.vlgmr.msra.gmra.mrb[28].mxu0 %v7536_v60  ;;  %v3436_v7 = vpop.permute.xlu0 %3435  ;;  %v11216_v60 = vld [vmem:[#allocation23_spill] sm:$0xff] }
 0xd1a   : > { %3595 = vmatprep.mubr.bf16.mxu0 %v7539_v56 }
 0xd1b   : > { %v3493_v53 = vpack.c.bf16 %v3455_v21, %v3453_v47  ;;  %v3434_v34 = vpop.permute.xlu1 %3433  ;;  %v3494_v6 = vpack.c.bf16 %v3456_v20, %v3454_v4 }
 0xd1d   : > { %3606 = vmatprep.subr.bf16.mxu0 %v3494_v6  ;;  %v3444_v33 = vpop.permute.xlu0 %3443 }
 0xd1e   : > { %v3448_v1 = vsel %vm1791_vm10, %v3436_v7, %v3444_v33  ;;  %v3452_v54 = vsel %vm1791_vm10, %v3444_v33, %v3436_v7  ;;  %3607 = vmatpush1.bf16.msra.mxu0 %v3493_v53  ;;  %v11217_v7 = vld [vmem:[#allocation24_spill] sm:$0xff]  ;;  %v11219_v33 = vld [vmem:[#allocation25_spill] sm:$0xff] }
 0xd1f   : > { %v3459_v24 = vmul.f32 %v3448_v1, %v8487_v35  ;;  %v3460_v22 = vmul.f32 %v3452_v54, %v8490_v37  ;;  %v3442_v8 = vpop.permute.xlu1 %3441  ;;  %v11221_v54 = vld [vmem:[#allocation26_spill] sm:$0xff] }
 0xd20   : > { %v3447_v39 = vsel %vm1791_vm10, %v3434_v34, %v3442_v8  ;;  %v3451_v62 = vsel %vm1791_vm10, %v3442_v8, %v3434_v34 }
 0xd21   : > { %v3457_v43 = vmul.f32 %v3447_v39, %v8487_v35  ;;  %v3458_v61 = vmul.f32 %v3451_v62, %v8490_v37  ;;  %3596 = vmatmul.mubr.bf16.gmra.mrb[32].mxu0 %v7541_v29 }
 0xd22   : > { %3638 = vmatprep.mubr.bf16.mxu0 %v11210_v14 }
 0xd23   : > { %v3495_v15 = vpack.c.bf16 %v3459_v24, %v3457_v43  ;;  %v3496_v26 = vpack.c.bf16 %v3460_v22, %v3458_v61  ;;  %v11223_v22 = vld [vmem:[#allocation27_spill] sm:$0xff] }
 0xd25   : > { %3608 = vmatprep.subr.bf16.mxu0 %v3496_v26 }
 0xd26   : > { %3609 = vmatpush1.bf16.msra.mxu0 %v3495_v15 }
 0xd29   : > { %6752 = vmatmul.mubr.msk.bf16.vlgmr.msra.gmra.mrb[28].mxu0 %vm759_vm0, %v7542_v18 }
 0xd2a   : > { %3648 = vmatprep.mubr.bf16.mxu0 %v11210_v14 }
 0xd2e   : > { %v3505_v3 = vpop.permute.xlu0 %3504 }
 0xd30   : > { %v3500_v48 = vpop.permute.xlu1 %3499 }
 0xd31   : > { %6753 = vmatmul.mubr.msk.bf16.gmra.mrb[32].mxu0 %vm759_vm0, %v7543_v23 }
 0xd32   : > { %4289 = vmatprep.mubr.bf16.mxu0 %v11210_v14  ;;  %v3515_v40 = vpop.permute.xlu0 %3514 }
 0xd34   : > { %v3510_v56 = vpop.permute.xlu1 %3509 }
 0xdfc   : > { %v3640_v46 = vpop.f32.mrb[28].mxu0 }
 0xdfd   : > { %v7465_v59 = vadd.f32 %v3640_v46, %v3500_v48  ;;  %v3642_v55 = vpop.f32.mrb[29].mxu0  ;;  %v9806_v46 = vld [vmem:[%s11073_s6 + $0x10] sm:$0xff] }
 0xdfe   : > { %v7466_v10 = vadd.f32 %v3642_v55, %v3500_v48  ;;  %v3644_v31 = vpop.f32.mrb[30].mxu0  ;;  %v9799_v48 = vld [vmem:[%s11073_s6 + $0x8] sm:$0xff]  ;;  %v7878_v55 = vld [vmem:[%s11073_s6] sm:$0xff] }
 0xdff   : > { %v9765_v50 = vadd.f32 %v7465_v59, %v11213_v9  ;;  %v7467_v45 = vadd.f32 %v3644_v31, %v3505_v3  ;;  %v3646_v11 = vpop.f32.mrb[31].mxu0  ;;  %v9813_v59 = vld [vmem:[%s11073_s6 + $0x18] sm:$0xff] }
 0xe00   : > { %v9768_v36 = vadd.f32 %v7466_v10, %v11214_v44  ;;  %v7468_v25 = vadd.f32 %v3646_v11, %v3505_v3 }
 0xe01   : > { %v9771_v32 = vadd.f32 %v7467_v45, %v11215_v63 }
 0xe02   : > { %v9774_v52 = vadd.f32 %v7468_v25, %v11216_v60  ;;  %v3677_v16 = vadd.f32 %v9768_v36, %v9765_v50 }
 0xe04   : > { %v3650_v21 = vpop.f32.mrb[32].mxu0  ;;  %3678 = vadd.xlane.f32.xlu1 %v3677_v16  ;;  %v3680_v20 = vadd.f32 %v9774_v52, %v9771_v32 }
 0xe05   : > { %v7469_v19 = vadd.f32 %v3650_v21, %v3510_v56  ;;  %v3652_v12 = vpop.f32.mrb[33].mxu0 }
 0xe06   : > { %v7470_v47 = vadd.f32 %v3652_v12, %v3510_v56  ;;  %v3654_v4 = vpop.f32.mrb[34].mxu0  ;;  %3681 = vadd.xlane.f32.xlu0 %v3680_v20 }
 0xe07   : > { %v9781_v53 = vadd.f32 %v7469_v19, %v11217_v7  ;;  %v7471_v34 = vadd.f32 %v3654_v4, %v3515_v40  ;;  %v3656_v6 = vpop.f32.mrb[35].mxu0 }
 0xe08   : > { %v9784_v29 = vadd.f32 %v7470_v47, %v11219_v33  ;;  %v7472_v1 = vadd.f32 %v3656_v6, %v3515_v40 }
 0xe09   : > { %11218 = vst [vmem:[#allocation20_spill] sm:$0xff] %v9781_v53  ;;  %v9787_v24 = vadd.f32 %v7471_v34, %v11221_v54 }
 0xe0a   : > { %11220 = vst [vmem:[#allocation21_spill] sm:$0xff] %v9784_v29  ;;  %v9790_v8 = vadd.f32 %v7472_v1, %v11223_v22  ;;  %v3683_v39 = vadd.f32 %v9784_v29, %v9781_v53 }
 0xe0b   : > { %11222 = vst [vmem:[#allocation22_spill] sm:$0xff] %v9787_v24 }
 0xe0c   : > { %11224 = vst [vmem:[#allocation23_spill] sm:$0xff] %v9790_v8  ;;  %3684 = vadd.xlane.f32.xlu0 %v3683_v39  ;;  %v3686_v62 = vadd.f32 %v9790_v8, %v9787_v24 }
 0xe0e   : > { %3687 = vadd.xlane.f32.xlu1 %v3686_v62 }
 0xe91   : > { %v3679_v43 = vpop.xlane.xlu1 %3678 }
 0xe93   : > { %v3682_v61 = vpop.xlane.xlu0 %3681 }
 0xe94   : > { %v7409_v15 = vpack.c.bf16 %v3682_v61, %v3679_v43  ;;  %v6754_v43 = vld [vmem:[%s11080_s13 + $0xe0] sm:$0xff] }
 0xe95   : > { %v6758_v61 = vld [vmem:[%s11080_s13 + $0x100] sm:$0xff] }
 0xe96   : > { %7410 = vmatprep.subr.bf16.mxu1 %v7409_v15 }
 0xe97   : > { %7412 = vmatpush3.bf16.msra.mxu1 %v7409_v15  ;;  %v6755_v15 = vld [vmem:[%s11080_s13 + $0xe8] sm:$0xff] }
 0xe99   : > { %v3685_v26 = vpop.xlane.xlu0 %3684 }
 0xe9b   : > { %v3688_v18 = vpop.xlane.xlu1 %3687 }
 0xe9c   : > { %v7413_v23 = vpack.c.bf16 %v3688_v18, %v3685_v26  ;;  %v6756_v26 = vld [vmem:[%s11080_s13 + $0xf0] sm:$0xff]  ;;  %v6759_v18 = vld [vmem:[%s11080_s13 + $0x108] sm:$0xff] }
 0xe9e   : > { %7414 = vmatprep.subr.bf16.mxu1 %v7413_v23 }
 0xe9f   : > { %7416 = vmatpush3.bf16.msra.mxu1 %v7413_v23  ;;  %v6757_v23 = vld [vmem:[%s11080_s13 + $0xf8] sm:$0xff] }
 0xea2   : > { %7238 = vmatmul.mubr.msk.f32.vlgmr.msra.gmra.mrb[32].mxu1 %vm759_vm0, %v9799_v48 }
 0xea3   : > { %7240 = vmatprep.mubr.msk.f32.mxu1 %vm759_vm0, %v9806_v46 }
 0xea6   : > { %7241 = vmatmul.mubr.msk.f32.gmra.mrb[34].mxu1 %vm759_vm0, %v9813_v59 }
 0xea7   : > { %7251 = vmatprep.mubr.msk.f32.mxu1 %vm759_vm0, %v7878_v55 }
 0xf75   : > { %v7239_v3 = vpop.f32.mrb[32].mxu1 }
 0xf76   : > { %3781 = vperm.xlu1 %7525, %v7239_v3   ;;  %v3755_v10 = vpop.f32.mrb[33].mxu1 }
 0xf77   : > { %3776 = vperm.xlu0 %7524, %v3755_v10  }
 0xf79   : > { %v7242_v31 = vpop.f32.mrb[34].mxu1 }
 0xf7a   : > { %v3765_v9 = vpop.f32.mrb[35].mxu1 }
 0xf7b   : > { %3791 = vperm.xlu0 %7524, %v7242_v31   ;;  %3786 = vperm.xlu1 %7525, %v3765_v9  }
 0xff5   : > { %v3782_v45 = vpop.permute.xlu1 %3781 }
 0xff6   : > { %v9822_v11 = vsub.f32 %v9771_v32, %v3782_v45  ;;  %v9825_v44 = vsub.f32 %v9774_v52, %v3782_v45  ;;  %v3777_v25 = vpop.permute.xlu0 %3776 }
 0xff7   : > { %v9828_v63 = vsub.f32 %v9765_v50, %v3777_v25  ;;  %v9831_v60 = vsub.f32 %v9768_v36, %v3777_v25 }
 0xff8   : > { %v3804_v16 = vmul.f32 %v9822_v11, %v9822_v11  ;;  %v3805_v56 = vmul.f32 %v9825_v44, %v9825_v44 }
 0xff9   : > { %v3802_v21 = vmul.f32 %v9828_v63, %v9828_v63  ;;  %v3803_v20 = vmul.f32 %v9831_v60, %v9831_v60 }
 0xffa   : > { %v3792_v19 = vpop.permute.xlu0 %3791  ;;  %v3787_v12 = vpop.permute.xlu1 %3786  ;;  %v3813_v40 = vadd.f32 %v3805_v56, %v3804_v16 }
 0xffb   : > { %v9842_v47 = vsub.f32 %v9787_v24, %v3792_v19  ;;  %v9845_v4 = vsub.f32 %v9790_v8, %v3792_v19  ;;  %v9848_v7 = vsub.f32 %v9781_v53, %v3787_v12  ;;  %v9851_v34 = vsub.f32 %v9784_v29, %v3787_v12 }
 0xffc   : > { %3814 = vadd.xlane.f32.xlu0 %v3813_v40  ;;  %v3810_v6 = vadd.f32 %v3803_v20, %v3802_v21 }
 0xffd   : > { %v3808_v33 = vmul.f32 %v9842_v47, %v9842_v47  ;;  %v3809_v1 = vmul.f32 %v9845_v4, %v9845_v4  ;;  %v3806_v54 = vmul.f32 %v9848_v7, %v9848_v7  ;;  %v3807_v22 = vmul.f32 %v9851_v34, %v9851_v34 }
 0xffe   : > { %3811 = vadd.xlane.f32.xlu1 %v3810_v6 }
 0xfff   : > { %v3819_v39 = vadd.f32 %v3809_v1, %v3808_v33  ;;  %v3816_v62 = vadd.f32 %v3807_v22, %v3806_v54  ;;  %v6760_v33 = vld [vmem:[%s11080_s13 + $0x110] sm:$0xff]  ;;  %v6761_v1 = vld [vmem:[%s11080_s13 + $0x118] sm:$0xff]  ;;  %v6770_v54 = vld [vmem:[%s11080_s13 + $0x120] sm:$0xff] }
0x1000   : > { %v6771_v22 = vld [vmem:[%s11080_s13 + $0x128] sm:$0xff] }
0x1001   : > { %3817 = vadd.xlane.f32.xlu0 %v3816_v62  ;;  %v6773_v62 = vld [vmem:[%s11080_s13 + $0x138] sm:$0xff] }
0x1002   : > { %3820 = vadd.xlane.f32.xlu1 %v3819_v39  ;;  %v6772_v39 = vld [vmem:[%s11080_s13 + $0x130] sm:$0xff] }
0x1013   : > { %3941 = vperm.xlu1 %7525, %v6754_v43   ;;  %v6778_v43 = vld [vmem:[%s11080_s13 + $0x140] sm:$0xff] }
0x1017   : > { %3969 = vperm.xlu1 %7525, %v6758_v61   ;;  %3946 = vperm.xlu0 %7524, %v6755_v15   ;;  %v6779_v61 = vld [vmem:[%s11080_s13 + $0x148] sm:$0xff]  ;;  %v6782_v15 = vld [vmem:[%s11080_s13 + $0x160] sm:$0xff] }
0x101b   : > { %3951 = vperm.xlu1 %7525, %v6756_v26   ;;  %3974 = vperm.xlu0 %7524, %v6759_v18   ;;  %v6783_v26 = vld [vmem:[%s11080_s13 + $0x168] sm:$0xff]  ;;  %v6780_v18 = vld [vmem:[%s11080_s13 + $0x150] sm:$0xff] }
0x101f   : > { %3956 = vperm.xlu0 %7524, %v6757_v23   ;;  %v6781_v23 = vld [vmem:[%s11080_s13 + $0x158] sm:$0xff] }
0x1089   : > { %v3815_v55 = vpop.xlane.xlu0 %3814 }
0x108b   : > { %v3812_v3 = vpop.xlane.xlu1 %3811 }
0x108c   : > { %v7417_v10 = vpack.c.bf16 %v3815_v55, %v3812_v3  ;;  %v6784_v55 = vld [vmem:[%s11080_s13 + $0x170] sm:$0xff]  ;;  %v6785_v3 = vld [vmem:[%s11080_s13 + $0x178] sm:$0xff] }
0x108e   : > { %7418 = vmatprep.subr.bf16.mxu1 %v7417_v10  ;;  %v3818_v31 = vpop.xlane.xlu0 %3817 }
0x108f   : > { %7420 = vmatpush3.bf16.msra.mxu1 %v7417_v10  ;;  %v3821_v9 = vpop.xlane.xlu1 %3820  ;;  %v6817_v10 = vld [vmem:[%s11080_s13 + $0x180] sm:$0xff] }
0x1090   : > { %v7421_v45 = vpack.c.bf16 %v3821_v9, %v3818_v31  ;;  %v6818_v31 = vld [vmem:[%s11080_s13 + $0x188] sm:$0xff]  ;;  %v6819_v9 = vld [vmem:[%s11080_s13 + $0x190] sm:$0xff] }
0x1092   : > { %7422 = vmatprep.subr.bf16.mxu1 %v7421_v45 }
0x1093   : > { %7424 = vmatpush3.bf16.msra.mxu1 %v7421_v45  ;;  %v6820_v45 = vld [vmem:[%s11080_s13 + $0x198] sm:$0xff] }
0x1096   : > { %7252 = vmatmul.mubr.msk.f32.vlgmr.msra.gmra.mrb[36].mxu1 %vm759_vm0, %v9799_v48 }
0x1097   : > { %7254 = vmatprep.mubr.msk.f32.mxu1 %vm759_vm0, %v9806_v46 }
0x109a   : > { %7255 = vmatmul.mubr.msk.f32.gmra.mrb[38].mxu1 %vm759_vm0, %v9813_v59 }
0x109b   : > { %4076 = vmatprep.mubr.bf16.mxu1 %v11210_v14 }
0x1169   : > { %v7253_v25 = vpop.f32.mrb[36].mxu1 }
0x116a   : > { %v3894_v16 = vadd.f32 1e-05, %v7253_v25  ;;  %v3888_v56 = vpop.f32.mrb[37].mxu1  ;;  %v6825_v25 = vld [vmem:[%s11080_s13 + $0x1a0] sm:$0xff] }
0x116b   : > { %v3889_v21 = vadd.f32 1e-05, %v3888_v56  ;;  %v6829_v56 = vld [vmem:[%s11080_s13 + $0x1c0] sm:$0xff] }
0x116c   : > { %7743 = vrsqrt.f32 %v3894_v16  ;;  %v6826_v16 = vld [vmem:[%s11080_s13 + $0x1a8] sm:$0xff] }
0x116d   : > { %7745 = vrsqrt.f32 %v3889_v21  ;;  %v7256_v20 = vpop.f32.mrb[38].mxu1  ;;  %v6830_v21 = vld [vmem:[%s11080_s13 + $0x1c8] sm:$0xff] }
0x116e   : > { %v3904_v19 = vadd.f32 1e-05, %v7256_v20  ;;  %v3898_v12 = vpop.f32.mrb[39].mxu1  ;;  %v6827_v20 = vld [vmem:[%s11080_s13 + $0x1b0] sm:$0xff] }
0x116f   : > { %v3899_v40 = vadd.f32 1e-05, %v3898_v12  ;;  %v6831_v12 = vld [vmem:[%s11080_s13 + $0x1d0] sm:$0xff] }
0x1170   : > { %7747 = vrsqrt.f32 %v3904_v19  ;;  %v6828_v19 = vld [vmem:[%s11080_s13 + $0x1b8] sm:$0xff] }
0x1171   : > { %7749 = vrsqrt.f32 %v3899_v40  ;;  %v6832_v40 = vld [vmem:[%s11080_s13 + $0x1d8] sm:$0xff] }
0x1176   : > { %v7744_v48 = vpop.eup %7743 }
0x1177   : > { %v7746_v6 = vpop.eup %7745  ;;  %3918 = vperm.xlu1 %7525, %v7744_v48   ;;  %v4866_v48 = vld [vmem:[%s11081_s14] sm:$0xff] }
0x1178   : > { %3913 = vperm.xlu0 %7524, %v7746_v6   ;;  %v4867_v6 = vld [vmem:[%s11081_s14 + $0x8] sm:$0xff] }
0x117a   : > { %v7748_v46 = vpop.eup %7747 }
0x117b   : > { %v7750_v59 = vpop.eup %7749 }
0x117c   : > { %3923 = vperm.xlu1 %7525, %v7750_v59   ;;  %3928 = vperm.xlu0 %7524, %v7748_v46   ;;  %v4868_v46 = vld [vmem:[%s11081_s14 + $0x10] sm:$0xff]  ;;  %v4869_v59 = vld [vmem:[%s11081_s14 + $0x18] sm:$0xff] }
0x1180   : > { %3979 = vperm.xlu1 %7525, %v6760_v33   ;;  %3984 = vperm.xlu0 %7524, %v6761_v1   ;;  %v4870_v33 = vld [vmem:[%s11081_s14 + $0x20] sm:$0xff]  ;;  %v4871_v1 = vld [vmem:[%s11081_s14 + $0x28] sm:$0xff] }
0x1184   : > { %4010 = vperm.xlu1 %7525, %v6770_v54   ;;  %4015 = vperm.xlu0 %7524, %v6771_v22   ;;  %v4872_v54 = vld [vmem:[%s11081_s14 + $0x30] sm:$0xff]  ;;  %v4873_v22 = vld [vmem:[%s11081_s14 + $0x38] sm:$0xff] }
0x1188   : > { %4020 = vperm.xlu1 %7525, %v6772_v39   ;;  %4025 = vperm.xlu0 %7524, %v6773_v62   ;;  %v4874_v39 = vld [vmem:[%s11081_s14 + $0x40] sm:$0xff]  ;;  %v4875_v62 = vld [vmem:[%s11081_s14 + $0x48] sm:$0xff] }
0x118c   : > { %4178 = vperm.xlu1 %7525, %v6778_v43   ;;  %4183 = vperm.xlu0 %7524, %v6779_v61   ;;  %v4876_v43 = vld [vmem:[%s11081_s14 + $0x50] sm:$0xff]  ;;  %v4877_v61 = vld [vmem:[%s11081_s14 + $0x58] sm:$0xff] }
0x1190   : > { %4206 = vperm.xlu1 %7525, %v6782_v15   ;;  %4211 = vperm.xlu0 %7524, %v6783_v26   ;;  %v4878_v15 = vld [vmem:[%s11081_s14 + $0x60] sm:$0xff]  ;;  %v4879_v26 = vld [vmem:[%s11081_s14 + $0x68] sm:$0xff] }
0x1194   : > { %4188 = vperm.xlu1 %7525, %v6780_v18   ;;  %4193 = vperm.xlu0 %7524, %v6781_v23   ;;  %v4880_v18 = vld [vmem:[%s11081_s14 + $0x70] sm:$0xff]  ;;  %v4881_v23 = vld [vmem:[%s11081_s14 + $0x78] sm:$0xff] }
0x1198   : > { %4216 = vperm.xlu1 %7525, %v6784_v55   ;;  %4221 = vperm.xlu0 %7524, %v6785_v3   ;;  %v6849_v55 = vld [vmem:[%s11080_s13 + $0x1e0] sm:$0xff]  ;;  %v6850_v3 = vld [vmem:[%s11080_s13 + $0x1e8] sm:$0xff] }
0x119c   : > { %4617 = vperm.xlu1 %7525, %v6817_v10   ;;  %4622 = vperm.xlu0 %7524, %v6818_v31   ;;  %v6851_v10 = vld [vmem:[%s11080_s13 + $0x1f0] sm:$0xff]  ;;  %v6852_v31 = vld [vmem:[%s11080_s13 + $0x1f8] sm:$0xff] }
0x11a0   : > { %4627 = vperm.xlu1 %7525, %v6819_v9   ;;  %4632 = vperm.xlu0 %7524, %v6820_v45   ;;  %v6859_v9 = vld [vmem:[%s11080_s13 + $0x200] sm:$0xff]  ;;  %v6860_v45 = vld [vmem:[%s11080_s13 + $0x208] sm:$0xff] }
0x11a4   : > { %4792 = vperm.xlu1 %7525, %v6825_v25   ;;  %4797 = vperm.xlu0 %7524, %v6826_v16   ;;  %v6861_v25 = vld [vmem:[%s11080_s13 + $0x210] sm:$0xff]  ;;  %v6862_v16 = vld [vmem:[%s11080_s13 + $0x218] sm:$0xff] }
0x11a8   : > { %4820 = vperm.xlu1 %7525, %v6829_v56   ;;  %4825 = vperm.xlu0 %7524, %v6830_v21   ;;  %v3942_v56 = vpop.permute.xlu1 %3941  ;;  %v3947_v21 = vpop.permute.xlu0 %3946 }
0x11ac   : > { %4802 = vperm.xlu1 %7525, %v6827_v20   ;;  %4807 = vperm.xlu0 %7524, %v6828_v19   ;;  %v3970_v20 = vpop.permute.xlu1 %3969  ;;  %v3975_v19 = vpop.permute.xlu0 %3974 }
0x11b0   : > { %4830 = vperm.xlu1 %7525, %v6831_v12   ;;  %4835 = vperm.xlu0 %7524, %v6832_v40   ;;  %v3952_v12 = vpop.permute.xlu1 %3951  ;;  %v3957_v40 = vpop.permute.xlu0 %3956 }
0x11b4   : > { %4884 = vperm.xlu1 %7525, %v4866_v48   ;;  %4889 = vperm.xlu0 %7524, %v4867_v6  }
0x11b8   : > { %4894 = vperm.xlu1 %7525, %v4868_v46   ;;  %4899 = vperm.xlu0 %7524, %v4869_v59  }
0x11bc   : > { %4904 = vperm.xlu1 %7525, %v4870_v33   ;;  %4909 = vperm.xlu0 %7524, %v4871_v1  }
0x11c0   : > { %4914 = vperm.xlu1 %7525, %v4872_v54   ;;  %4919 = vperm.xlu0 %7524, %v4873_v22  }
0x11c4   : > { %4924 = vperm.xlu1 %7525, %v4874_v39   ;;  %4929 = vperm.xlu0 %7524, %v4875_v62  }
0x11c8   : > { %4934 = vperm.xlu1 %7525, %v4876_v43   ;;  %4939 = vperm.xlu0 %7524, %v4877_v61  }
0x11cc   : > { %4944 = vperm.xlu1 %7525, %v4878_v15   ;;  %4949 = vperm.xlu0 %7524, %v4879_v26  }
0x11d0   : > { %4954 = vperm.xlu1 %7525, %v4880_v18   ;;  %4959 = vperm.xlu0 %7524, %v4881_v23  }
0x11d4   : > { %5454 = vperm.xlu1 %7525, %v6849_v55   ;;  %5459 = vperm.xlu0 %7524, %v6850_v3  }
0x11d8   : > { %5464 = vperm.xlu1 %7525, %v6851_v10   ;;  %5469 = vperm.xlu0 %7524, %v6852_v31  }
0x11dc   : > { %5561 = vperm.xlu1 %7525, %v6859_v9   ;;  %5566 = vperm.xlu0 %7524, %v6860_v45  }
0x11e0   : > { %5571 = vperm.xlu1 %7525, %v6861_v25   ;;  %5576 = vperm.xlu0 %7524, %v6862_v16  }
0x11f6   : > { %v3919_v48 = vpop.permute.xlu1 %3918 }
0x11f7   : > { %v3933_v6 = vmul.f32 %v3919_v48, %v9822_v11  ;;  %v3934_v46 = vmul.f32 %v3919_v48, %v9825_v44  ;;  %v3914_v59 = vpop.permute.xlu0 %3913 }
0x11f8   : > { %v3931_v33 = vmul.f32 %v3914_v59, %v9828_v63  ;;  %v3932_v1 = vmul.f32 %v3914_v59, %v9831_v60 }
0x11f9   : > { %v3961_v54 = vmul.f32 %v3947_v21, %v3933_v6  ;;  %v3962_v22 = vmul.f32 %v3947_v21, %v3934_v46  ;;  %v4310_v6 = vld [vmem:[%s723_s7] sm:$0xff]  ;;  %s728_s7 = scalar_lea.vmem %s11227_s18, %s11226_s24 }
0x11fa   : > { %v3959_v39 = vmul.f32 %v3942_v56, %v3931_v33  ;;  %v3960_v62 = vmul.f32 %v3942_v56, %v3932_v1  ;;  %v4311_v46 = vpack.c.bf16 %v4310_v6, %v4310_v6 }
0x11fb   : > { %v3989_v43 = vadd.f32 %v3975_v19, %v3961_v54  ;;  %v3929_v61 = vpop.permute.xlu0 %3928  ;;  %v3924_v15 = vpop.permute.xlu1 %3923  ;;  %v3990_v26 = vadd.f32 %v3975_v19, %v3962_v22 }
0x11fc   : > { %v3987_v18 = vadd.f32 %v3970_v20, %v3959_v39  ;;  %v3937_v23 = vmul.f32 %v3929_v61, %v9842_v47  ;;  %v3938_v11 = vmul.f32 %v3929_v61, %v9845_v4  ;;  %v3935_v44 = vmul.f32 %v3924_v15, %v9848_v7  ;;  %v7544_v7 = vld [vmem:[%s11077_s10] sm:$0xff]  }
0x11fd   : > { %v3936_v55 = vmul.f32 %v3924_v15, %v9851_v34  ;;  %v3988_v63 = vadd.f32 %v3970_v20, %v3960_v62  ;;  %v7545_v34 = vld [vmem:[%s11077_s10 + $0x8] sm:$0xff]   ;;  %v7547_v20 = vld [vmem:[%s11077_s10 + $0x20] sm:$0xff]  }
0x11fe   : > { %v3965_v3 = vmul.f32 %v3957_v40, %v3937_v23  ;;  %v3966_v60 = vmul.f32 %v3957_v40, %v3938_v11  ;;  %v3963_v10 = vmul.f32 %v3952_v12, %v3935_v44  ;;  %v3999_v31 = vpack.c.bf16 %v3989_v43, %v3987_v18  ;;  %v7549_v40 = vld [vmem:[%s11077_s10 + $0x28] sm:$0xff]  }
0x11ff   : > { %v3985_v9 = vpop.permute.xlu0 %3984  ;;  %v3964_v45 = vmul.f32 %v3952_v12, %v3936_v55  ;;  %v3980_v25 = vpop.permute.xlu1 %3979  ;;  %v4000_v16 = vpack.c.bf16 %v3990_v26, %v3988_v63  ;;  %v7900_v12 = vmov 0.0  }
0x1200   : > { %v3993_v56 = vadd.f32 %v3985_v9, %v3965_v3  ;;  %v3994_v21 = vadd.f32 %v3985_v9, %v3966_v60  ;;  %v3991_v19 = vadd.f32 %v3980_v25, %v3963_v10 }
0x1201   : > { %v3992_v48 = vadd.f32 %v3980_v25, %v3964_v45  ;;  %4044 = vmatprep.subr.bf16.mxu1 %v4000_v16 }
0x1202   : > { %v4001_v47 = vpack.c.bf16 %v3993_v56, %v3991_v19  ;;  %4045 = vmatpush1.bf16.msra.mxu1 %v3999_v31 }
0x1203   : > { %v4002_v4 = vpack.c.bf16 %v3994_v21, %v3992_v48  ;;  %v4011_v1 = vpop.permute.xlu1 %4010  ;;  %v4016_v39 = vpop.permute.xlu0 %4015 }
0x1205   : > { %4046 = vmatprep.subr.bf16.mxu1 %v4002_v4 }
0x1206   : > { %4047 = vmatpush1.bf16.msra.mxu1 %v4001_v47 }
0x1207   : > { %7257 = vmatprep.subr.bf16.mxu1 %v7900_v12  ;;  %v4021_v15 = vpop.permute.xlu1 %4020  ;;  %v4026_v55 = vpop.permute.xlu0 %4025 }
0x1209   : > { %6776 = vmatmul.mubr.msk.bf16.vlgmr.msra.gmra.mrb[40].mxu1 %vm759_vm0, %v7544_v7 }
0x120a   : > { %4086 = vmatprep.mubr.bf16.mxu1 %v11210_v14  ;;  %7258 = vmatpush3.bf16.msra.mxu1 %v7547_v20 }
0x120b   : > { %7259 = vmatprep.subr.bf16.mxu1 %v7900_v12 }
0x120e   : > { %7260 = vmatpush3.bf16.msra.mxu1 %v7549_v40 }
0x1211   : > { %6777 = vmatmul.mubr.msk.bf16.gmra.mrb[44].mxu1 %vm759_vm0, %v7545_v34 }
0x1212   : > { %7261 = vmatprep.mubr.msk.bf16.mxu1 %vm7901_vm13, %v7900_v12 }
0x1219   : > { %7262 = vmatmul.mubr.msk.bf16.vlgmr.msra.gmra.mrb[48].mxu1 %vm759_vm0, %v4311_v46 }
0x121a   : > { %4488 = vmatprep.mubr.bf16.mxu1 %v11210_v14 }
0x12dc   : > { %v4078_v59 = vpop.f32.mrb[40].mxu1 }
0x12dd   : > { %v4080_v33 = vpop.f32.mrb[41].mxu1  ;;  %v10071_v61 = vadd.f32 %v4078_v59, %v4011_v1 }
0x12de   : > { %v4082_v54 = vpop.f32.mrb[42].mxu1  ;;  %v10073_v26 = vadd.f32 %v4080_v33, %v4011_v1 }
0x12df   : > { %v4084_v22 = vpop.f32.mrb[43].mxu1  ;;  %v10067_v62 = vadd.f32 %v4082_v54, %v4016_v39 }
0x12e0   : > { %v10069_v43 = vadd.f32 %v4084_v22, %v4016_v39 }
0x12e1   : > { %v4107_v23 = vadd.f32 %v10067_v62, %v10071_v61 }
0x12e2   : > { %v4116_v63 = vadd.f32 %v10069_v43, %v10073_v26 }
0x12e4   : > { %v4088_v18 = vpop.f32.mrb[44].mxu1 }
0x12e5   : > { %v10077_v11 = vadd.f32 %v4088_v18, %v4021_v15  ;;  %v4090_v44 = vpop.f32.mrb[45].mxu1 }
0x12e6   : > { %v10081_v3 = vadd.f32 %v4090_v44, %v4021_v15  ;;  %v4092_v60 = vpop.f32.mrb[46].mxu1 }
0x12e7   : > { %v4108_v10 = vadd.f32 %v4107_v23, %v10077_v11  ;;  %v10084_v31 = vadd.f32 %v4092_v60, %v4026_v55  ;;  %v4094_v9 = vpop.f32.mrb[47].mxu1 }
0x12e8   : > { %v4117_v45 = vadd.f32 %v4116_v63, %v10081_v3  ;;  %v10087_v25 = vadd.f32 %v4094_v9, %v4026_v55 }
0x12e9   : > { %v4109_v16 = vadd.f32 %v4108_v10, %v10084_v31 }
0x12ea   : > { %v4118_v56 = vadd.f32 %v4117_v45, %v10087_v25 }
0x12eb   : > { %v4110_v21 = vrot.slane %v4109_v16, 4 }
0x12ec   : > { %v4119_v19 = vrot.slane %v4118_v56, 4 }
0x12ed   : > { %v4111_v48 = vadd.f32 %v4110_v21, %v4109_v16 }
0x12ee   : > { %v4120_v47 = vadd.f32 %v4119_v19, %v4118_v56 }
0x12ef   : > { %v4112_v4 = vrot.slane %v4111_v48, 2 }
0x12f0   : > { %v4121_v7 = vrot.slane %v4120_v47, 2 }
0x12f1   : > { %v4113_v34 = vadd.f32 %v4112_v4, %v4111_v48 }
0x12f2   : > { %v4122_v20 = vadd.f32 %v4121_v7, %v4120_v47 }
0x12f3   : > { %v4114_v12 = vrot.slane %v4113_v34, 1 }
0x12f4   : > { %v4123_v40 = vrot.slane %v4122_v20, 1 }
0x12f5   : > { %v4115_v6 = vadd.f32 %v4114_v12, %v4113_v34 }
0x12f6   : > { %v4124_v46 = vadd.f32 %v4123_v40, %v4122_v20 }
0x12f7   : > { %v4126_v59 = vmul.f32 0.03125, %v4115_v6 }
0x12f8   : > { %v4127_v33 = vmul.f32 0.03125, %v4124_v46 }
0x12f9   : > { %v4128_v1 = vsub.f32 %v10071_v61, %v4126_v59  ;;  %v4130_v54 = vsub.f32 %v10067_v62, %v4126_v59  ;;  %v4132_v22 = vsub.f32 %v10077_v11, %v4126_v59  ;;  %v4134_v23 = vsub.f32 %v10084_v31, %v4126_v59 }
0x12fa   : > { %v4129_v39 = vsub.f32 %v10073_v26, %v4127_v33  ;;  %v4131_v15 = vsub.f32 %v10069_v43, %v4127_v33  ;;  %v4133_v18 = vsub.f32 %v10081_v3, %v4127_v33  ;;  %v4135_v63 = vsub.f32 %v10087_v25, %v4127_v33 }
0x12fb   : > { %v4136_v44 = vmul.f32 %v4128_v1, %v4128_v1  ;;  %v4138_v55 = vmul.f32 %v4130_v54, %v4130_v54  ;;  %v4140_v9 = vmul.f32 %v4132_v22, %v4132_v22  ;;  %v4142_v21 = vmul.f32 %v4134_v23, %v4134_v23 }
0x12fc   : > { %v4137_v60 = vmul.f32 %v4129_v39, %v4129_v39  ;;  %v4139_v10 = vmul.f32 %v4131_v15, %v4131_v15  ;;  %v4141_v16 = vmul.f32 %v4133_v18, %v4133_v18  ;;  %v4143_v48 = vmul.f32 %v4135_v63, %v4135_v63 }
0x12fd   : > { %v4144_v45 = vadd.f32 %v4138_v55, %v4136_v44 }
0x12fe   : > { %v4153_v56 = vadd.f32 %v4139_v10, %v4137_v60  ;;  %v4184_v60 = vpop.permute.xlu0 %4183  ;;  %v4179_v10 = vpop.permute.xlu1 %4178 }
0x12ff   : > { %v4145_v19 = vadd.f32 %v4144_v45, %v4140_v9 }
0x1300   : > { %v4154_v47 = vadd.f32 %v4153_v56, %v4141_v16 }
0x1301   : > { %v4146_v4 = vadd.f32 %v4145_v19, %v4142_v21 }
0x1302   : > { %v4155_v7 = vadd.f32 %v4154_v47, %v4143_v48  ;;  %v4212_v56 = vpop.permute.xlu0 %4211  ;;  %v4207_v21 = vpop.permute.xlu1 %4206 }
0x1303   : > { %v4147_v34 = vrot.slane %v4146_v4, 4 }
0x1304   : > { %v4156_v20 = vrot.slane %v4155_v7, 4 }
0x1305   : > { %v4148_v12 = vadd.f32 %v4147_v34, %v4146_v4 }
0x1306   : > { %v4157_v40 = vadd.f32 %v4156_v20, %v4155_v7  ;;  %v4194_v19 = vpop.permute.xlu0 %4193  ;;  %v4189_v48 = vpop.permute.xlu1 %4188 }
0x1307   : > { %v4149_v6 = vrot.slane %v4148_v12, 2 }
0x1308   : > { %v4158_v46 = vrot.slane %v4157_v40, 2 }
0x1309   : > { %v4150_v59 = vadd.f32 %v4149_v6, %v4148_v12 }
0x130a   : > { %v4159_v33 = vadd.f32 %v4158_v46, %v4157_v40 }
0x130b   : > { %v4151_v37 = vrot.slane %v4150_v59, 1 }
0x130c   : > { %v4160_v35 = vrot.slane %v4159_v33, 1 }
0x130d   : > { %v4152_v0 = vadd.f32 %v4151_v37, %v4150_v59 }
0x130e   : > { %v4161_v44 = vadd.f32 %v4160_v35, %v4159_v33 }
0x130f   : > { %v4162_v55 = vmul.f32 0.03125, %v4152_v0 }
0x1310   : > { %v4163_v9 = vmul.f32 0.03125, %v4161_v44 }
0x1311   : > { %v4164_v45 = vadd.f32 1e-05, %v4162_v55 }
0x1312   : > { %v4165_v16 = vadd.f32 1e-05, %v4163_v9  ;;  %v4222_v9 = vpop.permute.xlu0 %4221 }
0x1313   : > { %7751 = vrsqrt.f32 %v4164_v45  ;;  %v4217_v45 = vpop.permute.xlu1 %4216 }
0x1314   : > { %7753 = vrsqrt.f32 %v4165_v16 }
0x131d   : > { %v7752_v47 = vpop.eup %7751 }
0x131e   : > { %v7754_v4 = vpop.eup %7753  ;;  %v4174_v7 = vmul.f32 %v7752_v47, %v4134_v23  ;;  %v4168_v34 = vmul.f32 %v7752_v47, %v4128_v1  ;;  %v4170_v20 = vmul.f32 %v7752_v47, %v4130_v54  ;;  %v4172_v12 = vmul.f32 %v7752_v47, %v4132_v22  ;;  %v4313_v47 = vld [vmem:[%s728_s7 + $0x8] sm:$0xff] }
0x131f   : > { %v4175_v37 = vmul.f32 %v7754_v4, %v4135_v63  ;;  %v4169_v35 = vmul.f32 %v7754_v4, %v4129_v39  ;;  %v4171_v0 = vmul.f32 %v7754_v4, %v4131_v15  ;;  %v4173_v40 = vmul.f32 %v7754_v4, %v4133_v18  ;;  %v4314_v4 = vld [vmem:[%s728_s7 + $0x10] sm:$0xff] }
0x1320   : > { %v4196_v6 = vmul.f32 %v4179_v10, %v4168_v34  ;;  %v4198_v46 = vmul.f32 %v4184_v60, %v4170_v20  ;;  %v4202_v16 = vmul.f32 %v4194_v19, %v4174_v7  ;;  %v4200_v42 = vmul.f32 %v4189_v48, %v4172_v12  ;;  %v4315_v34 = vld [vmem:[%s728_s7 + $0x18] sm:$0xff]  ;;  %v7550_v20 = vld [vmem:[%s11077_s10 + $0x30] sm:$0xff]  }
0x1321   : > { %v4197_v59 = vmul.f32 %v4179_v10, %v4169_v35  ;;  %v4199_v33 = vmul.f32 %v4184_v60, %v4171_v0  ;;  %v4201_v44 = vmul.f32 %v4189_v48, %v4173_v40  ;;  %v4203_v55 = vmul.f32 %v4194_v19, %v4175_v37  ;;  %v7546_v19 = vld [vmem:[%s11077_s10 + $0x10] sm:$0xff]   ;;  %v4312_v48 = vld [vmem:[%s728_s7] sm:$0xff]  ;;  %v7551_v37 = vld [vmem:[%s11077_s10 + $0x38] sm:$0xff]  }
0x1322   : > { %v4224_v27 = vadd.f32 %v4207_v21, %v4196_v6  ;;  %v4226_v58 = vadd.f32 %v4212_v56, %v4198_v46  ;;  %v4228_v15 = vadd.f32 %v4217_v45, %v4200_v42  ;;  %v4230_v18 = vadd.f32 %v4222_v9, %v4202_v16  ;;  %v7548_v42 = vld [vmem:[%s11077_s10 + $0x18] sm:$0xff]  }
0x1323   : > { %v4225_v23 = vadd.f32 %v4207_v21, %v4197_v59  ;;  %v4227_v1 = vadd.f32 %v4212_v56, %v4199_v33  ;;  %v4229_v54 = vadd.f32 %v4217_v45, %v4201_v44  ;;  %v4231_v22 = vadd.f32 %v4222_v9, %v4203_v55 }
0x1324   : > { %v4237_v39 = vpack.c.bf16 %v4226_v58, %v4224_v27  ;;  %v4239_v60 = vpack.c.bf16 %v4230_v18, %v4228_v15  ;;  %v4372_v27 = vpop.f32.mrb[48].mxu1  ;;  %v4316_v7 = vpack.c.bf16 %v4313_v47, %v4312_v48  ;;  %v4317_v12 = vpack.c.bf16 %v4315_v34, %v4314_v4 }
0x1325   : > { %v4238_v63 = vpack.c.bf16 %v4227_v1, %v4225_v23  ;;  %v4240_v10 = vpack.c.bf16 %v4231_v22, %v4229_v54  ;;  %v7263_v58 = vpop.f32.mrb[49].mxu1  ;;  %v4448_v23 = vpack.c.bf16 %v4372_v27, %v4372_v27 }
0x1326   : > { %v4375_v56 = vpop.f32.mrb[50].mxu1 }
0x1327   : > { %4257 = vmatprep.subr.bf16.mxu0 %v4238_v63  ;;  %v7264_v21 = vpop.f32.mrb[51].mxu1 }
0x1328   : > { %4258 = vmatpush1.bf16.msra.mxu0 %v4237_v39 }
0x1329   : > { %4259 = vmatprep.subr.bf16.mxu0 %v4240_v10 }
0x132c   : > { %4260 = vmatpush1.bf16.msra.mxu0 %v4239_v60 }
0x132d   : > { %7265 = vmatprep.subr.bf16.mxu0 %v4316_v7 }
0x132f   : > { %6792 = vmatmul.mubr.msk.bf16.vlgmr.msra.gmra.mrb[36].mxu0 %vm759_vm0, %v7546_v19 }
0x1330   : > { %4299 = vmatprep.mubr.bf16.mxu0 %v11210_v14  ;;  %7266 = vmatpush3.bf16.msra.mxu0 %v4316_v7 }
0x1331   : > { %7267 = vmatprep.subr.bf16.mxu0 %v4317_v12 }
0x1334   : > { %7268 = vmatpush3.bf16.msra.mxu0 %v4317_v12 }
0x1337   : > { %6793 = vmatmul.mubr.msk.bf16.gmra.mrb[40].mxu0 %vm759_vm0, %v7548_v42 }
0x1338   : > { %7269 = vmatprep.mubr.msk.bf16.mxu0 %vm759_vm0, %v7550_v20 }
0x133f   : > { %7270 = vmatmul.mubr.msk.bf16.vlgmr.msra.gmra.mrb[44].mxu0 %vm759_vm0, %v7551_v37 }
0x1340   : > { %4580 = vmatprep.mubr.bf16.mxu0 %v11210_v14 }
0x1402   : > { %v4291_v35 = vpop.f32.mrb[36].mxu0 }
0x1403   : > { %v4293_v0 = vpop.f32.mrb[37].mxu0 }
0x1404   : > { %v4295_v40 = vpop.f32.mrb[38].mxu0 }
0x1405   : > { %v4449_v6 = vpack.c.bf16 %v4295_v40, %v4291_v35  ;;  %v4297_v46 = vpop.f32.mrb[39].mxu0 }
0x1406   : > { %v4450_v59 = vpack.c.bf16 %v4297_v46, %v4293_v0 }
0x1408   : > { %4456 = vmatprep.subr.bf16.mxu1 %v4450_v59 }
0x1409   : > { %4457 = vmatpush1.bf16.msra.mxu1 %v4449_v6 }
0x140a   : > { %v4301_v33 = vpop.f32.mrb[40].mxu0 }
0x140b   : > { %v4303_v44 = vpop.f32.mrb[41].mxu0 }
0x140c   : > { %v4305_v55 = vpop.f32.mrb[42].mxu0 }
0x140d   : > { %v4451_v9 = vpack.c.bf16 %v4305_v55, %v4301_v33  ;;  %v4307_v45 = vpop.f32.mrb[43].mxu0 }
0x140e   : > { %v4452_v16 = vpack.c.bf16 %v4307_v45, %v4303_v44 }
0x1410   : > { %4458 = vmatprep.subr.bf16.mxu1 %v4452_v16 }
0x1411   : > { %4459 = vmatpush1.bf16.msra.mxu1 %v4451_v9 }
0x1412   : > { %v7271_v1 = vpop.f32.mrb[44].mxu0 }
0x1413   : > { %v4433_v54 = vpop.f32.mrb[45].mxu0 }
0x1414   : > { %6809 = vmatmul.mubr.msk.bf16.vlgmr.msra.gmra.mrb[52].mxu1 %vm759_vm0, %v4448_v23  ;;  %v7272_v22 = vpop.f32.mrb[46].mxu0 }
0x1415   : > { %4683 = vmatprep.mubr.bf16.mxu1 %v11210_v14  ;;  %v4532_v63 = vpack.c.bf16 %v7272_v22, %v7271_v1  ;;  %v4436_v39 = vpop.f32.mrb[47].mxu0 }
0x1416   : > { %v4531_v15 = vpack.c.bf16 %v4436_v39, %v4433_v54 }
0x14e7   : > { %v4490_v18 = vpop.f32.mrb[52].mxu1 }
0x14e8   : > { %v4497_v10 = vrot.slane %v4490_v18, 4  ;;  %v4492_v60 = vpop.f32.mrb[53].mxu1 }
0x14e9   : > { %v4503_v19 = vrot.slane %v4492_v60, 4  ;;  %v4494_v42 = vpop.f32.mrb[54].mxu1 }
0x14ea   : > { %v4498_v58 = vmax.f32 %v4490_v18, %v4497_v10  ;;  %v4495_v56 = vpop.f32.mrb[55].mxu1 }
0x14eb   : > { %v4504_v27 = vmax.f32 %v4492_v60, %v4503_v19 }
0x14ec   : > { %v4499_v21 = vrot.slane %v4498_v58, 2 }
0x14ed   : > { %v4505_v48 = vrot.slane %v4504_v27, 2 }
0x14ee   : > { %v4500_v47 = vmax.f32 %v4498_v58, %v4499_v21 }
0x14ef   : > { %v4506_v4 = vmax.f32 %v4504_v27, %v4505_v48 }
0x14f0   : > { %v4501_v7 = vrot.slane %v4500_v47, 1 }
0x14f1   : > { %v4507_v34 = vrot.slane %v4506_v4, 1 }
0x14f2   : > { %v4502_v20 = vmax.f32 %v4500_v47, %v4501_v7 }
0x14f3   : > { %v4508_v12 = vmax.f32 %v4506_v4, %v4507_v34 }
0x14f4   : > { %v4509_v37 = vsub.f32 %v4490_v18, %v4502_v20 }
0x14f5   : > { %v4510_v35 = vsub.f32 %v4492_v60, %v4508_v12 }
0x14f6   : > { %v4511_v0 = vmul.f32 1.442695, %v4509_v37 }
0x14f7   : > { %v4513_v40 = vmul.f32 1.442695, %v4510_v35 }
0x14f8   : > { %7755 = vpow2.f32 %v4511_v0 }
0x14f9   : > { %7757 = vpow2.f32 %v4513_v40 }
0x1502   : > { %v7756_v6 = vpop.eup %7755 }
0x1503   : > { %v7758_v46 = vpop.eup %7757  ;;  %v4515_v59 = vrot.slane %v7756_v6, 4 }
0x1504   : > { %v4521_v33 = vrot.slane %v7758_v46, 4 }
0x1505   : > { %v4516_v44 = vadd.f32 %v7756_v6, %v4515_v59  ;;  %v4618_v59 = vpop.permute.xlu1 %4617 }
0x1506   : > { %v4522_v55 = vadd.f32 %v7758_v46, %v4521_v33 }
0x1507   : > { %v4517_v9 = vrot.slane %v4516_v44, 2 }
0x1508   : > { %v4523_v45 = vrot.slane %v4522_v55, 2 }
0x1509   : > { %v4518_v16 = vadd.f32 %v4517_v9, %v4516_v44 }
0x150a   : > { %v4524_v23 = vadd.f32 %v4523_v45, %v4522_v55 }
0x150b   : > { %v4519_v1 = vrot.slane %v4518_v16, 1 }
0x150c   : > { %v4525_v54 = vrot.slane %v4524_v23, 1 }
0x150d   : > { %v4520_v22 = vadd.f32 %v4519_v1, %v4518_v16  ;;  %v4628_v1 = vpop.permute.xlu1 %4627 }
0x150e   : > { %v4526_v39 = vadd.f32 %v4525_v54, %v4524_v23 }
0x150f   : > { %7759 = vrcp.f32 %v4520_v22 }
0x1510   : > { %7761 = vrcp.f32 %v4526_v39 }
0x1519   : > { %v7760_v18 = vpop.eup %7759 }
0x151a   : > { %v7762_v10 = vpop.eup %7761  ;;  %v4529_v60 = vmul.f32 %v7760_v18, %v7756_v6  ;;  %v4623_v6 = vpop.permute.xlu0 %4622 }
0x151b   : > { %v4530_v19 = vmul.f32 %v7762_v10, %v7758_v46 }
0x151c   : > { %v4533_v42 = vpack.c.bf16 %v4529_v60, %v4529_v60 }
0x151d   : > { %v4534_v58 = vpack.c.bf16 %v4530_v19, %v4530_v19 }
0x151e   : > { %v4543_v56 = vsel %vm1856_vm11, %v4533_v42, 0  ;;  %v4633_v60 = vpop.permute.xlu0 %4632 }
0x151f   : > { %6810 = vmatprep.subr.msk.bf16.mxu0 %vm1856_vm11, %v4534_v58 }
0x1520   : > { %4549 = vmatpush1.bf16.msra.mxu0 %v4543_v56 }
0x1523   : > { %6811 = vmatmul.mubr.msk.bf16.vlgmr.msra.gmra.mrb[48].mxu0 %vm4535_vm14, %v4531_v15  ;;  %v7553_v15 = vld [vmem:[%s11077_s10 + $0x48] sm:$0xff]  }
0x1524   : > { %4590 = vmatprep.mubr.bf16.mxu0 %v11210_v14 }
0x152b   : > { %6812 = vmatmul.mubr.msk.bf16.gmra.mrb[52].mxu0 %vm4535_vm14, %v4532_v63  ;;  %v7552_v63 = vld [vmem:[%s11077_s10 + $0x40] sm:$0xff]  }
0x152c   : > { %5058 = vmatprep.mubr.bf16.mxu0 %v11210_v14 }
0x15f6   : > { %v4582_v27 = vpop.f32.mrb[48].mxu0 }
0x15f7   : > { %v4584_v21 = vpop.f32.mrb[49].mxu0 }
0x15f8   : > { %v4586_v48 = vpop.f32.mrb[50].mxu0 }
0x15f9   : > { %v4606_v47 = vpack.c.bf16 %v4586_v48, %v4582_v27  ;;  %v4588_v4 = vpop.f32.mrb[51].mxu0 }
0x15fa   : > { %v4607_v7 = vpack.c.bf16 %v4588_v4, %v4584_v21 }
0x15fc   : > { %4651 = vmatprep.subr.bf16.mxu1 %v4607_v7 }
0x15fd   : > { %4652 = vmatpush1.bf16.msra.mxu1 %v4606_v47 }
0x15fe   : > { %v4592_v34 = vpop.f32.mrb[52].mxu0 }
0x15ff   : > { %v4594_v20 = vpop.f32.mrb[53].mxu0 }
0x1600   : > { %v4596_v12 = vpop.f32.mrb[54].mxu0 }
0x1601   : > { %v4608_v37 = vpack.c.bf16 %v4596_v12, %v4592_v34  ;;  %v4598_v35 = vpop.f32.mrb[55].mxu0 }
0x1602   : > { %v4609_v0 = vpack.c.bf16 %v4598_v35, %v4594_v20 }
0x1604   : > { %4653 = vmatprep.subr.bf16.mxu1 %v4609_v0 }
0x1605   : > { %4654 = vmatpush1.bf16.msra.mxu1 %v4608_v37 }
0x1608   : > { %6823 = vmatmul.mubr.msk.bf16.vlgmr.msra.gmra.mrb[56].mxu1 %vm759_vm0, %v7552_v63 }
0x1609   : > { %4693 = vmatprep.mubr.bf16.mxu1 %v11210_v14 }
0x1610   : > { %6824 = vmatmul.mubr.msk.bf16.gmra.mrb[60].mxu1 %vm759_vm0, %v7553_v15 }
0x1611   : > { %5516 = vmatprep.mubr.bf16.mxu1 %v11210_v14 }
0x16db   : > { %v4685_v40 = vpop.f32.mrb[56].mxu1 }
0x16dc   : > { %v4687_v46 = vpop.f32.mrb[57].mxu1  ;;  %v4686_v45 = vadd.f32 %v4685_v40, %v4618_v59 }
0x16dd   : > { %v4689_v33 = vpop.f32.mrb[58].mxu1  ;;  %v4688_v16 = vadd.f32 %v4687_v46, %v4618_v59 }
0x16de   : > { %v4690_v44 = vadd.f32 %v4689_v33, %v4623_v6  ;;  %v4691_v55 = vpop.f32.mrb[59].mxu1  ;;  %v10145_v39 = vadd.f32 %v4686_v45, %v10071_v61 }
0x16df   : > { %v4692_v9 = vadd.f32 %v4691_v55, %v4623_v6  ;;  %v10148_v19 = vadd.f32 %v4688_v16, %v10073_v26 }
0x16e0   : > { %v10139_v23 = vadd.f32 %v4690_v44, %v10067_v62 }
0x16e1   : > { %v10142_v54 = vadd.f32 %v4692_v9, %v10069_v43 }
0x16e2   : > { %v4722_v62 = vadd.f32 %v10139_v23, %v10145_v39 }
0x16e3   : > { %v4695_v22 = vpop.f32.mrb[60].mxu1  ;;  %v4731_v61 = vadd.f32 %v10142_v54, %v10148_v19 }
0x16e4   : > { %v4696_v18 = vadd.f32 %v4695_v22, %v4628_v1  ;;  %v4697_v10 = vpop.f32.mrb[61].mxu1 }
0x16e5   : > { %v4698_v42 = vadd.f32 %v4697_v10, %v4628_v1  ;;  %v4699_v58 = vpop.f32.mrb[62].mxu1 }
0x16e6   : > { %v10153_v56 = vadd.f32 %v4696_v18, %v10077_v11  ;;  %v4700_v43 = vadd.f32 %v4699_v58, %v4633_v60  ;;  %v4701_v27 = vpop.f32.mrb[63].mxu1 }
0x16e7   : > { %v10158_v21 = vadd.f32 %v4698_v42, %v10081_v3  ;;  %v4702_v48 = vadd.f32 %v4701_v27, %v4633_v60 }
0x16e8   : > { %v4723_v26 = vadd.f32 %v4722_v62, %v10153_v56  ;;  %v10162_v47 = vadd.f32 %v4700_v43, %v10084_v31 }
0x16e9   : > { %v4732_v4 = vadd.f32 %v4731_v61, %v10158_v21  ;;  %v10166_v7 = vadd.f32 %v4702_v48, %v10087_v25 }
0x16ea   : > { %v4724_v11 = vadd.f32 %v4723_v26, %v10162_v47 }
0x16eb   : > { %v4733_v34 = vadd.f32 %v4732_v4, %v10166_v7 }
0x16ec   : > { %v4725_v20 = vrot.slane %v4724_v11, 4 }
0x16ed   : > { %v4734_v12 = vrot.slane %v4733_v34, 4 }
0x16ee   : > { %v4726_v37 = vadd.f32 %v4725_v20, %v4724_v11 }
0x16ef   : > { %v4735_v3 = vadd.f32 %v4734_v12, %v4733_v34 }
0x16f0   : > { %v4727_v35 = vrot.slane %v4726_v37, 2 }
0x16f1   : > { %v4736_v0 = vrot.slane %v4735_v3, 2 }
0x16f2   : > { %v4728_v63 = vadd.f32 %v4727_v35, %v4726_v37 }
0x16f3   : > { %v4737_v15 = vadd.f32 %v4736_v0, %v4735_v3 }
0x16f4   : > { %v4729_v40 = vrot.slane %v4728_v63, 1 }
0x16f5   : > { %v4738_v31 = vrot.slane %v4737_v15, 1 }
0x16f6   : > { %v4730_v6 = vadd.f32 %v4729_v40, %v4728_v63 }
0x16f7   : > { %v4739_v46 = vadd.f32 %v4738_v31, %v4737_v15 }
0x16f8   : > { %v4740_v59 = vmul.f32 0.03125, %v4730_v6 }
0x16f9   : > { %v4741_v33 = vmul.f32 0.03125, %v4739_v46 }
0x16fa   : > { %v4742_v25 = vsub.f32 %v10145_v39, %v4740_v59  ;;  %v4744_v44 = vsub.f32 %v10139_v23, %v4740_v59  ;;  %v4746_v55 = vsub.f32 %v10153_v56, %v4740_v59  ;;  %v4748_v1 = vsub.f32 %v10162_v47, %v4740_v59 }
0x16fb   : > { %v4743_v9 = vsub.f32 %v10148_v19, %v4741_v33  ;;  %v4745_v45 = vsub.f32 %v10142_v54, %v4741_v33  ;;  %v4747_v16 = vsub.f32 %v10158_v21, %v4741_v33  ;;  %v4749_v10 = vsub.f32 %v10166_v7, %v4741_v33  ;;  %v4798_v33 = vpop.permute.xlu0 %4797 }
0x16fc   : > { %v4750_v22 = vmul.f32 %v4742_v25, %v4742_v25  ;;  %v4752_v18 = vmul.f32 %v4744_v44, %v4744_v44  ;;  %v4754_v58 = vmul.f32 %v4746_v55, %v4746_v55  ;;  %v4756_v61 = vmul.f32 %v4748_v1, %v4748_v1 }
0x16fd   : > { %v4751_v60 = vmul.f32 %v4743_v9, %v4743_v9  ;;  %v4753_v42 = vmul.f32 %v4745_v45, %v4745_v45  ;;  %v4755_v43 = vmul.f32 %v4747_v16, %v4747_v16  ;;  %v4757_v26 = vmul.f32 %v4749_v10, %v4749_v10 }
0x16fe   : > { %v4758_v62 = vadd.f32 %v4752_v18, %v4750_v22  ;;  %v4793_v22 = vpop.permute.xlu1 %4792 }
0x16ff   : > { %v4767_v27 = vadd.f32 %v4753_v42, %v4751_v60 }
0x1700   : > { %v4759_v48 = vadd.f32 %v4758_v62, %v4754_v58  ;;  %v4826_v58 = vpop.permute.xlu0 %4825 }
0x1701   : > { %v4768_v4 = vadd.f32 %v4767_v27, %v4755_v43 }
0x1702   : > { %v4760_v11 = vadd.f32 %v4759_v48, %v4756_v61  ;;  %v4821_v62 = vpop.permute.xlu1 %4820 }
0x1703   : > { %v4769_v34 = vadd.f32 %v4768_v4, %v4757_v26 }
0x1704   : > { %v4761_v20 = vrot.slane %v4760_v11, 4  ;;  %v4808_v43 = vpop.permute.xlu0 %4807 }
0x1705   : > { %v4770_v12 = vrot.slane %v4769_v34, 4 }
0x1706   : > { %v4762_v37 = vadd.f32 %v4761_v20, %v4760_v11  ;;  %v4803_v27 = vpop.permute.xlu1 %4802 }
0x1707   : > { %v4771_v3 = vadd.f32 %v4770_v12, %v4769_v34 }
0x1708   : > { %v4763_v35 = vrot.slane %v4762_v37, 2 }
0x1709   : > { %v4772_v0 = vrot.slane %v4771_v3, 2 }
0x170a   : > { %v4764_v63 = vadd.f32 %v4763_v35, %v4762_v37 }
0x170b   : > { %v4773_v15 = vadd.f32 %v4772_v0, %v4771_v3 }
0x170c   : > { %v4765_v40 = vrot.slane %v4764_v63, 1 }
0x170d   : > { %v4774_v31 = vrot.slane %v4773_v15, 1 }
0x170e   : > { %v4766_v6 = vadd.f32 %v4765_v40, %v4764_v63 }
0x170f   : > { %v4775_v46 = vadd.f32 %v4774_v31, %v4773_v15 }
0x1710   : > { %v4776_v59 = vmul.f32 0.03125, %v4766_v6  ;;  %v4836_v6 = vpop.permute.xlu0 %4835 }
0x1711   : > { %v4777_v18 = vmul.f32 0.03125, %v4775_v46  ;;  %v4831_v46 = vpop.permute.xlu1 %4830 }
0x1712   : > { %v4778_v60 = vadd.f32 1e-05, %v4776_v59 }
0x1713   : > { %v4779_v42 = vadd.f32 1e-05, %v4777_v18 }
0x1714   : > { %7763 = vrsqrt.f32 %v4778_v60 }
0x1715   : > { %7765 = vrsqrt.f32 %v4779_v42 }
0x171e   : > { %v7764_v61 = vpop.eup %7763 }
0x171f   : > { %v7766_v48 = vpop.eup %7765  ;;  %v4788_v26 = vmul.f32 %v7764_v61, %v4748_v1  ;;  %v4782_v4 = vmul.f32 %v7764_v61, %v4742_v25  ;;  %v4784_v11 = vmul.f32 %v7764_v61, %v4744_v44  ;;  %v4786_v34 = vmul.f32 %v7764_v61, %v4746_v55 }
0x1720   : > { %v4789_v20 = vmul.f32 %v7766_v48, %v4749_v10  ;;  %v4783_v12 = vmul.f32 %v7766_v48, %v4743_v9  ;;  %v4785_v37 = vmul.f32 %v7766_v48, %v4745_v45  ;;  %v4787_v3 = vmul.f32 %v7766_v48, %v4747_v16  ;;  %v7559_v48 = vld [vmem:[%s11078_s11 + $0x28] sm:$0xff]  }
0x1721   : > { %v4810_v35 = vmul.f32 %v4793_v22, %v4782_v4  ;;  %v4812_v0 = vmul.f32 %v4798_v33, %v4784_v11  ;;  %v4816_v59 = vmul.f32 %v4808_v43, %v4788_v26  ;;  %v4814_v42 = vmul.f32 %v4803_v27, %v4786_v34  ;;  %v7560_v26 = vld [vmem:[%s11078_s11 + $0x30] sm:$0xff]   ;;  %v7561_v4 = vld [vmem:[%s11078_s11 + $0x38] sm:$0xff]   ;;  %v4885_v11 = vpop.permute.xlu1 %4884 }
0x1722   : > { %v4811_v63 = vmul.f32 %v4793_v22, %v4783_v12  ;;  %v4813_v15 = vmul.f32 %v4798_v33, %v4785_v37  ;;  %v4815_v40 = vmul.f32 %v4803_v27, %v4787_v3  ;;  %v4817_v31 = vmul.f32 %v4808_v43, %v4789_v20  ;;  %v7554_v22 = vld [vmem:[%s11078_s11] sm:$0xff]   ;;  %v7557_v43 = vld [vmem:[%s11078_s11 + $0x18] sm:$0xff]   ;;  %v4890_v37 = vpop.permute.xlu0 %4889 }
0x1723   : > { %v4838_v18 = vadd.f32 %v4821_v62, %v4810_v35  ;;  %v4840_v60 = vadd.f32 %v4826_v58, %v4812_v0  ;;  %v4842_v45 = vadd.f32 %v4831_v46, %v4814_v42  ;;  %v4844_v16 = vadd.f32 %v4836_v6, %v4816_v59  ;;  %v7558_v27 = vld [vmem:[%s11078_s11 + $0x20] sm:$0xff]  }
0x1724   : > { %v4839_v1 = vadd.f32 %v4821_v62, %v4811_v63  ;;  %v4841_v25 = vadd.f32 %v4826_v58, %v4813_v15  ;;  %v4843_v44 = vadd.f32 %v4831_v46, %v4815_v40  ;;  %v4845_v55 = vadd.f32 %v4836_v6, %v4817_v31  ;;  %v7555_v58 = vld [vmem:[%s11078_s11 + $0x8] sm:$0xff]   ;;  %v7556_v62 = vld [vmem:[%s11078_s11 + $0x10] sm:$0xff]  }
0x1725   : > { %v4862_v9 = vpack.c.bf16 %v4840_v60, %v4838_v18  ;;  %v4864_v33 = vpack.c.bf16 %v4844_v16, %v4842_v45 }
0x1726   : > { %v4863_v10 = vpack.c.bf16 %v4841_v25, %v4839_v1  ;;  %v4865_v61 = vpack.c.bf16 %v4845_v55, %v4843_v44  ;;  %v4895_v1 = vpop.permute.xlu1 %4894 }
0x1728   : > { %5026 = vmatprep.subr.bf16.mxu0 %v4863_v10 }
0x1729   : > { %5027 = vmatpush1.bf16.msra.mxu0 %v4862_v9 }
0x172a   : > { %5028 = vmatprep.subr.bf16.mxu0 %v4865_v61  ;;  %v4900_v61 = vpop.permute.xlu0 %4899 }
0x172d   : > { %5029 = vmatpush1.bf16.msra.mxu0 %v4864_v33 }
0x1730   : > { %6841 = vmatmul.mubr.msk.bf16.vlgmr.msra.gmra.mrb[56].mxu0 %vm759_vm0, %v7554_v22 }
0x1731   : > { %5068 = vmatprep.mubr.bf16.mxu0 %v11210_v14 }
0x1738   : > { %6842 = vmatmul.mubr.msk.bf16.gmra.mrb[60].mxu0 %vm759_vm0, %v7555_v58 }
0x1739   : > { %5078 = vmatprep.mubr.bf16.mxu0 %v11210_v14 }
0x1740   : > { %6843 = vmatmul.mubr.msk.bf16.gmra.mrb[64].mxu0 %vm759_vm0, %v7556_v62 }
0x1741   : > { %5088 = vmatprep.mubr.bf16.mxu0 %v11210_v14 }
0x1748   : > { %6844 = vmatmul.mubr.msk.bf16.gmra.mrb[68].mxu0 %vm759_vm0, %v7557_v43 }
0x1749   : > { %5098 = vmatprep.mubr.bf16.mxu0 %v11210_v14 }
0x1750   : > { %6845 = vmatmul.mubr.msk.bf16.gmra.mrb[72].mxu0 %vm759_vm0, %v7558_v27 }
0x1751   : > { %5108 = vmatprep.mubr.bf16.mxu0 %v11210_v14 }
0x1758   : > { %6846 = vmatmul.mubr.msk.bf16.gmra.mrb[76].mxu0 %vm759_vm0, %v7559_v48 }
0x1759   : > { %5118 = vmatprep.mubr.bf16.mxu0 %v11210_v14 }
0x1760   : > { %6847 = vmatmul.mubr.msk.bf16.gmra.mrb[80].mxu0 %vm759_vm0, %v7560_v26 }
0x1761   : > { %5128 = vmatprep.mubr.bf16.mxu0 %v11210_v14 }
0x1768   : > { %6848 = vmatmul.mubr.msk.bf16.gmra.mrb[84].mxu0 %vm759_vm0, %v7561_v4 }
0x1803   : > { %v5060_v34 = vpop.f32.mrb[56].mxu0 }
0x1804   : > { %v10217_v20 = vadd.f32 %v5060_v34, %v4885_v11  ;;  %v5062_v12 = vpop.f32.mrb[57].mxu0 }
0x1805   : > { %v10219_v3 = vadd.f32 %v5062_v12, %v4885_v11  ;;  %v5064_v35 = vpop.f32.mrb[58].mxu0 }
0x1806   : > { %v5139_v0 = vmul.f32 %v10217_v20, %v10217_v20  ;;  %v10223_v63 = vadd.f32 %v5064_v35, %v4890_v37  ;;  %v5066_v15 = vpop.f32.mrb[59].mxu0 }
0x1807   : > { %v5140_v40 = vmul.f32 %v10219_v3, %v10219_v3  ;;  %v10227_v31 = vadd.f32 %v5066_v15, %v4890_v37 }
0x1808   : > { %v5171_v6 = vmul.f32 %v5139_v0, %v10217_v20  ;;  %v5141_v46 = vmul.f32 %v10223_v63, %v10223_v63 }
0x1809   : > { %v5172_v59 = vmul.f32 %v5140_v40, %v10219_v3  ;;  %v5142_v18 = vmul.f32 %v10227_v31, %v10227_v31 }
0x180a   : > { %v5203_v60 = vmul.f32 0.044715, %v5171_v6  ;;  %v5173_v42 = vmul.f32 %v5141_v46, %v10223_v63 }
0x180b   : > { %v5204_v25 = vmul.f32 0.044715, %v5172_v59  ;;  %v5174_v44 = vmul.f32 %v5142_v18, %v10227_v31  ;;  %v5070_v55 = vpop.f32.mrb[60].mxu0 }
0x180c   : > { %v5235_v10 = vadd.f32 %v5203_v60, %v10217_v20  ;;  %v5205_v9 = vmul.f32 0.044715, %v5173_v42  ;;  %v10238_v45 = vadd.f32 %v5070_v55, %v4895_v1  ;;  %v5072_v16 = vpop.f32.mrb[61].mxu0  ;;  %v4905_v60 = vpop.permute.xlu1 %4904 }
0x180d   : > { %v5236_v33 = vadd.f32 %v5204_v25, %v10219_v3  ;;  %v5206_v22 = vmul.f32 0.044715, %v5174_v44  ;;  %v10241_v58 = vadd.f32 %v5072_v16, %v4895_v1  ;;  %v5074_v62 = vpop.f32.mrb[62].mxu0  ;;  %v4910_v16 = vpop.permute.xlu0 %4909 }
0x180e   : > { %v5267_v43 = vmul.f32 0.7978846, %v5235_v10  ;;  %v5237_v27 = vadd.f32 %v5205_v9, %v10223_v63  ;;  %v5143_v48 = vmul.f32 %v10238_v45, %v10238_v45  ;;  %v10246_v26 = vadd.f32 %v5074_v62, %v4900_v61  ;;  %v5076_v4 = vpop.f32.mrb[63].mxu0 }
0x180f   : > { %v5268_v11 = vmul.f32 0.7978846, %v5236_v33  ;;  %v5238_v34 = vadd.f32 %v5206_v22, %v10227_v31  ;;  %v5144_v12 = vmul.f32 %v10241_v58, %v10241_v58  ;;  %v10251_v37 = vadd.f32 %v5076_v4, %v4900_v61 }
0x1810   : > { %7767 = vtanh.f32 %v5267_v43  ;;  %v5269_v35 = vmul.f32 0.7978846, %v5237_v27  ;;  %v5175_v0 = vmul.f32 %v5143_v48, %v10238_v45  ;;  %v5145_v15 = vmul.f32 %v10246_v26, %v10246_v26 }
0x1811   : > { %7769 = vtanh.f32 %v5268_v11  ;;  %v5270_v40 = vmul.f32 0.7978846, %v5238_v34  ;;  %v5176_v6 = vmul.f32 %v5144_v12, %v10241_v58  ;;  %v5146_v46 = vmul.f32 %v10251_v37, %v10251_v37 }
0x1812   : > { %7771 = vtanh.f32 %v5269_v35  ;;  %v5207_v59 = vmul.f32 0.044715, %v5175_v0  ;;  %v5177_v18 = vmul.f32 %v5145_v15, %v10246_v26 }
0x1813   : > { %v5208_v42 = vmul.f32 0.044715, %v5176_v6  ;;  %v5178_v1 = vmul.f32 %v5146_v46, %v10251_v37  ;;  %v5080_v25 = vpop.f32.mrb[64].mxu0  ;;  %7773 = vtanh.f32 %v5270_v40 }
0x1814   : > { %v5239_v44 = vadd.f32 %v5207_v59, %v10238_v45  ;;  %v5209_v55 = vmul.f32 0.044715, %v5177_v18  ;;  %v10262_v10 = vadd.f32 %v5080_v25, %v4905_v60  ;;  %v5082_v9 = vpop.f32.mrb[65].mxu0 }
0x1815   : > { %v5240_v61 = vadd.f32 %v5208_v42, %v10241_v58  ;;  %v5210_v33 = vmul.f32 0.044715, %v5178_v1  ;;  %v10265_v22 = vadd.f32 %v5082_v9, %v4905_v60  ;;  %v5084_v62 = vpop.f32.mrb[66].mxu0 }
0x1816   : > { %v5271_v43 = vmul.f32 0.7978846, %v5239_v44  ;;  %v5241_v27 = vadd.f32 %v5209_v55, %v10246_v26  ;;  %v5147_v48 = vmul.f32 %v10262_v10, %v10262_v10  ;;  %v10270_v4 = vadd.f32 %v5084_v62, %v4910_v16  ;;  %v5086_v11 = vpop.f32.mrb[67].mxu0  ;;  %v4915_v44 = vpop.permute.xlu1 %4914 }
0x1817   : > { %v5272_v34 = vmul.f32 0.7978846, %v5240_v61  ;;  %v5242_v12 = vadd.f32 %v5210_v33, %v10251_v37  ;;  %v5148_v35 = vmul.f32 %v10265_v22, %v10265_v22  ;;  %v10275_v0 = vadd.f32 %v5086_v11, %v4910_v16 }
0x1818   : > { %7775 = vtanh.f32 %v5271_v43  ;;  %v5273_v15 = vmul.f32 0.7978846, %v5241_v27  ;;  %v5179_v40 = vmul.f32 %v5147_v48, %v10262_v10  ;;  %v5149_v6 = vmul.f32 %v10270_v4, %v10270_v4 }
0x1819   : > { %7777 = vtanh.f32 %v5272_v34  ;;  %v5274_v46 = vmul.f32 0.7978846, %v5242_v12  ;;  %v5180_v59 = vmul.f32 %v5148_v35, %v10265_v22  ;;  %v5150_v18 = vmul.f32 %v10275_v0, %v10275_v0 }
0x181a   : > { %v7768_v60 = vpop.eup %7767  ;;  %7779 = vtanh.f32 %v5273_v15  ;;  %v5211_v42 = vmul.f32 0.044715, %v5179_v40  ;;  %v5181_v1 = vmul.f32 %v5149_v6, %v10270_v4 }
0x181b   : > { %v7770_v25 = vpop.eup %7769  ;;  %v5331_v55 = vadd.f32 1.0, %v7768_v60  ;;  %7781 = vtanh.f32 %v5274_v46  ;;  %v5212_v9 = vmul.f32 0.044715, %v5180_v59  ;;  %v5182_v16 = vmul.f32 %v5150_v18, %v10275_v0  ;;  %v5090_v61 = vpop.f32.mrb[68].mxu0 }
0x181c   : > { %v7772_v33 = vpop.eup %7771  ;;  %v5243_v62 = vadd.f32 %v5211_v42, %v10262_v10  ;;  %v5213_v43 = vmul.f32 0.044715, %v5181_v1  ;;  %v10286_v27 = vadd.f32 %v5090_v61, %v4915_v44  ;;  %v5092_v48 = vpop.f32.mrb[69].mxu0  ;;  %v10288_v11 = vadd.f32 1.0, %v7770_v25 }
0x181d   : > { %v5363_v34 = vmul.f32 0.5, %v5331_v55  ;;  %v5333_v12 = vadd.f32 1.0, %v7772_v33  ;;  %v5244_v35 = vadd.f32 %v5212_v9, %v10265_v22  ;;  %v5214_v15 = vmul.f32 0.044715, %v5182_v16  ;;  %v5094_v40 = vpop.f32.mrb[70].mxu0  ;;  %v7774_v42 = vpop.eup %7773 }
0x181e   : > { %v5275_v6 = vmul.f32 0.7978846, %v5243_v62  ;;  %v5245_v46 = vadd.f32 %v5213_v43, %v10270_v4  ;;  %v5151_v59 = vmul.f32 %v10286_v27, %v10286_v27  ;;  %v10294_v18 = vadd.f32 %v5092_v48, %v4915_v44  ;;  %v5096_v60 = vpop.f32.mrb[71].mxu0  ;;  %v4920_v9 = vpop.permute.xlu0 %4919 }
0x181f   : > { %v10297_v1 = vmul.f32 %v5363_v34, %v10217_v20  ;;  %v5365_v25 = vmul.f32 0.5, %v5333_v12  ;;  %v5276_v55 = vmul.f32 0.7978846, %v5244_v35  ;;  %v5246_v61 = vadd.f32 %v5214_v15, %v10275_v0 }
0x1820   : > { %7783 = vtanh.f32 %v5275_v6  ;;  %v5277_v16 = vmul.f32 0.7978846, %v5245_v46  ;;  %v5183_v33 = vmul.f32 %v5151_v59, %v10286_v27  ;;  %v5152_v62 = vmul.f32 %v10294_v18, %v10294_v18  ;;  %v4925_v6 = vpop.permute.xlu1 %4924 }
0x1821   : > { %v10304_v44 = vmul.f32 %v5365_v25, %v10223_v63  ;;  %7785 = vtanh.f32 %v5276_v55  ;;  %v5278_v43 = vmul.f32 0.7978846, %v5246_v61  ;;  %v10306_v48 = vadd.f32 %v5094_v40, %v4920_v9 }
0x1822   : > { %v7776_v20 = vpop.eup %7775  ;;  %7787 = vtanh.f32 %v5277_v16  ;;  %v5215_v34 = vmul.f32 0.044715, %v5183_v33  ;;  %v5184_v12 = vmul.f32 %v5152_v62, %v10294_v18  ;;  %v10309_v35 = vadd.f32 %v5096_v60, %v4920_v9 }
0x1823   : > { %v10311_v15 = vpop.eup %7777  ;;  %v5335_v46 = vadd.f32 1.0, %v7776_v20  ;;  %7789 = vtanh.f32 %v5278_v43  ;;  %v5153_v63 = vmul.f32 %v10306_v48, %v10306_v48  ;;  %v5100_v59 = vpop.f32.mrb[72].mxu0  ;;  %v5334_v25 = vadd.f32 1.0, %v7774_v42 }
0x1824   : > { %v7780_v55 = vpop.eup %7779  ;;  %v5247_v40 = vadd.f32 %v5215_v34, %v10286_v27  ;;  %v5216_v61 = vmul.f32 0.044715, %v5184_v12  ;;  %v5154_v16 = vmul.f32 %v10309_v35, %v10309_v35  ;;  %v10318_v33 = vadd.f32 %v5100_v59, %v4925_v6  ;;  %v5102_v60 = vpop.f32.mrb[73].mxu0 }
0x1825   : > { %v10320_v9 = vpop.eup %7781  ;;  %v5367_v62 = vmul.f32 0.5, %v5335_v46  ;;  %v5337_v20 = vadd.f32 1.0, %v7780_v55  ;;  %v5185_v43 = vmul.f32 %v5153_v63, %v10306_v48  ;;  %v10323_v17 = vadd.f32 %v5102_v60, %v4925_v6  ;;  %v5104_v41 = vpop.f32.mrb[74].mxu0 }
0x1826   : > { %v5279_v42 = vmul.f32 0.7978846, %v5247_v40  ;;  %v5248_v5 = vadd.f32 %v5216_v61, %v10294_v18  ;;  %v5186_v34 = vmul.f32 %v5154_v16, %v10309_v35  ;;  %v5155_v12 = vmul.f32 %v10318_v33, %v10318_v33  ;;  %v5106_v59 = vpop.f32.mrb[75].mxu0  ;;  %v4930_v6 = vpop.permute.xlu0 %4929 }
0x1827   : > { %v10330_v51 = vmul.f32 %v5367_v62, %v10238_v45  ;;  %v5369_v2 = vmul.f32 0.5, %v5337_v20  ;;  %v5217_v46 = vmul.f32 0.044715, %v5185_v43  ;;  %v5156_v63 = vmul.f32 %v10323_v17, %v10323_v17 }
0x1828   : > { %7791 = vtanh.f32 %v5279_v42  ;;  %v5280_v55 = vmul.f32 0.7978846, %v5248_v5  ;;  %v5218_v40 = vmul.f32 0.044715, %v5186_v34  ;;  %v5187_v61 = vmul.f32 %v5155_v12, %v10318_v33 }
0x1829   : > { %v10336_v16 = vmul.f32 %v5369_v2, %v10246_v26  ;;  %v5249_v60 = vadd.f32 %v5217_v46, %v10306_v48  ;;  %v5188_v49 = vmul.f32 %v5156_v63, %v10323_v17  ;;  %v10340_v45 = vadd.f32 %v5104_v41, %v4930_v6 }
0x182a   : > { %v7784_v62 = vpop.eup %7783  ;;  %7793 = vtanh.f32 %v5280_v55  ;;  %v5250_v20 = vadd.f32 %v5218_v40, %v10309_v35  ;;  %v5219_v43 = vmul.f32 0.044715, %v5187_v61  ;;  %v10343_v57 = vadd.f32 %v5106_v59, %v4930_v6 }
0x182b   : > { %v10345_v5 = vpop.eup %7785  ;;  %v5339_v42 = vadd.f32 1.0, %v7784_v62  ;;  %v5281_v34 = vmul.f32 0.7978846, %v5249_v60  ;;  %v5220_v12 = vmul.f32 0.044715, %v5188_v49  ;;  %v5157_v2 = vmul.f32 %v10340_v45, %v10340_v45  ;;  %v5110_v26 = vpop.f32.mrb[76].mxu0 }
0x182c   : > { %v7788_v46 = vpop.eup %7787  ;;  %v5282_v63 = vmul.f32 0.7978846, %v5250_v20  ;;  %v5251_v41 = vadd.f32 %v5219_v43, %v10318_v33  ;;  %v5158_v55 = vmul.f32 %v10343_v57, %v10343_v57  ;;  %v5364_v40 = vmul.f32 0.5, %v10288_v11  ;;  %v5112_v59 = vpop.f32.mrb[77].mxu0 }
0x182d   : > { %v10353_v6 = vpop.eup %7789  ;;  %v5371_v61 = vmul.f32 0.5, %v5339_v42  ;;  %v5341_v62 = vadd.f32 1.0, %v7788_v46  ;;  %7795 = vtanh.f32 %v5281_v34  ;;  %v5252_v49 = vadd.f32 %v5220_v12, %v10323_v17  ;;  %v5114_v60 = vpop.f32.mrb[78].mxu0 }
0x182e   : > { %7797 = vtanh.f32 %v5282_v63  ;;  %v5283_v28 = vmul.f32 0.7978846, %v5251_v41  ;;  %v5189_v20 = vmul.f32 %v5157_v2, %v10340_v45  ;;  %v5190_v43 = vmul.f32 %v5158_v55, %v10343_v57  ;;  %v5116_v30 = vpop.f32.mrb[79].mxu0  ;;  %v4935_v12 = vpop.permute.xlu1 %4934 }
0x182f   : > { %v10359_v38 = vmul.f32 %v5371_v61, %v10262_v10  ;;  %v5373_v11 = vmul.f32 0.5, %v5341_v62  ;;  %v5284_v13 = vmul.f32 0.7978846, %v5252_v49  ;;  %v5366_v8 = vmul.f32 0.5, %v5334_v25  ;;  %v4940_v55 = vpop.permute.xlu0 %4939 }
0x1830   : > { %7799 = vtanh.f32 %v5283_v28  ;;  %v5221_v42 = vmul.f32 0.044715, %v5189_v20  ;;  %v5222_v46 = vmul.f32 0.044715, %v5190_v43  ;;  %v5396_v34 = vmul.f32 %v5364_v40, %v10219_v3 }
0x1831   : > { %v10363_v63 = vmul.f32 %v5373_v11, %v10270_v4  ;;  %7801 = vtanh.f32 %v5284_v13  ;;  %v5398_v2 = vmul.f32 %v5366_v8, %v10227_v31  ;;  %v5431_v41 = vpack.c.bf16 %v10304_v44, %v10297_v1 }
0x1832   : > { %v7792_v10 = vpop.eup %7791  ;;  %v5253_v61 = vadd.f32 %v5221_v42, %v10340_v45  ;;  %v5254_v28 = vadd.f32 %v5222_v46, %v10343_v57  ;;  %v10370_v25 = vadd.f32 %v5110_v26, %v4935_v12  ;;  %v10372_v62 = vadd.f32 %v5112_v59, %v4935_v12 }
0x1833   : > { %v5343_v3 = vadd.f32 1.0, %v7792_v10  ;;  %v5432_v40 = vpack.c.bf16 %v5398_v2, %v5396_v34  ;;  %v10374_v4 = vadd.f32 %v5114_v60, %v4940_v55  ;;  %v10376_v13 = vadd.f32 %v5116_v30, %v4940_v55  ;;  %v5120_v8 = vpop.f32.mrb[80].mxu0 }
0x1834   : > { %v10378_v31 = vpop.eup %7793  ;;  %v5285_v1 = vmul.f32 0.7978846, %v5253_v61  ;;  %v5286_v44 = vmul.f32 0.7978846, %v5254_v28  ;;  %v5159_v49 = vmul.f32 %v10370_v25, %v10370_v25  ;;  %v5160_v26 = vmul.f32 %v10372_v62, %v10372_v62  ;;  %v5122_v20 = vpop.f32.mrb[81].mxu0 }
0x1835   : > { %v5375_v59 = vmul.f32 0.5, %v5343_v3  ;;  %5484 = vmatprep.subr.bf16.mxu1 %v5432_v40  ;;  %v5161_v60 = vmul.f32 %v10374_v4, %v10374_v4  ;;  %v5162_v30 = vmul.f32 %v10376_v13, %v10376_v13  ;;  %v5336_v43 = vadd.f32 1.0, %v10311_v15  ;;  %v5124_v11 = vpop.f32.mrb[82].mxu0 }
0x1836   : > { %7803 = vtanh.f32 %v5285_v1  ;;  %5485 = vmatpush1.bf16.msra.mxu1 %v5431_v41  ;;  %v5191_v42 = vmul.f32 %v5159_v49, %v10370_v25  ;;  %v5192_v46 = vmul.f32 %v5160_v26, %v10372_v62  ;;  %v5338_v34 = vadd.f32 1.0, %v10320_v9  ;;  %v5126_v12 = vpop.f32.mrb[83].mxu0 }
0x1837   : > { %v7796_v2 = vpop.eup %7795  ;;  %v10393_v10 = vmul.f32 %v5375_v59, %v10286_v27  ;;  %7805 = vtanh.f32 %v5286_v44  ;;  %v5193_v55 = vmul.f32 %v5161_v60, %v10374_v4  ;;  %v5194_v61 = vmul.f32 %v5162_v30, %v10376_v13 }
0x1838   : > { %v10397_v15 = vpop.eup %7797  ;;  %v5345_v28 = vadd.f32 1.0, %v7796_v2  ;;  %v5223_v41 = vmul.f32 0.044715, %v5191_v42  ;;  %v5224_v3 = vmul.f32 0.044715, %v5192_v46  ;;  %v5368_v40 = vmul.f32 0.5, %v5336_v43  ;;  %v4945_v2 = vpop.permute.xlu1 %4944 }
0x1839   : > { %v5225_v1 = vmul.f32 0.044715, %v5193_v55  ;;  %v5226_v49 = vmul.f32 0.044715, %v5194_v61  ;;  %v5370_v26 = vmul.f32 0.5, %v5338_v34  ;;  %v5433_v9 = vpack.c.bf16 %v10336_v16, %v10330_v51 }
0x183a   : > { %v7800_v24 = vpop.eup %7799  ;;  %v5377_v27 = vmul.f32 0.5, %v5345_v28  ;;  %v5255_v44 = vadd.f32 %v5223_v41, %v10370_v25  ;;  %v5256_v59 = vadd.f32 %v5224_v3, %v10372_v62  ;;  %v5400_v60 = vmul.f32 %v5368_v40, %v10241_v58  ;;  %v4950_v58 = vpop.permute.xlu0 %4949 }
0x183b   : > { %v10404_v30 = vpop.eup %7801  ;;  %v5347_v42 = vadd.f32 1.0, %v7800_v24  ;;  %v5257_v43 = vadd.f32 %v5225_v1, %v10374_v4  ;;  %v5258_v46 = vadd.f32 %v5226_v49, %v10376_v13  ;;  %v5402_v34 = vmul.f32 %v5370_v26, %v10251_v37  ;;  %v5130_v55 = vpop.f32.mrb[84].mxu0 }
0x183c   : > { %v10410_v51 = vmul.f32 %v5377_v27, %v10306_v48  ;;  %v5287_v16 = vmul.f32 0.7978846, %v5255_v44  ;;  %v5288_v61 = vmul.f32 0.7978846, %v5256_v59  ;;  %v10412_v28 = vadd.f32 %v5120_v8, %v4945_v2  ;;  %v5132_v41 = vpop.f32.mrb[85].mxu0 }
0x183d   : > { %v5379_v3 = vmul.f32 0.5, %v5347_v42  ;;  %v5289_v40 = vmul.f32 0.7978846, %v5257_v43  ;;  %v5290_v29 = vmul.f32 0.7978846, %v5258_v46  ;;  %v5434_v24 = vpack.c.bf16 %v5402_v34, %v5400_v60  ;;  %v5134_v53 = vpop.f32.mrb[86].mxu0 }
0x183e   : > { %7807 = vtanh.f32 %v5287_v16  ;;  %v5163_v1 = vmul.f32 %v10412_v28, %v10412_v28  ;;  %v10416_v37 = vadd.f32 %v5122_v20, %v4945_v2  ;;  %v10418_v49 = vadd.f32 %v5124_v11, %v4950_v58  ;;  %v5136_v48 = vpop.f32.mrb[87].mxu0 }
0x183f   : > { %v10421_v26 = vmul.f32 %v5379_v3, %v10318_v33  ;;  %7809 = vtanh.f32 %v5288_v61  ;;  %5486 = vmatprep.subr.bf16.mxu1 %v5434_v24  ;;  %v10423_v8 = vadd.f32 %v5126_v12, %v4950_v58  ;;  %v5340_v27 = vadd.f32 1.0, %v10345_v5  ;;  %v4955_v58 = vpop.permute.xlu1 %4954 }
0x1840   : > { %v7804_v44 = vpop.eup %7803  ;;  %7811 = vtanh.f32 %v5289_v40  ;;  %5487 = vmatpush1.bf16.msra.mxu1 %v5433_v9  ;;  %v5195_v59 = vmul.f32 %v5163_v1, %v10412_v28  ;;  %v5164_v20 = vmul.f32 %v10416_v37, %v10416_v37  ;;  %v5165_v11 = vmul.f32 %v10418_v49, %v10418_v49 }
0x1841   : > { %v10431_v60 = vpop.eup %7805  ;;  %v5349_v33 = vadd.f32 1.0, %v7804_v44  ;;  %7813 = vtanh.f32 %v5290_v29  ;;  %v5166_v12 = vmul.f32 %v10423_v8, %v10423_v8  ;;  %v5342_v5 = vadd.f32 1.0, %v10353_v6 }
0x1842   : > { %v5227_v2 = vmul.f32 0.044715, %v5195_v59  ;;  %v5196_v9 = vmul.f32 %v5164_v20, %v10416_v37  ;;  %v5197_v42 = vmul.f32 %v5165_v11, %v10418_v49  ;;  %v5372_v43 = vmul.f32 0.5, %v5340_v27  ;;  %v4960_v59 = vpop.permute.xlu0 %4959 }
0x1843   : > { %v5381_v46 = vmul.f32 0.5, %v5349_v33  ;;  %v5198_v34 = vmul.f32 %v5166_v12, %v10423_v8  ;;  %v5374_v16 = vmul.f32 0.5, %v5342_v5  ;;  %v5435_v61 = vpack.c.bf16 %v10363_v63, %v10359_v38 }
0x1844   : > { %v5259_v29 = vadd.f32 %v5227_v2, %v10412_v28  ;;  %v5228_v3 = vmul.f32 0.044715, %v5196_v9  ;;  %v5229_v40 = vmul.f32 0.044715, %v5197_v42  ;;  %v5404_v6 = vmul.f32 %v5372_v43, %v10265_v22 }
0x1845   : > { %v10444_v24 = vmul.f32 %v5381_v46, %v10340_v45  ;;  %v5230_v1 = vmul.f32 0.044715, %v5198_v34  ;;  %v5406_v27 = vmul.f32 %v5374_v16, %v10275_v0  ;;  %v10447_v44 = vadd.f32 %v5130_v55, %v4955_v58 }
0x1846   : > { %v5291_v20 = vmul.f32 0.7978846, %v5259_v29  ;;  %v5260_v11 = vadd.f32 %v5228_v3, %v10416_v37  ;;  %v5261_v38 = vadd.f32 %v5229_v40, %v10418_v49  ;;  %v10451_v63 = vadd.f32 %v5132_v41, %v4955_v58 }
0x1847   : > { %v5262_v33 = vadd.f32 %v5230_v1, %v10423_v8  ;;  %v5436_v12 = vpack.c.bf16 %v5406_v27, %v5404_v6  ;;  %v5167_v22 = vmul.f32 %v10447_v44, %v10447_v44  ;;  %v10456_v45 = vadd.f32 %v5134_v53, %v4960_v59 }
0x1848   : > { %v7808_v5 = vpop.eup %7807  ;;  %7815 = vtanh.f32 %v5291_v20  ;;  %v5292_v0 = vmul.f32 0.7978846, %v5260_v11  ;;  %v5293_v55 = vmul.f32 0.7978846, %v5261_v38  ;;  %v5168_v2 = vmul.f32 %v10451_v63, %v10451_v63 }
0x1849   : > { %v7810_v9 = vpop.eup %7809  ;;  %v5351_v42 = vadd.f32 1.0, %v7808_v5  ;;  %v5294_v43 = vmul.f32 0.7978846, %v5262_v33  ;;  %5488 = vmatprep.subr.bf16.mxu1 %v5436_v12  ;;  %v5199_v41 = vmul.f32 %v5167_v22, %v10447_v44  ;;  %v5169_v46 = vmul.f32 %v10456_v45, %v10456_v45 }
0x184a   : > { %v7812_v34 = vpop.eup %7811  ;;  %7817 = vtanh.f32 %v5292_v0  ;;  %5489 = vmatpush1.bf16.msra.mxu1 %v5435_v61  ;;  %v5200_v53 = vmul.f32 %v5168_v2, %v10451_v63  ;;  %v10464_v16 = vadd.f32 %v5136_v48, %v4960_v59  ;;  %v5344_v58 = vadd.f32 1.0, %v10378_v31 }
0x184b   : > { %v7814_v29 = vpop.eup %7813  ;;  %v5383_v3 = vmul.f32 0.5, %v5351_v42  ;;  %v5353_v40 = vadd.f32 1.0, %v7812_v34  ;;  %7819 = vtanh.f32 %v5293_v55  ;;  %v5231_v6 = vmul.f32 0.044715, %v5199_v41 }
0x184c   : > { %7821 = vtanh.f32 %v5294_v43  ;;  %v5232_v1 = vmul.f32 0.044715, %v5200_v53  ;;  %v5201_v27 = vmul.f32 %v5169_v46, %v10456_v45  ;;  %v5170_v20 = vmul.f32 %v10464_v16, %v10464_v16 }
0x184d   : > { %v10471_v61 = vmul.f32 %v5383_v3, %v10370_v25  ;;  %v5385_v11 = vmul.f32 0.5, %v5353_v40  ;;  %v5263_v48 = vadd.f32 %v5231_v6, %v10447_v44  ;;  %v5346_v31 = vadd.f32 1.0, %v10397_v15 }
0x184e   : > { %v5264_v59 = vadd.f32 %v5232_v1, %v10451_v63  ;;  %v5233_v38 = vmul.f32 0.044715, %v5201_v27  ;;  %v5202_v33 = vmul.f32 %v5170_v20, %v10464_v16  ;;  %v5376_v12 = vmul.f32 0.5, %v5344_v58 }
0x184f   : > { %v5417_v22 = vmul.f32 %v5385_v11, %v10374_v4  ;;  %v5295_v5 = vmul.f32 0.7978846, %v5263_v48  ;;  %v5378_v0 = vmul.f32 0.5, %v5346_v31  ;;  %v5437_v55 = vpack.c.bf16 %v10410_v51, %v10393_v10 }
0x1850   : > { %v5296_v25 = vmul.f32 0.7978846, %v5264_v59  ;;  %v5265_v2 = vadd.f32 %v5233_v38, %v10456_v45  ;;  %v5234_v42 = vmul.f32 0.044715, %v5202_v33  ;;  %v5408_v43 = vmul.f32 %v5376_v12, %v10294_v18 }
0x1851   : > { %7823 = vtanh.f32 %v5295_v5  ;;  %v5410_v15 = vmul.f32 %v5378_v0, %v10309_v35  ;;  %v5348_v41 = vadd.f32 1.0, %v10404_v30  ;;  %v5350_v46 = vadd.f32 1.0, %v10431_v60 }
0x1852   : > { %v7816_v34 = vpop.eup %7815  ;;  %7825 = vtanh.f32 %v5296_v25  ;;  %v5297_v4 = vmul.f32 0.7978846, %v5265_v2  ;;  %v5266_v53 = vadd.f32 %v5234_v42, %v10464_v16  ;;  %v5439_v10 = vpack.c.bf16 %v10444_v24, %v10421_v26 }
0x1853   : > { %v5355_v51 = vadd.f32 1.0, %v7816_v34  ;;  %v5438_v58 = vpack.c.bf16 %v5410_v15, %v5408_v43  ;;  %v5380_v3 = vmul.f32 0.5, %v5348_v41  ;;  %v5382_v40 = vmul.f32 0.5, %v5350_v46 }
0x1854   : > { %v7818_v18 = vpop.eup %7817  ;;  %7827 = vtanh.f32 %v5297_v4  ;;  %v5298_v6 = vmul.f32 0.7978846, %v5266_v53  ;;  %v5352_v35 = vadd.f32 1.0, %v7810_v9  ;;  %v5354_v1 = vadd.f32 1.0, %v7814_v29 }
0x1855   : > { %v7820_v30 = vpop.eup %7819  ;;  %v5387_v27 = vmul.f32 0.5, %v5355_v51  ;;  %5490 = vmatprep.subr.bf16.mxu1 %v5438_v58  ;;  %v5412_v60 = vmul.f32 %v5380_v3, %v10323_v17  ;;  %v5414_v20 = vmul.f32 %v5382_v40, %v10343_v57  ;;  %v5441_v11 = vpack.c.bf16 %v5417_v22, %v10471_v61  ;;  %v7562_v40 = vld [vmem:[%s11079_s12] sm:$0xff]  }
0x1856   : > { %v7822_v48 = vpop.eup %7821  ;;  %v5357_v26 = vadd.f32 1.0, %v7820_v30  ;;  %7829 = vtanh.f32 %v5298_v6  ;;  %5491 = vmatpush1.bf16.msra.mxu1 %v5437_v55  ;;  %v5384_v24 = vmul.f32 0.5, %v5352_v35  ;;  %v5386_v31 = vmul.f32 0.5, %v5354_v1  ;;  %v5460_v6 = vpop.permute.xlu0 %5459 }
0x1857   : > { %v5440_v59 = vpack.c.bf16 %v5414_v20, %v5412_v60  ;;  %v5356_v38 = vadd.f32 1.0, %v7818_v18  ;;  %v5358_v33 = vadd.f32 1.0, %v7822_v48  ;;  %v5419_v57 = vmul.f32 %v5387_v27, %v10412_v28 }
0x1858   : > { %v5389_v9 = vmul.f32 0.5, %v5357_v26  ;;  %v5416_v29 = vmul.f32 %v5384_v24, %v10372_v62  ;;  %v5418_v12 = vmul.f32 %v5386_v31, %v10376_v13 }
0x1859   : > { %5492 = vmatprep.subr.bf16.mxu1 %v5440_v59  ;;  %v5388_v17 = vmul.f32 0.5, %v5356_v38  ;;  %v5390_v5 = vmul.f32 0.5, %v5358_v33 }
0x185a   : > { %v5421_v61 = vmul.f32 %v5389_v9, %v10418_v49  ;;  %5493 = vmatpush1.bf16.msra.mxu1 %v5439_v10  ;;  %v5442_v22 = vpack.c.bf16 %v5418_v12, %v5416_v29  ;;  %v5470_v29 = vpop.permute.xlu0 %5469 }
0x185b   : > { %v7824_v0 = vpop.eup %7823  ;;  %v5420_v55 = vmul.f32 %v5388_v17, %v10416_v37  ;;  %v5422_v25 = vmul.f32 %v5390_v5, %v10423_v8 }
0x185c   : > { %v7826_v2 = vpop.eup %7825  ;;  %v5359_v42 = vadd.f32 1.0, %v7824_v0  ;;  %5494 = vmatprep.subr.bf16.mxu1 %v5442_v22  ;;  %v5443_v62 = vpack.c.bf16 %v5421_v61, %v5419_v57 }
0x185d   : > { %v5444_v43 = vpack.c.bf16 %v5422_v25, %v5420_v55  ;;  %v5360_v13 = vadd.f32 1.0, %v7826_v2  ;;  %v7564_v55 = vld [vmem:[%s11077_s10 + $0x50] sm:$0xff]  }
0x185e   : > { %v7828_v15 = vpop.eup %7827  ;;  %5495 = vmatpush1.bf16.msra.mxu1 %v5441_v11  ;;  %v5391_v41 = vmul.f32 0.5, %v5359_v42  ;;  %v5567_v42 = vpop.permute.xlu0 %5566 }
0x185f   : > { %v5361_v46 = vadd.f32 1.0, %v7828_v15  ;;  %5496 = vmatprep.subr.bf16.mxu1 %v5444_v43  ;;  %v5392_v4 = vmul.f32 0.5, %v5360_v13 }
0x1860   : > { %v7830_v28 = vpop.eup %7829  ;;  %v5423_v37 = vmul.f32 %v5391_v41, %v10447_v44  ;;  %v7563_v44 = vld [vmem:[%s11079_s12 + $0x8] sm:$0xff]  }
0x1861   : > { %v5393_v49 = vmul.f32 0.5, %v5361_v46  ;;  %v5362_v34 = vadd.f32 1.0, %v7830_v28  ;;  %v5424_v10 = vmul.f32 %v5392_v4, %v10451_v63  ;;  %v5455_v63 = vpop.permute.xlu1 %5454 }
0x1862   : > { %5497 = vmatpush1.bf16.msra.mxu1 %v5443_v62 }
0x1863   : > { %v5425_v8 = vmul.f32 %v5393_v49, %v10456_v45  ;;  %v5394_v53 = vmul.f32 0.5, %v5362_v34 }
0x1865   : > { %v5426_v51 = vmul.f32 %v5394_v53, %v10464_v16  ;;  %v5445_v58 = vpack.c.bf16 %v5425_v8, %v5423_v37  ;;  %v5465_v31 = vpop.permute.xlu1 %5464 }
0x1867   : > { %v5446_v3 = vpack.c.bf16 %v5426_v51, %v5424_v10 }
0x1869   : > { %5498 = vmatprep.subr.bf16.mxu1 %v5446_v3 }
0x186a   : > { %5499 = vmatpush1.bf16.msra.mxu1 %v5445_v58  ;;  %v5577_v58 = vpop.permute.xlu0 %5576 }
0x186d   : > { %5517 = vmatmul.mubr.bf16.vlgmr.msra.gmra.mrb[64].mxu1 %v7562_v40 }
0x186e   : > { %5526 = vmatprep.mubr.bf16.mxu1 %v11210_v14 }
0x1875   : > { %5527 = vmatmul.mubr.bf16.gmra.mrb[68].mxu1 %v7563_v44 }
0x1876   : > { %5627 = vmatprep.mubr.bf16.mxu1 %v11210_v14 }
0x1940   : > { %v5518_v45 = vpop.f32.mrb[64].mxu1 }
0x1941   : > { %v5519_v16 = vadd.f32 %v5518_v45, %v5455_v63  ;;  %v5520_v18 = vpop.f32.mrb[65].mxu1  ;;  %v11229_v45 = vld [vmem:[#allocation21_spill] sm:$0xff] }
0x1942   : > { %v5521_v35 = vadd.f32 %v5520_v18, %v5455_v63  ;;  %v5522_v1 = vpop.f32.mrb[66].mxu1  ;;  %v11230_v18 = vld [vmem:[#allocation22_spill] sm:$0xff] }
0x1943   : > { %v5523_v30 = vadd.f32 %v5522_v1, %v5460_v6  ;;  %v5524_v27 = vpop.f32.mrb[67].mxu1  ;;  %v5537_v20 = vadd.f32 %v5519_v16, %v10145_v39 }
0x1944   : > { %v5525_v60 = vadd.f32 %v5524_v27, %v5460_v6  ;;  %v5538_v48 = vadd.f32 %v5521_v35, %v10148_v19  ;;  %v11231_v6 = vld [vmem:[#allocation23_spill] sm:$0xff] }
0x1945   : > { %v5539_v11 = vadd.f32 %v5523_v30, %v10139_v23 }
0x1946   : > { %v5540_v26 = vadd.f32 %v5525_v60, %v10142_v54 }
0x1947   : > { %v5550_v24 = vpack.c.bf16 %v5539_v11, %v5537_v20 }
0x1948   : > { %v5528_v59 = vpop.f32.mrb[68].mxu1  ;;  %v5551_v38 = vpack.c.bf16 %v5540_v26, %v5538_v48 }
0x1949   : > { %v5529_v33 = vadd.f32 %v5528_v59, %v5465_v31  ;;  %v5530_v9 = vpop.f32.mrb[69].mxu1  ;;  %v10555_v59 = vld [vmem:[%s11073_s6 + $0x18] sm:$0xff] }
0x194a   : > { %v5531_v12 = vadd.f32 %v5530_v9, %v5465_v31  ;;  %v5532_v17 = vpop.f32.mrb[70].mxu1  ;;  %5595 = vmatprep.subr.bf16.mxu1 %v5551_v38  ;;  %v10548_v31 = vld [vmem:[%s11073_s6 + $0x10] sm:$0xff] }
0x194b   : > { %v5533_v5 = vadd.f32 %v5532_v17, %v5470_v29  ;;  %v5534_v57 = vpop.f32.mrb[71].mxu1  ;;  %5596 = vmatpush1.bf16.msra.mxu1 %v5550_v24  ;;  %v5541_v23 = vadd.f32 %v5529_v33, %v10153_v56  ;;  %v7565_v56 = vld [vmem:[%s11077_s10 + $0x58] sm:$0xff]   ;;  %v10541_v24 = vld [vmem:[%s11073_s6 + $0x8] sm:$0xff] }
0x194c   : > { %v5535_v39 = vadd.f32 %v5534_v57, %v5470_v29  ;;  %v5542_v54 = vadd.f32 %v5531_v12, %v10158_v21  ;;  %v7879_v21 = vld [vmem:[%s11073_s6] sm:$0xff] }
0x194d   : > { %v5543_v19 = vadd.f32 %v5533_v5, %v10162_v47  ;;  %v5562_v47 = vpop.permute.xlu1 %5561 }
0x194e   : > { %v5544_v61 = vadd.f32 %v5535_v39, %v10166_v7 }
0x194f   : > { %v5552_v22 = vpack.c.bf16 %v5543_v19, %v5541_v23 }
0x1950   : > { %v5553_v0 = vpack.c.bf16 %v5544_v61, %v5542_v54 }
0x1951   : > { %v5572_v37 = vpop.permute.xlu1 %5571 }
0x1952   : > { %5597 = vmatprep.subr.bf16.mxu1 %v5553_v0 }
0x1953   : > { %5598 = vmatpush1.bf16.msra.mxu1 %v5552_v22 }
0x1956   : > { %6865 = vmatmul.mubr.msk.bf16.vlgmr.msra.gmra.mrb[72].mxu1 %vm759_vm0, %v7564_v55 }
0x1957   : > { %5637 = vmatprep.mubr.bf16.mxu1 %v11210_v14 }
0x195e   : > { %6866 = vmatmul.mubr.msk.bf16.gmra.mrb[76].mxu1 %vm759_vm0, %v7565_v56 }
0x195f   : > { %7281 = vmatprep.mubr.msk.f32.mxu1 %vm759_vm0, %v7879_v21 }
0x1a29   : > { %v5629_v7 = vpop.f32.mrb[72].mxu1 }
0x1a2a   : > { %v5630_v25 = vadd.f32 %v5629_v7, %v5562_v47  ;;  %v5631_v2 = vpop.f32.mrb[73].mxu1 }
0x1a2b   : > { %v5632_v62 = vadd.f32 %v5631_v2, %v5562_v47  ;;  %v5633_v43 = vpop.f32.mrb[74].mxu1 }
0x1a2c   : > { %v5648_v13 = vadd.f32 %v5630_v25, %v9765_v50  ;;  %v5634_v15 = vadd.f32 %v5633_v43, %v5567_v42  ;;  %v5635_v41 = vpop.f32.mrb[75].mxu1  ;;  %v11228_v50 = vld [vmem:[#allocation20_spill] sm:$0xff] }
0x1a2d   : > { %v5649_v46 = vadd.f32 %v5632_v62, %v9768_v36  ;;  %v5636_v28 = vadd.f32 %v5635_v41, %v5567_v42 }
0x1a2e   : > { %v5650_v49 = vadd.f32 %v5634_v15, %v9771_v32 }
0x1a2f   : > { %v5651_v34 = vadd.f32 %v5636_v28, %v9774_v52  ;;  %v5666_v4 = vadd.f32 %v5649_v46, %v5648_v13  ;;  %v6871_v28 = vld [vmem:[%s11080_s13 + $0x240] sm:$0xff] }
0x1a31   : > { %v5639_v8 = vpop.f32.mrb[76].mxu1  ;;  %5667 = vadd.xlane.f32.xlu1 %v5666_v4  ;;  %v5669_v53 = vadd.f32 %v5651_v34, %v5650_v49  ;;  %v6872_v4 = vld [vmem:[%s11080_s13 + $0x248] sm:$0xff] }
0x1a32   : > { %v5640_v10 = vadd.f32 %v5639_v8, %v5572_v37  ;;  %v5641_v51 = vpop.f32.mrb[77].mxu1 }
0x1a33   : > { %v5642_v3 = vadd.f32 %v5641_v51, %v5572_v37  ;;  %v5643_v40 = vpop.f32.mrb[78].mxu1  ;;  %5670 = vadd.xlane.f32.xlu0 %v5669_v53  ;;  %v6870_v37 = vld [vmem:[%s11080_s13 + $0x238] sm:$0xff] }
0x1a34   : > { %v5652_v44 = vadd.f32 %v5640_v10, %v11228_v50  ;;  %v5644_v63 = vadd.f32 %v5643_v40, %v5577_v58  ;;  %v5645_v36 = vpop.f32.mrb[79].mxu1 }
0x1a35   : > { %v5653_v16 = vadd.f32 %v5642_v3, %v11229_v45  ;;  %v5646_v32 = vadd.f32 %v5645_v36, %v5577_v58 }
0x1a36   : > { %v5654_v52 = vadd.f32 %v5644_v63, %v11230_v18 }
0x1a37   : > { %v5655_v35 = vadd.f32 %v5646_v32, %v11231_v6  ;;  %v5672_v1 = vadd.f32 %v5653_v16, %v5652_v44 }
0x1a39   : > { %5673 = vadd.xlane.f32.xlu0 %v5672_v1  ;;  %v5675_v30 = vadd.f32 %v5655_v35, %v5654_v52  ;;  %v6873_v1 = vld [vmem:[%s11080_s13 + $0x250] sm:$0xff] }
0x1a3b   : > { %5676 = vadd.xlane.f32.xlu1 %v5675_v30  ;;  %v6874_v30 = vld [vmem:[%s11080_s13 + $0x258] sm:$0xff] }
0x1abe   : > { %v5668_v27 = vpop.xlane.xlu1 %5667 }
0x1ac0   : > { %v5671_v60 = vpop.xlane.xlu0 %5670 }
0x1ac1   : > { %v7425_v20 = vpack.c.bf16 %v5671_v60, %v5668_v27 }
0x1ac3   : > { %7426 = vmatprep.subr.bf16.mxu1 %v7425_v20 }
0x1ac4   : > { %7428 = vmatpush3.bf16.msra.mxu1 %v7425_v20 }
0x1ac6   : > { %v5674_v11 = vpop.xlane.xlu0 %5673 }
0x1ac8   : > { %v5677_v48 = vpop.xlane.xlu1 %5676 }
0x1ac9   : > { %v7429_v26 = vpack.c.bf16 %v5677_v48, %v5674_v11 }
0x1acb   : > { %7430 = vmatprep.subr.bf16.mxu1 %v7429_v26 }
0x1acc   : > { %7432 = vmatpush3.bf16.msra.mxu1 %v7429_v26 }
0x1acf   : > { %7282 = vmatmul.mubr.msk.f32.vlgmr.msra.gmra.mrb[80].mxu1 %vm759_vm0, %v10541_v24 }
0x1ad0   : > { %7284 = vmatprep.mubr.msk.f32.mxu1 %vm759_vm0, %v10548_v31 }
0x1ad3   : > { %7285 = vmatmul.mubr.msk.f32.gmra.mrb[82].mxu1 %vm759_vm0, %v10555_v59 }
0x1ad4   : > { %7295 = vmatprep.mubr.msk.f32.mxu1 %vm759_vm0, %v7879_v21 }
0x1ba2   : > { %v7283_v38 = vpop.f32.mrb[80].mxu1 }
0x1ba3   : > { %5770 = vperm.xlu1 %7525, %v7283_v38   ;;  %v5744_v33 = vpop.f32.mrb[81].mxu1 }
0x1ba4   : > { %5765 = vperm.xlu0 %7524, %v5744_v33  }
0x1ba6   : > { %v7286_v9 = vpop.f32.mrb[82].mxu1 }
0x1ba7   : > { %v5754_v29 = vpop.f32.mrb[83].mxu1 }
0x1ba8   : > { %5780 = vperm.xlu0 %7524, %v7286_v9   ;;  %5775 = vperm.xlu1 %7525, %v5754_v29  }
0x1c22   : > { %v5771_v12 = vpop.permute.xlu1 %5770 }
0x1c23   : > { %v10560_v17 = vsub.f32 %v5650_v49, %v5771_v12  ;;  %v10562_v5 = vsub.f32 %v5651_v34, %v5771_v12  ;;  %v5766_v57 = vpop.permute.xlu0 %5765  ;;  %v6868_v49 = vld [vmem:[%s11080_s13 + $0x228] sm:$0xff]  ;;  %v6869_v34 = vld [vmem:[%s11080_s13 + $0x230] sm:$0xff] }
0x1c24   : > { %v10564_v39 = vsub.f32 %v5648_v13, %v5766_v57  ;;  %v10566_v23 = vsub.f32 %v5649_v46, %v5766_v57  ;;  %v6867_v46 = vld [vmem:[%s11080_s13 + $0x220] sm:$0xff] }
0x1c25   : > { %v5793_v19 = vmul.f32 %v10560_v17, %v10560_v17  ;;  %v5794_v54 = vmul.f32 %v10562_v5, %v10562_v5 }
0x1c26   : > { %v5791_v61 = vmul.f32 %v10564_v39, %v10564_v39  ;;  %v5792_v22 = vmul.f32 %v10566_v23, %v10566_v23 }
0x1c27   : > { %v5781_v0 = vpop.permute.xlu0 %5780  ;;  %v5776_v55 = vpop.permute.xlu1 %5775  ;;  %v5802_v56 = vadd.f32 %v5794_v54, %v5793_v19 }
0x1c28   : > { %v10576_v21 = vsub.f32 %v5654_v52, %v5781_v0  ;;  %v10578_v47 = vsub.f32 %v5655_v35, %v5781_v0  ;;  %v10580_v7 = vsub.f32 %v5652_v44, %v5776_v55  ;;  %v10582_v25 = vsub.f32 %v5653_v16, %v5776_v55 }
0x1c29   : > { %5803 = vadd.xlane.f32.xlu0 %v5802_v56  ;;  %v5799_v2 = vadd.f32 %v5792_v22, %v5791_v61 }
0x1c2a   : > { %v5797_v42 = vmul.f32 %v10576_v21, %v10576_v21  ;;  %v5798_v62 = vmul.f32 %v10578_v47, %v10578_v47  ;;  %v5795_v43 = vmul.f32 %v10580_v7, %v10580_v7  ;;  %v5796_v13 = vmul.f32 %v10582_v25, %v10582_v25 }
0x1c2b   : > { %5800 = vadd.xlane.f32.xlu1 %v5799_v2 }
0x1c2c   : > { %v5808_v15 = vadd.f32 %v5798_v62, %v5797_v42  ;;  %v5805_v41 = vadd.f32 %v5796_v13, %v5795_v43 }
0x1c2e   : > { %5806 = vadd.xlane.f32.xlu0 %v5805_v41 }
0x1c2f   : > { %5809 = vadd.xlane.f32.xlu1 %v5808_v15 }
0x1c40   : > { %5930 = vperm.xlu1 %7525, %v6867_v46  }
0x1c44   : > { %5958 = vperm.xlu1 %7525, %v6871_v28   ;;  %5935 = vperm.xlu0 %7524, %v6868_v49  }
0x1c48   : > { %5940 = vperm.xlu1 %7525, %v6869_v34   ;;  %5963 = vperm.xlu0 %7524, %v6872_v4  }
0x1c4c   : > { %5945 = vperm.xlu0 %7524, %v6870_v37  }
0x1cb6   : > { %v5804_v8 = vpop.xlane.xlu0 %5803 }
0x1cb8   : > { %v5801_v53 = vpop.xlane.xlu1 %5800 }
0x1cb9   : > { %v7433_v10 = vpack.c.bf16 %v5804_v8, %v5801_v53 }
0x1cbb   : > { %7434 = vmatprep.subr.bf16.mxu1 %v7433_v10  ;;  %v5807_v51 = vpop.xlane.xlu0 %5806 }
0x1cbc   : > { %7436 = vmatpush3.bf16.msra.mxu1 %v7433_v10  ;;  %v5810_v58 = vpop.xlane.xlu1 %5809 }
0x1cbd   : > { %v7437_v3 = vpack.c.bf16 %v5810_v58, %v5807_v51 }
0x1cbf   : > { %7438 = vmatprep.subr.bf16.mxu1 %v7437_v3 }
0x1cc0   : > { %7440 = vmatpush3.bf16.msra.mxu1 %v7437_v3  ;;  %v5931_v27 = vpop.permute.xlu1 %5930 }
0x1cc3   : > { %7296 = vmatmul.mubr.msk.f32.vlgmr.msra.gmra.mrb[84].mxu1 %vm759_vm0, %v10541_v24  ;;  %v5936_v60 = vpop.permute.xlu0 %5935 }
0x1cc4   : > { %7298 = vmatprep.mubr.msk.f32.mxu1 %vm759_vm0, %v10548_v31  ;;  %v5959_v20 = vpop.permute.xlu1 %5958 }
0x1cc7   : > { %7299 = vmatmul.mubr.msk.f32.gmra.mrb[86].mxu1 %vm759_vm0, %v10555_v59  ;;  %v5964_v11 = vpop.permute.xlu0 %5963 }
0x1cc8   : > { %v10622_v48 = vpop.permute.xlu1 %5940 }
0x1ccb   : > { %v5946_v26 = vpop.permute.xlu0 %5945 }
0x1d96   : > { %v7297_v40 = vpop.f32.mrb[84].mxu1 }
0x1d97   : > { %v5883_v50 = vadd.f32 1e-05, %v7297_v40  ;;  %v5877_v44 = vpop.f32.mrb[85].mxu1 }
0x1d98   : > { %v5878_v63 = vadd.f32 1e-05, %v5877_v44 }
0x1d99   : > { %7831 = vrsqrt.f32 %v5883_v50 }
0x1d9a   : > { %7833 = vrsqrt.f32 %v5878_v63  ;;  %v7300_v36 = vpop.f32.mrb[86].mxu1 }
0x1d9b   : > { %v5893_v45 = vadd.f32 1e-05, %v7300_v36  ;;  %v5887_v16 = vpop.f32.mrb[87].mxu1 }
0x1d9c   : > { %v5888_v32 = vadd.f32 1e-05, %v5887_v16 }
0x1d9d   : > { %7835 = vrsqrt.f32 %v5893_v45 }
0x1d9e   : > { %7837 = vrsqrt.f32 %v5888_v32 }
0x1da3   : > { %v7832_v18 = vpop.eup %7831 }
0x1da4   : > { %v7834_v52 = vpop.eup %7833  ;;  %5907 = vperm.xlu1 %7525, %v7832_v18  }
0x1da5   : > { %5902 = vperm.xlu0 %7524, %v7834_v52  }
0x1da7   : > { %v7836_v6 = vpop.eup %7835 }
0x1da8   : > { %v7838_v35 = vpop.eup %7837 }
0x1da9   : > { %5912 = vperm.xlu1 %7525, %v7838_v35   ;;  %5917 = vperm.xlu0 %7524, %v7836_v6  }
0x1dad   : > { %5968 = vperm.xlu1 %7525, %v6873_v1   ;;  %5973 = vperm.xlu0 %7524, %v6874_v30  }
0x1e23   : > { %v5908_v24 = vpop.permute.xlu1 %5907 }
0x1e24   : > { %v5922_v31 = vmul.f32 %v5908_v24, %v10560_v17  ;;  %v5923_v59 = vmul.f32 %v5908_v24, %v10562_v5  ;;  %v5903_v38 = vpop.permute.xlu0 %5902 }
0x1e25   : > { %v5920_v33 = vmul.f32 %v5903_v38, %v10564_v39  ;;  %v5921_v9 = vmul.f32 %v5903_v38, %v10566_v23 }
0x1e26   : > { %v5950_v29 = vmul.f32 %v5936_v60, %v5922_v31  ;;  %v5951_v12 = vmul.f32 %v5936_v60, %v5923_v59 }
0x1e27   : > { %v5948_v57 = vmul.f32 %v5931_v27, %v5920_v33  ;;  %v5949_v19 = vmul.f32 %v5931_v27, %v5921_v9 }
0x1e28   : > { %v5978_v54 = vadd.f32 %v5964_v11, %v5950_v29  ;;  %v5979_v61 = vadd.f32 %v5964_v11, %v5951_v12  ;;  %v5918_v37 = vpop.permute.xlu0 %5917  ;;  %v5913_v53 = vpop.permute.xlu1 %5912  ;;  %v7902_v12 = vmov 1983009808  }
0x1e29   : > { %v5976_v22 = vadd.f32 %v5959_v20, %v5948_v57  ;;  %v5977_v0 = vadd.f32 %v5959_v20, %v5949_v19  ;;  %v5926_v51 = vmul.f32 %v5918_v37, %v10576_v21  ;;  %v5924_v58 = vmul.f32 %v5913_v53, %v10580_v7  ;;  %v6040_v19 = vld [vmem:[%s11076_s9] sm:$0x3f] }
0x1e2a   : > { %v6885_v55 = vmul.f32 -1.442695, %v5978_v54  ;;  %v6886_v56 = vmul.f32 -1.442695, %v5979_v61  ;;  %v5927_v3 = vmul.f32 %v5918_v37, %v10578_v47  ;;  %v5925_v44 = vmul.f32 %v5913_v53, %v10582_v25 }
0x1e2b   : > { %v6883_v2 = vmul.f32 -1.442695, %v5976_v22  ;;  %v6884_v42 = vmul.f32 -1.442695, %v5977_v0  ;;  %v5954_v40 = vmul.f32 %v5946_v26, %v5926_v51  ;;  %v5952_v63 = vmul.f32 %v10622_v48, %v5924_v58 }
0x1e2c   : > { %7839 = vpow2.f32 %v6885_v55  ;;  %v5974_v50 = vpop.permute.xlu0 %5973  ;;  %v5969_v21 = vpop.permute.xlu1 %5968  ;;  %v5955_v36 = vmul.f32 %v5946_v26, %v5927_v3  ;;  %v5953_v47 = vmul.f32 %v10622_v48, %v5925_v44  ;;  %v6342_v57 = vunpack.c.l.s4 %v7902_v12  ;;  %v6041_v44 = vld [vmem:[%s11082_s15] sm:$0xf] }
0x1e2d   : > { %7841 = vpow2.f32 %v6886_v56  ;;  %v5982_v7 = vadd.f32 %v5974_v50, %v5954_v40  ;;  %v5980_v45 = vadd.f32 %v5969_v21, %v5952_v63 }
0x1e2e   : > { %7843 = vpow2.f32 %v6883_v2  ;;  %v5983_v16 = vadd.f32 %v5974_v50, %v5955_v36  ;;  %v5981_v25 = vadd.f32 %v5969_v21, %v5953_v47 }
0x1e2f   : > { %7845 = vpow2.f32 %v6884_v42  ;;  %v6889_v32 = vmul.f32 -1.442695, %v5982_v7  ;;  %v6887_v18 = vmul.f32 -1.442695, %v5980_v45 }
0x1e30   : > { %v6890_v52 = vmul.f32 -1.442695, %v5983_v16  ;;  %v6888_v6 = vmul.f32 -1.442695, %v5981_v25 }
0x1e36   : > { %v7840_v17 = vpop.eup %7839 }
0x1e37   : > { %v7842_v5 = vpop.eup %7841  ;;  %v6010_v39 = vadd.f32 1.0, %v7840_v17 }
0x1e38   : > { %v7844_v23 = vpop.eup %7843  ;;  %v6011_v62 = vadd.f32 1.0, %v7842_v5 }
0x1e39   : > { %v7846_v43 = vpop.eup %7845  ;;  %7847 = vrcp.f32 %v6010_v39  ;;  %v6008_v13 = vadd.f32 1.0, %v7844_v23 }
0x1e3a   : > { %7849 = vrcp.f32 %v6011_v62  ;;  %v6009_v15 = vadd.f32 1.0, %v7846_v43  ;;  %v11234_v43 = vld [vmem:[#allocation7_spill] sm:$0xff] }
0x1e3b   : > { %7851 = vrcp.f32 %v6008_v13 }
0x1e3c   : > { %7853 = vrcp.f32 %v6009_v15  ;;  %v11235_v15 = vld [vmem:[#allocation5_spill] sm:$0xff] }
0x1e3d   : > { %7855 = vpow2.f32 %v6889_v32 }
0x1e3e   : > { %7857 = vpow2.f32 %v6887_v18 }
0x1e3f   : > { %7859 = vpow2.f32 %v6890_v52 }
0x1e40   : > { %7861 = vpow2.f32 %v6888_v6 }
0x1e43   : > { %v7848_v41 = vpop.eup %7847 }
0x1e44   : > { %v7850_v46 = vpop.eup %7849  ;;  %v10628_v28 = vmul.f32 %v7848_v41, %v5978_v54  ;;  %v6340_v54 = vcombine.high %v6040_v19, %v6040_v19 }
0x1e45   : > { %v7852_v49 = vpop.eup %7851  ;;  %v10634_v8 = vmul.f32 %v7850_v46, %v5979_v61  ;;  %v6343_v61 = vunpack.c.0.s8 %v6342_v57 }
0x1e46   : > { %v10630_v34 = vmul.f32 %v7852_v49, %v5976_v22  ;;  %6044 = vrot.lane.b32.xlu0 %v10628_v28, %s11211_s4  ;;  %v7854_v4 = vpop.eup %7853  ;;  %v11232_v22 = vld [vmem:[#allocation2_spill] sm:$0xff] }
0x1e47   : > { %v10638_v10 = vmul.f32 %v7854_v4, %v5977_v0  ;;  %v7856_v35 = vpop.eup %7855  ;;  %v6346_v0 = vsub.s32 %v6343_v61, %v11232_v22 }
0x1e48   : > { %6042 = vrot.lane.b32.xlu1 %v10630_v34, %s11211_s4  ;;  %v7858_v1 = vpop.eup %7857  ;;  %v6014_v30 = vadd.f32 1.0, %v7856_v35 }
0x1e49   : > { %v7860_v27 = vpop.eup %7859  ;;  %v6012_v60 = vadd.f32 1.0, %v7858_v1  ;;  %v10770_v56 = vrot.slane %v6040_v19, %v6346_v0  ;;  %v10772_v2 = vrot.slane %v6340_v54, %v6346_v0 }
0x1e4a   : > { %6052 = vrot.lane.b32.xlu0 %v10634_v8, %s11211_s4  ;;  %v7862_v20 = vpop.eup %7861  ;;  %v6015_v11 = vadd.f32 1.0, %v7860_v27  ;;  %7863 = vrcp.f32 %v6014_v30 }
0x1e4b   : > { %v6013_v48 = vadd.f32 1.0, %v7862_v20  ;;  %7865 = vrcp.f32 %v6012_v60  ;;  %v6355_v17 = vcombine.high %v10770_v56, %v10770_v56 }
0x1e4c   : > { %6050 = vrot.lane.b32.xlu1 %v10638_v10, %s11211_s4  ;;  %7867 = vrcp.f32 %v6015_v11 }
0x1e4d   : > { %7869 = vrcp.f32 %v6013_v48  ;;  %6393 = vmatprep.mubr.bf16.mxu0 %v6355_v17  ;;  %v11236_v17 = vld [vmem:[#allocation4_spill] sm:$0xff] }
0x1e4e   : > { %6076 = vrot.lane.b32.xlu0 %v10628_v28, %s11212_s27 }
0x1e50   : > { %6074 = vrot.lane.b32.xlu1 %v10630_v34, %s11212_s27 }
0x1e52   : > { %6084 = vrot.lane.b32.xlu0 %v10634_v8, %s11212_s27 }
0x1e54   : > { %6082 = vrot.lane.b32.xlu1 %v10638_v10, %s11212_s27  ;;  %v7864_v26 = vpop.eup %7863 }
0x1e55   : > { %v7866_v24 = vpop.eup %7865  ;;  %v10692_v31 = vmul.f32 %v7864_v26, %v5982_v7 }
0x1e56   : > { %6108 = vrot.lane.b32.xlu0 %v10628_v28, %s11203_s30  ;;  %v7868_v59 = vpop.eup %7867  ;;  %v10696_v38 = vmul.f32 %v7866_v24, %v5980_v45 }
0x1e57   : > { %v7870_v33 = vpop.eup %7869  ;;  %v10700_v9 = vmul.f32 %v7868_v59, %v5983_v16 }
0x1e58   : > { %6106 = vrot.lane.b32.xlu1 %v10630_v34, %s11203_s30  ;;  %v10704_v29 = vmul.f32 %v7870_v33, %v5981_v25 }
0x1e5a   : > { %6116 = vrot.lane.b32.xlu0 %v10634_v8, %s11203_s30 }
0x1e5c   : > { %6114 = vrot.lane.b32.xlu1 %v10638_v10, %s11203_s30 }
0x1e5e   : > { %6140 = vrot.lane.b32.xlu0 %v10628_v28, %s11204_s29 }
0x1e60   : > { %6138 = vrot.lane.b32.xlu1 %v10630_v34, %s11204_s29 }
0x1e62   : > { %6148 = vrot.lane.b32.xlu0 %v10634_v8, %s11204_s29 }
0x1e64   : > { %6146 = vrot.lane.b32.xlu1 %v10638_v10, %s11204_s29 }
0x1e66   : > { %6172 = vrot.lane.b32.xlu0 %v10628_v28, %s11205_s1 }
0x1e68   : > { %6170 = vrot.lane.b32.xlu1 %v10630_v34, %s11205_s1 }
0x1e6a   : > { %6180 = vrot.lane.b32.xlu0 %v10634_v8, %s11205_s1 }
0x1e6c   : > { %6178 = vrot.lane.b32.xlu1 %v10638_v10, %s11205_s1 }
0x1e6e   : > { %6204 = vrot.lane.b32.xlu0 %v10628_v28, %s11206_s26 }
0x1e70   : > { %6202 = vrot.lane.b32.xlu1 %v10630_v34, %s11206_s26 }
0x1e72   : > { %6212 = vrot.lane.b32.xlu0 %v10634_v8, %s11206_s26 }
0x1e74   : > { %6210 = vrot.lane.b32.xlu1 %v10638_v10, %s11206_s26 }
0x1e76   : > { %6236 = vrot.lane.b32.xlu0 %v10628_v28, %s11207_s28 }
0x1e78   : > { %6234 = vrot.lane.b32.xlu1 %v10630_v34, %s11207_s28 }
0x1e7a   : > { %6048 = vrot.lane.b32.xlu0 %v10692_v31, %s11211_s4 }
0x1e7c   : > { %6046 = vrot.lane.b32.xlu1 %v10696_v38, %s11211_s4 }
0x1e7e   : > { %6056 = vrot.lane.b32.xlu0 %v10700_v9, %s11211_s4 }
0x1e80   : > { %6054 = vrot.lane.b32.xlu1 %v10704_v29, %s11211_s4 }
0x1e82   : > { %6080 = vrot.lane.b32.xlu0 %v10692_v31, %s11212_s27 }
0x1e84   : > { %6078 = vrot.lane.b32.xlu1 %v10696_v38, %s11212_s27 }
0x1e86   : > { %6088 = vrot.lane.b32.xlu0 %v10700_v9, %s11212_s27 }
0x1e88   : > { %6086 = vrot.lane.b32.xlu1 %v10704_v29, %s11212_s27 }
0x1e8a   : > { %6112 = vrot.lane.b32.xlu0 %v10692_v31, %s11203_s30 }
0x1e8c   : > { %6110 = vrot.lane.b32.xlu1 %v10696_v38, %s11203_s30 }
0x1e8e   : > { %6120 = vrot.lane.b32.xlu0 %v10700_v9, %s11203_s30 }
0x1e90   : > { %6118 = vrot.lane.b32.xlu1 %v10704_v29, %s11203_s30 }
0x1e92   : > { %6144 = vrot.lane.b32.xlu0 %v10692_v31, %s11204_s29 }
0x1e94   : > { %6142 = vrot.lane.b32.xlu1 %v10696_v38, %s11204_s29 }
0x1e96   : > { %6152 = vrot.lane.b32.xlu0 %v10700_v9, %s11204_s29 }
0x1e98   : > { %6150 = vrot.lane.b32.xlu1 %v10704_v29, %s11204_s29 }
0x1e9a   : > { %6176 = vrot.lane.b32.xlu0 %v10692_v31, %s11205_s1 }
0x1e9c   : > { %6242 = vrot.lane.b32.xlu1 %v10638_v10, %s11207_s28 }
0x1e9e   : > { %6184 = vrot.lane.b32.xlu0 %v10700_v9, %s11205_s1 }
0x1ea0   : > { %6266 = vrot.lane.b32.xlu1 %v10630_v34, %s11209_s5 }
0x1ea2   : > { %6208 = vrot.lane.b32.xlu0 %v10692_v31, %s11206_s26 }
0x1ea4   : > { %6174 = vrot.lane.b32.xlu1 %v10696_v38, %s11205_s1 }
0x1ea6   : > { %6216 = vrot.lane.b32.xlu0 %v10700_v9, %s11206_s26 }
0x1ea8   : > { %6182 = vrot.lane.b32.xlu1 %v10704_v29, %s11205_s1 }
0x1eaa   : > { %6244 = vrot.lane.b32.xlu0 %v10634_v8, %s11207_s28 }
0x1eac   : > { %6206 = vrot.lane.b32.xlu1 %v10696_v38, %s11206_s26 }
0x1eae   : > { %6240 = vrot.lane.b32.xlu0 %v10692_v31, %s11207_s28 }
0x1eb0   : > { %6214 = vrot.lane.b32.xlu1 %v10704_v29, %s11206_s26 }
0x1eb2   : > { %6248 = vrot.lane.b32.xlu0 %v10700_v9, %s11207_s28 }
0x1eb4   : > { %6238 = vrot.lane.b32.xlu1 %v10696_v38, %s11207_s28 }
0x1eb6   : > { %6268 = vrot.lane.b32.xlu0 %v10628_v28, %s11209_s5 }
0x1eb8   : > { %6246 = vrot.lane.b32.xlu1 %v10704_v29, %s11207_s28  ;;  %v6045_v55 = vpop.permute.xlu0 %6044  ;;  %s11250_s28 = sshll.u32 %s11252_s25, 3 }
0x1eb9   : > { %s733_s27 = scalar_lea.vmem %s11088_s21, %s11250_s28 }
0x1eba   : > { %v6043_v42 = vpop.permute.xlu1 %6042  ;;  %6276 = vrot.lane.b32.xlu0 %v10634_v8, %s11209_s5 }
0x1ebc   : > { %6274 = vrot.lane.b32.xlu1 %v10638_v10, %s11209_s5  ;;  %v6053_v5 = vpop.permute.xlu0 %6052 }
0x1ebd   : > { %v6059_v23 = vsel %vm1638_vm3, %v6045_v55, %v6053_v5  ;;  %v6063_v62 = vsel %vm1638_vm3, %v6053_v5, %v6045_v55 }
0x1ebe   : > { %v6068_v13 = vmul.f32 %v6063_v62, %v11234_v43  ;;  %v6069_v41 = vmul.f32 %v6059_v23, %v11235_v15  ;;  %v6051_v46 = vpop.permute.xlu1 %6050  ;;  %6272 = vrot.lane.b32.xlu0 %v10692_v31, %s11209_s5 }
0x1ebf   : > { %v6058_v49 = vsel %vm1638_vm3, %v6043_v42, %v6051_v46  ;;  %v6062_v4 = vsel %vm1638_vm3, %v6051_v46, %v6043_v42  ;;  %v11237_v46 = vld [vmem:[#allocation6_spill] sm:$0xff] }
0x1ec0   : > { %v6066_v37 = vmul.f32 %v6062_v4, %v11234_v43  ;;  %v6067_v53 = vmul.f32 %v6058_v49, %v11235_v15  ;;  %6270 = vrot.lane.b32.xlu1 %v10696_v38, %s11209_s5  ;;  %v6077_v51 = vpop.permute.xlu0 %6076 }
0x1ec2   : > { %v6298_v58 = vpack.c.bf16 %v6068_v13, %v6066_v37  ;;  %v6075_v3 = vpop.permute.xlu1 %6074  ;;  %6280 = vrot.lane.b32.xlu0 %v10700_v9, %s11209_s5  ;;  %v6299_v40 = vpack.c.bf16 %v6069_v41, %v6067_v53 }
0x1ec4   : > { %6278 = vrot.lane.b32.xlu1 %v10704_v29, %s11209_s5  ;;  %6361 = vmatprep.subr.bf16.mxu0 %v6299_v40  ;;  %v6085_v50 = vpop.permute.xlu0 %6084 }
0x1ec5   : > { %6362 = vmatpush1.bf16.msra.mxu0 %v6298_v58  ;;  %v6091_v59 = vsel %vm1659_vm4, %v6077_v51, %v6085_v50  ;;  %v6095_v22 = vsel %vm1659_vm4, %v6085_v50, %v6077_v51 }
0x1ec6   : > { %v6083_v63 = vpop.permute.xlu1 %6082  ;;  %v6101_v5 = vmul.f32 %v6091_v59, %v11236_v17  ;;  %v6100_v49 = vmul.f32 %v6095_v22, %v11237_v46 }
0x1ec7   : > { %v6090_v33 = vsel %vm1659_vm4, %v6075_v3, %v6083_v63  ;;  %v6094_v0 = vsel %vm1659_vm4, %v6083_v63, %v6075_v3 }
0x1ec8   : > { %6336 = vperm.xlu1 %7525, %v6041_v44   ;;  %v6109_v21 = vpop.permute.xlu0 %6108  ;;  %v6099_v23 = vmul.f32 %v6090_v33, %v11236_v17  ;;  %v6098_v4 = vmul.f32 %v6094_v0, %v11237_v46 }
0x1eca   : > { %v6107_v36 = vpop.permute.xlu1 %6106  ;;  %v6303_v3 = vpack.c.bf16 %v6101_v5, %v6099_v23  ;;  %v6302_v44 = vpack.c.bf16 %v6100_v49, %v6098_v4 }
0x1ecc   : > { %v6117_v7 = vpop.permute.xlu0 %6116 }
0x1ecd   : > { %v6123_v40 = vsel %vm1681_vm5, %v6109_v21, %v6117_v7 }
0x1ece   : > { %v6115_v47 = vpop.permute.xlu1 %6114 }
0x1ecf   : > { %v6122_v50 = vsel %vm1681_vm5, %v6107_v36, %v6115_v47  ;;  %v6126_v59 = vsel %vm1681_vm5, %v6115_v47, %v6107_v36 }
0x1ed0   : > { %v10803_v45 = vpop.permute.xlu0 %6140 }
0x1ed2   : > { %v10805_v16 = vpop.permute.xlu1 %6138 }
0x1ed4   : > { %v10807_v32 = vpop.permute.xlu0 %6148 }
0x1ed5   : > { %v6155_v5 = vsel %vm1703_vm6, %v10803_v45, %v10807_v32 }
0x1ed6   : > { %v10809_v25 = vpop.permute.xlu1 %6146 }
0x1ed8   : > { %v10811_v18 = vpop.permute.xlu0 %6172 }
0x1eda   : > { %v10813_v52 = vpop.permute.xlu1 %6170 }
0x1edc   : > { %v10815_v6 = vpop.permute.xlu0 %6180 }
0x1ede   : > { %v10817_v35 = vpop.permute.xlu1 %6178 }
0x1ee0   : > { %v10819_v1 = vpop.permute.xlu0 %6204 }
0x1ee2   : > { %v10821_v30 = vpop.permute.xlu1 %6202 }
0x1ee4   : > { %v10823_v27 = vpop.permute.xlu0 %6212 }
0x1ee6   : > { %v10825_v60 = vpop.permute.xlu1 %6210 }
0x1ee8   : > { %v10827_v20 = vpop.permute.xlu0 %6236 }
0x1eea   : > { %v10829_v11 = vpop.permute.xlu1 %6234 }
0x1eec   : > { %v6049_v48 = vpop.permute.xlu0 %6048 }
0x1eee   : > { %v6047_v26 = vpop.permute.xlu1 %6046 }
0x1ef0   : > { %v6057_v24 = vpop.permute.xlu0 %6056 }
0x1ef1   : > { %v6061_v12 = vsel %vm1638_vm3, %v6049_v48, %v6057_v24  ;;  %v6065_v57 = vsel %vm1638_vm3, %v6057_v24, %v6049_v48  ;;  %v6127_v24 = vsel %vm1681_vm5, %v6117_v7, %v6109_v21  ;;  %v11239_v21 = vld [vmem:[#allocation8_spill] sm:$0xff] }
0x1ef2   : > { %v6072_v19 = vmul.f32 %v6065_v57, %v11234_v43  ;;  %v6073_v54 = vmul.f32 %v6061_v12, %v11235_v15  ;;  %v6055_v61 = vpop.permute.xlu1 %6054  ;;  %v11238_v57 = vld [vmem:[#allocation9_spill] sm:$0xff]  ;;  %v6132_v7 = vmul.f32 %v6127_v24, %v11239_v21  ;;  %v6130_v36 = vmul.f32 %v6126_v59, %v11239_v21 }
0x1ef3   : > { %v6060_v55 = vsel %vm1638_vm3, %v6047_v26, %v6055_v61  ;;  %v6064_v42 = vsel %vm1638_vm3, %v6055_v61, %v6047_v26 }
0x1ef4   : > { %v6070_v62 = vmul.f32 %v6064_v42, %v11234_v43  ;;  %v6071_v13 = vmul.f32 %v6060_v55, %v11235_v15  ;;  %v6081_v41 = vpop.permute.xlu0 %6080 }
0x1ef6   : > { %v6300_v37 = vpack.c.bf16 %v6072_v19, %v6070_v62  ;;  %v6079_v53 = vpop.permute.xlu1 %6078  ;;  %v6301_v51 = vpack.c.bf16 %v6073_v54, %v6071_v13  ;;  %v6133_v19 = vmul.f32 %v6123_v40, %v11238_v57  ;;  %v6131_v54 = vmul.f32 %v6122_v50, %v11238_v57 }
0x1ef7   : > { %v6158_v50 = vsel %vm1703_vm6, %v10809_v25, %v10805_v16 }
0x1ef8   : > { %6363 = vmatprep.subr.bf16.mxu0 %v6301_v51  ;;  %v6089_v58 = vpop.permute.xlu0 %6088  ;;  %v6307_v62 = vpack.c.bf16 %v6133_v19, %v6131_v54  ;;  %v11240_v51 = vld [vmem:[#allocation10_spill] sm:$0xff] }
0x1ef9   : > { %v6093_v43 = vsel %vm1659_vm4, %v6081_v41, %v6089_v58  ;;  %v6097_v15 = vsel %vm1659_vm4, %v6089_v58, %v6081_v41  ;;  %6364 = vmatpush1.bf16.msra.mxu0 %v6300_v37  ;;  %v6165_v58 = vmul.f32 %v6155_v5, %v11240_v51 }
0x1efa   : > { %v6104_v63 = vmul.f32 %v6097_v15, %v11237_v46  ;;  %v6105_v48 = vmul.f32 %v6093_v43, %v11236_v17  ;;  %6365 = vmatprep.subr.bf16.mxu0 %v6303_v3  ;;  %v6087_v26 = vpop.permute.xlu1 %6086 }
0x1efb   : > { %v6092_v33 = vsel %vm1659_vm4, %v6079_v53, %v6087_v26  ;;  %v6096_v12 = vsel %vm1659_vm4, %v6087_v26, %v6079_v53  ;;  %v6159_v53 = vsel %vm1703_vm6, %v10807_v32, %v10803_v45  ;;  %v11241_v26 = vld [vmem:[#allocation11_spill] sm:$0xff] }
0x1efc   : > { %v6102_v61 = vmul.f32 %v6096_v12, %v11237_v46  ;;  %v6103_v22 = vmul.f32 %v6092_v33, %v11236_v17  ;;  %v6113_v0 = vpop.permute.xlu0 %6112  ;;  %v6154_v17 = vsel %vm1703_vm6, %v10805_v16, %v10809_v25  ;;  %v6306_v46 = vpack.c.bf16 %v6132_v7, %v6130_v36 }
0x1efd   : > { %6366 = vmatpush1.bf16.msra.mxu0 %v6302_v44  ;;  %v6163_v43 = vmul.f32 %v6154_v17, %v11240_v51  ;;  %v6164_v24 = vmul.f32 %v6159_v53, %v11241_v26  ;;  %v6162_v59 = vmul.f32 %v6158_v50, %v11241_v26  ;;  %v6190_v17 = vsel %vm1725_vm7, %v10817_v35, %v10813_v52 }
0x1efe   : > { %v6304_v47 = vpack.c.bf16 %v6104_v63, %v6102_v61  ;;  %v6111_v55 = vpop.permute.xlu1 %6110  ;;  %v6305_v42 = vpack.c.bf16 %v6105_v48, %v6103_v22  ;;  %v6317_v53 = vpack.c.bf16 %v10700_v9, %v10704_v29  ;;  %v6222_v9 = vsel %vm1747_vm8, %v10825_v60, %v10821_v30 }
0x1eff   : > { %v6311_v12 = vpack.c.bf16 %v6165_v58, %v6163_v43  ;;  %v6310_v61 = vpack.c.bf16 %v6164_v24, %v6162_v59  ;;  %v11245_v24 = vld [vmem:[#allocation16_spill] sm:$0xff] }
0x1f00   : > { %6367 = vmatprep.subr.bf16.mxu0 %v6305_v42  ;;  %v6121_v23 = vpop.permute.xlu0 %6120 }
0x1f01   : > { %v6125_v13 = vsel %vm1681_vm5, %v6113_v0, %v6121_v23  ;;  %v6129_v41 = vsel %vm1681_vm5, %v6121_v23, %v6113_v0  ;;  %6368 = vmatpush1.bf16.msra.mxu0 %v6304_v47  ;;  %v6315_v23 = vpack.c.bf16 %v10634_v8, %v10638_v10  ;;  %v6186_v8 = vsel %vm1725_vm7, %v10813_v52, %v10817_v35 }
0x1f02   : > { %v6136_v49 = vmul.f32 %v6129_v41, %v11239_v21  ;;  %v6137_v4 = vmul.f32 %v6125_v13, %v11238_v57  ;;  %6369 = vmatprep.subr.bf16.mxu0 %v6307_v62  ;;  %v6119_v37 = vpop.permute.xlu1 %6118  ;;  %v6191_v62 = vsel %vm1725_vm7, %v10815_v6, %v10811_v18  ;;  %v6187_v41 = vsel %vm1725_vm7, %v10811_v18, %v10815_v6 }
0x1f03   : > { %v6124_v3 = vsel %vm1681_vm5, %v6111_v55, %v6119_v37  ;;  %v6128_v40 = vsel %vm1681_vm5, %v6119_v37, %v6111_v55  ;;  %v6314_v10 = vpack.c.bf16 %v10628_v28, %v10630_v34  ;;  %v6223_v28 = vsel %vm1747_vm8, %v10823_v27, %v10819_v1 }
0x1f04   : > { %v6134_v15 = vmul.f32 %v6128_v40, %v11239_v21  ;;  %v6135_v44 = vmul.f32 %v6124_v3, %v11238_v57  ;;  %v6145_v45 = vpop.permute.xlu0 %6144  ;;  %v6316_v34 = vpack.c.bf16 %v10692_v31, %v10696_v38  ;;  %v6219_v31 = vsel %vm1747_vm8, %v10819_v1, %v10823_v27  ;;  %v11244_v38 = vld [vmem:[#allocation14_spill] sm:$0xff] }
0x1f05   : > { %6370 = vmatpush1.bf16.msra.mxu0 %v6306_v46  ;;  %v11242_v46 = vld [vmem:[#allocation12_spill] sm:$0xff]  ;;  %v6229_v50 = vmul.f32 %v6223_v28, %v11244_v38 }
0x1f06   : > { %v6308_v32 = vpack.c.bf16 %v6136_v49, %v6134_v15  ;;  %v6143_v63 = vpop.permute.xlu1 %6142  ;;  %v6309_v48 = vpack.c.bf16 %v6137_v4, %v6135_v44  ;;  %v6197_v49 = vmul.f32 %v6191_v62, %v11242_v46  ;;  %v6195_v4 = vmul.f32 %v6190_v17, %v11242_v46 }
0x1f07   : > { %v6218_v15 = vsel %vm1747_vm8, %v10821_v30, %v10825_v60  ;;  %v6227_v44 = vmul.f32 %v6222_v9, %v11244_v38  ;;  %v6228_v30 = vmul.f32 %v6219_v31, %v11245_v24 }
0x1f08   : > { %6371 = vmatprep.subr.bf16.mxu0 %v6309_v48  ;;  %v6153_v33 = vpop.permute.xlu0 %6152  ;;  %v6319_v52 = vpack.c.bf16 %v6197_v49, %v6195_v4  ;;  %v6226_v60 = vmul.f32 %v6218_v15, %v11245_v24  ;;  %v11249_v15 = vld [vmem:[#allocation18_spill] sm:$0xff] }
0x1f09   : > { %v6157_v16 = vsel %vm1703_vm6, %v6145_v45, %v6153_v33  ;;  %v6161_v25 = vsel %vm1703_vm6, %v6153_v33, %v6145_v45  ;;  %6372 = vmatpush1.bf16.msra.mxu0 %v6308_v32 }
0x1f0a   : > { %v6168_v57 = vmul.f32 %v6161_v25, %v11241_v26  ;;  %v6169_v19 = vmul.f32 %v6157_v16, %v11240_v51  ;;  %6373 = vmatprep.subr.bf16.mxu0 %v6311_v12  ;;  %v6151_v54 = vpop.permute.xlu1 %6150 }
0x1f0b   : > { %v6156_v22 = vsel %vm1703_vm6, %v6143_v63, %v6151_v54  ;;  %v6160_v0 = vsel %vm1703_vm6, %v6151_v54, %v6143_v63 }
0x1f0c   : > { %v6166_v21 = vmul.f32 %v6160_v0, %v11241_v26  ;;  %v6167_v7 = vmul.f32 %v6156_v22, %v11240_v51  ;;  %v6177_v36 = vpop.permute.xlu0 %6176  ;;  %v11243_v51 = vld [vmem:[#allocation13_spill] sm:$0xff] }
0x1f0d   : > { %6374 = vmatpush1.bf16.msra.mxu0 %v6310_v61  ;;  %v6196_v58 = vmul.f32 %v6187_v41, %v11243_v51  ;;  %v6194_v18 = vmul.f32 %v6186_v8, %v11243_v51  ;;  %v6322_v61 = vpack.c.bf16 %v6228_v30, %v6226_v60 }
0x1f0e   : > { %v6312_v47 = vpack.c.bf16 %v6168_v57, %v6166_v21  ;;  %v10923_v55 = vpop.permute.xlu1 %6242  ;;  %v6313_v42 = vpack.c.bf16 %v6169_v19, %v6167_v7  ;;  %v6323_v19 = vpack.c.bf16 %v6229_v50, %v6227_v44  ;;  %v11248_v50 = vld [vmem:[#allocation17_spill] sm:$0xff] }
0x1f0f   : > { %v6318_v40 = vpack.c.bf16 %v6196_v58, %v6194_v18  ;;  %v6254_v22 = vsel %vm1769_vm9, %v10923_v55, %v10829_v11  ;;  %v6250_v8 = vsel %vm1769_vm9, %v10829_v11, %v10923_v55 }
0x1f10   : > { %6375 = vmatprep.subr.bf16.mxu0 %v6313_v42  ;;  %v6185_v5 = vpop.permute.xlu0 %6184 }
0x1f11   : > { %6376 = vmatpush1.bf16.msra.mxu0 %v6312_v47  ;;  %v6189_v35 = vsel %vm1725_vm7, %v6177_v36, %v6185_v5  ;;  %v6193_v3 = vsel %vm1725_vm7, %v6185_v5, %v6177_v36  ;;  %v11246_v5 = vld [vmem:[#allocation15_spill] sm:$0xff] }
0x1f12   : > { %6377 = vmatprep.subr.bf16.mxu0 %v6315_v23  ;;  %v10935_v13 = vpop.permute.xlu1 %6266  ;;  %v6200_v63 = vmul.f32 %v6189_v35, %v11243_v51  ;;  %v6201_v1 = vmul.f32 %v6193_v3, %v11242_v46 }
0x1f14   : > { %v6209_v37 = vpop.permute.xlu0 %6208 }
0x1f15   : > { %6378 = vmatpush1.bf16.msra.mxu0 %v6314_v10  ;;  %v6259_v10 = vmul.f32 %v6254_v22, %v11246_v5 }
0x1f16   : > { %6379 = vmatprep.subr.bf16.mxu0 %v6317_v53  ;;  %v6175_v6 = vpop.permute.xlu1 %6174 }
0x1f18   : > { %v6217_v29 = vpop.permute.xlu0 %6216 }
0x1f19   : > { %6380 = vmatpush1.bf16.msra.mxu0 %v6316_v34  ;;  %v6221_v16 = vsel %vm1747_vm8, %v6209_v37, %v6217_v29  ;;  %v6225_v25 = vsel %vm1747_vm8, %v6217_v29, %v6209_v37  ;;  %v11247_v37 = vld [vmem:[#allocation19_spill] sm:$0xff] }
0x1f1a   : > { %6381 = vmatprep.subr.bf16.mxu0 %v6319_v52  ;;  %v6183_v43 = vpop.permute.xlu1 %6182  ;;  %v6232_v21 = vmul.f32 %v6221_v16, %v11245_v24  ;;  %v6233_v7 = vmul.f32 %v6225_v25, %v11244_v38  ;;  %v6258_v58 = vmul.f32 %v6250_v8, %v11247_v37 }
0x1f1b   : > { %v6188_v45 = vsel %vm1725_vm7, %v6175_v6, %v6183_v43  ;;  %v6192_v32 = vsel %vm1725_vm7, %v6183_v43, %v6175_v6 }
0x1f1c   : > { %v6198_v27 = vmul.f32 %v6188_v45, %v11243_v51  ;;  %v6199_v48 = vmul.f32 %v6192_v32, %v11242_v46  ;;  %v6245_v26 = vpop.permute.xlu0 %6244 }
0x1f1d   : > { %6382 = vmatpush1.bf16.msra.mxu0 %v6318_v40  ;;  %v6255_v54 = vsel %vm1769_vm9, %v6245_v26, %v10827_v20  ;;  %v6251_v42 = vsel %vm1769_vm9, %v10827_v20, %v6245_v26 }
0x1f1e   : > { %v6320_v59 = vpack.c.bf16 %v6200_v63, %v6198_v27  ;;  %v6207_v33 = vpop.permute.xlu1 %6206  ;;  %v6321_v12 = vpack.c.bf16 %v6201_v1, %v6199_v48  ;;  %v6261_v23 = vmul.f32 %v6255_v54, %v11246_v5  ;;  %v6260_v20 = vmul.f32 %v6251_v42, %v11247_v37 }
0x1f20   : > { %6383 = vmatprep.subr.bf16.mxu0 %v6321_v12  ;;  %v6241_v57 = vpop.permute.xlu0 %6240  ;;  %v6327_v51 = vpack.c.bf16 %v6261_v23, %v6259_v10  ;;  %v6326_v55 = vpack.c.bf16 %v6260_v20, %v6258_v58 }
0x1f21   : > { %6384 = vmatpush1.bf16.msra.mxu0 %v6320_v59 }
0x1f22   : > { %6385 = vmatprep.subr.bf16.mxu0 %v6323_v19  ;;  %v6215_v0 = vpop.permute.xlu1 %6214 }
0x1f23   : > { %v6220_v36 = vsel %vm1747_vm8, %v6207_v33, %v6215_v0  ;;  %v6224_v47 = vsel %vm1747_vm8, %v6215_v0, %v6207_v33 }
0x1f24   : > { %v6230_v62 = vmul.f32 %v6220_v36, %v11245_v24  ;;  %v6231_v17 = vmul.f32 %v6224_v47, %v11244_v38  ;;  %v6249_v41 = vpop.permute.xlu0 %6248 }
0x1f25   : > { %6386 = vmatpush1.bf16.msra.mxu0 %v6322_v61  ;;  %v6253_v18 = vsel %vm1769_vm9, %v6241_v57, %v6249_v41  ;;  %v6257_v6 = vsel %vm1769_vm9, %v6249_v41, %v6241_v57 }
0x1f26   : > { %v6324_v46 = vpack.c.bf16 %v6232_v21, %v6230_v62  ;;  %v6239_v49 = vpop.permute.xlu1 %6238  ;;  %v6325_v4 = vpack.c.bf16 %v6233_v7, %v6231_v17  ;;  %v6264_v9 = vmul.f32 %v6253_v18, %v11247_v37  ;;  %v6265_v29 = vmul.f32 %v6257_v6, %v11246_v5 }
0x1f28   : > { %6387 = vmatprep.subr.bf16.mxu0 %v6325_v4  ;;  %v6269_v53 = vpop.permute.xlu0 %6268 }
0x1f29   : > { %6388 = vmatpush1.bf16.msra.mxu0 %v6324_v46 }
0x1f2a   : > { %6389 = vmatprep.subr.bf16.mxu0 %v6327_v51  ;;  %v6247_v11 = vpop.permute.xlu1 %6246 }
0x1f2b   : > { %v6252_v28 = vsel %vm1769_vm9, %v6239_v49, %v6247_v11  ;;  %v6256_v34 = vsel %vm1769_vm9, %v6247_v11, %v6239_v49 }
0x1f2c   : > { %v6262_v52 = vmul.f32 %v6252_v28, %v11247_v37  ;;  %v6263_v35 = vmul.f32 %v6256_v34, %v11246_v5  ;;  %v6277_v3 = vpop.permute.xlu0 %6276 }
0x1f2d   : > { %v6283_v40 = vsel %vm1791_vm10, %v6269_v53, %v6277_v3  ;;  %v6287_v31 = vsel %vm1791_vm10, %v6277_v3, %v6269_v53  ;;  %6390 = vmatpush1.bf16.msra.mxu0 %v6326_v55 }
0x1f2e   : > { %v6328_v38 = vpack.c.bf16 %v6264_v9, %v6262_v52  ;;  %v6292_v43 = vmul.f32 %v6283_v40, %v11248_v50  ;;  %v6293_v44 = vmul.f32 %v6287_v31, %v11249_v15  ;;  %v6275_v45 = vpop.permute.xlu1 %6274  ;;  %v6329_v32 = vpack.c.bf16 %v6265_v29, %v6263_v35 }
0x1f2f   : > { %v6282_v63 = vsel %vm1791_vm10, %v10935_v13, %v6275_v45  ;;  %v6286_v1 = vsel %vm1791_vm10, %v6275_v45, %v10935_v13 }
0x1f30   : > { %v6290_v27 = vmul.f32 %v6282_v63, %v11248_v50  ;;  %v6291_v48 = vmul.f32 %v6286_v1, %v11249_v15  ;;  %6391 = vmatprep.subr.bf16.mxu0 %v6329_v32  ;;  %v6273_v26 = vpop.permute.xlu0 %6272 }
0x1f31   : > { %6392 = vmatpush1.bf16.msra.mxu0 %v6328_v38 }
0x1f32   : > { %v6330_v24 = vpack.c.bf16 %v6292_v43, %v6290_v27  ;;  %v6271_v30 = vpop.permute.xlu1 %6270  ;;  %v6331_v60 = vpack.c.bf16 %v6293_v44, %v6291_v48 }
0x1f34   : > { %6394 = vmatmul.mubr.bf16.vlgmr.msra.gmra.mrb[88].mxu0 %v10770_v56  ;;  %6402 = vmatprep.subr.bf16.mxu0 %v6331_v60  ;;  %v6281_v59 = vpop.permute.xlu0 %6280 }
0x1f35   : > { %v6285_v33 = vsel %vm1791_vm10, %v6273_v26, %v6281_v59  ;;  %v6289_v13 = vsel %vm1791_vm10, %v6281_v59, %v6273_v26  ;;  %6403 = vmatpush1.bf16.msra.mxu0 %v6330_v24  ;;  %6434 = vmatprep.mubr.bf16.mxu0 %v11210_v14 }
0x1f36   : > { %v6296_v12 = vmul.f32 %v6285_v33, %v11248_v50  ;;  %v6297_v16 = vmul.f32 %v6289_v13, %v11249_v15  ;;  %v6279_v25 = vpop.permute.xlu1 %6278 }
0x1f37   : > { %v6284_v56 = vsel %vm1791_vm10, %v6271_v30, %v6279_v25  ;;  %v6288_v57 = vsel %vm1791_vm10, %v6279_v25, %v6271_v30 }
0x1f38   : > { %v6294_v19 = vmul.f32 %v6284_v56, %v11248_v50  ;;  %v6295_v54 = vmul.f32 %v6288_v57, %v11249_v15 }
0x1f3a   : > { %v6332_v61 = vpack.c.bf16 %v6296_v12, %v6294_v19  ;;  %v6333_v22 = vpack.c.bf16 %v6297_v16, %v6295_v54 }
0x1f3c   : > { %6404 = vmatprep.subr.bf16.mxu0 %v6333_v22 }
0x1f3d   : > { %6405 = vmatpush1.bf16.msra.mxu0 %v6332_v61 }
0x1f40   : > { %6891 = vmatmul.mubr.msk.bf16.vlgmr.msra.gmra.mrb[88].mxu0 %vm759_vm0, %v10772_v2 }
0x1f47   : > { %v6337_v14 = vpop.permute.xlu1 %6336 }
0x2013   : > { %v6436_v0 = vpop.f32.mrb[88].mxu0 }
0x2014   : > { %v7473_v21 = vadd.f32 %v6436_v0, %v6337_v14  ;;  %v6438_v7 = vpop.f32.mrb[89].mxu0 }
0x2015   : > { %v7474_v36 = vadd.f32 %v6438_v7, %v6337_v14  ;;  %v6440_v47 = vpop.f32.mrb[90].mxu0 }
0x2016   : > { %v6441_v39 = vpop.f32.mrb[91].mxu0 }
0x2017   : > { %v6445_v42 = vcombine.low %v7473_v21, %v7474_v36 }
0x2019   : > { %6447 = vst [vmem:[%s733_s27] sm:$0xff] %v6445_v42 }
0x201a PF: > { %s31_s2 = sadd.s32 1, %s7889_s2  }
0x201b   : > { %p28_p4 = scmp.ge.s32.totalorder %s31_s2, 4  }
0x201d   :  { %30 = sbr.rel (!%p28_p4) target bundleno = 12 (0xc), region = 182 }

</bundles_post_ra>
